<compile_context>
chip_gen: v5e
topology: v5e:2x2
jax: 0.10.0
libtpu: 0.0.40
codegen_flags: <defaults>
</compile_context>

<pallas_src>
import functools

import numpy as np
import jax
import jax.numpy as jnp
from jax.experimental import pallas as pl
from jax.experimental.pallas import tpu as pltpu

PAD = (1, 2, 1, 2)           # PyTorch F.pad order: (w_left, w_right, h_top, h_bottom)
LRELU_SLOPE = 0.2
BN_EPS = 1e-5
MXU_DTYPE = jnp.bfloat16     # MXU operand dtype (accumulation is always f32)
K_ALIGN = 16                 # bf16 sublane packing: round contraction dim up to 16


def _round_up(x, m):
    return (x + m - 1) // m * m


# ------------------------------ Pallas kernels ------------------------------
# One fused kernel per layer: the full (M, K) patch matrix, (K, Cout) weight
# and (M, Cout) output live in VMEM (grid=(1,)), so the conv epilogue never
# round-trips through HBM.

def _conv_bias_kernel(p_ref, w_ref, b_ref, o_ref, *, apply_lrelu, slope):
    # (M, K)bf16 @ (K, Cout)bf16 -> f32 acc, + bias, optional fused LeakyReLU.
    acc = jnp.dot(p_ref[...], w_ref[...], preferred_element_type=jnp.float32)
    acc = acc + b_ref[...]
    if apply_lrelu:
        acc = jnp.where(acc >= 0.0, acc, slope * acc)
    o_ref[...] = acc.astype(o_ref.dtype)


def _conv_bn_lrelu_kernel(p_ref, w_ref, g_ref, bt_ref, o_ref, *, slope, eps):
    # Fused: conv matmul + per-channel batch stats (two-pass, f32) +
    # scale/shift + LeakyReLU.  The conv result stays in vregs/VMEM between
    # the stats and normalize phases (no HBM round trip).
    x = jnp.dot(p_ref[...], w_ref[...], preferred_element_type=jnp.float32)
    inv_m = 1.0 / x.shape[0]
    mean = jnp.sum(x, axis=0, keepdims=True) * inv_m
    d = x - mean
    var = jnp.sum(d * d, axis=0, keepdims=True) * inv_m      # biased (train mode)
    scale = g_ref[...] * jax.lax.rsqrt(var + eps)
    y = d * scale + bt_ref[...]
    o_ref[...] = jnp.where(y >= 0.0, y, slope * y).astype(o_ref.dtype)


# ---------------------------- pallas_call wrappers ---------------------------

def _full_block(shape):
    # Whole-array block: block_shape == array dims satisfies the (8,128) rule
    # without any zero padding; with grid=(1,) each operand is DMA'd once.
    return pl.BlockSpec(shape, lambda i: (0,) * len(shape))


def _fused_conv_bias(patches, w, b, apply_lrelu, out_dtype):
    M, K = patches.shape
    Cout = w.shape[1]
    b2 = b.reshape(1, Cout).astype(jnp.float32)
    return pl.pallas_call(
        functools.partial(_conv_bias_kernel, apply_lrelu=apply_lrelu,
                          slope=LRELU_SLOPE),
        out_shape=jax.ShapeDtypeStruct((M, Cout), out_dtype),
        grid=(1,),
        in_specs=[_full_block((M, K)), _full_block((K, Cout)),
                  _full_block((1, Cout))],
        out_specs=_full_block((M, Cout)),
        compiler_params=pltpu.CompilerParams(
            dimension_semantics=("arbitrary",)),
    )(patches, w, b2)


def _fused_conv_bn_lrelu(patches, w, gamma, beta, out_dtype):
    M, K = patches.shape
    Cout = w.shape[1]
    g2 = gamma.reshape(1, Cout).astype(jnp.float32)
    bt2 = beta.reshape(1, Cout).astype(jnp.float32)
    return pl.pallas_call(
        functools.partial(_conv_bn_lrelu_kernel, slope=LRELU_SLOPE, eps=BN_EPS),
        out_shape=jax.ShapeDtypeStruct((M, Cout), out_dtype),
        grid=(1,),
        in_specs=[_full_block((M, K)), _full_block((K, Cout)),
                  _full_block((1, Cout)), _full_block((1, Cout))],
        out_specs=_full_block((M, Cout)),
        compiler_params=pltpu.CompilerParams(
            dimension_semantics=("arbitrary",)),
    )(patches, w, g2, bt2)


# --------------------------------- JAX glue ---------------------------------

def _circular_pad_nhwc(x):
    wl, wr, ht, hb = PAD
    return jnp.pad(x, ((0, 0), (ht, hb), (wl, wr), (0, 0)), mode='wrap')


def _im2col(xp, kh, kw, sh, sw):
    N, Hp, Wp, C = xp.shape
    Ho = (Hp - kh) // sh + 1
    Wo = (Wp - kw) // sw + 1
    cols = []
    for i in range(kh):
        for j in range(kw):
            cols.append(xp[:, i:i + sh * (Ho - 1) + 1:sh,
                           j:j + sw * (Wo - 1) + 1:sw, :])
    p = jnp.stack(cols, axis=3)                         # (N, Ho, Wo, kh*kw, C)
    return p.reshape(N * Ho * Wo, kh * kw * C), (N, Ho, Wo)


# -------------------------- model definition / forward ----------------------

def make_layer_cfgs(input_nc=1, output_nc=1, ndf=8, n_layers=3):
    # Mirrors LiDARNLayerDiscriminatorV3.__init__ with use_actnorm=False
    # (norm_layer = BatchNorm2d => use_bias=False on the normalized convs).
    cfgs = [dict(cin=input_nc, cout=ndf, k=(1, 4), stride=(1, 1), bias=True, bn=False),
            dict(cin=ndf, cout=ndf, k=(4, 4), stride=(2, 2), bias=True, bn=False)]
    nf_mult = 1
    for n in range(1, n_layers):
        prev, nf_mult = nf_mult, min(2 ** n, 8)
        cfgs.append(dict(cin=ndf * prev, cout=ndf * nf_mult, k=(4, 4),
                         stride=(2, 2), bias=False, bn=True))
    prev, nf_mult = nf_mult, min(2 ** n_layers, 8)
    cfgs.append(dict(cin=ndf * prev, cout=ndf * nf_mult, k=(4, 4),
                     stride=(1, 1), bias=False, bn=True))
    cfgs.append(dict(cin=ndf * nf_mult, cout=output_nc, k=(4, 4),
                     stride=(1, 1), bias=True, bn=False))
    return cfgs


def init_params(key, cfgs):
    params = []
    for cfg in cfgs:
        key, k1, k2, k3, k4 = jax.random.split(key, 5)
        cin, cout = cfg['cin'], cfg['cout']
        kh, kw = cfg['k']
        W = jax.random.normal(k1, (cout, cin, kh, kw), jnp.float32) / np.sqrt(cin * kh * kw)
        b = jax.random.normal(k2, (cout,), jnp.float32) * 0.01 if cfg['bias'] else None
        gamma = 1.0 + 0.1 * jax.random.normal(k3, (cout,), jnp.float32) if cfg['bn'] else None
        beta = 0.05 * jax.random.normal(k4, (cout,), jnp.float32) if cfg['bn'] else None
        params.append(dict(W=W, b=b, gamma=gamma, beta=beta))
    return params


def discriminator_forward(x_nchw, params, cfgs):
    # (the PyTorch forward's pdb.set_trace() is a debugger hook -> skipped)
    x = jnp.transpose(x_nchw, (0, 2, 3, 1)).astype(MXU_DTYPE)   # NCHW -> NHWC, bf16
    n = len(cfgs)
    for i, (p, cfg) in enumerate(zip(params, cfgs)):
        is_last = i == n - 1
        kh, kw = cfg['k']
        sh, sw = cfg['stride']
        cout, cin = cfg['cout'], cfg['cin']
        xp = _circular_pad_nhwc(x)
        patches, (N, Ho, Wo) = _im2col(xp, kh, kw, sh, sw)      # (M, K) bf16
        K = kh * kw * cin
        w_mat = jnp.transpose(p['W'], (2, 3, 1, 0)).reshape(K, cout).astype(MXU_DTYPE)
        Kp = _round_up(K, K_ALIGN)
        if Kp != K:                                   # only layer 1: K = 4 -> 16
            patches = jnp.pad(patches, ((0, 0), (0, Kp - K)))
            w_mat = jnp.pad(w_mat, ((0, Kp - K), (0, 0)))
        out_dtype = jnp.float32 if is_last else MXU_DTYPE
        if cfg['bn']:
            y = _fused_conv_bn_lrelu(patches, w_mat, p['gamma'], p['beta'], out_dtype)
        else:
            y = _fused_conv_bias(patches, w_mat, p['b'],
                                 apply_lrelu=not is_last, out_dtype=out_dtype)
        x = y.reshape(N, Ho, Wo, cout)                # free row-major reshape
    return jnp.transpose(x, (0, 3, 1, 2))             # NHWC -> NCHW


# ------------------------------ pure-JAX reference ---------------------------

def reference_forward(x_nchw, params, cfgs, mxu_dtype=jnp.float32):
    """mxu_dtype=float32: exact f32 reference of the PyTorch module.
    mxu_dtype=bfloat16: mimics the kernel's precision scheme (bf16 MXU operands
    and stored activations, f32 accumulation/elementwise) to validate the
    Pallas implementation itself at tight tolerance."""
    wl, wr, ht, hb = PAD
    x = x_nchw.astype(jnp.float32).astype(mxu_dtype)
    n = len(cfgs)
    for i, (p, cfg) in enumerate(zip(params, cfgs)):
        xp = jnp.pad(x, ((0, 0), (0, 0), (ht, hb), (wl, wr)), mode='wrap')
        y = jax.lax.conv_general_dilated(
            xp, p['W'].astype(mxu_dtype), window_strides=cfg['stride'],
            padding='VALID', dimension_numbers=('NCHW', 'OIHW', 'NCHW'),
            preferred_element_type=jnp.float32)
        if p['b'] is not None:
            y = y + p['b'][None, :, None, None]
        if cfg['bn']:
            mean = jnp.mean(y, axis=(0, 2, 3), keepdims=True)
            var = jnp.mean((y - mean) ** 2, axis=(0, 2, 3), keepdims=True)
            y = (y - mean) * jax.lax.rsqrt(var + BN_EPS)
            y = y * p['gamma'][None, :, None, None] + p['beta'][None, :, None, None]
        if i != n - 1:
            y = jnp.where(y >= 0, y, LRELU_SLOPE * y).astype(mxu_dtype)
        x = y
    return x


# ------------------------------------ main -----------------------------------

if __name__ == "__main__":
    key = jax.random.PRNGKey(0)
    kx, kp = jax.random.split(key)
    # LiDAR range image, NCHW (small demo shapes; ndf scaled down from 64 to 8)
    x = jax.random.normal(kx, (2, 1, 16, 64), jnp.float32)
    cfgs = make_layer_cfgs(input_nc=1, output_nc=1, ndf=8, n_layers=3)
    params = init_params(kp, cfgs)

    fwd = jax.jit(functools.partial(discriminator_forward, cfgs=cfgs))
    out = jax.block_until_ready(fwd(x, params))

    # (1) tight check vs a reference using the SAME precision scheme
    #     -> validates the Pallas kernels / conv-as-matmul / fused BN.
    ref_mimic = reference_forward(x, params, cfgs, mxu_dtype=jnp.bfloat16)
    # (2) loose sanity check vs the exact f32 reference
    #     -> validates that the bf16-MXU precision choice is benign.
    ref_f32 = reference_forward(x, params, cfgs, mxu_dtype=jnp.float32)

    assert out.shape == ref_f32.shape, (out.shape, ref_f32.shape)
    err_kernel = float(jnp.max(jnp.abs(out - ref_mimic)))
    rel_f32 = float(jnp.linalg.norm(out - ref_f32) / jnp.linalg.norm(ref_f32))
    if err_kernel < 1e-2 and rel_f32 < 1e-1:
        print("KERNEL_OK")
    else:
        raise SystemExit(
            f"mismatch: kernel-vs-bf16-ref max abs err = {err_kernel}, "
            f"relative err vs f32 ref = {rel_f32}")
</pallas_src>

<mosaic_0001>
module attributes {stable_mosaic.version = 11 : i64} {
  func.func @_conv_bias_kernel(%arg0: i32, %arg1: memref<2432x16xbf16, #tpu.memory_space<vmem>>, %arg2: memref<16x8xbf16, #tpu.memory_space<vmem>>, %arg3: memref<1x8xf32, #tpu.memory_space<vmem>>, %arg4: memref<2432x8xbf16, #tpu.memory_space<vmem>>) attributes {dimension_semantics = [#tpu.dimension_semantics<arbitrary>], iteration_bounds = array<i64: 1>, scalar_prefetch = 0 : i64, scratch_operands = 0 : i64, tpu.core_type = #tpu.core_type<tc>, window_params = [{pipeline_mode = #tpu.pipeline_mode<synchronous>, transform_indices = @transform_0, window_bounds = array<i64: 2432, 16>}, {pipeline_mode = #tpu.pipeline_mode<synchronous>, transform_indices = @transform_1, window_bounds = array<i64: 16, 8>}, {pipeline_mode = #tpu.pipeline_mode<synchronous>, transform_indices = @transform_2, window_bounds = array<i64: 1, 8>}, {pipeline_mode = #tpu.pipeline_mode<synchronous>, transform_indices = @transform_3, window_bounds = array<i64: 2432, 8>}]} {
    %c0 = arith.constant 0 : index
    %c0_0 = arith.constant 0 : index
    %0 = vector.load %arg1[%c0, %c0_0] : memref<2432x16xbf16, #tpu.memory_space<vmem>>, vector<2432x16xbf16>
    %c0_1 = arith.constant 0 : index
    %c0_2 = arith.constant 0 : index
    %1 = vector.load %arg2[%c0_1, %c0_2] : memref<16x8xbf16, #tpu.memory_space<vmem>>, vector<16x8xbf16>
    %cst = arith.constant dense<0.000000e+00> : vector<2432x8xf32>
    %2 = tpu.matmul %0, %1, %cst {dimension_numbers = #tpu.dot_dimension_numbers<[1], [0], [0], [1], [0, 0, 1, 1], [], []>} : vector<2432x16xbf16>, vector<16x8xbf16>, vector<2432x8xf32> -> vector<2432x8xf32>
    %c0_3 = arith.constant 0 : index
    %c0_4 = arith.constant 0 : index
    %3 = vector.load %arg3[%c0_3, %c0_4] : memref<1x8xf32, #tpu.memory_space<vmem>>, vector<1x8xf32>
    %4 = vector.broadcast %3 : vector<1x8xf32> to vector<2432x8xf32>
    %5 = arith.addf %2, %4 : vector<2432x8xf32>
    %cst_5 = arith.constant 0.000000e+00 : f32
    %6 = vector.broadcast %cst_5 : f32 to vector<2432x8xf32>
    %7 = arith.cmpf oge, %5, %6 : vector<2432x8xf32>
    %cst_6 = arith.constant 2.000000e-01 : f32
    %8 = vector.broadcast %cst_6 : f32 to vector<2432x8xf32>
    %9 = arith.mulf %8, %5 : vector<2432x8xf32>
    %10 = arith.select %7, %5, %9 : vector<2432x8xi1>, vector<2432x8xf32>
    %11 = arith.truncf %10 : vector<2432x8xf32> to vector<2432x8xbf16>
    %c0_7 = arith.constant 0 : index
    %c0_8 = arith.constant 0 : index
    %12 = vector.load %arg4[%c0_7, %c0_8] : memref<2432x8xbf16, #tpu.memory_space<vmem>>, vector<2432x8xbf16>
    tpu.vector_store %arg4[%c0_7, %c0_8], %11 {strides = array<i32>} : memref<2432x8xbf16, #tpu.memory_space<vmem>>, vector<2432x8xbf16>,
    return
  }
  func.func @transform_0(%arg0: i32) -> (i32, i32) {
    %c0_i32 = arith.constant 0 : i32
    %c0_i32_0 = arith.constant 0 : i32
    %c0_i32_1 = arith.constant 0 : i32
    return %c0_i32, %c0_i32_0 : i32, i32
  }
  func.func @transform_1(%arg0: i32) -> (i32, i32) {
    %c0_i32 = arith.constant 0 : i32
    %c0_i32_0 = arith.constant 0 : i32
    %c0_i32_1 = arith.constant 0 : i32
    return %c0_i32, %c0_i32_0 : i32, i32
  }
  func.func @transform_2(%arg0: i32) -> (i32, i32) {
    %c0_i32 = arith.constant 0 : i32
    %c0_i32_0 = arith.constant 0 : i32
    %c0_i32_1 = arith.constant 0 : i32
    return %c0_i32, %c0_i32_0 : i32, i32
  }
  func.func @transform_3(%arg0: i32) -> (i32, i32) {
    %c0_i32 = arith.constant 0 : i32
    %c0_i32_0 = arith.constant 0 : i32
    %c0_i32_1 = arith.constant 0 : i32
    return %c0_i32, %c0_i32_0 : i32, i32
  }
}

module attributes {stable_mosaic.version = 11 : i64} {
  func.func @_conv_bias_kernel(%arg0: i32, %arg1: memref<640x128xbf16, #tpu.memory_space<vmem>>, %arg2: memref<128x8xbf16, #tpu.memory_space<vmem>>, %arg3: memref<1x8xf32, #tpu.memory_space<vmem>>, %arg4: memref<640x8xbf16, #tpu.memory_space<vmem>>) attributes {dimension_semantics = [#tpu.dimension_semantics<arbitrary>], iteration_bounds = array<i64: 1>, scalar_prefetch = 0 : i64, scratch_operands = 0 : i64, tpu.core_type = #tpu.core_type<tc>, window_params = [{pipeline_mode = #tpu.pipeline_mode<synchronous>, transform_indices = @transform_0, window_bounds = array<i64: 640, 128>}, {pipeline_mode = #tpu.pipeline_mode<synchronous>, transform_indices = @transform_1, window_bounds = array<i64: 128, 8>}, {pipeline_mode = #tpu.pipeline_mode<synchronous>, transform_indices = @transform_2, window_bounds = array<i64: 1, 8>}, {pipeline_mode = #tpu.pipeline_mode<synchronous>, transform_indices = @transform_3, window_bounds = array<i64: 640, 8>}]} {
    %c0 = arith.constant 0 : index
    %c0_0 = arith.constant 0 : index
    %0 = vector.load %arg1[%c0, %c0_0] : memref<640x128xbf16, #tpu.memory_space<vmem>>, vector<640x128xbf16>
    %c0_1 = arith.constant 0 : index
    %c0_2 = arith.constant 0 : index
    %1 = vector.load %arg2[%c0_1, %c0_2] : memref<128x8xbf16, #tpu.memory_space<vmem>>, vector<128x8xbf16>
    %cst = arith.constant dense<0.000000e+00> : vector<640x8xf32>
    %2 = tpu.matmul %0, %1, %cst {dimension_numbers = #tpu.dot_dimension_numbers<[1], [0], [0], [1], [0, 0, 1, 1], [], []>} : vector<640x128xbf16>, vector<128x8xbf16>, vector<640x8xf32> -> vector<640x8xf32>
    %c0_3 = arith.constant 0 : index
    %c0_4 = arith.constant 0 : index
    %3 = vector.load %arg3[%c0_3, %c0_4] : memref<1x8xf32, #tpu.memory_space<vmem>>, vector<1x8xf32>
    %4 = vector.broadcast %3 : vector<1x8xf32> to vector<640x8xf32>
    %5 = arith.addf %2, %4 : vector<640x8xf32>
    %cst_5 = arith.constant 0.000000e+00 : f32
    %6 = vector.broadcast %cst_5 : f32 to vector<640x8xf32>
    %7 = arith.cmpf oge, %5, %6 : vector<640x8xf32>
    %cst_6 = arith.constant 2.000000e-01 : f32
    %8 = vector.broadcast %cst_6 : f32 to vector<640x8xf32>
    %9 = arith.mulf %8, %5 : vector<640x8xf32>
    %10 = arith.select %7, %5, %9 : vector<640x8xi1>, vector<640x8xf32>
    %11 = arith.truncf %10 : vector<640x8xf32> to vector<640x8xbf16>
    %c0_7 = arith.constant 0 : index
    %c0_8 = arith.constant 0 : index
    %12 = vector.load %arg4[%c0_7, %c0_8] : memref<640x8xbf16, #tpu.memory_space<vmem>>, vector<640x8xbf16>
    tpu.vector_store %arg4[%c0_7, %c0_8], %11 {strides = array<i32>} : memref<640x8xbf16, #tpu.memory_space<vmem>>, vector<640x8xbf16>,
    return
  }
  func.func @transform_0(%arg0: i32) -> (i32, i32) {
    %c0_i32 = arith.constant 0 : i32
    %c0_i32_0 = arith.constant 0 : i32
    %c0_i32_1 = arith.constant 0 : i32
    return %c0_i32, %c0_i32_0 : i32, i32
  }
  func.func @transform_1(%arg0: i32) -> (i32, i32) {
    %c0_i32 = arith.constant 0 : i32
    %c0_i32_0 = arith.constant 0 : i32
    %c0_i32_1 = arith.constant 0 : i32
    return %c0_i32, %c0_i32_0 : i32, i32
  }
  func.func @transform_2(%arg0: i32) -> (i32, i32) {
    %c0_i32 = arith.constant 0 : i32
    %c0_i32_0 = arith.constant 0 : i32
    %c0_i32_1 = arith.constant 0 : i32
    return %c0_i32, %c0_i32_0 : i32, i32
  }
  func.func @transform_3(%arg0: i32) -> (i32, i32) {
    %c0_i32 = arith.constant 0 : i32
    %c0_i32_0 = arith.constant 0 : i32
    %c0_i32_1 = arith.constant 0 : i32
    return %c0_i32, %c0_i32_0 : i32, i32
  }
}

module attributes {stable_mosaic.version = 11 : i64} {
  func.func @_conv_bn_lrelu_kernel(%arg0: i32, %arg1: memref<160x128xbf16, #tpu.memory_space<vmem>>, %arg2: memref<128x16xbf16, #tpu.memory_space<vmem>>, %arg3: memref<1x16xf32, #tpu.memory_space<vmem>>, %arg4: memref<1x16xf32, #tpu.memory_space<vmem>>, %arg5: memref<160x16xbf16, #tpu.memory_space<vmem>>) attributes {dimension_semantics = [#tpu.dimension_semantics<arbitrary>], iteration_bounds = array<i64: 1>, scalar_prefetch = 0 : i64, scratch_operands = 0 : i64, tpu.core_type = #tpu.core_type<tc>, window_params = [{pipeline_mode = #tpu.pipeline_mode<synchronous>, transform_indices = @transform_0, window_bounds = array<i64: 160, 128>}, {pipeline_mode = #tpu.pipeline_mode<synchronous>, transform_indices = @transform_1, window_bounds = array<i64: 128, 16>}, {pipeline_mode = #tpu.pipeline_mode<synchronous>, transform_indices = @transform_2, window_bounds = array<i64: 1, 16>}, {pipeline_mode = #tpu.pipeline_mode<synchronous>, transform_indices = @transform_3, window_bounds = array<i64: 1, 16>}, {pipeline_mode = #tpu.pipeline_mode<synchronous>, transform_indices = @transform_4, window_bounds = array<i64: 160, 16>}]} {
    %c0 = arith.constant 0 : index
    %c0_0 = arith.constant 0 : index
    %0 = vector.load %arg1[%c0, %c0_0] : memref<160x128xbf16, #tpu.memory_space<vmem>>, vector<160x128xbf16>
    %c0_1 = arith.constant 0 : index
    %c0_2 = arith.constant 0 : index
    %1 = vector.load %arg2[%c0_1, %c0_2] : memref<128x16xbf16, #tpu.memory_space<vmem>>, vector<128x16xbf16>
    %cst = arith.constant dense<0.000000e+00> : vector<160x16xf32>
    %2 = tpu.matmul %0, %1, %cst {dimension_numbers = #tpu.dot_dimension_numbers<[1], [0], [0], [1], [0, 0, 1, 1], [], []>} : vector<160x128xbf16>, vector<128x16xbf16>, vector<160x16xf32> -> vector<160x16xf32>
    %cst_3 = arith.constant dense<0.000000e+00> : vector<16xf32>
    %3 = vector.multi_reduction <add>, %2, %cst_3 [0] : vector<160x16xf32> to vector<16xf32>
    %4 = vector.shape_cast %3 : vector<16xf32> to vector<1x16xf32>
    %cst_4 = arith.constant 6.250000e-03 : f32
    %5 = vector.broadcast %cst_4 : f32 to vector<1x16xf32>
    %6 = arith.mulf %4, %5 : vector<1x16xf32>
    %7 = vector.broadcast %6 : vector<1x16xf32> to vector<160x16xf32>
    %8 = arith.subf %2, %7 : vector<160x16xf32>
    %9 = arith.mulf %8, %8 : vector<160x16xf32>
    %cst_5 = arith.constant dense<0.000000e+00> : vector<16xf32>
    %10 = vector.multi_reduction <add>, %9, %cst_5 [0] : vector<160x16xf32> to vector<16xf32>
    %11 = vector.shape_cast %10 : vector<16xf32> to vector<1x16xf32>
    %cst_6 = arith.constant 6.250000e-03 : f32
    %12 = vector.broadcast %cst_6 : f32 to vector<1x16xf32>
    %13 = arith.mulf %11, %12 : vector<1x16xf32>
    %c0_7 = arith.constant 0 : index
    %c0_8 = arith.constant 0 : index
    %14 = vector.load %arg3[%c0_7, %c0_8] : memref<1x16xf32, #tpu.memory_space<vmem>>, vector<1x16xf32>
    %cst_9 = arith.constant 9.99999974E-6 : f32
    %15 = vector.broadcast %cst_9 : f32 to vector<1x16xf32>
    %16 = arith.addf %13, %15 : vector<1x16xf32>
    %17 = math.rsqrt %16 : vector<1x16xf32>
    %18 = arith.mulf %14, %17 : vector<1x16xf32>
    %19 = vector.broadcast %18 : vector<1x16xf32> to vector<160x16xf32>
    %20 = arith.mulf %8, %19 : vector<160x16xf32>
    %c0_10 = arith.constant 0 : index
    %c0_11 = arith.constant 0 : index
    %21 = vector.load %arg4[%c0_10, %c0_11] : memref<1x16xf32, #tpu.memory_space<vmem>>, vector<1x16xf32>
    %22 = vector.broadcast %21 : vector<1x16xf32> to vector<160x16xf32>
    %23 = arith.addf %20, %22 : vector<160x16xf32>
    %cst_12 = arith.constant 0.000000e+00 : f32
    %24 = vector.broadcast %cst_12 : f32 to vector<160x16xf32>
    %25 = arith.cmpf oge, %23, %24 : vector<160x16xf32>
    %cst_13 = arith.constant 2.000000e-01 : f32
    %26 = vector.broadcast %cst_13 : f32 to vector<160x16xf32>
    %27 = arith.mulf %26, %23 : vector<160x16xf32>
    %28 = arith.select %25, %23, %27 : vector<160x16xi1>, vector<160x16xf32>
    %29 = arith.truncf %28 : vector<160x16xf32> to vector<160x16xbf16>
    %c0_14 = arith.constant 0 : index
    %c0_15 = arith.constant 0 : index
    %30 = vector.load %arg5[%c0_14, %c0_15] : memref<160x16xbf16, #tpu.memory_space<vmem>>, vector<160x16xbf16>
    tpu.vector_store %arg5[%c0_14, %c0_15], %29 {strides = array<i32>} : memref<160x16xbf16, #tpu.memory_space<vmem>>, vector<160x16xbf16>,
    return
  }
  func.func @transform_0(%arg0: i32) -> (i32, i32) {
    %c0_i32 = arith.constant 0 : i32
    %c0_i32_0 = arith.constant 0 : i32
    %c0_i32_1 = arith.constant 0 : i32
    return %c0_i32, %c0_i32_0 : i32, i32
  }
  func.func @transform_1(%arg0: i32) -> (i32, i32) {
    %c0_i32 = arith.constant 0 : i32
    %c0_i32_0 = arith.constant 0 : i32
    %c0_i32_1 = arith.constant 0 : i32
    return %c0_i32, %c0_i32_0 : i32, i32
  }
  func.func @transform_2(%arg0: i32) -> (i32, i32) {
    %c0_i32 = arith.constant 0 : i32
    %c0_i32_0 = arith.constant 0 : i32
    %c0_i32_1 = arith.constant 0 : i32
    return %c0_i32, %c0_i32_0 : i32, i32
  }
  func.func @transform_3(%arg0: i32) -> (i32, i32) {
    %c0_i32 = arith.constant 0 : i32
    %c0_i32_0 = arith.constant 0 : i32
    %c0_i32_1 = arith.constant 0 : i32
    return %c0_i32, %c0_i32_0 : i32, i32
  }
  func.func @transform_4(%arg0: i32) -> (i32, i32) {
    %c0_i32 = arith.constant 0 : i32
    %c0_i32_0 = arith.constant 0 : i32
    %c0_i32_1 = arith.constant 0 : i32
    return %c0_i32, %c0_i32_0 : i32, i32
  }
}

module attributes {stable_mosaic.version = 11 : i64} {
  func.func @_conv_bn_lrelu_kernel(%arg0: i32, %arg1: memref<48x256xbf16, #tpu.memory_space<vmem>>, %arg2: memref<256x32xbf16, #tpu.memory_space<vmem>>, %arg3: memref<1x32xf32, #tpu.memory_space<vmem>>, %arg4: memref<1x32xf32, #tpu.memory_space<vmem>>, %arg5: memref<48x32xbf16, #tpu.memory_space<vmem>>) attributes {dimension_semantics = [#tpu.dimension_semantics<arbitrary>], iteration_bounds = array<i64: 1>, scalar_prefetch = 0 : i64, scratch_operands = 0 : i64, tpu.core_type = #tpu.core_type<tc>, window_params = [{pipeline_mode = #tpu.pipeline_mode<synchronous>, transform_indices = @transform_0, window_bounds = array<i64: 48, 256>}, {pipeline_mode = #tpu.pipeline_mode<synchronous>, transform_indices = @transform_1, window_bounds = array<i64: 256, 32>}, {pipeline_mode = #tpu.pipeline_mode<synchronous>, transform_indices = @transform_2, window_bounds = array<i64: 1, 32>}, {pipeline_mode = #tpu.pipeline_mode<synchronous>, transform_indices = @transform_3, window_bounds = array<i64: 1, 32>}, {pipeline_mode = #tpu.pipeline_mode<synchronous>, transform_indices = @transform_4, window_bounds = array<i64: 48, 32>}]} {
    %c0 = arith.constant 0 : index
    %c0_0 = arith.constant 0 : index
    %0 = vector.load %arg1[%c0, %c0_0] : memref<48x256xbf16, #tpu.memory_space<vmem>>, vector<48x256xbf16>
    %c0_1 = arith.constant 0 : index
    %c0_2 = arith.constant 0 : index
    %1 = vector.load %arg2[%c0_1, %c0_2] : memref<256x32xbf16, #tpu.memory_space<vmem>>, vector<256x32xbf16>
    %cst = arith.constant dense<0.000000e+00> : vector<48x32xf32>
    %2 = tpu.matmul %0, %1, %cst {dimension_numbers = #tpu.dot_dimension_numbers<[1], [0], [0], [1], [0, 0, 1, 1], [], []>} : vector<48x256xbf16>, vector<256x32xbf16>, vector<48x32xf32> -> vector<48x32xf32>
    %cst_3 = arith.constant dense<0.000000e+00> : vector<32xf32>
    %3 = vector.multi_reduction <add>, %2, %cst_3 [0] : vector<48x32xf32> to vector<32xf32>
    %4 = vector.shape_cast %3 : vector<32xf32> to vector<1x32xf32>
    %cst_4 = arith.constant 0.020833334 : f32
    %5 = vector.broadcast %cst_4 : f32 to vector<1x32xf32>
    %6 = arith.mulf %4, %5 : vector<1x32xf32>
    %7 = vector.broadcast %6 : vector<1x32xf32> to vector<48x32xf32>
    %8 = arith.subf %2, %7 : vector<48x32xf32>
    %9 = arith.mulf %8, %8 : vector<48x32xf32>
    %cst_5 = arith.constant dense<0.000000e+00> : vector<32xf32>
    %10 = vector.multi_reduction <add>, %9, %cst_5 [0] : vector<48x32xf32> to vector<32xf32>
    %11 = vector.shape_cast %10 : vector<32xf32> to vector<1x32xf32>
    %cst_6 = arith.constant 0.020833334 : f32
    %12 = vector.broadcast %cst_6 : f32 to vector<1x32xf32>
    %13 = arith.mulf %11, %12 : vector<1x32xf32>
    %c0_7 = arith.constant 0 : index
    %c0_8 = arith.constant 0 : index
    %14 = vector.load %arg3[%c0_7, %c0_8] : memref<1x32xf32, #tpu.memory_space<vmem>>, vector<1x32xf32>
    %cst_9 = arith.constant 9.99999974E-6 : f32
    %15 = vector.broadcast %cst_9 : f32 to vector<1x32xf32>
    %16 = arith.addf %13, %15 : vector<1x32xf32>
    %17 = math.rsqrt %16 : vector<1x32xf32>
    %18 = arith.mulf %14, %17 : vector<1x32xf32>
    %19 = vector.broadcast %18 : vector<1x32xf32> to vector<48x32xf32>
    %20 = arith.mulf %8, %19 : vector<48x32xf32>
    %c0_10 = arith.constant 0 : index
    %c0_11 = arith.constant 0 : index
    %21 = vector.load %arg4[%c0_10, %c0_11] : memref<1x32xf32, #tpu.memory_space<vmem>>, vector<1x32xf32>
    %22 = vector.broadcast %21 : vector<1x32xf32> to vector<48x32xf32>
    %23 = arith.addf %20, %22 : vector<48x32xf32>
    %cst_12 = arith.constant 0.000000e+00 : f32
    %24 = vector.broadcast %cst_12 : f32 to vector<48x32xf32>
    %25 = arith.cmpf oge, %23, %24 : vector<48x32xf32>
    %cst_13 = arith.constant 2.000000e-01 : f32
    %26 = vector.broadcast %cst_13 : f32 to vector<48x32xf32>
    %27 = arith.mulf %26, %23 : vector<48x32xf32>
    %28 = arith.select %25, %23, %27 : vector<48x32xi1>, vector<48x32xf32>
    %29 = arith.truncf %28 : vector<48x32xf32> to vector<48x32xbf16>
    %c0_14 = arith.constant 0 : index
    %c0_15 = arith.constant 0 : index
    %30 = vector.load %arg5[%c0_14, %c0_15] : memref<48x32xbf16, #tpu.memory_space<vmem>>, vector<48x32xbf16>
    tpu.vector_store %arg5[%c0_14, %c0_15], %29 {strides = array<i32>} : memref<48x32xbf16, #tpu.memory_space<vmem>>, vector<48x32xbf16>,
    return
  }
  func.func @transform_0(%arg0: i32) -> (i32, i32) {
    %c0_i32 = arith.constant 0 : i32
    %c0_i32_0 = arith.constant 0 : i32
    %c0_i32_1 = arith.constant 0 : i32
    return %c0_i32, %c0_i32_0 : i32, i32
  }
  func.func @transform_1(%arg0: i32) -> (i32, i32) {
    %c0_i32 = arith.constant 0 : i32
    %c0_i32_0 = arith.constant 0 : i32
    %c0_i32_1 = arith.constant 0 : i32
    return %c0_i32, %c0_i32_0 : i32, i32
  }
  func.func @transform_2(%arg0: i32) -> (i32, i32) {
    %c0_i32 = arith.constant 0 : i32
    %c0_i32_0 = arith.constant 0 : i32
    %c0_i32_1 = arith.constant 0 : i32
    return %c0_i32, %c0_i32_0 : i32, i32
  }
  func.func @transform_3(%arg0: i32) -> (i32, i32) {
    %c0_i32 = arith.constant 0 : i32
    %c0_i32_0 = arith.constant 0 : i32
    %c0_i32_1 = arith.constant 0 : i32
    return %c0_i32, %c0_i32_0 : i32, i32
  }
  func.func @transform_4(%arg0: i32) -> (i32, i32) {
    %c0_i32 = arith.constant 0 : i32
    %c0_i32_0 = arith.constant 0 : i32
    %c0_i32_1 = arith.constant 0 : i32
    return %c0_i32, %c0_i32_0 : i32, i32
  }
}

module attributes {stable_mosaic.version = 11 : i64} {
  func.func @_conv_bn_lrelu_kernel(%arg0: i32, %arg1: memref<48x512xbf16, #tpu.memory_space<vmem>>, %arg2: memref<512x64xbf16, #tpu.memory_space<vmem>>, %arg3: memref<1x64xf32, #tpu.memory_space<vmem>>, %arg4: memref<1x64xf32, #tpu.memory_space<vmem>>, %arg5: memref<48x64xbf16, #tpu.memory_space<vmem>>) attributes {dimension_semantics = [#tpu.dimension_semantics<arbitrary>], iteration_bounds = array<i64: 1>, scalar_prefetch = 0 : i64, scratch_operands = 0 : i64, tpu.core_type = #tpu.core_type<tc>, window_params = [{pipeline_mode = #tpu.pipeline_mode<synchronous>, transform_indices = @transform_0, window_bounds = array<i64: 48, 512>}, {pipeline_mode = #tpu.pipeline_mode<synchronous>, transform_indices = @transform_1, window_bounds = array<i64: 512, 64>}, {pipeline_mode = #tpu.pipeline_mode<synchronous>, transform_indices = @transform_2, window_bounds = array<i64: 1, 64>}, {pipeline_mode = #tpu.pipeline_mode<synchronous>, transform_indices = @transform_3, window_bounds = array<i64: 1, 64>}, {pipeline_mode = #tpu.pipeline_mode<synchronous>, transform_indices = @transform_4, window_bounds = array<i64: 48, 64>}]} {
    %c0 = arith.constant 0 : index
    %c0_0 = arith.constant 0 : index
    %0 = vector.load %arg1[%c0, %c0_0] : memref<48x512xbf16, #tpu.memory_space<vmem>>, vector<48x512xbf16>
    %c0_1 = arith.constant 0 : index
    %c0_2 = arith.constant 0 : index
    %1 = vector.load %arg2[%c0_1, %c0_2] : memref<512x64xbf16, #tpu.memory_space<vmem>>, vector<512x64xbf16>
    %cst = arith.constant dense<0.000000e+00> : vector<48x64xf32>
    %2 = tpu.matmul %0, %1, %cst {dimension_numbers = #tpu.dot_dimension_numbers<[1], [0], [0], [1], [0, 0, 1, 1], [], []>} : vector<48x512xbf16>, vector<512x64xbf16>, vector<48x64xf32> -> vector<48x64xf32>
    %cst_3 = arith.constant dense<0.000000e+00> : vector<64xf32>
    %3 = vector.multi_reduction <add>, %2, %cst_3 [0] : vector<48x64xf32> to vector<64xf32>
    %4 = vector.shape_cast %3 : vector<64xf32> to vector<1x64xf32>
    %cst_4 = arith.constant 0.020833334 : f32
    %5 = vector.broadcast %cst_4 : f32 to vector<1x64xf32>
    %6 = arith.mulf %4, %5 : vector<1x64xf32>
    %7 = vector.broadcast %6 : vector<1x64xf32> to vector<48x64xf32>
    %8 = arith.subf %2, %7 : vector<48x64xf32>
    %9 = arith.mulf %8, %8 : vector<48x64xf32>
    %cst_5 = arith.constant dense<0.000000e+00> : vector<64xf32>
    %10 = vector.multi_reduction <add>, %9, %cst_5 [0] : vector<48x64xf32> to vector<64xf32>
    %11 = vector.shape_cast %10 : vector<64xf32> to vector<1x64xf32>
    %cst_6 = arith.constant 0.020833334 : f32
    %12 = vector.broadcast %cst_6 : f32 to vector<1x64xf32>
    %13 = arith.mulf %11, %12 : vector<1x64xf32>
    %c0_7 = arith.constant 0 : index
    %c0_8 = arith.constant 0 : index
    %14 = vector.load %arg3[%c0_7, %c0_8] : memref<1x64xf32, #tpu.memory_space<vmem>>, vector<1x64xf32>
    %cst_9 = arith.constant 9.99999974E-6 : f32
    %15 = vector.broadcast %cst_9 : f32 to vector<1x64xf32>
    %16 = arith.addf %13, %15 : vector<1x64xf32>
    %17 = math.rsqrt %16 : vector<1x64xf32>
    %18 = arith.mulf %14, %17 : vector<1x64xf32>
    %19 = vector.broadcast %18 : vector<1x64xf32> to vector<48x64xf32>
    %20 = arith.mulf %8, %19 : vector<48x64xf32>
    %c0_10 = arith.constant 0 : index
    %c0_11 = arith.constant 0 : index
    %21 = vector.load %arg4[%c0_10, %c0_11] : memref<1x64xf32, #tpu.memory_space<vmem>>, vector<1x64xf32>
    %22 = vector.broadcast %21 : vector<1x64xf32> to vector<48x64xf32>
    %23 = arith.addf %20, %22 : vector<48x64xf32>
    %cst_12 = arith.constant 0.000000e+00 : f32
    %24 = vector.broadcast %cst_12 : f32 to vector<48x64xf32>
    %25 = arith.cmpf oge, %23, %24 : vector<48x64xf32>
    %cst_13 = arith.constant 2.000000e-01 : f32
    %26 = vector.broadcast %cst_13 : f32 to vector<48x64xf32>
    %27 = arith.mulf %26, %23 : vector<48x64xf32>
    %28 = arith.select %25, %23, %27 : vector<48x64xi1>, vector<48x64xf32>
    %29 = arith.truncf %28 : vector<48x64xf32> to vector<48x64xbf16>
    %c0_14 = arith.constant 0 : index
    %c0_15 = arith.constant 0 : index
    %30 = vector.load %arg5[%c0_14, %c0_15] : memref<48x64xbf16, #tpu.memory_space<vmem>>, vector<48x64xbf16>
    tpu.vector_store %arg5[%c0_14, %c0_15], %29 {strides = array<i32>} : memref<48x64xbf16, #tpu.memory_space<vmem>>, vector<48x64xbf16>,
    return
  }
  func.func @transform_0(%arg0: i32) -> (i32, i32) {
    %c0_i32 = arith.constant 0 : i32
    %c0_i32_0 = arith.constant 0 : i32
    %c0_i32_1 = arith.constant 0 : i32
    return %c0_i32, %c0_i32_0 : i32, i32
  }
  func.func @transform_1(%arg0: i32) -> (i32, i32) {
    %c0_i32 = arith.constant 0 : i32
    %c0_i32_0 = arith.constant 0 : i32
    %c0_i32_1 = arith.constant 0 : i32
    return %c0_i32, %c0_i32_0 : i32, i32
  }
  func.func @transform_2(%arg0: i32) -> (i32, i32) {
    %c0_i32 = arith.constant 0 : i32
    %c0_i32_0 = arith.constant 0 : i32
    %c0_i32_1 = arith.constant 0 : i32
    return %c0_i32, %c0_i32_0 : i32, i32
  }
  func.func @transform_3(%arg0: i32) -> (i32, i32) {
    %c0_i32 = arith.constant 0 : i32
    %c0_i32_0 = arith.constant 0 : i32
    %c0_i32_1 = arith.constant 0 : i32
    return %c0_i32, %c0_i32_0 : i32, i32
  }
  func.func @transform_4(%arg0: i32) -> (i32, i32) {
    %c0_i32 = arith.constant 0 : i32
    %c0_i32_0 = arith.constant 0 : i32
    %c0_i32_1 = arith.constant 0 : i32
    return %c0_i32, %c0_i32_0 : i32, i32
  }
}

module attributes {stable_mosaic.version = 11 : i64} {
  func.func @_conv_bias_kernel(%arg0: i32, %arg1: memref<48x1024xbf16, #tpu.memory_space<vmem>>, %arg2: memref<1024x1xbf16, #tpu.memory_space<vmem>>, %arg3: memref<1x1xf32, #tpu.memory_space<vmem>>, %arg4: memref<48x1xf32, #tpu.memory_space<vmem>>) attributes {dimension_semantics = [#tpu.dimension_semantics<arbitrary>], iteration_bounds = array<i64: 1>, scalar_prefetch = 0 : i64, scratch_operands = 0 : i64, tpu.core_type = #tpu.core_type<tc>, window_params = [{pipeline_mode = #tpu.pipeline_mode<synchronous>, transform_indices = @transform_0, window_bounds = array<i64: 48, 1024>}, {pipeline_mode = #tpu.pipeline_mode<synchronous>, transform_indices = @transform_1, window_bounds = array<i64: 1024, 1>}, {pipeline_mode = #tpu.pipeline_mode<synchronous>, transform_indices = @transform_2, window_bounds = array<i64: 1, 1>}, {pipeline_mode = #tpu.pipeline_mode<synchronous>, transform_indices = @transform_3, window_bounds = array<i64: 48, 1>}]} {
    %c0 = arith.constant 0 : index
    %c0_0 = arith.constant 0 : index
    %0 = vector.load %arg1[%c0, %c0_0] : memref<48x1024xbf16, #tpu.memory_space<vmem>>, vector<48x1024xbf16>
    %c0_1 = arith.constant 0 : index
    %c0_2 = arith.constant 0 : index
    %1 = vector.load %arg2[%c0_1, %c0_2] : memref<1024x1xbf16, #tpu.memory_space<vmem>>, vector<1024x1xbf16>
    %cst = arith.constant dense<0.000000e+00> : vector<48x1xf32>
    %2 = tpu.matmul %0, %1, %cst {dimension_numbers = #tpu.dot_dimension_numbers<[1], [0], [0], [1], [0, 0, 1, 1], [], []>} : vector<48x1024xbf16>, vector<1024x1xbf16>, vector<48x1xf32> -> vector<48x1xf32>
    %c0_3 = arith.constant 0 : index
    %c0_4 = arith.constant 0 : index
    %3 = vector.load %arg3[%c0_3, %c0_4] : memref<1x1xf32, #tpu.memory_space<vmem>>, vector<1x1xf32>
    %4 = vector.broadcast %3 : vector<1x1xf32> to vector<48x1xf32>
    %5 = arith.addf %2, %4 : vector<48x1xf32>
    %c0_5 = arith.constant 0 : index
    %c0_6 = arith.constant 0 : index
    %6 = vector.load %arg4[%c0_5, %c0_6] : memref<48x1xf32, #tpu.memory_space<vmem>>, vector<48x1xf32>
    tpu.vector_store %arg4[%c0_5, %c0_6], %5 {strides = array<i32>} : memref<48x1xf32, #tpu.memory_space<vmem>>, vector<48x1xf32>,
    return
  }
  func.func @transform_0(%arg0: i32) -> (i32, i32) {
    %c0_i32 = arith.constant 0 : i32
    %c0_i32_0 = arith.constant 0 : i32
    %c0_i32_1 = arith.constant 0 : i32
    return %c0_i32, %c0_i32_0 : i32, i32
  }
  func.func @transform_1(%arg0: i32) -> (i32, i32) {
    %c0_i32 = arith.constant 0 : i32
    %c0_i32_0 = arith.constant 0 : i32
    %c0_i32_1 = arith.constant 0 : i32
    return %c0_i32, %c0_i32_0 : i32, i32
  }
  func.func @transform_2(%arg0: i32) -> (i32, i32) {
    %c0_i32 = arith.constant 0 : i32
    %c0_i32_0 = arith.constant 0 : i32
    %c0_i32_1 = arith.constant 0 : i32
    return %c0_i32, %c0_i32_0 : i32, i32
  }
  func.func @transform_3(%arg0: i32) -> (i32, i32) {
    %c0_i32 = arith.constant 0 : i32
    %c0_i32_0 = arith.constant 0 : i32
    %c0_i32_1 = arith.constant 0 : i32
    return %c0_i32, %c0_i32_0 : i32, i32
  }
}

</mosaic_0001>

<bundles_post_ra>
// kernel: discriminator_forward.6
= control target key start
LH: loop header
LB: loop body
LE: loop exit
PB: predicated region body
PF: predicated region fallthrough
CT: control target
= control target key end

     0   :  { %vm1091_vm0 = vcmask 130048   ;;  %vm3533_vm3 = vcmask 60416   ;;  %s6943_s1 = inlined_call_operand.vmem [shape: bf16[16,8], index: 1, kind: input, shape index: {}]   ;;  %s6944_s0 = inlined_call_operand.vmem [shape: bf16[2432,16], index: 0, kind: input, shape index: {}]   ;;  %s6945_s2 = inlined_call_operand.vmem [shape: f32[1,8], index: 2, kind: input, shape index: {}]   ;;  %s6946_s3 = inlined_call_operand.vmem [shape: bf16[2432,8], index: 3, kind: output, shape index: {}]  }
   0x1   :  { %v4758_v0 = vld [vmem:[%s6943_s1] sm:$0xff]  ;;  %v4644_v2 = vld [vmem:[%s6944_s0 + $0x130] sm:$0xff]  ;;  %v4607_v5 = vld [vmem:[%s6944_s0 + $0x8] sm:$0xff] }
   0x2   :  { %v4606_v1 = vld [vmem:[%s6944_s0] sm:$0xff]  ;;  %1555 = vmatpush.bf16.msra.mxu0 %v4758_v0  ;;  %4759 = vmatpush.bf16.msra.mxu1 %v4758_v0  ;;  %v4720_v4 = vld [vmem:[%s6944_s0 + $0x390] sm:$0xff]  ;;  %v4645_v6 = vld [vmem:[%s6944_s0 + $0x138] sm:$0xff] }
   0x3   :  { %v4682_v3 = vld [vmem:[%s6944_s0 + $0x260] sm:$0xff]  ;;  %4760 = vmatpush.bf16.msra.mxu2 %v4758_v0  ;;  %4761 = vmatpush.bf16.msra.mxu3 %v4758_v0  ;;  %v4683_v7 = vld [vmem:[%s6944_s0 + $0x268] sm:$0xff]  ;;  %v4721_v8 = vld [vmem:[%s6944_s0 + $0x398] sm:$0xff] }
   0x4   :  { %v4608_v9 = vld [vmem:[%s6944_s0 + $0x10] sm:$0xff]  ;;  %v4646_v10 = vld [vmem:[%s6944_s0 + $0x140] sm:$0xff]  ;;  %v4609_v13 = vld [vmem:[%s6944_s0 + $0x18] sm:$0xff] }
   0x5   :  { %4454 = vmatmul.msk.bf16.vlgmr.msra.gmra.mxu0 %vm1091_vm0, %v4606_v1  ;;  %4492 = vmatmul.msk.bf16.vlgmr.msra.gmra.mxu1 %vm1091_vm0, %v4644_v2  ;;  %v4684_v11 = vld [vmem:[%s6944_s0 + $0x270] sm:$0xff]  ;;  %v4722_v12 = vld [vmem:[%s6944_s0 + $0x3a0] sm:$0xff]  ;;  %v4647_v14 = vld [vmem:[%s6944_s0 + $0x148] sm:$0xff] }
   0x6   :  { %4530 = vmatmul.msk.bf16.vlgmr.msra.gmra.mxu2 %vm1091_vm0, %v4682_v3  ;;  %4568 = vmatmul.msk.bf16.vlgmr.msra.gmra.mxu3 %vm1091_vm0, %v4720_v4  ;;  %v4685_v15 = vld [vmem:[%s6944_s0 + $0x278] sm:$0xff]  ;;  %v4723_v16 = vld [vmem:[%s6944_s0 + $0x3a8] sm:$0xff]  ;;  %v4610_v17 = vld [vmem:[%s6944_s0 + $0x20] sm:$0xff] }
   0x7   :  { %v4648_v18 = vld [vmem:[%s6944_s0 + $0x150] sm:$0xff]  ;;  %v4686_v19 = vld [vmem:[%s6944_s0 + $0x280] sm:$0xff]  ;;  %v4611_v21 = vld [vmem:[%s6944_s0 + $0x28] sm:$0xff] }
   0x8   :  { %v4724_v20 = vld [vmem:[%s6944_s0 + $0x3b0] sm:$0xff]  ;;  %v4649_v22 = vld [vmem:[%s6944_s0 + $0x158] sm:$0xff]  ;;  %v4687_v23 = vld [vmem:[%s6944_s0 + $0x288] sm:$0xff] }
   0x9   :  { %v4725_v24 = vld [vmem:[%s6944_s0 + $0x3b8] sm:$0xff]  ;;  %v4612_v25 = vld [vmem:[%s6944_s0 + $0x30] sm:$0xff]  ;;  %v4650_v26 = vld [vmem:[%s6944_s0 + $0x160] sm:$0xff] }
   0xa   :  { %v4688_v27 = vld [vmem:[%s6944_s0 + $0x290] sm:$0xff]  ;;  %v4726_v28 = vld [vmem:[%s6944_s0 + $0x3c0] sm:$0xff]  ;;  %v4613_v29 = vld [vmem:[%s6944_s0 + $0x38] sm:$0xff] }
   0xb   :  { %v4651_v30 = vld [vmem:[%s6944_s0 + $0x168] sm:$0xff]  ;;  %v4689_v31 = vld [vmem:[%s6944_s0 + $0x298] sm:$0xff]  ;;  %v4921_v33 = vld [vmem:[%s6945_s2] ss:$0 sm:$0xff] }
   0xc   :  { %v4727_v32 = vld [vmem:[%s6944_s0 + $0x3c8] sm:$0xff]  ;;  %v4614_v34 = vld [vmem:[%s6944_s0 + $0x40] sm:$0xff]  ;;  %v4652_v35 = vld [vmem:[%s6944_s0 + $0x170] sm:$0xff] }
   0xd   :  { %v4690_v38 = vld [vmem:[%s6944_s0 + $0x2a0] sm:$0xff]  ;;  %v4728_v39 = vld [vmem:[%s6944_s0 + $0x3d0] sm:$0xff] }
  0x15   :  { %4455 = vmatmul.msk.bf16.gmra.mxu0 %vm1091_vm0, %v4607_v5  ;;  %4493 = vmatmul.msk.bf16.gmra.mxu1 %vm1091_vm0, %v4645_v6  ;;  %v4615_v6 = vld [vmem:[%s6944_s0 + $0x48] sm:$0xff] }
  0x16   :  { %4531 = vmatmul.msk.bf16.gmra.mxu2 %vm1091_vm0, %v4683_v7  ;;  %4569 = vmatmul.msk.bf16.gmra.mxu3 %vm1091_vm0, %v4721_v8  ;;  %v4653_v7 = vld [vmem:[%s6944_s0 + $0x178] sm:$0xff] }
  0x25   :  { %4456 = vmatmul.msk.bf16.gmra.mxu0 %vm1091_vm0, %v4608_v9  ;;  %4494 = vmatmul.msk.bf16.gmra.mxu1 %vm1091_vm0, %v4646_v10 }
  0x26   :  { %4532 = vmatmul.msk.bf16.gmra.mxu2 %vm1091_vm0, %v4684_v11  ;;  %4570 = vmatmul.msk.bf16.gmra.mxu3 %vm1091_vm0, %v4722_v12  ;;  %v4691_v12 = vld [vmem:[%s6944_s0 + $0x2a8] sm:$0xff] }
  0x35   :  { %4457 = vmatmul.msk.bf16.gmra.mxu0 %vm1091_vm0, %v4609_v13  ;;  %4495 = vmatmul.msk.bf16.gmra.mxu1 %vm1091_vm0, %v4647_v14  ;;  %v4729_v13 = vld [vmem:[%s6944_s0 + $0x3d8] sm:$0xff] }
  0x36   :  { %4533 = vmatmul.msk.bf16.gmra.mxu2 %vm1091_vm0, %v4685_v15  ;;  %4571 = vmatmul.msk.bf16.gmra.mxu3 %vm1091_vm0, %v4723_v16 }
  0x45   :  { %4458 = vmatmul.msk.bf16.gmra.mxu0 %vm1091_vm0, %v4610_v17  ;;  %4496 = vmatmul.msk.bf16.gmra.mxu1 %vm1091_vm0, %v4648_v18 }
  0x46   :  { %4534 = vmatmul.msk.bf16.gmra.mxu2 %vm1091_vm0, %v4686_v19  ;;  %4572 = vmatmul.msk.bf16.gmra.mxu3 %vm1091_vm0, %v4724_v20 }
  0x55   :  { %4459 = vmatmul.msk.bf16.gmra.mxu0 %vm1091_vm0, %v4611_v21  ;;  %4497 = vmatmul.msk.bf16.gmra.mxu1 %vm1091_vm0, %v4649_v22 }
  0x56   :  { %4535 = vmatmul.msk.bf16.gmra.mxu2 %vm1091_vm0, %v4687_v23  ;;  %4573 = vmatmul.msk.bf16.gmra.mxu3 %vm1091_vm0, %v4725_v24 }
  0x65   :  { %4460 = vmatmul.msk.bf16.gmra.mxu0 %vm1091_vm0, %v4612_v25  ;;  %4498 = vmatmul.msk.bf16.gmra.mxu1 %vm1091_vm0, %v4650_v26 }
  0x66   :  { %4536 = vmatmul.msk.bf16.gmra.mxu2 %vm1091_vm0, %v4688_v27  ;;  %4574 = vmatmul.msk.bf16.gmra.mxu3 %vm1091_vm0, %v4726_v28 }
  0x75   :  { %4461 = vmatmul.msk.bf16.gmra.mxu0 %vm1091_vm0, %v4613_v29  ;;  %4499 = vmatmul.msk.bf16.gmra.mxu1 %vm1091_vm0, %v4651_v30 }
  0x76   :  { %4537 = vmatmul.msk.bf16.gmra.mxu2 %vm1091_vm0, %v4689_v31  ;;  %4575 = vmatmul.msk.bf16.gmra.mxu3 %vm1091_vm0, %v4727_v32 }
  0x82   :  { %v1557_v36 = vpop.f32.mrf.mxu0  ;;  %v1747_v37 = vpop.f32.mrf.mxu1 }
  0x83   :  { %v1558_v40 = vadd.f32 %v4921_v33, %v1557_v36  ;;  %v1748_v41 = vadd.f32 %v4921_v33, %v1747_v37 }
  0x85   :  { %vm2317_vm1 = vcmp.ge.f32.partialorder %v1558_v40, 0.0  ;;  %v2621_v42 = vmul.f32 0.2, %v1558_v40  ;;  %vm2393_vm2 = vcmp.ge.f32.partialorder %v1748_v41, 0.0  ;;  %v2697_v43 = vmul.f32 0.2, %v1748_v41  ;;  %4462 = vmatmul.msk.bf16.gmra.mxu0 %vm1091_vm0, %v4614_v34  ;;  %4500 = vmatmul.msk.bf16.gmra.mxu1 %vm1091_vm0, %v4652_v35 }
  0x86   :  { %4538 = vmatmul.msk.bf16.gmra.mxu2 %vm1091_vm0, %v4690_v38  ;;  %4576 = vmatmul.msk.bf16.gmra.mxu3 %vm1091_vm0, %v4728_v39 }
  0x87   :  { %v2925_v44 = vsel %vm2317_vm1, %v1558_v40, %v2621_v42  ;;  %v3001_v45 = vsel %vm2393_vm2, %v1748_v41, %v2697_v43 }
  0x88   :  { %v3229_v46 = vpack.c.bf16 %v2925_v44, %v2925_v44  ;;  %v3305_v47 = vpack.c.bf16 %v3001_v45, %v3001_v45 }
  0x89   :  { %v1937_v48 = vpop.f32.mrf.mxu2  ;;  %v2127_v49 = vpop.f32.mrf.mxu3 }
  0x8a   :  { %3534 = vst.msk [vmem:[%s6946_s3] sm:$0xf] %vm3533_vm3, %v3229_v46  ;;  %v1938_v50 = vadd.f32 %v4921_v33, %v1937_v48  ;;  %v2128_v51 = vadd.f32 %v4921_v33, %v2127_v49  ;;  %v1559_v52 = vpop.f32.mrf.mxu0  ;;  %v1749_v53 = vpop.f32.mrf.mxu1 }
  0x8b   :  { %3610 = vst.msk [vmem:[%s6946_s3 + $0x130] sm:$0xf] %vm3533_vm3, %v3305_v47  ;;  %v1560_v54 = vadd.f32 %v4921_v33, %v1559_v52  ;;  %v1750_v55 = vadd.f32 %v4921_v33, %v1749_v53  ;;  %v4654_v52 = vld [vmem:[%s6944_s0 + $0x180] sm:$0xff] }
  0x8c   :  { %vm2469_vm4 = vcmp.ge.f32.partialorder %v1938_v50, 0.0  ;;  %v2773_v56 = vmul.f32 0.2, %v1938_v50  ;;  %vm2545_vm5 = vcmp.ge.f32.partialorder %v2128_v51, 0.0  ;;  %v2849_v57 = vmul.f32 0.2, %v2128_v51 }
  0x8d   :  { %vm2318_vm6 = vcmp.ge.f32.partialorder %v1560_v54, 0.0  ;;  %v2622_v58 = vmul.f32 0.2, %v1560_v54  ;;  %vm2394_vm7 = vcmp.ge.f32.partialorder %v1750_v55, 0.0  ;;  %v2698_v59 = vmul.f32 0.2, %v1750_v55 }
  0x8e   :  { %v3077_v60 = vsel %vm2469_vm4, %v1938_v50, %v2773_v56  ;;  %v3153_v61 = vsel %vm2545_vm5, %v2128_v51, %v2849_v57  ;;  %v4616_v51 = vld [vmem:[%s6944_s0 + $0x50] sm:$0xff] }
  0x8f   :  { %v3381_v62 = vpack.c.bf16 %v3077_v60, %v3077_v60  ;;  %v3457_v63 = vpack.c.bf16 %v3153_v61, %v3153_v61  ;;  %v2926_v0 = vsel %vm2318_vm6, %v1560_v54, %v2622_v58  ;;  %v3002_v1 = vsel %vm2394_vm7, %v1750_v55, %v2698_v59  ;;  %v4692_v57 = vld [vmem:[%s6944_s0 + $0x2b0] sm:$0xff]  ;;  %v4730_v58 = vld [vmem:[%s6944_s0 + $0x3e0] sm:$0xff] }
  0x90   :  { %v3230_v2 = vpack.c.bf16 %v2926_v0, %v2926_v0  ;;  %v3306_v3 = vpack.c.bf16 %v3002_v1, %v3002_v1 }
  0x91   :  { %3686 = vst.msk [vmem:[%s6946_s3 + $0x260] sm:$0xf] %vm3533_vm3, %v3381_v62  ;;  %v1939_v4 = vpop.f32.mrf.mxu2  ;;  %v2129_v5 = vpop.f32.mrf.mxu3 }
  0x92   :  { %3762 = vst.msk [vmem:[%s6946_s3 + $0x390] sm:$0xf] %vm3533_vm3, %v3457_v63  ;;  %v1940_v8 = vadd.f32 %v4921_v33, %v1939_v4  ;;  %v2130_v9 = vadd.f32 %v4921_v33, %v2129_v5  ;;  %v1562_v10 = vpop.f32.mrf.mxu0  ;;  %v1752_v11 = vpop.f32.mrf.mxu1 }
  0x93   :  { %3535 = vst.msk [vmem:[%s6946_s3 + $0x4] sm:$0xf] %vm3533_vm3, %v3230_v2  ;;  %v1563_v14 = vadd.f32 %v4921_v33, %v1562_v10  ;;  %v1753_v15 = vadd.f32 %v4921_v33, %v1752_v11 }
  0x94   :  { %3611 = vst.msk [vmem:[%s6946_s3 + $0x134] sm:$0xf] %vm3533_vm3, %v3306_v3  ;;  %vm2470_vm8 = vcmp.ge.f32.partialorder %v1940_v8, 0.0  ;;  %v2774_v16 = vmul.f32 0.2, %v1940_v8  ;;  %vm2546_vm9 = vcmp.ge.f32.partialorder %v2130_v9, 0.0 }
  0x95   :  { %v2850_v17 = vmul.f32 0.2, %v2130_v9  ;;  %vm2319_vm10 = vcmp.ge.f32.partialorder %v1563_v14, 0.0  ;;  %v2623_v18 = vmul.f32 0.2, %v1563_v14  ;;  %vm2395_vm11 = vcmp.ge.f32.partialorder %v1753_v15, 0.0  ;;  %4463 = vmatmul.msk.bf16.gmra.mxu0 %vm1091_vm0, %v4615_v6  ;;  %4501 = vmatmul.msk.bf16.gmra.mxu1 %vm1091_vm0, %v4653_v7 }
  0x96   :  { %v3078_v19 = vsel %vm2470_vm8, %v1940_v8, %v2774_v16  ;;  %v2699_v20 = vmul.f32 0.2, %v1753_v15  ;;  %4539 = vmatmul.msk.bf16.gmra.mxu2 %vm1091_vm0, %v4691_v12  ;;  %4577 = vmatmul.msk.bf16.gmra.mxu3 %vm1091_vm0, %v4729_v13 }
  0x97   :  { %v3382_v21 = vpack.c.bf16 %v3078_v19, %v3078_v19  ;;  %v3154_v22 = vsel %vm2546_vm9, %v2130_v9, %v2850_v17  ;;  %v2927_v23 = vsel %vm2319_vm10, %v1563_v14, %v2623_v18 }
  0x98   :  { %v3458_v24 = vpack.c.bf16 %v3154_v22, %v3154_v22  ;;  %v3231_v25 = vpack.c.bf16 %v2927_v23, %v2927_v23  ;;  %v3003_v26 = vsel %vm2395_vm11, %v1753_v15, %v2699_v20 }
  0x99   :  { %3687 = vst.msk [vmem:[%s6946_s3 + $0x264] sm:$0xf] %vm3533_vm3, %v3382_v21  ;;  %v3307_v27 = vpack.c.bf16 %v3003_v26, %v3003_v26  ;;  %v1942_v28 = vpop.f32.mrf.mxu2  ;;  %v2132_v29 = vpop.f32.mrf.mxu3 }
  0x9a   :  { %3763 = vst.msk [vmem:[%s6946_s3 + $0x394] sm:$0xf] %vm3533_vm3, %v3458_v24  ;;  %v1943_v30 = vadd.f32 %v4921_v33, %v1942_v28  ;;  %v2133_v31 = vadd.f32 %v4921_v33, %v2132_v29  ;;  %v1564_v32 = vpop.f32.mrf.mxu0  ;;  %v1754_v34 = vpop.f32.mrf.mxu1 }
  0x9b   :  { %3536 = vst.msk [vmem:[%s6946_s3 + $0x8] sm:$0xf] %vm3533_vm3, %v3231_v25  ;;  %v1565_v35 = vadd.f32 %v4921_v33, %v1564_v32  ;;  %v1755_v36 = vadd.f32 %v4921_v33, %v1754_v34  ;;  %v4655_v32 = vld [vmem:[%s6944_s0 + $0x188] sm:$0xff] }
  0x9c   :  { %3612 = vst.msk [vmem:[%s6946_s3 + $0x138] sm:$0xf] %vm3533_vm3, %v3307_v27  ;;  %vm2471_vm12 = vcmp.ge.f32.partialorder %v1943_v30, 0.0  ;;  %v2775_v37 = vmul.f32 0.2, %v1943_v30  ;;  %vm2547_vm13 = vcmp.ge.f32.partialorder %v2133_v31, 0.0 }
  0x9d   :  { %v2851_v38 = vmul.f32 0.2, %v2133_v31  ;;  %vm2320_vm14 = vcmp.ge.f32.partialorder %v1565_v35, 0.0  ;;  %v2624_v39 = vmul.f32 0.2, %v1565_v35  ;;  %vm2396_vm15 = vcmp.ge.f32.partialorder %v1755_v36, 0.0 }
  0x9e   :  { %v3079_v40 = vsel %vm2471_vm12, %v1943_v30, %v2775_v37  ;;  %v2700_v41 = vmul.f32 0.2, %v1755_v36 }
  0x9f   :  { %v3383_v42 = vpack.c.bf16 %v3079_v40, %v3079_v40  ;;  %v3155_v43 = vsel %vm2547_vm13, %v2133_v31, %v2851_v38  ;;  %v2928_v44 = vsel %vm2320_vm14, %v1565_v35, %v2624_v39  ;;  %v4617_v31 = vld [vmem:[%s6944_s0 + $0x58] sm:$0xff]  ;;  %v4731_v39 = vld [vmem:[%s6944_s0 + $0x3e8] sm:$0xff] }
  0xa0   :  { %v3459_v45 = vpack.c.bf16 %v3155_v43, %v3155_v43  ;;  %v3232_v46 = vpack.c.bf16 %v2928_v44, %v2928_v44  ;;  %v3004_v47 = vsel %vm2396_vm15, %v1755_v36, %v2700_v41  ;;  %v4693_v38 = vld [vmem:[%s6944_s0 + $0x2b8] sm:$0xff] }
  0xa1   :  { %3688 = vst.msk [vmem:[%s6946_s3 + $0x268] sm:$0xf] %vm3533_vm3, %v3383_v42  ;;  %v3308_v48 = vpack.c.bf16 %v3004_v47, %v3004_v47  ;;  %v1944_v49 = vpop.f32.mrf.mxu2  ;;  %v2134_v50 = vpop.f32.mrf.mxu3 }
  0xa2   :  { %3764 = vst.msk [vmem:[%s6946_s3 + $0x398] sm:$0xf] %vm3533_vm3, %v3459_v45  ;;  %v1945_v53 = vadd.f32 %v4921_v33, %v1944_v49  ;;  %v2135_v54 = vadd.f32 %v4921_v33, %v2134_v50  ;;  %v1567_v55 = vpop.f32.mrf.mxu0  ;;  %v1757_v56 = vpop.f32.mrf.mxu1 }
  0xa3   :  { %3537 = vst.msk [vmem:[%s6946_s3 + $0xc] sm:$0xf] %vm3533_vm3, %v3232_v46  ;;  %v1568_v59 = vadd.f32 %v4921_v33, %v1567_v55  ;;  %v1758_v60 = vadd.f32 %v4921_v33, %v1757_v56 }
  0xa4   :  { %3613 = vst.msk [vmem:[%s6946_s3 + $0x13c] sm:$0xf] %vm3533_vm3, %v3308_v48  ;;  %vm2472_vm1 = vcmp.ge.f32.partialorder %v1945_v53, 0.0  ;;  %v2776_v61 = vmul.f32 0.2, %v1945_v53  ;;  %vm2548_vm2 = vcmp.ge.f32.partialorder %v2135_v54, 0.0 }
  0xa5   :  { %v2852_v62 = vmul.f32 0.2, %v2135_v54  ;;  %vm2321_vm4 = vcmp.ge.f32.partialorder %v1568_v59, 0.0  ;;  %v2625_v63 = vmul.f32 0.2, %v1568_v59  ;;  %vm2397_vm5 = vcmp.ge.f32.partialorder %v1758_v60, 0.0  ;;  %4464 = vmatmul.msk.bf16.gmra.mxu0 %vm1091_vm0, %v4616_v51  ;;  %4502 = vmatmul.msk.bf16.gmra.mxu1 %vm1091_vm0, %v4654_v52 }
  0xa6   :  { %v3080_v0 = vsel %vm2472_vm1, %v1945_v53, %v2776_v61  ;;  %v2701_v1 = vmul.f32 0.2, %v1758_v60  ;;  %4540 = vmatmul.msk.bf16.gmra.mxu2 %vm1091_vm0, %v4692_v57  ;;  %4578 = vmatmul.msk.bf16.gmra.mxu3 %vm1091_vm0, %v4730_v58 }
  0xa7   :  { %v3384_v2 = vpack.c.bf16 %v3080_v0, %v3080_v0  ;;  %v3156_v3 = vsel %vm2548_vm2, %v2135_v54, %v2852_v62  ;;  %v2929_v4 = vsel %vm2321_vm4, %v1568_v59, %v2625_v63 }
  0xa8   :  { %v3460_v5 = vpack.c.bf16 %v3156_v3, %v3156_v3  ;;  %v3233_v6 = vpack.c.bf16 %v2929_v4, %v2929_v4  ;;  %v3005_v7 = vsel %vm2397_vm5, %v1758_v60, %v2701_v1 }
  0xa9   :  { %3689 = vst.msk [vmem:[%s6946_s3 + $0x26c] sm:$0xf] %vm3533_vm3, %v3384_v2  ;;  %v3309_v8 = vpack.c.bf16 %v3005_v7, %v3005_v7  ;;  %v1947_v9 = vpop.f32.mrf.mxu2  ;;  %v2137_v10 = vpop.f32.mrf.mxu3 }
  0xaa   :  { %3765 = vst.msk [vmem:[%s6946_s3 + $0x39c] sm:$0xf] %vm3533_vm3, %v3460_v5  ;;  %v1948_v11 = vadd.f32 %v4921_v33, %v1947_v9  ;;  %v2138_v12 = vadd.f32 %v4921_v33, %v2137_v10  ;;  %v1569_v13 = vpop.f32.mrf.mxu0  ;;  %v1759_v14 = vpop.f32.mrf.mxu1 }
  0xab   :  { %3538 = vst.msk [vmem:[%s6946_s3 + $0x10] sm:$0xf] %vm3533_vm3, %v3233_v6  ;;  %v1570_v15 = vadd.f32 %v4921_v33, %v1569_v13  ;;  %v1760_v16 = vadd.f32 %v4921_v33, %v1759_v14  ;;  %v4656_v13 = vld [vmem:[%s6944_s0 + $0x190] sm:$0xff] }
  0xac   :  { %3614 = vst.msk [vmem:[%s6946_s3 + $0x140] sm:$0xf] %vm3533_vm3, %v3309_v8  ;;  %vm2473_vm6 = vcmp.ge.f32.partialorder %v1948_v11, 0.0  ;;  %v2777_v17 = vmul.f32 0.2, %v1948_v11  ;;  %vm2549_vm7 = vcmp.ge.f32.partialorder %v2138_v12, 0.0 }
  0xad   :  { %v2853_v18 = vmul.f32 0.2, %v2138_v12  ;;  %vm2322_vm8 = vcmp.ge.f32.partialorder %v1570_v15, 0.0  ;;  %v2626_v19 = vmul.f32 0.2, %v1570_v15  ;;  %vm2398_vm9 = vcmp.ge.f32.partialorder %v1760_v16, 0.0 }
  0xae   :  { %v3081_v20 = vsel %vm2473_vm6, %v1948_v11, %v2777_v17  ;;  %v2702_v21 = vmul.f32 0.2, %v1760_v16 }
  0xaf   :  { %v3385_v22 = vpack.c.bf16 %v3081_v20, %v3081_v20  ;;  %v3157_v23 = vsel %vm2549_vm7, %v2138_v12, %v2853_v18  ;;  %v2930_v24 = vsel %vm2322_vm8, %v1570_v15, %v2626_v19  ;;  %v4618_v12 = vld [vmem:[%s6944_s0 + $0x60] sm:$0xff]  ;;  %v4732_v19 = vld [vmem:[%s6944_s0 + $0x3f0] sm:$0xff] }
  0xb0   :  { %v3461_v25 = vpack.c.bf16 %v3157_v23, %v3157_v23  ;;  %v3234_v26 = vpack.c.bf16 %v2930_v24, %v2930_v24  ;;  %v3006_v27 = vsel %vm2398_vm9, %v1760_v16, %v2702_v21  ;;  %v4694_v18 = vld [vmem:[%s6944_s0 + $0x2c0] sm:$0xff] }
  0xb1   :  { %3690 = vst.msk [vmem:[%s6946_s3 + $0x270] sm:$0xf] %vm3533_vm3, %v3385_v22  ;;  %v3310_v28 = vpack.c.bf16 %v3006_v27, %v3006_v27  ;;  %v1949_v29 = vpop.f32.mrf.mxu2  ;;  %v2139_v30 = vpop.f32.mrf.mxu3 }
  0xb2   :  { %3766 = vst.msk [vmem:[%s6946_s3 + $0x3a0] sm:$0xf] %vm3533_vm3, %v3461_v25  ;;  %v1950_v34 = vadd.f32 %v4921_v33, %v1949_v29  ;;  %v2140_v35 = vadd.f32 %v4921_v33, %v2139_v30  ;;  %v1572_v36 = vpop.f32.mrf.mxu0  ;;  %v1762_v37 = vpop.f32.mrf.mxu1 }
  0xb3   :  { %3539 = vst.msk [vmem:[%s6946_s3 + $0x14] sm:$0xf] %vm3533_vm3, %v3234_v26  ;;  %v1573_v40 = vadd.f32 %v4921_v33, %v1572_v36  ;;  %v1763_v41 = vadd.f32 %v4921_v33, %v1762_v37 }
  0xb4   :  { %3615 = vst.msk [vmem:[%s6946_s3 + $0x144] sm:$0xf] %vm3533_vm3, %v3310_v28  ;;  %vm2474_vm10 = vcmp.ge.f32.partialorder %v1950_v34, 0.0  ;;  %v2778_v42 = vmul.f32 0.2, %v1950_v34  ;;  %vm2550_vm11 = vcmp.ge.f32.partialorder %v2140_v35, 0.0 }
  0xb5   :  { %v2854_v43 = vmul.f32 0.2, %v2140_v35  ;;  %vm2323_vm12 = vcmp.ge.f32.partialorder %v1573_v40, 0.0  ;;  %v2627_v44 = vmul.f32 0.2, %v1573_v40  ;;  %vm2399_vm13 = vcmp.ge.f32.partialorder %v1763_v41, 0.0  ;;  %4465 = vmatmul.msk.bf16.gmra.mxu0 %vm1091_vm0, %v4617_v31  ;;  %4503 = vmatmul.msk.bf16.gmra.mxu1 %vm1091_vm0, %v4655_v32 }
  0xb6   :  { %v3082_v45 = vsel %vm2474_vm10, %v1950_v34, %v2778_v42  ;;  %v2703_v46 = vmul.f32 0.2, %v1763_v41  ;;  %4541 = vmatmul.msk.bf16.gmra.mxu2 %vm1091_vm0, %v4693_v38  ;;  %4579 = vmatmul.msk.bf16.gmra.mxu3 %vm1091_vm0, %v4731_v39 }
  0xb7   :  { %v3386_v47 = vpack.c.bf16 %v3082_v45, %v3082_v45  ;;  %v3158_v48 = vsel %vm2550_vm11, %v2140_v35, %v2854_v43  ;;  %v2931_v49 = vsel %vm2323_vm12, %v1573_v40, %v2627_v44 }
  0xb8   :  { %v3462_v50 = vpack.c.bf16 %v3158_v48, %v3158_v48  ;;  %v3235_v51 = vpack.c.bf16 %v2931_v49, %v2931_v49  ;;  %v3007_v52 = vsel %vm2399_vm13, %v1763_v41, %v2703_v46 }
  0xb9   :  { %3691 = vst.msk [vmem:[%s6946_s3 + $0x274] sm:$0xf] %vm3533_vm3, %v3386_v47  ;;  %v3311_v53 = vpack.c.bf16 %v3007_v52, %v3007_v52  ;;  %v1952_v54 = vpop.f32.mrf.mxu2  ;;  %v2142_v55 = vpop.f32.mrf.mxu3 }
  0xba   :  { %3767 = vst.msk [vmem:[%s6946_s3 + $0x3a4] sm:$0xf] %vm3533_vm3, %v3462_v50  ;;  %v1953_v56 = vadd.f32 %v4921_v33, %v1952_v54  ;;  %v2143_v57 = vadd.f32 %v4921_v33, %v2142_v55  ;;  %v1574_v58 = vpop.f32.mrf.mxu0  ;;  %v1764_v59 = vpop.f32.mrf.mxu1 }
  0xbb   :  { %3540 = vst.msk [vmem:[%s6946_s3 + $0x18] sm:$0xf] %vm3533_vm3, %v3235_v51  ;;  %v1575_v60 = vadd.f32 %v4921_v33, %v1574_v58  ;;  %v1765_v61 = vadd.f32 %v4921_v33, %v1764_v59  ;;  %v4657_v58 = vld [vmem:[%s6944_s0 + $0x198] sm:$0xff] }
  0xbc   :  { %3616 = vst.msk [vmem:[%s6946_s3 + $0x148] sm:$0xf] %vm3533_vm3, %v3311_v53  ;;  %vm2475_vm14 = vcmp.ge.f32.partialorder %v1953_v56, 0.0  ;;  %v2779_v62 = vmul.f32 0.2, %v1953_v56  ;;  %vm2551_vm15 = vcmp.ge.f32.partialorder %v2143_v57, 0.0 }
  0xbd   :  { %v2855_v63 = vmul.f32 0.2, %v2143_v57  ;;  %vm2324_vm1 = vcmp.ge.f32.partialorder %v1575_v60, 0.0  ;;  %v2628_v0 = vmul.f32 0.2, %v1575_v60  ;;  %vm2400_vm2 = vcmp.ge.f32.partialorder %v1765_v61, 0.0 }
  0xbe   :  { %v3083_v1 = vsel %vm2475_vm14, %v1953_v56, %v2779_v62  ;;  %v2704_v2 = vmul.f32 0.2, %v1765_v61 }
  0xbf   :  { %v3387_v3 = vpack.c.bf16 %v3083_v1, %v3083_v1  ;;  %v3159_v4 = vsel %vm2551_vm15, %v2143_v57, %v2855_v63  ;;  %v2932_v5 = vsel %vm2324_vm1, %v1575_v60, %v2628_v0  ;;  %v4619_v57 = vld [vmem:[%s6944_s0 + $0x68] sm:$0xff]  ;;  %v4733_v0 = vld [vmem:[%s6944_s0 + $0x3f8] sm:$0xff] }
  0xc0   :  { %v3463_v6 = vpack.c.bf16 %v3159_v4, %v3159_v4  ;;  %v3236_v7 = vpack.c.bf16 %v2932_v5, %v2932_v5  ;;  %v3008_v8 = vsel %vm2400_vm2, %v1765_v61, %v2704_v2  ;;  %v4695_v63 = vld [vmem:[%s6944_s0 + $0x2c8] sm:$0xff] }
  0xc1   :  { %3692 = vst.msk [vmem:[%s6946_s3 + $0x278] sm:$0xf] %vm3533_vm3, %v3387_v3  ;;  %v3312_v9 = vpack.c.bf16 %v3008_v8, %v3008_v8  ;;  %v1954_v10 = vpop.f32.mrf.mxu2  ;;  %v2144_v11 = vpop.f32.mrf.mxu3 }
  0xc2   :  { %3768 = vst.msk [vmem:[%s6946_s3 + $0x3a8] sm:$0xf] %vm3533_vm3, %v3463_v6  ;;  %v1955_v14 = vadd.f32 %v4921_v33, %v1954_v10  ;;  %v2145_v15 = vadd.f32 %v4921_v33, %v2144_v11  ;;  %v1577_v16 = vpop.f32.mrf.mxu0  ;;  %v1767_v17 = vpop.f32.mrf.mxu1 }
  0xc3   :  { %3541 = vst.msk [vmem:[%s6946_s3 + $0x1c] sm:$0xf] %vm3533_vm3, %v3236_v7  ;;  %v1578_v20 = vadd.f32 %v4921_v33, %v1577_v16  ;;  %v1768_v21 = vadd.f32 %v4921_v33, %v1767_v17 }
  0xc4   :  { %3617 = vst.msk [vmem:[%s6946_s3 + $0x14c] sm:$0xf] %vm3533_vm3, %v3312_v9  ;;  %vm2476_vm4 = vcmp.ge.f32.partialorder %v1955_v14, 0.0  ;;  %v2780_v22 = vmul.f32 0.2, %v1955_v14  ;;  %vm2552_vm5 = vcmp.ge.f32.partialorder %v2145_v15, 0.0 }
  0xc5   :  { %v2856_v23 = vmul.f32 0.2, %v2145_v15  ;;  %vm2325_vm6 = vcmp.ge.f32.partialorder %v1578_v20, 0.0  ;;  %v2629_v24 = vmul.f32 0.2, %v1578_v20  ;;  %vm2401_vm7 = vcmp.ge.f32.partialorder %v1768_v21, 0.0  ;;  %4466 = vmatmul.msk.bf16.gmra.mxu0 %vm1091_vm0, %v4618_v12  ;;  %4504 = vmatmul.msk.bf16.gmra.mxu1 %vm1091_vm0, %v4656_v13 }
  0xc6   :  { %v3084_v25 = vsel %vm2476_vm4, %v1955_v14, %v2780_v22  ;;  %v2705_v26 = vmul.f32 0.2, %v1768_v21  ;;  %4542 = vmatmul.msk.bf16.gmra.mxu2 %vm1091_vm0, %v4694_v18  ;;  %4580 = vmatmul.msk.bf16.gmra.mxu3 %vm1091_vm0, %v4732_v19 }
  0xc7   :  { %v3388_v27 = vpack.c.bf16 %v3084_v25, %v3084_v25  ;;  %v3160_v28 = vsel %vm2552_vm5, %v2145_v15, %v2856_v23  ;;  %v2933_v29 = vsel %vm2325_vm6, %v1578_v20, %v2629_v24 }
  0xc8   :  { %v3464_v30 = vpack.c.bf16 %v3160_v28, %v3160_v28  ;;  %v3237_v31 = vpack.c.bf16 %v2933_v29, %v2933_v29  ;;  %v3009_v32 = vsel %vm2401_vm7, %v1768_v21, %v2705_v26 }
  0xc9   :  { %3693 = vst.msk [vmem:[%s6946_s3 + $0x27c] sm:$0xf] %vm3533_vm3, %v3388_v27  ;;  %v3313_v34 = vpack.c.bf16 %v3009_v32, %v3009_v32  ;;  %v1957_v35 = vpop.f32.mrf.mxu2  ;;  %v2147_v36 = vpop.f32.mrf.mxu3 }
  0xca   :  { %3769 = vst.msk [vmem:[%s6946_s3 + $0x3ac] sm:$0xf] %vm3533_vm3, %v3464_v30  ;;  %v1958_v37 = vadd.f32 %v4921_v33, %v1957_v35  ;;  %v2148_v38 = vadd.f32 %v4921_v33, %v2147_v36  ;;  %v1579_v39 = vpop.f32.mrf.mxu0  ;;  %v1769_v40 = vpop.f32.mrf.mxu1 }
  0xcb   :  { %3542 = vst.msk [vmem:[%s6946_s3 + $0x20] sm:$0xf] %vm3533_vm3, %v3237_v31  ;;  %v1580_v41 = vadd.f32 %v4921_v33, %v1579_v39  ;;  %v1770_v42 = vadd.f32 %v4921_v33, %v1769_v40  ;;  %v4658_v39 = vld [vmem:[%s6944_s0 + $0x1a0] sm:$0xff] }
  0xcc   :  { %3618 = vst.msk [vmem:[%s6946_s3 + $0x150] sm:$0xf] %vm3533_vm3, %v3313_v34  ;;  %vm2477_vm8 = vcmp.ge.f32.partialorder %v1958_v37, 0.0  ;;  %v2781_v43 = vmul.f32 0.2, %v1958_v37  ;;  %vm2553_vm9 = vcmp.ge.f32.partialorder %v2148_v38, 0.0 }
  0xcd   :  { %v2857_v44 = vmul.f32 0.2, %v2148_v38  ;;  %vm2326_vm10 = vcmp.ge.f32.partialorder %v1580_v41, 0.0  ;;  %v2630_v45 = vmul.f32 0.2, %v1580_v41  ;;  %vm2402_vm11 = vcmp.ge.f32.partialorder %v1770_v42, 0.0 }
  0xce   :  { %v3085_v46 = vsel %vm2477_vm8, %v1958_v37, %v2781_v43  ;;  %v2706_v47 = vmul.f32 0.2, %v1770_v42 }
  0xcf   :  { %v3389_v48 = vpack.c.bf16 %v3085_v46, %v3085_v46  ;;  %v3161_v49 = vsel %vm2553_vm9, %v2148_v38, %v2857_v44  ;;  %v2934_v50 = vsel %vm2326_vm10, %v1580_v41, %v2630_v45  ;;  %v4620_v38 = vld [vmem:[%s6944_s0 + $0x70] sm:$0xff]  ;;  %v4734_v45 = vld [vmem:[%s6944_s0 + $0x400] sm:$0xff] }
  0xd0   :  { %v3465_v51 = vpack.c.bf16 %v3161_v49, %v3161_v49  ;;  %v3238_v52 = vpack.c.bf16 %v2934_v50, %v2934_v50  ;;  %v3010_v53 = vsel %vm2402_vm11, %v1770_v42, %v2706_v47  ;;  %v4696_v44 = vld [vmem:[%s6944_s0 + $0x2d0] sm:$0xff] }
  0xd1   :  { %3694 = vst.msk [vmem:[%s6946_s3 + $0x280] sm:$0xf] %vm3533_vm3, %v3389_v48  ;;  %v3314_v54 = vpack.c.bf16 %v3010_v53, %v3010_v53  ;;  %v1959_v55 = vpop.f32.mrf.mxu2  ;;  %v2149_v56 = vpop.f32.mrf.mxu3 }
  0xd2   :  { %3770 = vst.msk [vmem:[%s6946_s3 + $0x3b0] sm:$0xf] %vm3533_vm3, %v3465_v51  ;;  %v1960_v59 = vadd.f32 %v4921_v33, %v1959_v55  ;;  %v2150_v60 = vadd.f32 %v4921_v33, %v2149_v56  ;;  %v1582_v61 = vpop.f32.mrf.mxu0  ;;  %v1772_v62 = vpop.f32.mrf.mxu1 }
  0xd3   :  { %3543 = vst.msk [vmem:[%s6946_s3 + $0x24] sm:$0xf] %vm3533_vm3, %v3238_v52  ;;  %v1583_v1 = vadd.f32 %v4921_v33, %v1582_v61  ;;  %v1773_v2 = vadd.f32 %v4921_v33, %v1772_v62 }
  0xd4   :  { %3619 = vst.msk [vmem:[%s6946_s3 + $0x154] sm:$0xf] %vm3533_vm3, %v3314_v54  ;;  %vm2478_vm12 = vcmp.ge.f32.partialorder %v1960_v59, 0.0  ;;  %v2782_v3 = vmul.f32 0.2, %v1960_v59  ;;  %vm2554_vm13 = vcmp.ge.f32.partialorder %v2150_v60, 0.0 }
  0xd5   :  { %v2858_v4 = vmul.f32 0.2, %v2150_v60  ;;  %vm2327_vm14 = vcmp.ge.f32.partialorder %v1583_v1, 0.0  ;;  %v2631_v5 = vmul.f32 0.2, %v1583_v1  ;;  %vm2403_vm15 = vcmp.ge.f32.partialorder %v1773_v2, 0.0  ;;  %4467 = vmatmul.msk.bf16.gmra.mxu0 %vm1091_vm0, %v4619_v57  ;;  %4505 = vmatmul.msk.bf16.gmra.mxu1 %vm1091_vm0, %v4657_v58 }
  0xd6   :  { %v3086_v6 = vsel %vm2478_vm12, %v1960_v59, %v2782_v3  ;;  %v2707_v7 = vmul.f32 0.2, %v1773_v2  ;;  %4543 = vmatmul.msk.bf16.gmra.mxu2 %vm1091_vm0, %v4695_v63  ;;  %4581 = vmatmul.msk.bf16.gmra.mxu3 %vm1091_vm0, %v4733_v0 }
  0xd7   :  { %v3390_v8 = vpack.c.bf16 %v3086_v6, %v3086_v6  ;;  %v3162_v9 = vsel %vm2554_vm13, %v2150_v60, %v2858_v4  ;;  %v2935_v10 = vsel %vm2327_vm14, %v1583_v1, %v2631_v5 }
  0xd8   :  { %v3466_v11 = vpack.c.bf16 %v3162_v9, %v3162_v9  ;;  %v3239_v12 = vpack.c.bf16 %v2935_v10, %v2935_v10  ;;  %v3011_v13 = vsel %vm2403_vm15, %v1773_v2, %v2707_v7 }
  0xd9   :  { %3695 = vst.msk [vmem:[%s6946_s3 + $0x284] sm:$0xf] %vm3533_vm3, %v3390_v8  ;;  %v3315_v14 = vpack.c.bf16 %v3011_v13, %v3011_v13  ;;  %v1962_v15 = vpop.f32.mrf.mxu2  ;;  %v2152_v16 = vpop.f32.mrf.mxu3 }
  0xda   :  { %3771 = vst.msk [vmem:[%s6946_s3 + $0x3b4] sm:$0xf] %vm3533_vm3, %v3466_v11  ;;  %v1963_v17 = vadd.f32 %v4921_v33, %v1962_v15  ;;  %v2153_v18 = vadd.f32 %v4921_v33, %v2152_v16  ;;  %v1584_v19 = vpop.f32.mrf.mxu0  ;;  %v1774_v20 = vpop.f32.mrf.mxu1 }
  0xdb   :  { %3544 = vst.msk [vmem:[%s6946_s3 + $0x28] sm:$0xf] %vm3533_vm3, %v3239_v12  ;;  %v1585_v21 = vadd.f32 %v4921_v33, %v1584_v19  ;;  %v1775_v22 = vadd.f32 %v4921_v33, %v1774_v20  ;;  %v4659_v19 = vld [vmem:[%s6944_s0 + $0x1a8] sm:$0xff] }
  0xdc   :  { %3620 = vst.msk [vmem:[%s6946_s3 + $0x158] sm:$0xf] %vm3533_vm3, %v3315_v14  ;;  %vm2479_vm1 = vcmp.ge.f32.partialorder %v1963_v17, 0.0  ;;  %v2783_v23 = vmul.f32 0.2, %v1963_v17  ;;  %vm2555_vm2 = vcmp.ge.f32.partialorder %v2153_v18, 0.0 }
  0xdd   :  { %v2859_v24 = vmul.f32 0.2, %v2153_v18  ;;  %vm2328_vm4 = vcmp.ge.f32.partialorder %v1585_v21, 0.0  ;;  %v2632_v25 = vmul.f32 0.2, %v1585_v21  ;;  %vm2404_vm5 = vcmp.ge.f32.partialorder %v1775_v22, 0.0 }
  0xde   :  { %v3087_v26 = vsel %vm2479_vm1, %v1963_v17, %v2783_v23  ;;  %v2708_v27 = vmul.f32 0.2, %v1775_v22 }
  0xdf   :  { %v3391_v28 = vpack.c.bf16 %v3087_v26, %v3087_v26  ;;  %v3163_v29 = vsel %vm2555_vm2, %v2153_v18, %v2859_v24  ;;  %v2936_v30 = vsel %vm2328_vm4, %v1585_v21, %v2632_v25  ;;  %v4621_v18 = vld [vmem:[%s6944_s0 + $0x78] sm:$0xff]  ;;  %v4735_v25 = vld [vmem:[%s6944_s0 + $0x408] sm:$0xff] }
  0xe0   :  { %v3467_v31 = vpack.c.bf16 %v3163_v29, %v3163_v29  ;;  %v3240_v32 = vpack.c.bf16 %v2936_v30, %v2936_v30  ;;  %v3012_v34 = vsel %vm2404_vm5, %v1775_v22, %v2708_v27  ;;  %v4697_v24 = vld [vmem:[%s6944_s0 + $0x2d8] sm:$0xff] }
  0xe1   :  { %3696 = vst.msk [vmem:[%s6946_s3 + $0x288] sm:$0xf] %vm3533_vm3, %v3391_v28  ;;  %v3316_v35 = vpack.c.bf16 %v3012_v34, %v3012_v34  ;;  %v1964_v36 = vpop.f32.mrf.mxu2  ;;  %v2154_v37 = vpop.f32.mrf.mxu3 }
  0xe2   :  { %3772 = vst.msk [vmem:[%s6946_s3 + $0x3b8] sm:$0xf] %vm3533_vm3, %v3467_v31  ;;  %v1965_v40 = vadd.f32 %v4921_v33, %v1964_v36  ;;  %v2155_v41 = vadd.f32 %v4921_v33, %v2154_v37  ;;  %v1587_v42 = vpop.f32.mrf.mxu0  ;;  %v1777_v43 = vpop.f32.mrf.mxu1 }
  0xe3   :  { %3545 = vst.msk [vmem:[%s6946_s3 + $0x2c] sm:$0xf] %vm3533_vm3, %v3240_v32  ;;  %v1588_v46 = vadd.f32 %v4921_v33, %v1587_v42  ;;  %v1778_v47 = vadd.f32 %v4921_v33, %v1777_v43 }
  0xe4   :  { %3621 = vst.msk [vmem:[%s6946_s3 + $0x15c] sm:$0xf] %vm3533_vm3, %v3316_v35  ;;  %vm2480_vm6 = vcmp.ge.f32.partialorder %v1965_v40, 0.0  ;;  %v2784_v48 = vmul.f32 0.2, %v1965_v40  ;;  %vm2556_vm7 = vcmp.ge.f32.partialorder %v2155_v41, 0.0 }
  0xe5   :  { %v2860_v49 = vmul.f32 0.2, %v2155_v41  ;;  %vm2329_vm8 = vcmp.ge.f32.partialorder %v1588_v46, 0.0  ;;  %v2633_v50 = vmul.f32 0.2, %v1588_v46  ;;  %vm2405_vm9 = vcmp.ge.f32.partialorder %v1778_v47, 0.0  ;;  %4468 = vmatmul.msk.bf16.gmra.mxu0 %vm1091_vm0, %v4620_v38  ;;  %4506 = vmatmul.msk.bf16.gmra.mxu1 %vm1091_vm0, %v4658_v39 }
  0xe6   :  { %v3088_v51 = vsel %vm2480_vm6, %v1965_v40, %v2784_v48  ;;  %v2709_v52 = vmul.f32 0.2, %v1778_v47  ;;  %4544 = vmatmul.msk.bf16.gmra.mxu2 %vm1091_vm0, %v4696_v44  ;;  %4582 = vmatmul.msk.bf16.gmra.mxu3 %vm1091_vm0, %v4734_v45 }
  0xe7   :  { %v3392_v53 = vpack.c.bf16 %v3088_v51, %v3088_v51  ;;  %v3164_v54 = vsel %vm2556_vm7, %v2155_v41, %v2860_v49  ;;  %v2937_v55 = vsel %vm2329_vm8, %v1588_v46, %v2633_v50 }
  0xe8   :  { %v3468_v56 = vpack.c.bf16 %v3164_v54, %v3164_v54  ;;  %v3241_v57 = vpack.c.bf16 %v2937_v55, %v2937_v55  ;;  %v3013_v58 = vsel %vm2405_vm9, %v1778_v47, %v2709_v52 }
  0xe9   :  { %3697 = vst.msk [vmem:[%s6946_s3 + $0x28c] sm:$0xf] %vm3533_vm3, %v3392_v53  ;;  %v3317_v59 = vpack.c.bf16 %v3013_v58, %v3013_v58  ;;  %v1967_v60 = vpop.f32.mrf.mxu2  ;;  %v2157_v61 = vpop.f32.mrf.mxu3 }
  0xea   :  { %3773 = vst.msk [vmem:[%s6946_s3 + $0x3bc] sm:$0xf] %vm3533_vm3, %v3468_v56  ;;  %v1968_v62 = vadd.f32 %v4921_v33, %v1967_v60  ;;  %v2158_v63 = vadd.f32 %v4921_v33, %v2157_v61  ;;  %v1589_v0 = vpop.f32.mrf.mxu0  ;;  %v1779_v1 = vpop.f32.mrf.mxu1 }
  0xeb   :  { %3546 = vst.msk [vmem:[%s6946_s3 + $0x30] sm:$0xf] %vm3533_vm3, %v3241_v57  ;;  %v1590_v2 = vadd.f32 %v4921_v33, %v1589_v0  ;;  %v1780_v3 = vadd.f32 %v4921_v33, %v1779_v1  ;;  %v4660_v0 = vld [vmem:[%s6944_s0 + $0x1b0] sm:$0xff] }
  0xec   :  { %3622 = vst.msk [vmem:[%s6946_s3 + $0x160] sm:$0xf] %vm3533_vm3, %v3317_v59  ;;  %vm2481_vm10 = vcmp.ge.f32.partialorder %v1968_v62, 0.0  ;;  %v2785_v4 = vmul.f32 0.2, %v1968_v62  ;;  %vm2557_vm11 = vcmp.ge.f32.partialorder %v2158_v63, 0.0 }
  0xed   :  { %v2861_v5 = vmul.f32 0.2, %v2158_v63  ;;  %vm2330_vm12 = vcmp.ge.f32.partialorder %v1590_v2, 0.0  ;;  %v2634_v6 = vmul.f32 0.2, %v1590_v2  ;;  %vm2406_vm13 = vcmp.ge.f32.partialorder %v1780_v3, 0.0 }
  0xee   :  { %v3089_v7 = vsel %vm2481_vm10, %v1968_v62, %v2785_v4  ;;  %v2710_v8 = vmul.f32 0.2, %v1780_v3 }
  0xef   :  { %v3393_v9 = vpack.c.bf16 %v3089_v7, %v3089_v7  ;;  %v3165_v10 = vsel %vm2557_vm11, %v2158_v63, %v2861_v5  ;;  %v2938_v11 = vsel %vm2330_vm12, %v1590_v2, %v2634_v6  ;;  %v4622_v63 = vld [vmem:[%s6944_s0 + $0x80] sm:$0xff]  ;;  %v4736_v6 = vld [vmem:[%s6944_s0 + $0x410] sm:$0xff] }
  0xf0   :  { %v3469_v12 = vpack.c.bf16 %v3165_v10, %v3165_v10  ;;  %v3242_v13 = vpack.c.bf16 %v2938_v11, %v2938_v11  ;;  %v3014_v14 = vsel %vm2406_vm13, %v1780_v3, %v2710_v8  ;;  %v4698_v5 = vld [vmem:[%s6944_s0 + $0x2e0] sm:$0xff] }
  0xf1   :  { %3698 = vst.msk [vmem:[%s6946_s3 + $0x290] sm:$0xf] %vm3533_vm3, %v3393_v9  ;;  %v3318_v15 = vpack.c.bf16 %v3014_v14, %v3014_v14  ;;  %v1969_v16 = vpop.f32.mrf.mxu2  ;;  %v2159_v17 = vpop.f32.mrf.mxu3 }
  0xf2   :  { %3774 = vst.msk [vmem:[%s6946_s3 + $0x3c0] sm:$0xf] %vm3533_vm3, %v3469_v12  ;;  %v1970_v20 = vadd.f32 %v4921_v33, %v1969_v16  ;;  %v2160_v21 = vadd.f32 %v4921_v33, %v2159_v17  ;;  %v1592_v22 = vpop.f32.mrf.mxu0  ;;  %v1782_v23 = vpop.f32.mrf.mxu1 }
  0xf3   :  { %3547 = vst.msk [vmem:[%s6946_s3 + $0x34] sm:$0xf] %vm3533_vm3, %v3242_v13  ;;  %v1593_v26 = vadd.f32 %v4921_v33, %v1592_v22  ;;  %v1783_v27 = vadd.f32 %v4921_v33, %v1782_v23  ;;  %v5392_v22 = vld [vmem:[%s6945_s2] ss:$0 sm:$0xff] }
  0xf4   :  { %3623 = vst.msk [vmem:[%s6946_s3 + $0x164] sm:$0xf] %vm3533_vm3, %v3318_v15  ;;  %vm2482_vm14 = vcmp.ge.f32.partialorder %v1970_v20, 0.0  ;;  %v2786_v28 = vmul.f32 0.2, %v1970_v20  ;;  %vm2558_vm15 = vcmp.ge.f32.partialorder %v2160_v21, 0.0 }
  0xf5   :  { %v2862_v29 = vmul.f32 0.2, %v2160_v21  ;;  %vm2331_vm1 = vcmp.ge.f32.partialorder %v1593_v26, 0.0  ;;  %v2635_v30 = vmul.f32 0.2, %v1593_v26  ;;  %vm2407_vm2 = vcmp.ge.f32.partialorder %v1783_v27, 0.0  ;;  %4469 = vmatmul.msk.bf16.gmra.mxu0 %vm1091_vm0, %v4621_v18  ;;  %4507 = vmatmul.msk.bf16.gmra.mxu1 %vm1091_vm0, %v4659_v19 }
  0xf6   :  { %v3090_v31 = vsel %vm2482_vm14, %v1970_v20, %v2786_v28  ;;  %v2711_v32 = vmul.f32 0.2, %v1783_v27  ;;  %4545 = vmatmul.msk.bf16.gmra.mxu2 %vm1091_vm0, %v4697_v24  ;;  %4583 = vmatmul.msk.bf16.gmra.mxu3 %vm1091_vm0, %v4735_v25 }
  0xf7   :  { %v3394_v34 = vpack.c.bf16 %v3090_v31, %v3090_v31  ;;  %v3166_v35 = vsel %vm2558_vm15, %v2160_v21, %v2862_v29  ;;  %v2939_v36 = vsel %vm2331_vm1, %v1593_v26, %v2635_v30 }
  0xf8   :  { %v3470_v37 = vpack.c.bf16 %v3166_v35, %v3166_v35  ;;  %v3243_v38 = vpack.c.bf16 %v2939_v36, %v2939_v36  ;;  %v3015_v39 = vsel %vm2407_vm2, %v1783_v27, %v2711_v32 }
  0xf9   :  { %3699 = vst.msk [vmem:[%s6946_s3 + $0x294] sm:$0xf] %vm3533_vm3, %v3394_v34  ;;  %v3319_v40 = vpack.c.bf16 %v3015_v39, %v3015_v39  ;;  %v1972_v41 = vpop.f32.mrf.mxu2  ;;  %v2162_v42 = vpop.f32.mrf.mxu3 }
  0xfa   :  { %3775 = vst.msk [vmem:[%s6946_s3 + $0x3c4] sm:$0xf] %vm3533_vm3, %v3470_v37  ;;  %v1973_v43 = vadd.f32 %v4921_v33, %v1972_v41  ;;  %v2163_v44 = vadd.f32 %v4921_v33, %v2162_v42  ;;  %v1594_v45 = vpop.f32.mrf.mxu0  ;;  %v1784_v46 = vpop.f32.mrf.mxu1 }
  0xfb   :  { %3548 = vst.msk [vmem:[%s6946_s3 + $0x38] sm:$0xf] %vm3533_vm3, %v3243_v38  ;;  %v1595_v47 = vadd.f32 %v4921_v33, %v1594_v45  ;;  %v1785_v48 = vadd.f32 %v4921_v33, %v1784_v46  ;;  %v4661_v45 = vld [vmem:[%s6944_s0 + $0x1b8] sm:$0xff] }
  0xfc   :  { %3624 = vst.msk [vmem:[%s6946_s3 + $0x168] sm:$0xf] %vm3533_vm3, %v3319_v40  ;;  %vm2483_vm4 = vcmp.ge.f32.partialorder %v1973_v43, 0.0  ;;  %v2787_v49 = vmul.f32 0.2, %v1973_v43  ;;  %vm2559_vm5 = vcmp.ge.f32.partialorder %v2163_v44, 0.0 }
  0xfd   :  { %v2863_v50 = vmul.f32 0.2, %v2163_v44  ;;  %vm2332_vm6 = vcmp.ge.f32.partialorder %v1595_v47, 0.0  ;;  %v2636_v51 = vmul.f32 0.2, %v1595_v47  ;;  %vm2408_vm7 = vcmp.ge.f32.partialorder %v1785_v48, 0.0 }
  0xfe   :  { %v3091_v52 = vsel %vm2483_vm4, %v1973_v43, %v2787_v49  ;;  %v2712_v53 = vmul.f32 0.2, %v1785_v48 }
  0xff   :  { %v3395_v54 = vpack.c.bf16 %v3091_v52, %v3091_v52  ;;  %v3167_v55 = vsel %vm2559_vm5, %v2163_v44, %v2863_v50  ;;  %v2940_v56 = vsel %vm2332_vm6, %v1595_v47, %v2636_v51  ;;  %v4623_v44 = vld [vmem:[%s6944_s0 + $0x88] sm:$0xff]  ;;  %v4737_v51 = vld [vmem:[%s6944_s0 + $0x418] sm:$0xff] }
 0x100   :  { %v3471_v57 = vpack.c.bf16 %v3167_v55, %v3167_v55  ;;  %v3244_v58 = vpack.c.bf16 %v2940_v56, %v2940_v56  ;;  %v3016_v59 = vsel %vm2408_vm7, %v1785_v48, %v2712_v53  ;;  %v4699_v50 = vld [vmem:[%s6944_s0 + $0x2e8] sm:$0xff] }
 0x101   :  { %3700 = vst.msk [vmem:[%s6946_s3 + $0x298] sm:$0xf] %vm3533_vm3, %v3395_v54  ;;  %v3320_v60 = vpack.c.bf16 %v3016_v59, %v3016_v59  ;;  %v1974_v61 = vpop.f32.mrf.mxu2  ;;  %v2164_v62 = vpop.f32.mrf.mxu3 }
 0x102   :  { %3776 = vst.msk [vmem:[%s6946_s3 + $0x3c8] sm:$0xf] %vm3533_vm3, %v3471_v57  ;;  %v1975_v1 = vadd.f32 %v4921_v33, %v1974_v61  ;;  %v2165_v2 = vadd.f32 %v4921_v33, %v2164_v62  ;;  %v1597_v3 = vpop.f32.mrf.mxu0  ;;  %v1787_v4 = vpop.f32.mrf.mxu1 }
 0x103   :  { %3549 = vst.msk [vmem:[%s6946_s3 + $0x3c] sm:$0xf] %vm3533_vm3, %v3244_v58  ;;  %v1598_v7 = vadd.f32 %v4921_v33, %v1597_v3  ;;  %v1788_v8 = vadd.f32 %v4921_v33, %v1787_v4 }
 0x104   :  { %3625 = vst.msk [vmem:[%s6946_s3 + $0x16c] sm:$0xf] %vm3533_vm3, %v3320_v60  ;;  %vm2484_vm8 = vcmp.ge.f32.partialorder %v1975_v1, 0.0  ;;  %v2788_v9 = vmul.f32 0.2, %v1975_v1  ;;  %vm2560_vm9 = vcmp.ge.f32.partialorder %v2165_v2, 0.0 }
 0x105   :  { %v2864_v10 = vmul.f32 0.2, %v2165_v2  ;;  %vm2333_vm10 = vcmp.ge.f32.partialorder %v1598_v7, 0.0  ;;  %v2637_v11 = vmul.f32 0.2, %v1598_v7  ;;  %vm2409_vm11 = vcmp.ge.f32.partialorder %v1788_v8, 0.0  ;;  %4470 = vmatmul.msk.bf16.gmra.mxu0 %vm1091_vm0, %v4622_v63  ;;  %4508 = vmatmul.msk.bf16.gmra.mxu1 %vm1091_vm0, %v4660_v0 }
 0x106   :  { %v3092_v12 = vsel %vm2484_vm8, %v1975_v1, %v2788_v9  ;;  %v2713_v13 = vmul.f32 0.2, %v1788_v8  ;;  %4546 = vmatmul.msk.bf16.gmra.mxu2 %vm1091_vm0, %v4698_v5  ;;  %4584 = vmatmul.msk.bf16.gmra.mxu3 %vm1091_vm0, %v4736_v6 }
 0x107   :  { %v3396_v33 = vpack.c.bf16 %v3092_v12, %v3092_v12  ;;  %v3168_v14 = vsel %vm2560_vm9, %v2165_v2, %v2864_v10  ;;  %v2941_v15 = vsel %vm2333_vm10, %v1598_v7, %v2637_v11 }
 0x108   :  { %v3472_v16 = vpack.c.bf16 %v3168_v14, %v3168_v14  ;;  %v3245_v17 = vpack.c.bf16 %v2941_v15, %v2941_v15  ;;  %v3017_v18 = vsel %vm2409_vm11, %v1788_v8, %v2713_v13 }
 0x109   :  { %3701 = vst.msk [vmem:[%s6946_s3 + $0x29c] sm:$0xf] %vm3533_vm3, %v3396_v33  ;;  %v3321_v19 = vpack.c.bf16 %v3017_v18, %v3017_v18  ;;  %v1977_v20 = vpop.f32.mrf.mxu2  ;;  %v2167_v21 = vpop.f32.mrf.mxu3 }
 0x10a   :  { %3777 = vst.msk [vmem:[%s6946_s3 + $0x3cc] sm:$0xf] %vm3533_vm3, %v3472_v16  ;;  %v1978_v23 = vadd.f32 %v5392_v22, %v1977_v20  ;;  %v2168_v24 = vadd.f32 %v5392_v22, %v2167_v21  ;;  %v1599_v25 = vpop.f32.mrf.mxu0  ;;  %v1789_v26 = vpop.f32.mrf.mxu1 }
 0x10b   :  { %3550 = vst.msk [vmem:[%s6946_s3 + $0x40] sm:$0xf] %vm3533_vm3, %v3245_v17  ;;  %v1600_v27 = vadd.f32 %v5392_v22, %v1599_v25  ;;  %v1790_v28 = vadd.f32 %v5392_v22, %v1789_v26  ;;  %v4662_v25 = vld [vmem:[%s6944_s0 + $0x1c0] sm:$0xff] }
 0x10c   :  { %3626 = vst.msk [vmem:[%s6946_s3 + $0x170] sm:$0xf] %vm3533_vm3, %v3321_v19  ;;  %vm2485_vm12 = vcmp.ge.f32.partialorder %v1978_v23, 0.0  ;;  %v2789_v29 = vmul.f32 0.2, %v1978_v23  ;;  %vm2561_vm13 = vcmp.ge.f32.partialorder %v2168_v24, 0.0 }
 0x10d   :  { %v2865_v30 = vmul.f32 0.2, %v2168_v24  ;;  %vm2334_vm14 = vcmp.ge.f32.partialorder %v1600_v27, 0.0  ;;  %v2638_v31 = vmul.f32 0.2, %v1600_v27  ;;  %vm2410_vm15 = vcmp.ge.f32.partialorder %v1790_v28, 0.0 }
 0x10e   :  { %v3093_v32 = vsel %vm2485_vm12, %v1978_v23, %v2789_v29  ;;  %v2714_v34 = vmul.f32 0.2, %v1790_v28 }
 0x10f   :  { %v3397_v35 = vpack.c.bf16 %v3093_v32, %v3093_v32  ;;  %v3169_v36 = vsel %vm2561_vm13, %v2168_v24, %v2865_v30  ;;  %v2942_v37 = vsel %vm2334_vm14, %v1600_v27, %v2638_v31  ;;  %v4624_v24 = vld [vmem:[%s6944_s0 + $0x90] sm:$0xff]  ;;  %v4738_v31 = vld [vmem:[%s6944_s0 + $0x420] sm:$0xff] }
 0x110   :  { %v3473_v38 = vpack.c.bf16 %v3169_v36, %v3169_v36  ;;  %v3246_v39 = vpack.c.bf16 %v2942_v37, %v2942_v37  ;;  %v3018_v40 = vsel %vm2410_vm15, %v1790_v28, %v2714_v34  ;;  %v4700_v30 = vld [vmem:[%s6944_s0 + $0x2f0] sm:$0xff] }
 0x111   :  { %3702 = vst.msk [vmem:[%s6946_s3 + $0x2a0] sm:$0xf] %vm3533_vm3, %v3397_v35  ;;  %v3322_v41 = vpack.c.bf16 %v3018_v40, %v3018_v40  ;;  %v1979_v42 = vpop.f32.mrf.mxu2  ;;  %v2169_v43 = vpop.f32.mrf.mxu3 }
 0x112   :  { %3778 = vst.msk [vmem:[%s6946_s3 + $0x3d0] sm:$0xf] %vm3533_vm3, %v3473_v38  ;;  %v1980_v46 = vadd.f32 %v5392_v22, %v1979_v42  ;;  %v2170_v47 = vadd.f32 %v5392_v22, %v2169_v43  ;;  %v1602_v48 = vpop.f32.mrf.mxu0  ;;  %v1792_v49 = vpop.f32.mrf.mxu1 }
 0x113   :  { %3551 = vst.msk [vmem:[%s6946_s3 + $0x44] sm:$0xf] %vm3533_vm3, %v3246_v39  ;;  %v1603_v52 = vadd.f32 %v5392_v22, %v1602_v48  ;;  %v1793_v53 = vadd.f32 %v5392_v22, %v1792_v49 }
 0x114   :  { %3627 = vst.msk [vmem:[%s6946_s3 + $0x174] sm:$0xf] %vm3533_vm3, %v3322_v41  ;;  %vm2486_vm1 = vcmp.ge.f32.partialorder %v1980_v46, 0.0  ;;  %v2790_v54 = vmul.f32 0.2, %v1980_v46  ;;  %vm2562_vm2 = vcmp.ge.f32.partialorder %v2170_v47, 0.0 }
 0x115   :  { %v2866_v55 = vmul.f32 0.2, %v2170_v47  ;;  %vm2335_vm4 = vcmp.ge.f32.partialorder %v1603_v52, 0.0  ;;  %v2639_v56 = vmul.f32 0.2, %v1603_v52  ;;  %vm2411_vm5 = vcmp.ge.f32.partialorder %v1793_v53, 0.0  ;;  %4471 = vmatmul.msk.bf16.gmra.mxu0 %vm1091_vm0, %v4623_v44  ;;  %4509 = vmatmul.msk.bf16.gmra.mxu1 %vm1091_vm0, %v4661_v45 }
 0x116   :  { %v3094_v57 = vsel %vm2486_vm1, %v1980_v46, %v2790_v54  ;;  %v2715_v58 = vmul.f32 0.2, %v1793_v53  ;;  %4547 = vmatmul.msk.bf16.gmra.mxu2 %vm1091_vm0, %v4699_v50  ;;  %4585 = vmatmul.msk.bf16.gmra.mxu3 %vm1091_vm0, %v4737_v51 }
 0x117   :  { %v3398_v59 = vpack.c.bf16 %v3094_v57, %v3094_v57  ;;  %v3170_v60 = vsel %vm2562_vm2, %v2170_v47, %v2866_v55  ;;  %v2943_v61 = vsel %vm2335_vm4, %v1603_v52, %v2639_v56 }
 0x118   :  { %v3474_v62 = vpack.c.bf16 %v3170_v60, %v3170_v60  ;;  %v3247_v63 = vpack.c.bf16 %v2943_v61, %v2943_v61  ;;  %v3019_v0 = vsel %vm2411_vm5, %v1793_v53, %v2715_v58 }
 0x119   :  { %3703 = vst.msk [vmem:[%s6946_s3 + $0x2a4] sm:$0xf] %vm3533_vm3, %v3398_v59  ;;  %v3323_v1 = vpack.c.bf16 %v3019_v0, %v3019_v0  ;;  %v1982_v2 = vpop.f32.mrf.mxu2  ;;  %v2172_v3 = vpop.f32.mrf.mxu3 }
 0x11a   :  { %3779 = vst.msk [vmem:[%s6946_s3 + $0x3d4] sm:$0xf] %vm3533_vm3, %v3474_v62  ;;  %v1983_v4 = vadd.f32 %v5392_v22, %v1982_v2  ;;  %v2173_v5 = vadd.f32 %v5392_v22, %v2172_v3  ;;  %v1604_v6 = vpop.f32.mrf.mxu0  ;;  %v1794_v7 = vpop.f32.mrf.mxu1 }
 0x11b   :  { %3552 = vst.msk [vmem:[%s6946_s3 + $0x48] sm:$0xf] %vm3533_vm3, %v3247_v63  ;;  %v1605_v8 = vadd.f32 %v5392_v22, %v1604_v6  ;;  %v1795_v9 = vadd.f32 %v5392_v22, %v1794_v7  ;;  %v4663_v6 = vld [vmem:[%s6944_s0 + $0x1c8] sm:$0xff] }
 0x11c   :  { %3628 = vst.msk [vmem:[%s6946_s3 + $0x178] sm:$0xf] %vm3533_vm3, %v3323_v1  ;;  %vm2487_vm6 = vcmp.ge.f32.partialorder %v1983_v4, 0.0  ;;  %v2791_v10 = vmul.f32 0.2, %v1983_v4  ;;  %vm2563_vm7 = vcmp.ge.f32.partialorder %v2173_v5, 0.0 }
 0x11d   :  { %v2867_v11 = vmul.f32 0.2, %v2173_v5  ;;  %vm2336_vm8 = vcmp.ge.f32.partialorder %v1605_v8, 0.0  ;;  %v2640_v12 = vmul.f32 0.2, %v1605_v8  ;;  %vm2412_vm9 = vcmp.ge.f32.partialorder %v1795_v9, 0.0 }
 0x11e   :  { %v3095_v13 = vsel %vm2487_vm6, %v1983_v4, %v2791_v10  ;;  %v2716_v33 = vmul.f32 0.2, %v1795_v9 }
 0x11f   :  { %v3399_v14 = vpack.c.bf16 %v3095_v13, %v3095_v13  ;;  %v3171_v15 = vsel %vm2563_vm7, %v2173_v5, %v2867_v11  ;;  %v2944_v16 = vsel %vm2336_vm8, %v1605_v8, %v2640_v12  ;;  %v4625_v5 = vld [vmem:[%s6944_s0 + $0x98] sm:$0xff]  ;;  %v4739_v12 = vld [vmem:[%s6944_s0 + $0x428] sm:$0xff] }
 0x120   :  { %v3475_v17 = vpack.c.bf16 %v3171_v15, %v3171_v15  ;;  %v3248_v18 = vpack.c.bf16 %v2944_v16, %v2944_v16  ;;  %v3020_v19 = vsel %vm2412_vm9, %v1795_v9, %v2716_v33  ;;  %v4701_v11 = vld [vmem:[%s6944_s0 + $0x2f8] sm:$0xff] }
 0x121   :  { %3704 = vst.msk [vmem:[%s6946_s3 + $0x2a8] sm:$0xf] %vm3533_vm3, %v3399_v14  ;;  %v3324_v20 = vpack.c.bf16 %v3020_v19, %v3020_v19  ;;  %v1984_v21 = vpop.f32.mrf.mxu2  ;;  %v2174_v23 = vpop.f32.mrf.mxu3 }
 0x122   :  { %3780 = vst.msk [vmem:[%s6946_s3 + $0x3d8] sm:$0xf] %vm3533_vm3, %v3475_v17  ;;  %v1985_v26 = vadd.f32 %v5392_v22, %v1984_v21  ;;  %v2175_v27 = vadd.f32 %v5392_v22, %v2174_v23  ;;  %v1607_v28 = vpop.f32.mrf.mxu0  ;;  %v1797_v29 = vpop.f32.mrf.mxu1 }
 0x123   :  { %3553 = vst.msk [vmem:[%s6946_s3 + $0x4c] sm:$0xf] %vm3533_vm3, %v3248_v18  ;;  %v1608_v32 = vadd.f32 %v5392_v22, %v1607_v28  ;;  %v1798_v34 = vadd.f32 %v5392_v22, %v1797_v29 }
 0x124   :  { %3629 = vst.msk [vmem:[%s6946_s3 + $0x17c] sm:$0xf] %vm3533_vm3, %v3324_v20  ;;  %vm2488_vm10 = vcmp.ge.f32.partialorder %v1985_v26, 0.0  ;;  %v2792_v35 = vmul.f32 0.2, %v1985_v26  ;;  %vm2564_vm11 = vcmp.ge.f32.partialorder %v2175_v27, 0.0 }
 0x125   :  { %v2868_v36 = vmul.f32 0.2, %v2175_v27  ;;  %vm2337_vm12 = vcmp.ge.f32.partialorder %v1608_v32, 0.0  ;;  %v2641_v37 = vmul.f32 0.2, %v1608_v32  ;;  %vm2413_vm13 = vcmp.ge.f32.partialorder %v1798_v34, 0.0  ;;  %4472 = vmatmul.msk.bf16.gmra.mxu0 %vm1091_vm0, %v4624_v24  ;;  %4510 = vmatmul.msk.bf16.gmra.mxu1 %vm1091_vm0, %v4662_v25 }
 0x126   :  { %v3096_v38 = vsel %vm2488_vm10, %v1985_v26, %v2792_v35  ;;  %v2717_v39 = vmul.f32 0.2, %v1798_v34  ;;  %4548 = vmatmul.msk.bf16.gmra.mxu2 %vm1091_vm0, %v4700_v30  ;;  %4586 = vmatmul.msk.bf16.gmra.mxu3 %vm1091_vm0, %v4738_v31 }
 0x127   :  { %v3400_v40 = vpack.c.bf16 %v3096_v38, %v3096_v38  ;;  %v3172_v41 = vsel %vm2564_vm11, %v2175_v27, %v2868_v36  ;;  %v2945_v42 = vsel %vm2337_vm12, %v1608_v32, %v2641_v37 }
 0x128   :  { %v3476_v43 = vpack.c.bf16 %v3172_v41, %v3172_v41  ;;  %v3249_v44 = vpack.c.bf16 %v2945_v42, %v2945_v42  ;;  %v3021_v45 = vsel %vm2413_vm13, %v1798_v34, %v2717_v39 }
 0x129   :  { %3705 = vst.msk [vmem:[%s6946_s3 + $0x2ac] sm:$0xf] %vm3533_vm3, %v3400_v40  ;;  %v3325_v46 = vpack.c.bf16 %v3021_v45, %v3021_v45  ;;  %v1987_v47 = vpop.f32.mrf.mxu2  ;;  %v2177_v48 = vpop.f32.mrf.mxu3 }
 0x12a   :  { %3781 = vst.msk [vmem:[%s6946_s3 + $0x3dc] sm:$0xf] %vm3533_vm3, %v3476_v43  ;;  %v1988_v49 = vadd.f32 %v5392_v22, %v1987_v47  ;;  %v2178_v50 = vadd.f32 %v5392_v22, %v2177_v48  ;;  %v1609_v51 = vpop.f32.mrf.mxu0  ;;  %v1799_v52 = vpop.f32.mrf.mxu1 }
 0x12b   :  { %3554 = vst.msk [vmem:[%s6946_s3 + $0x50] sm:$0xf] %vm3533_vm3, %v3249_v44  ;;  %v1610_v53 = vadd.f32 %v5392_v22, %v1609_v51  ;;  %v1800_v54 = vadd.f32 %v5392_v22, %v1799_v52  ;;  %v4664_v51 = vld [vmem:[%s6944_s0 + $0x1d0] sm:$0xff] }
 0x12c   :  { %3630 = vst.msk [vmem:[%s6946_s3 + $0x180] sm:$0xf] %vm3533_vm3, %v3325_v46  ;;  %vm2489_vm14 = vcmp.ge.f32.partialorder %v1988_v49, 0.0  ;;  %v2793_v55 = vmul.f32 0.2, %v1988_v49  ;;  %vm2565_vm15 = vcmp.ge.f32.partialorder %v2178_v50, 0.0 }
 0x12d   :  { %v2869_v56 = vmul.f32 0.2, %v2178_v50  ;;  %vm2338_vm1 = vcmp.ge.f32.partialorder %v1610_v53, 0.0  ;;  %v2642_v57 = vmul.f32 0.2, %v1610_v53  ;;  %vm2414_vm2 = vcmp.ge.f32.partialorder %v1800_v54, 0.0 }
 0x12e   :  { %v3097_v58 = vsel %vm2489_vm14, %v1988_v49, %v2793_v55  ;;  %v2718_v59 = vmul.f32 0.2, %v1800_v54 }
 0x12f   :  { %v3401_v60 = vpack.c.bf16 %v3097_v58, %v3097_v58  ;;  %v3173_v61 = vsel %vm2565_vm15, %v2178_v50, %v2869_v56  ;;  %v2946_v62 = vsel %vm2338_vm1, %v1610_v53, %v2642_v57  ;;  %v4626_v50 = vld [vmem:[%s6944_s0 + $0xa0] sm:$0xff]  ;;  %v4740_v57 = vld [vmem:[%s6944_s0 + $0x430] sm:$0xff] }
 0x130   :  { %v3477_v63 = vpack.c.bf16 %v3173_v61, %v3173_v61  ;;  %v3250_v0 = vpack.c.bf16 %v2946_v62, %v2946_v62  ;;  %v3022_v1 = vsel %vm2414_vm2, %v1800_v54, %v2718_v59  ;;  %v4702_v56 = vld [vmem:[%s6944_s0 + $0x300] sm:$0xff] }
 0x131   :  { %3706 = vst.msk [vmem:[%s6946_s3 + $0x2b0] sm:$0xf] %vm3533_vm3, %v3401_v60  ;;  %v3326_v2 = vpack.c.bf16 %v3022_v1, %v3022_v1  ;;  %v1989_v3 = vpop.f32.mrf.mxu2  ;;  %v2179_v4 = vpop.f32.mrf.mxu3 }
 0x132   :  { %3782 = vst.msk [vmem:[%s6946_s3 + $0x3e0] sm:$0xf] %vm3533_vm3, %v3477_v63  ;;  %v1990_v7 = vadd.f32 %v5392_v22, %v1989_v3  ;;  %v2180_v8 = vadd.f32 %v5392_v22, %v2179_v4  ;;  %v1612_v9 = vpop.f32.mrf.mxu0  ;;  %v1802_v10 = vpop.f32.mrf.mxu1 }
 0x133   :  { %3555 = vst.msk [vmem:[%s6946_s3 + $0x54] sm:$0xf] %vm3533_vm3, %v3250_v0  ;;  %v1613_v13 = vadd.f32 %v5392_v22, %v1612_v9  ;;  %v1803_v33 = vadd.f32 %v5392_v22, %v1802_v10 }
 0x134   :  { %3631 = vst.msk [vmem:[%s6946_s3 + $0x184] sm:$0xf] %vm3533_vm3, %v3326_v2  ;;  %vm2490_vm4 = vcmp.ge.f32.partialorder %v1990_v7, 0.0  ;;  %v2794_v14 = vmul.f32 0.2, %v1990_v7  ;;  %vm2566_vm5 = vcmp.ge.f32.partialorder %v2180_v8, 0.0 }
 0x135   :  { %v2870_v15 = vmul.f32 0.2, %v2180_v8  ;;  %vm2339_vm6 = vcmp.ge.f32.partialorder %v1613_v13, 0.0  ;;  %v2643_v16 = vmul.f32 0.2, %v1613_v13  ;;  %vm2415_vm7 = vcmp.ge.f32.partialorder %v1803_v33, 0.0  ;;  %4473 = vmatmul.msk.bf16.gmra.mxu0 %vm1091_vm0, %v4625_v5  ;;  %4511 = vmatmul.msk.bf16.gmra.mxu1 %vm1091_vm0, %v4663_v6 }
 0x136   :  { %v3098_v17 = vsel %vm2490_vm4, %v1990_v7, %v2794_v14  ;;  %v2719_v18 = vmul.f32 0.2, %v1803_v33  ;;  %4549 = vmatmul.msk.bf16.gmra.mxu2 %vm1091_vm0, %v4701_v11  ;;  %4587 = vmatmul.msk.bf16.gmra.mxu3 %vm1091_vm0, %v4739_v12 }
 0x137   :  { %v3402_v19 = vpack.c.bf16 %v3098_v17, %v3098_v17  ;;  %v3174_v20 = vsel %vm2566_vm5, %v2180_v8, %v2870_v15  ;;  %v2947_v21 = vsel %vm2339_vm6, %v1613_v13, %v2643_v16 }
 0x138   :  { %v3478_v23 = vpack.c.bf16 %v3174_v20, %v3174_v20  ;;  %v3251_v24 = vpack.c.bf16 %v2947_v21, %v2947_v21  ;;  %v3023_v25 = vsel %vm2415_vm7, %v1803_v33, %v2719_v18 }
 0x139   :  { %3707 = vst.msk [vmem:[%s6946_s3 + $0x2b4] sm:$0xf] %vm3533_vm3, %v3402_v19  ;;  %v3327_v26 = vpack.c.bf16 %v3023_v25, %v3023_v25  ;;  %v1992_v27 = vpop.f32.mrf.mxu2  ;;  %v2182_v28 = vpop.f32.mrf.mxu3 }
 0x13a   :  { %3783 = vst.msk [vmem:[%s6946_s3 + $0x3e4] sm:$0xf] %vm3533_vm3, %v3478_v23  ;;  %v1993_v29 = vadd.f32 %v5392_v22, %v1992_v27  ;;  %v2183_v30 = vadd.f32 %v5392_v22, %v2182_v28  ;;  %v1614_v31 = vpop.f32.mrf.mxu0  ;;  %v1804_v32 = vpop.f32.mrf.mxu1 }
 0x13b   :  { %3556 = vst.msk [vmem:[%s6946_s3 + $0x58] sm:$0xf] %vm3533_vm3, %v3251_v24  ;;  %v1615_v34 = vadd.f32 %v5392_v22, %v1614_v31  ;;  %v1805_v35 = vadd.f32 %v5392_v22, %v1804_v32  ;;  %v4665_v31 = vld [vmem:[%s6944_s0 + $0x1d8] sm:$0xff] }
 0x13c   :  { %3632 = vst.msk [vmem:[%s6946_s3 + $0x188] sm:$0xf] %vm3533_vm3, %v3327_v26  ;;  %vm2491_vm8 = vcmp.ge.f32.partialorder %v1993_v29, 0.0  ;;  %v2795_v36 = vmul.f32 0.2, %v1993_v29  ;;  %vm2567_vm9 = vcmp.ge.f32.partialorder %v2183_v30, 0.0 }
 0x13d   :  { %v2871_v37 = vmul.f32 0.2, %v2183_v30  ;;  %vm2340_vm10 = vcmp.ge.f32.partialorder %v1615_v34, 0.0  ;;  %v2644_v38 = vmul.f32 0.2, %v1615_v34  ;;  %vm2416_vm11 = vcmp.ge.f32.partialorder %v1805_v35, 0.0 }
 0x13e   :  { %v3099_v39 = vsel %vm2491_vm8, %v1993_v29, %v2795_v36  ;;  %v2720_v40 = vmul.f32 0.2, %v1805_v35 }
 0x13f   :  { %v3403_v41 = vpack.c.bf16 %v3099_v39, %v3099_v39  ;;  %v3175_v42 = vsel %vm2567_vm9, %v2183_v30, %v2871_v37  ;;  %v2948_v43 = vsel %vm2340_vm10, %v1615_v34, %v2644_v38  ;;  %v4627_v30 = vld [vmem:[%s6944_s0 + $0xa8] sm:$0xff]  ;;  %v4741_v38 = vld [vmem:[%s6944_s0 + $0x438] sm:$0xff] }
 0x140   :  { %v3479_v44 = vpack.c.bf16 %v3175_v42, %v3175_v42  ;;  %v3252_v45 = vpack.c.bf16 %v2948_v43, %v2948_v43  ;;  %v3024_v46 = vsel %vm2416_vm11, %v1805_v35, %v2720_v40  ;;  %v4703_v37 = vld [vmem:[%s6944_s0 + $0x308] sm:$0xff] }
 0x141   :  { %3708 = vst.msk [vmem:[%s6946_s3 + $0x2b8] sm:$0xf] %vm3533_vm3, %v3403_v41  ;;  %v3328_v47 = vpack.c.bf16 %v3024_v46, %v3024_v46  ;;  %v1994_v48 = vpop.f32.mrf.mxu2  ;;  %v2184_v49 = vpop.f32.mrf.mxu3 }
 0x142   :  { %3784 = vst.msk [vmem:[%s6946_s3 + $0x3e8] sm:$0xf] %vm3533_vm3, %v3479_v44  ;;  %v1995_v52 = vadd.f32 %v5392_v22, %v1994_v48  ;;  %v2185_v53 = vadd.f32 %v5392_v22, %v2184_v49  ;;  %v1617_v54 = vpop.f32.mrf.mxu0  ;;  %v1807_v55 = vpop.f32.mrf.mxu1 }
 0x143   :  { %3557 = vst.msk [vmem:[%s6946_s3 + $0x5c] sm:$0xf] %vm3533_vm3, %v3252_v45  ;;  %v1618_v58 = vadd.f32 %v5392_v22, %v1617_v54  ;;  %v1808_v59 = vadd.f32 %v5392_v22, %v1807_v55 }
 0x144   :  { %3633 = vst.msk [vmem:[%s6946_s3 + $0x18c] sm:$0xf] %vm3533_vm3, %v3328_v47  ;;  %vm2492_vm12 = vcmp.ge.f32.partialorder %v1995_v52, 0.0  ;;  %v2796_v60 = vmul.f32 0.2, %v1995_v52  ;;  %vm2568_vm13 = vcmp.ge.f32.partialorder %v2185_v53, 0.0 }
 0x145   :  { %v2872_v61 = vmul.f32 0.2, %v2185_v53  ;;  %vm2341_vm14 = vcmp.ge.f32.partialorder %v1618_v58, 0.0  ;;  %v2645_v62 = vmul.f32 0.2, %v1618_v58  ;;  %vm2417_vm15 = vcmp.ge.f32.partialorder %v1808_v59, 0.0  ;;  %4474 = vmatmul.msk.bf16.gmra.mxu0 %vm1091_vm0, %v4626_v50  ;;  %4512 = vmatmul.msk.bf16.gmra.mxu1 %vm1091_vm0, %v4664_v51 }
 0x146   :  { %v3100_v63 = vsel %vm2492_vm12, %v1995_v52, %v2796_v60  ;;  %v2721_v0 = vmul.f32 0.2, %v1808_v59  ;;  %4550 = vmatmul.msk.bf16.gmra.mxu2 %vm1091_vm0, %v4702_v56  ;;  %4588 = vmatmul.msk.bf16.gmra.mxu3 %vm1091_vm0, %v4740_v57 }
 0x147   :  { %v3404_v1 = vpack.c.bf16 %v3100_v63, %v3100_v63  ;;  %v3176_v2 = vsel %vm2568_vm13, %v2185_v53, %v2872_v61  ;;  %v2949_v3 = vsel %vm2341_vm14, %v1618_v58, %v2645_v62 }
 0x148   :  { %v3480_v4 = vpack.c.bf16 %v3176_v2, %v3176_v2  ;;  %v3253_v5 = vpack.c.bf16 %v2949_v3, %v2949_v3  ;;  %v3025_v6 = vsel %vm2417_vm15, %v1808_v59, %v2721_v0 }
 0x149   :  { %3709 = vst.msk [vmem:[%s6946_s3 + $0x2bc] sm:$0xf] %vm3533_vm3, %v3404_v1  ;;  %v3329_v7 = vpack.c.bf16 %v3025_v6, %v3025_v6  ;;  %v1997_v8 = vpop.f32.mrf.mxu2  ;;  %v2187_v9 = vpop.f32.mrf.mxu3 }
 0x14a   :  { %3785 = vst.msk [vmem:[%s6946_s3 + $0x3ec] sm:$0xf] %vm3533_vm3, %v3480_v4  ;;  %v1998_v10 = vadd.f32 %v5392_v22, %v1997_v8  ;;  %v2188_v11 = vadd.f32 %v5392_v22, %v2187_v9  ;;  %v1619_v12 = vpop.f32.mrf.mxu0  ;;  %v1809_v13 = vpop.f32.mrf.mxu1 }
 0x14b   :  { %3558 = vst.msk [vmem:[%s6946_s3 + $0x60] sm:$0xf] %vm3533_vm3, %v3253_v5  ;;  %v1620_v33 = vadd.f32 %v5392_v22, %v1619_v12  ;;  %v1810_v14 = vadd.f32 %v5392_v22, %v1809_v13  ;;  %v4666_v12 = vld [vmem:[%s6944_s0 + $0x1e0] sm:$0xff] }
 0x14c   :  { %3634 = vst.msk [vmem:[%s6946_s3 + $0x190] sm:$0xf] %vm3533_vm3, %v3329_v7  ;;  %vm2493_vm1 = vcmp.ge.f32.partialorder %v1998_v10, 0.0  ;;  %v2797_v15 = vmul.f32 0.2, %v1998_v10  ;;  %vm2569_vm2 = vcmp.ge.f32.partialorder %v2188_v11, 0.0 }
 0x14d   :  { %v2873_v16 = vmul.f32 0.2, %v2188_v11  ;;  %vm2342_vm4 = vcmp.ge.f32.partialorder %v1620_v33, 0.0  ;;  %v2646_v17 = vmul.f32 0.2, %v1620_v33  ;;  %vm2418_vm5 = vcmp.ge.f32.partialorder %v1810_v14, 0.0 }
 0x14e   :  { %v3101_v18 = vsel %vm2493_vm1, %v1998_v10, %v2797_v15  ;;  %v2722_v19 = vmul.f32 0.2, %v1810_v14 }
 0x14f   :  { %v3405_v20 = vpack.c.bf16 %v3101_v18, %v3101_v18  ;;  %v3177_v21 = vsel %vm2569_vm2, %v2188_v11, %v2873_v16  ;;  %v2950_v23 = vsel %vm2342_vm4, %v1620_v33, %v2646_v17  ;;  %v4628_v11 = vld [vmem:[%s6944_s0 + $0xb0] sm:$0xff]  ;;  %v4742_v17 = vld [vmem:[%s6944_s0 + $0x440] sm:$0xff] }
 0x150   :  { %v3481_v24 = vpack.c.bf16 %v3177_v21, %v3177_v21  ;;  %v3254_v25 = vpack.c.bf16 %v2950_v23, %v2950_v23  ;;  %v3026_v26 = vsel %vm2418_vm5, %v1810_v14, %v2722_v19  ;;  %v4704_v16 = vld [vmem:[%s6944_s0 + $0x310] sm:$0xff] }
 0x151   :  { %3710 = vst.msk [vmem:[%s6946_s3 + $0x2c0] sm:$0xf] %vm3533_vm3, %v3405_v20  ;;  %v3330_v27 = vpack.c.bf16 %v3026_v26, %v3026_v26  ;;  %v1999_v28 = vpop.f32.mrf.mxu2  ;;  %v2189_v29 = vpop.f32.mrf.mxu3 }
 0x152   :  { %3786 = vst.msk [vmem:[%s6946_s3 + $0x3f0] sm:$0xf] %vm3533_vm3, %v3481_v24  ;;  %v2000_v32 = vadd.f32 %v5392_v22, %v1999_v28  ;;  %v2190_v34 = vadd.f32 %v5392_v22, %v2189_v29  ;;  %v1622_v35 = vpop.f32.mrf.mxu0  ;;  %v1812_v36 = vpop.f32.mrf.mxu1 }
 0x153   :  { %3559 = vst.msk [vmem:[%s6946_s3 + $0x64] sm:$0xf] %vm3533_vm3, %v3254_v25  ;;  %v1623_v39 = vadd.f32 %v5392_v22, %v1622_v35  ;;  %v1813_v40 = vadd.f32 %v5392_v22, %v1812_v36 }
 0x154   :  { %3635 = vst.msk [vmem:[%s6946_s3 + $0x194] sm:$0xf] %vm3533_vm3, %v3330_v27  ;;  %vm2494_vm6 = vcmp.ge.f32.partialorder %v2000_v32, 0.0  ;;  %v2798_v41 = vmul.f32 0.2, %v2000_v32  ;;  %vm2570_vm7 = vcmp.ge.f32.partialorder %v2190_v34, 0.0 }
 0x155   :  { %v2874_v42 = vmul.f32 0.2, %v2190_v34  ;;  %vm2343_vm8 = vcmp.ge.f32.partialorder %v1623_v39, 0.0  ;;  %v2647_v43 = vmul.f32 0.2, %v1623_v39  ;;  %vm2419_vm9 = vcmp.ge.f32.partialorder %v1813_v40, 0.0  ;;  %4475 = vmatmul.msk.bf16.gmra.mxu0 %vm1091_vm0, %v4627_v30  ;;  %4513 = vmatmul.msk.bf16.gmra.mxu1 %vm1091_vm0, %v4665_v31 }
 0x156   :  { %v3102_v44 = vsel %vm2494_vm6, %v2000_v32, %v2798_v41  ;;  %v2723_v45 = vmul.f32 0.2, %v1813_v40  ;;  %4551 = vmatmul.msk.bf16.gmra.mxu2 %vm1091_vm0, %v4703_v37  ;;  %4589 = vmatmul.msk.bf16.gmra.mxu3 %vm1091_vm0, %v4741_v38 }
 0x157   :  { %v3406_v46 = vpack.c.bf16 %v3102_v44, %v3102_v44  ;;  %v3178_v47 = vsel %vm2570_vm7, %v2190_v34, %v2874_v42  ;;  %v2951_v48 = vsel %vm2343_vm8, %v1623_v39, %v2647_v43 }
 0x158   :  { %v3482_v49 = vpack.c.bf16 %v3178_v47, %v3178_v47  ;;  %v3255_v50 = vpack.c.bf16 %v2951_v48, %v2951_v48  ;;  %v3027_v51 = vsel %vm2419_vm9, %v1813_v40, %v2723_v45 }
 0x159   :  { %3711 = vst.msk [vmem:[%s6946_s3 + $0x2c4] sm:$0xf] %vm3533_vm3, %v3406_v46  ;;  %v3331_v52 = vpack.c.bf16 %v3027_v51, %v3027_v51  ;;  %v2002_v53 = vpop.f32.mrf.mxu2  ;;  %v2192_v54 = vpop.f32.mrf.mxu3 }
 0x15a   :  { %3787 = vst.msk [vmem:[%s6946_s3 + $0x3f4] sm:$0xf] %vm3533_vm3, %v3482_v49  ;;  %v2003_v55 = vadd.f32 %v5392_v22, %v2002_v53  ;;  %v2193_v56 = vadd.f32 %v5392_v22, %v2192_v54  ;;  %v1624_v57 = vpop.f32.mrf.mxu0  ;;  %v1814_v58 = vpop.f32.mrf.mxu1 }
 0x15b   :  { %3560 = vst.msk [vmem:[%s6946_s3 + $0x68] sm:$0xf] %vm3533_vm3, %v3255_v50  ;;  %v1625_v59 = vadd.f32 %v5392_v22, %v1624_v57  ;;  %v1815_v60 = vadd.f32 %v5392_v22, %v1814_v58  ;;  %v4667_v57 = vld [vmem:[%s6944_s0 + $0x1e8] sm:$0xff] }
 0x15c   :  { %3636 = vst.msk [vmem:[%s6946_s3 + $0x198] sm:$0xf] %vm3533_vm3, %v3331_v52  ;;  %vm2495_vm10 = vcmp.ge.f32.partialorder %v2003_v55, 0.0  ;;  %v2799_v61 = vmul.f32 0.2, %v2003_v55  ;;  %vm2571_vm11 = vcmp.ge.f32.partialorder %v2193_v56, 0.0 }
 0x15d   :  { %v2875_v62 = vmul.f32 0.2, %v2193_v56  ;;  %vm2344_vm12 = vcmp.ge.f32.partialorder %v1625_v59, 0.0  ;;  %v2648_v63 = vmul.f32 0.2, %v1625_v59  ;;  %vm2420_vm13 = vcmp.ge.f32.partialorder %v1815_v60, 0.0 }
 0x15e   :  { %v3103_v0 = vsel %vm2495_vm10, %v2003_v55, %v2799_v61  ;;  %v2724_v1 = vmul.f32 0.2, %v1815_v60 }
 0x15f   :  { %v3407_v2 = vpack.c.bf16 %v3103_v0, %v3103_v0  ;;  %v3179_v3 = vsel %vm2571_vm11, %v2193_v56, %v2875_v62  ;;  %v2952_v4 = vsel %vm2344_vm12, %v1625_v59, %v2648_v63  ;;  %v4629_v56 = vld [vmem:[%s6944_s0 + $0xb8] sm:$0xff]  ;;  %v4743_v63 = vld [vmem:[%s6944_s0 + $0x448] sm:$0xff] }
 0x160   :  { %v3483_v5 = vpack.c.bf16 %v3179_v3, %v3179_v3  ;;  %v3256_v6 = vpack.c.bf16 %v2952_v4, %v2952_v4  ;;  %v3028_v7 = vsel %vm2420_vm13, %v1815_v60, %v2724_v1  ;;  %v4705_v62 = vld [vmem:[%s6944_s0 + $0x318] sm:$0xff] }
 0x161   :  { %3712 = vst.msk [vmem:[%s6946_s3 + $0x2c8] sm:$0xf] %vm3533_vm3, %v3407_v2  ;;  %v3332_v8 = vpack.c.bf16 %v3028_v7, %v3028_v7  ;;  %v2004_v9 = vpop.f32.mrf.mxu2  ;;  %v2194_v10 = vpop.f32.mrf.mxu3 }
 0x162   :  { %3788 = vst.msk [vmem:[%s6946_s3 + $0x3f8] sm:$0xf] %vm3533_vm3, %v3483_v5  ;;  %v2005_v13 = vadd.f32 %v5392_v22, %v2004_v9  ;;  %v2195_v33 = vadd.f32 %v5392_v22, %v2194_v10  ;;  %v1627_v14 = vpop.f32.mrf.mxu0  ;;  %v1817_v15 = vpop.f32.mrf.mxu1 }
 0x163   :  { %3561 = vst.msk [vmem:[%s6946_s3 + $0x6c] sm:$0xf] %vm3533_vm3, %v3256_v6  ;;  %v1628_v18 = vadd.f32 %v5392_v22, %v1627_v14  ;;  %v1818_v19 = vadd.f32 %v5392_v22, %v1817_v15 }
 0x164   :  { %3637 = vst.msk [vmem:[%s6946_s3 + $0x19c] sm:$0xf] %vm3533_vm3, %v3332_v8  ;;  %vm2496_vm14 = vcmp.ge.f32.partialorder %v2005_v13, 0.0  ;;  %v2800_v20 = vmul.f32 0.2, %v2005_v13  ;;  %vm2572_vm15 = vcmp.ge.f32.partialorder %v2195_v33, 0.0 }
 0x165   :  { %v2876_v21 = vmul.f32 0.2, %v2195_v33  ;;  %vm2345_vm1 = vcmp.ge.f32.partialorder %v1628_v18, 0.0  ;;  %v2649_v23 = vmul.f32 0.2, %v1628_v18  ;;  %vm2421_vm2 = vcmp.ge.f32.partialorder %v1818_v19, 0.0  ;;  %4476 = vmatmul.msk.bf16.gmra.mxu0 %vm1091_vm0, %v4628_v11  ;;  %4514 = vmatmul.msk.bf16.gmra.mxu1 %vm1091_vm0, %v4666_v12 }
 0x166   :  { %v3104_v24 = vsel %vm2496_vm14, %v2005_v13, %v2800_v20  ;;  %v2725_v25 = vmul.f32 0.2, %v1818_v19  ;;  %4552 = vmatmul.msk.bf16.gmra.mxu2 %vm1091_vm0, %v4704_v16  ;;  %4590 = vmatmul.msk.bf16.gmra.mxu3 %vm1091_vm0, %v4742_v17 }
 0x167   :  { %v3408_v26 = vpack.c.bf16 %v3104_v24, %v3104_v24  ;;  %v3180_v27 = vsel %vm2572_vm15, %v2195_v33, %v2876_v21  ;;  %v2953_v28 = vsel %vm2345_vm1, %v1628_v18, %v2649_v23 }
 0x168   :  { %v3484_v29 = vpack.c.bf16 %v3180_v27, %v3180_v27  ;;  %v3257_v30 = vpack.c.bf16 %v2953_v28, %v2953_v28  ;;  %v3029_v31 = vsel %vm2421_vm2, %v1818_v19, %v2725_v25 }
 0x169   :  { %3713 = vst.msk [vmem:[%s6946_s3 + $0x2cc] sm:$0xf] %vm3533_vm3, %v3408_v26  ;;  %v3333_v32 = vpack.c.bf16 %v3029_v31, %v3029_v31  ;;  %v2007_v34 = vpop.f32.mrf.mxu2  ;;  %v2197_v35 = vpop.f32.mrf.mxu3 }
 0x16a   :  { %3789 = vst.msk [vmem:[%s6946_s3 + $0x3fc] sm:$0xf] %vm3533_vm3, %v3484_v29  ;;  %v2008_v36 = vadd.f32 %v5392_v22, %v2007_v34  ;;  %v2198_v37 = vadd.f32 %v5392_v22, %v2197_v35  ;;  %v1629_v38 = vpop.f32.mrf.mxu0  ;;  %v1819_v39 = vpop.f32.mrf.mxu1 }
 0x16b   :  { %3562 = vst.msk [vmem:[%s6946_s3 + $0x70] sm:$0xf] %vm3533_vm3, %v3257_v30  ;;  %v1630_v40 = vadd.f32 %v5392_v22, %v1629_v38  ;;  %v1820_v41 = vadd.f32 %v5392_v22, %v1819_v39  ;;  %v4668_v38 = vld [vmem:[%s6944_s0 + $0x1f0] sm:$0xff] }
 0x16c   :  { %3638 = vst.msk [vmem:[%s6946_s3 + $0x1a0] sm:$0xf] %vm3533_vm3, %v3333_v32  ;;  %vm2497_vm4 = vcmp.ge.f32.partialorder %v2008_v36, 0.0  ;;  %v2801_v42 = vmul.f32 0.2, %v2008_v36  ;;  %vm2573_vm5 = vcmp.ge.f32.partialorder %v2198_v37, 0.0 }
 0x16d   :  { %v2877_v43 = vmul.f32 0.2, %v2198_v37  ;;  %vm2346_vm6 = vcmp.ge.f32.partialorder %v1630_v40, 0.0  ;;  %v2650_v44 = vmul.f32 0.2, %v1630_v40  ;;  %vm2422_vm7 = vcmp.ge.f32.partialorder %v1820_v41, 0.0 }
 0x16e   :  { %v3105_v45 = vsel %vm2497_vm4, %v2008_v36, %v2801_v42  ;;  %v2726_v46 = vmul.f32 0.2, %v1820_v41 }
 0x16f   :  { %v3409_v47 = vpack.c.bf16 %v3105_v45, %v3105_v45  ;;  %v3181_v48 = vsel %vm2573_vm5, %v2198_v37, %v2877_v43  ;;  %v2954_v49 = vsel %vm2346_vm6, %v1630_v40, %v2650_v44  ;;  %v4630_v37 = vld [vmem:[%s6944_s0 + $0xc0] sm:$0xff]  ;;  %v4744_v44 = vld [vmem:[%s6944_s0 + $0x450] sm:$0xff] }
 0x170   :  { %v3485_v50 = vpack.c.bf16 %v3181_v48, %v3181_v48  ;;  %v3258_v51 = vpack.c.bf16 %v2954_v49, %v2954_v49  ;;  %v3030_v52 = vsel %vm2422_vm7, %v1820_v41, %v2726_v46  ;;  %v4706_v43 = vld [vmem:[%s6944_s0 + $0x320] sm:$0xff] }
 0x171   :  { %3714 = vst.msk [vmem:[%s6946_s3 + $0x2d0] sm:$0xf] %vm3533_vm3, %v3409_v47  ;;  %v3334_v53 = vpack.c.bf16 %v3030_v52, %v3030_v52  ;;  %v2009_v54 = vpop.f32.mrf.mxu2  ;;  %v2199_v55 = vpop.f32.mrf.mxu3 }
 0x172   :  { %3790 = vst.msk [vmem:[%s6946_s3 + $0x400] sm:$0xf] %vm3533_vm3, %v3485_v50  ;;  %v2010_v58 = vadd.f32 %v5392_v22, %v2009_v54  ;;  %v2200_v59 = vadd.f32 %v5392_v22, %v2199_v55  ;;  %v1632_v60 = vpop.f32.mrf.mxu0  ;;  %v1822_v61 = vpop.f32.mrf.mxu1 }
 0x173   :  { %3563 = vst.msk [vmem:[%s6946_s3 + $0x74] sm:$0xf] %vm3533_vm3, %v3258_v51  ;;  %v1633_v0 = vadd.f32 %v5392_v22, %v1632_v60  ;;  %v1823_v1 = vadd.f32 %v5392_v22, %v1822_v61  ;;  %v5845_v60 = vld [vmem:[%s6945_s2] ss:$0 sm:$0xff] }
 0x174   :  { %3639 = vst.msk [vmem:[%s6946_s3 + $0x1a4] sm:$0xf] %vm3533_vm3, %v3334_v53  ;;  %vm2498_vm8 = vcmp.ge.f32.partialorder %v2010_v58, 0.0  ;;  %v2802_v2 = vmul.f32 0.2, %v2010_v58  ;;  %vm2574_vm9 = vcmp.ge.f32.partialorder %v2200_v59, 0.0 }
 0x175   :  { %v2878_v3 = vmul.f32 0.2, %v2200_v59  ;;  %vm2347_vm10 = vcmp.ge.f32.partialorder %v1633_v0, 0.0  ;;  %v2651_v4 = vmul.f32 0.2, %v1633_v0  ;;  %vm2423_vm11 = vcmp.ge.f32.partialorder %v1823_v1, 0.0  ;;  %4477 = vmatmul.msk.bf16.gmra.mxu0 %vm1091_vm0, %v4629_v56  ;;  %4515 = vmatmul.msk.bf16.gmra.mxu1 %vm1091_vm0, %v4667_v57 }
 0x176   :  { %v3106_v5 = vsel %vm2498_vm8, %v2010_v58, %v2802_v2  ;;  %v2727_v6 = vmul.f32 0.2, %v1823_v1  ;;  %4553 = vmatmul.msk.bf16.gmra.mxu2 %vm1091_vm0, %v4705_v62  ;;  %4591 = vmatmul.msk.bf16.gmra.mxu3 %vm1091_vm0, %v4743_v63 }
 0x177   :  { %v3410_v7 = vpack.c.bf16 %v3106_v5, %v3106_v5  ;;  %v3182_v8 = vsel %vm2574_vm9, %v2200_v59, %v2878_v3  ;;  %v2955_v9 = vsel %vm2347_vm10, %v1633_v0, %v2651_v4 }
 0x178   :  { %v3486_v10 = vpack.c.bf16 %v3182_v8, %v3182_v8  ;;  %v3259_v11 = vpack.c.bf16 %v2955_v9, %v2955_v9  ;;  %v3031_v12 = vsel %vm2423_vm11, %v1823_v1, %v2727_v6 }
 0x179   :  { %3715 = vst.msk [vmem:[%s6946_s3 + $0x2d4] sm:$0xf] %vm3533_vm3, %v3410_v7  ;;  %v3335_v13 = vpack.c.bf16 %v3031_v12, %v3031_v12  ;;  %v2012_v33 = vpop.f32.mrf.mxu2  ;;  %v2202_v14 = vpop.f32.mrf.mxu3 }
 0x17a   :  { %3791 = vst.msk [vmem:[%s6946_s3 + $0x404] sm:$0xf] %vm3533_vm3, %v3486_v10  ;;  %v2013_v15 = vadd.f32 %v5392_v22, %v2012_v33  ;;  %v2203_v16 = vadd.f32 %v5392_v22, %v2202_v14  ;;  %v1634_v17 = vpop.f32.mrf.mxu0  ;;  %v1824_v18 = vpop.f32.mrf.mxu1 }
 0x17b   :  { %3564 = vst.msk [vmem:[%s6946_s3 + $0x78] sm:$0xf] %vm3533_vm3, %v3259_v11  ;;  %v1635_v19 = vadd.f32 %v5392_v22, %v1634_v17  ;;  %v1825_v20 = vadd.f32 %v5392_v22, %v1824_v18  ;;  %v4669_v17 = vld [vmem:[%s6944_s0 + $0x1f8] sm:$0xff] }
 0x17c   :  { %3640 = vst.msk [vmem:[%s6946_s3 + $0x1a8] sm:$0xf] %vm3533_vm3, %v3335_v13  ;;  %vm2499_vm12 = vcmp.ge.f32.partialorder %v2013_v15, 0.0  ;;  %v2803_v21 = vmul.f32 0.2, %v2013_v15  ;;  %vm2575_vm13 = vcmp.ge.f32.partialorder %v2203_v16, 0.0 }
 0x17d   :  { %v2879_v23 = vmul.f32 0.2, %v2203_v16  ;;  %vm2348_vm14 = vcmp.ge.f32.partialorder %v1635_v19, 0.0  ;;  %v2652_v24 = vmul.f32 0.2, %v1635_v19  ;;  %vm2424_vm15 = vcmp.ge.f32.partialorder %v1825_v20, 0.0 }
 0x17e   :  { %v3107_v25 = vsel %vm2499_vm12, %v2013_v15, %v2803_v21  ;;  %v2728_v26 = vmul.f32 0.2, %v1825_v20 }
 0x17f   :  { %v3411_v27 = vpack.c.bf16 %v3107_v25, %v3107_v25  ;;  %v3183_v28 = vsel %vm2575_vm13, %v2203_v16, %v2879_v23  ;;  %v2956_v29 = vsel %vm2348_vm14, %v1635_v19, %v2652_v24  ;;  %v4631_v16 = vld [vmem:[%s6944_s0 + $0xc8] sm:$0xff]  ;;  %v4745_v24 = vld [vmem:[%s6944_s0 + $0x458] sm:$0xff] }
 0x180   :  { %v3487_v30 = vpack.c.bf16 %v3183_v28, %v3183_v28  ;;  %v3260_v31 = vpack.c.bf16 %v2956_v29, %v2956_v29  ;;  %v3032_v32 = vsel %vm2424_vm15, %v1825_v20, %v2728_v26  ;;  %v4707_v23 = vld [vmem:[%s6944_s0 + $0x328] sm:$0xff] }
 0x181   :  { %3716 = vst.msk [vmem:[%s6946_s3 + $0x2d8] sm:$0xf] %vm3533_vm3, %v3411_v27  ;;  %v3336_v34 = vpack.c.bf16 %v3032_v32, %v3032_v32  ;;  %v2014_v35 = vpop.f32.mrf.mxu2  ;;  %v2204_v36 = vpop.f32.mrf.mxu3 }
 0x182   :  { %3792 = vst.msk [vmem:[%s6946_s3 + $0x408] sm:$0xf] %vm3533_vm3, %v3487_v30  ;;  %v2015_v39 = vadd.f32 %v5392_v22, %v2014_v35  ;;  %v2205_v40 = vadd.f32 %v5392_v22, %v2204_v36  ;;  %v1637_v41 = vpop.f32.mrf.mxu0  ;;  %v1827_v42 = vpop.f32.mrf.mxu1 }
 0x183   :  { %3565 = vst.msk [vmem:[%s6946_s3 + $0x7c] sm:$0xf] %vm3533_vm3, %v3260_v31  ;;  %v1638_v45 = vadd.f32 %v5392_v22, %v1637_v41  ;;  %v1828_v46 = vadd.f32 %v5392_v22, %v1827_v42 }
 0x184   :  { %3641 = vst.msk [vmem:[%s6946_s3 + $0x1ac] sm:$0xf] %vm3533_vm3, %v3336_v34  ;;  %vm2500_vm1 = vcmp.ge.f32.partialorder %v2015_v39, 0.0  ;;  %v2804_v47 = vmul.f32 0.2, %v2015_v39  ;;  %vm2576_vm2 = vcmp.ge.f32.partialorder %v2205_v40, 0.0 }
 0x185   :  { %v2880_v48 = vmul.f32 0.2, %v2205_v40  ;;  %vm2349_vm4 = vcmp.ge.f32.partialorder %v1638_v45, 0.0  ;;  %v2653_v49 = vmul.f32 0.2, %v1638_v45  ;;  %vm2425_vm5 = vcmp.ge.f32.partialorder %v1828_v46, 0.0  ;;  %4478 = vmatmul.msk.bf16.gmra.mxu0 %vm1091_vm0, %v4630_v37  ;;  %4516 = vmatmul.msk.bf16.gmra.mxu1 %vm1091_vm0, %v4668_v38 }
 0x186   :  { %v3108_v50 = vsel %vm2500_vm1, %v2015_v39, %v2804_v47  ;;  %v2729_v51 = vmul.f32 0.2, %v1828_v46  ;;  %4554 = vmatmul.msk.bf16.gmra.mxu2 %vm1091_vm0, %v4706_v43  ;;  %4592 = vmatmul.msk.bf16.gmra.mxu3 %vm1091_vm0, %v4744_v44 }
 0x187   :  { %v3412_v22 = vpack.c.bf16 %v3108_v50, %v3108_v50  ;;  %v3184_v52 = vsel %vm2576_vm2, %v2205_v40, %v2880_v48  ;;  %v2957_v53 = vsel %vm2349_vm4, %v1638_v45, %v2653_v49 }
 0x188   :  { %v3488_v54 = vpack.c.bf16 %v3184_v52, %v3184_v52  ;;  %v3261_v55 = vpack.c.bf16 %v2957_v53, %v2957_v53  ;;  %v3033_v56 = vsel %vm2425_vm5, %v1828_v46, %v2729_v51 }
 0x189   :  { %3717 = vst.msk [vmem:[%s6946_s3 + $0x2dc] sm:$0xf] %vm3533_vm3, %v3412_v22  ;;  %v3337_v57 = vpack.c.bf16 %v3033_v56, %v3033_v56  ;;  %v2017_v58 = vpop.f32.mrf.mxu2  ;;  %v2207_v59 = vpop.f32.mrf.mxu3 }
 0x18a   :  { %3793 = vst.msk [vmem:[%s6946_s3 + $0x40c] sm:$0xf] %vm3533_vm3, %v3488_v54  ;;  %v2018_v61 = vadd.f32 %v5845_v60, %v2017_v58  ;;  %v2208_v62 = vadd.f32 %v5845_v60, %v2207_v59  ;;  %v1639_v63 = vpop.f32.mrf.mxu0  ;;  %v1829_v0 = vpop.f32.mrf.mxu1 }
 0x18b   :  { %3566 = vst.msk [vmem:[%s6946_s3 + $0x80] sm:$0xf] %vm3533_vm3, %v3261_v55  ;;  %v1640_v1 = vadd.f32 %v5845_v60, %v1639_v63  ;;  %v1830_v2 = vadd.f32 %v5845_v60, %v1829_v0  ;;  %v4670_v63 = vld [vmem:[%s6944_s0 + $0x200] sm:$0xff] }
 0x18c   :  { %3642 = vst.msk [vmem:[%s6946_s3 + $0x1b0] sm:$0xf] %vm3533_vm3, %v3337_v57  ;;  %vm2501_vm6 = vcmp.ge.f32.partialorder %v2018_v61, 0.0  ;;  %v2805_v3 = vmul.f32 0.2, %v2018_v61  ;;  %vm2577_vm7 = vcmp.ge.f32.partialorder %v2208_v62, 0.0 }
 0x18d   :  { %v2881_v4 = vmul.f32 0.2, %v2208_v62  ;;  %vm2350_vm8 = vcmp.ge.f32.partialorder %v1640_v1, 0.0  ;;  %v2654_v5 = vmul.f32 0.2, %v1640_v1  ;;  %vm2426_vm9 = vcmp.ge.f32.partialorder %v1830_v2, 0.0 }
 0x18e   :  { %v3109_v6 = vsel %vm2501_vm6, %v2018_v61, %v2805_v3  ;;  %v2730_v7 = vmul.f32 0.2, %v1830_v2 }
 0x18f   :  { %v3413_v8 = vpack.c.bf16 %v3109_v6, %v3109_v6  ;;  %v3185_v9 = vsel %vm2577_vm7, %v2208_v62, %v2881_v4  ;;  %v2958_v10 = vsel %vm2350_vm8, %v1640_v1, %v2654_v5  ;;  %v4632_v62 = vld [vmem:[%s6944_s0 + $0xd0] sm:$0xff]  ;;  %v4746_v5 = vld [vmem:[%s6944_s0 + $0x460] sm:$0xff] }
 0x190   :  { %v3489_v11 = vpack.c.bf16 %v3185_v9, %v3185_v9  ;;  %v3262_v12 = vpack.c.bf16 %v2958_v10, %v2958_v10  ;;  %v3034_v13 = vsel %vm2426_vm9, %v1830_v2, %v2730_v7  ;;  %v4708_v4 = vld [vmem:[%s6944_s0 + $0x330] sm:$0xff] }
 0x191   :  { %3718 = vst.msk [vmem:[%s6946_s3 + $0x2e0] sm:$0xf] %vm3533_vm3, %v3413_v8  ;;  %v3338_v33 = vpack.c.bf16 %v3034_v13, %v3034_v13  ;;  %v2019_v14 = vpop.f32.mrf.mxu2  ;;  %v2209_v15 = vpop.f32.mrf.mxu3 }
 0x192   :  { %3794 = vst.msk [vmem:[%s6946_s3 + $0x410] sm:$0xf] %vm3533_vm3, %v3489_v11  ;;  %v2020_v18 = vadd.f32 %v5845_v60, %v2019_v14  ;;  %v2210_v19 = vadd.f32 %v5845_v60, %v2209_v15  ;;  %v1642_v20 = vpop.f32.mrf.mxu0  ;;  %v1832_v21 = vpop.f32.mrf.mxu1 }
 0x193   :  { %3567 = vst.msk [vmem:[%s6946_s3 + $0x84] sm:$0xf] %vm3533_vm3, %v3262_v12  ;;  %v1643_v25 = vadd.f32 %v5845_v60, %v1642_v20  ;;  %v1833_v26 = vadd.f32 %v5845_v60, %v1832_v21 }
 0x194   :  { %3643 = vst.msk [vmem:[%s6946_s3 + $0x1b4] sm:$0xf] %vm3533_vm3, %v3338_v33  ;;  %vm2502_vm10 = vcmp.ge.f32.partialorder %v2020_v18, 0.0  ;;  %v2806_v27 = vmul.f32 0.2, %v2020_v18  ;;  %vm2578_vm11 = vcmp.ge.f32.partialorder %v2210_v19, 0.0 }
 0x195   :  { %v2882_v28 = vmul.f32 0.2, %v2210_v19  ;;  %vm2351_vm12 = vcmp.ge.f32.partialorder %v1643_v25, 0.0  ;;  %v2655_v29 = vmul.f32 0.2, %v1643_v25  ;;  %vm2427_vm13 = vcmp.ge.f32.partialorder %v1833_v26, 0.0  ;;  %4479 = vmatmul.msk.bf16.gmra.mxu0 %vm1091_vm0, %v4631_v16  ;;  %4517 = vmatmul.msk.bf16.gmra.mxu1 %vm1091_vm0, %v4669_v17 }
 0x196   :  { %v3110_v30 = vsel %vm2502_vm10, %v2020_v18, %v2806_v27  ;;  %v2731_v31 = vmul.f32 0.2, %v1833_v26  ;;  %4555 = vmatmul.msk.bf16.gmra.mxu2 %vm1091_vm0, %v4707_v23  ;;  %4593 = vmatmul.msk.bf16.gmra.mxu3 %vm1091_vm0, %v4745_v24 }
 0x197   :  { %v3414_v32 = vpack.c.bf16 %v3110_v30, %v3110_v30  ;;  %v3186_v34 = vsel %vm2578_vm11, %v2210_v19, %v2882_v28  ;;  %v2959_v35 = vsel %vm2351_vm12, %v1643_v25, %v2655_v29 }
 0x198   :  { %v3490_v36 = vpack.c.bf16 %v3186_v34, %v3186_v34  ;;  %v3263_v37 = vpack.c.bf16 %v2959_v35, %v2959_v35  ;;  %v3035_v38 = vsel %vm2427_vm13, %v1833_v26, %v2731_v31 }
 0x199   :  { %3719 = vst.msk [vmem:[%s6946_s3 + $0x2e4] sm:$0xf] %vm3533_vm3, %v3414_v32  ;;  %v3339_v39 = vpack.c.bf16 %v3035_v38, %v3035_v38  ;;  %v2022_v40 = vpop.f32.mrf.mxu2  ;;  %v2212_v41 = vpop.f32.mrf.mxu3 }
 0x19a   :  { %3795 = vst.msk [vmem:[%s6946_s3 + $0x414] sm:$0xf] %vm3533_vm3, %v3490_v36  ;;  %v2023_v42 = vadd.f32 %v5845_v60, %v2022_v40  ;;  %v2213_v43 = vadd.f32 %v5845_v60, %v2212_v41  ;;  %v1644_v44 = vpop.f32.mrf.mxu0  ;;  %v1834_v45 = vpop.f32.mrf.mxu1 }
 0x19b   :  { %3568 = vst.msk [vmem:[%s6946_s3 + $0x88] sm:$0xf] %vm3533_vm3, %v3263_v37  ;;  %v1645_v46 = vadd.f32 %v5845_v60, %v1644_v44  ;;  %v1835_v47 = vadd.f32 %v5845_v60, %v1834_v45  ;;  %v4671_v44 = vld [vmem:[%s6944_s0 + $0x208] sm:$0xff] }
 0x19c   :  { %3644 = vst.msk [vmem:[%s6946_s3 + $0x1b8] sm:$0xf] %vm3533_vm3, %v3339_v39  ;;  %vm2503_vm14 = vcmp.ge.f32.partialorder %v2023_v42, 0.0  ;;  %v2807_v48 = vmul.f32 0.2, %v2023_v42  ;;  %vm2579_vm15 = vcmp.ge.f32.partialorder %v2213_v43, 0.0 }
 0x19d   :  { %v2883_v49 = vmul.f32 0.2, %v2213_v43  ;;  %vm2352_vm1 = vcmp.ge.f32.partialorder %v1645_v46, 0.0  ;;  %v2656_v50 = vmul.f32 0.2, %v1645_v46  ;;  %vm2428_vm2 = vcmp.ge.f32.partialorder %v1835_v47, 0.0 }
 0x19e   :  { %v3111_v51 = vsel %vm2503_vm14, %v2023_v42, %v2807_v48  ;;  %v2732_v22 = vmul.f32 0.2, %v1835_v47 }
 0x19f   :  { %v3415_v52 = vpack.c.bf16 %v3111_v51, %v3111_v51  ;;  %v3187_v53 = vsel %vm2579_vm15, %v2213_v43, %v2883_v49  ;;  %v2960_v54 = vsel %vm2352_vm1, %v1645_v46, %v2656_v50  ;;  %v4633_v43 = vld [vmem:[%s6944_s0 + $0xd8] sm:$0xff]  ;;  %v4747_v50 = vld [vmem:[%s6944_s0 + $0x468] sm:$0xff] }
 0x1a0   :  { %v3491_v55 = vpack.c.bf16 %v3187_v53, %v3187_v53  ;;  %v3264_v56 = vpack.c.bf16 %v2960_v54, %v2960_v54  ;;  %v3036_v57 = vsel %vm2428_vm2, %v1835_v47, %v2732_v22  ;;  %v4709_v49 = vld [vmem:[%s6944_s0 + $0x338] sm:$0xff] }
 0x1a1   :  { %3720 = vst.msk [vmem:[%s6946_s3 + $0x2e8] sm:$0xf] %vm3533_vm3, %v3415_v52  ;;  %v3340_v58 = vpack.c.bf16 %v3036_v57, %v3036_v57  ;;  %v2024_v59 = vpop.f32.mrf.mxu2  ;;  %v2214_v61 = vpop.f32.mrf.mxu3 }
 0x1a2   :  { %3796 = vst.msk [vmem:[%s6946_s3 + $0x418] sm:$0xf] %vm3533_vm3, %v3491_v55  ;;  %v2025_v0 = vadd.f32 %v5845_v60, %v2024_v59  ;;  %v2215_v1 = vadd.f32 %v5845_v60, %v2214_v61  ;;  %v1647_v2 = vpop.f32.mrf.mxu0  ;;  %v1837_v3 = vpop.f32.mrf.mxu1 }
 0x1a3   :  { %3569 = vst.msk [vmem:[%s6946_s3 + $0x8c] sm:$0xf] %vm3533_vm3, %v3264_v56  ;;  %v1648_v6 = vadd.f32 %v5845_v60, %v1647_v2  ;;  %v1838_v7 = vadd.f32 %v5845_v60, %v1837_v3 }
 0x1a4   :  { %3645 = vst.msk [vmem:[%s6946_s3 + $0x1bc] sm:$0xf] %vm3533_vm3, %v3340_v58  ;;  %vm2504_vm4 = vcmp.ge.f32.partialorder %v2025_v0, 0.0  ;;  %v2808_v8 = vmul.f32 0.2, %v2025_v0  ;;  %vm2580_vm5 = vcmp.ge.f32.partialorder %v2215_v1, 0.0 }
 0x1a5   :  { %v2884_v9 = vmul.f32 0.2, %v2215_v1  ;;  %vm2353_vm6 = vcmp.ge.f32.partialorder %v1648_v6, 0.0  ;;  %v2657_v10 = vmul.f32 0.2, %v1648_v6  ;;  %vm2429_vm7 = vcmp.ge.f32.partialorder %v1838_v7, 0.0  ;;  %4480 = vmatmul.msk.bf16.gmra.mxu0 %vm1091_vm0, %v4632_v62  ;;  %4518 = vmatmul.msk.bf16.gmra.mxu1 %vm1091_vm0, %v4670_v63 }
 0x1a6   :  { %v3112_v11 = vsel %vm2504_vm4, %v2025_v0, %v2808_v8  ;;  %v2733_v12 = vmul.f32 0.2, %v1838_v7  ;;  %4556 = vmatmul.msk.bf16.gmra.mxu2 %vm1091_vm0, %v4708_v4  ;;  %4594 = vmatmul.msk.bf16.gmra.mxu3 %vm1091_vm0, %v4746_v5 }
 0x1a7   :  { %v3416_v13 = vpack.c.bf16 %v3112_v11, %v3112_v11  ;;  %v3188_v33 = vsel %vm2580_vm5, %v2215_v1, %v2884_v9  ;;  %v2961_v14 = vsel %vm2353_vm6, %v1648_v6, %v2657_v10 }
 0x1a8   :  { %v3492_v15 = vpack.c.bf16 %v3188_v33, %v3188_v33  ;;  %v3265_v16 = vpack.c.bf16 %v2961_v14, %v2961_v14  ;;  %v3037_v17 = vsel %vm2429_vm7, %v1838_v7, %v2733_v12 }
 0x1a9   :  { %3721 = vst.msk [vmem:[%s6946_s3 + $0x2ec] sm:$0xf] %vm3533_vm3, %v3416_v13  ;;  %v3341_v18 = vpack.c.bf16 %v3037_v17, %v3037_v17  ;;  %v2027_v19 = vpop.f32.mrf.mxu2  ;;  %v2217_v20 = vpop.f32.mrf.mxu3 }
 0x1aa   :  { %3797 = vst.msk [vmem:[%s6946_s3 + $0x41c] sm:$0xf] %vm3533_vm3, %v3492_v15  ;;  %v2028_v21 = vadd.f32 %v5845_v60, %v2027_v19  ;;  %v2218_v23 = vadd.f32 %v5845_v60, %v2217_v20  ;;  %v1649_v24 = vpop.f32.mrf.mxu0  ;;  %v1839_v25 = vpop.f32.mrf.mxu1 }
 0x1ab   :  { %3570 = vst.msk [vmem:[%s6946_s3 + $0x90] sm:$0xf] %vm3533_vm3, %v3265_v16  ;;  %v1650_v26 = vadd.f32 %v5845_v60, %v1649_v24  ;;  %v1840_v27 = vadd.f32 %v5845_v60, %v1839_v25  ;;  %v4672_v24 = vld [vmem:[%s6944_s0 + $0x210] sm:$0xff] }
 0x1ac   :  { %3646 = vst.msk [vmem:[%s6946_s3 + $0x1c0] sm:$0xf] %vm3533_vm3, %v3341_v18  ;;  %vm2505_vm8 = vcmp.ge.f32.partialorder %v2028_v21, 0.0  ;;  %v2809_v28 = vmul.f32 0.2, %v2028_v21  ;;  %vm2581_vm9 = vcmp.ge.f32.partialorder %v2218_v23, 0.0 }
 0x1ad   :  { %v2885_v29 = vmul.f32 0.2, %v2218_v23  ;;  %vm2354_vm10 = vcmp.ge.f32.partialorder %v1650_v26, 0.0  ;;  %v2658_v30 = vmul.f32 0.2, %v1650_v26  ;;  %vm2430_vm11 = vcmp.ge.f32.partialorder %v1840_v27, 0.0 }
 0x1ae   :  { %v3113_v31 = vsel %vm2505_vm8, %v2028_v21, %v2809_v28  ;;  %v2734_v32 = vmul.f32 0.2, %v1840_v27 }
 0x1af   :  { %v3417_v34 = vpack.c.bf16 %v3113_v31, %v3113_v31  ;;  %v3189_v35 = vsel %vm2581_vm9, %v2218_v23, %v2885_v29  ;;  %v2962_v36 = vsel %vm2354_vm10, %v1650_v26, %v2658_v30  ;;  %v4634_v23 = vld [vmem:[%s6944_s0 + $0xe0] sm:$0xff]  ;;  %v4748_v30 = vld [vmem:[%s6944_s0 + $0x470] sm:$0xff] }
 0x1b0   :  { %v3493_v37 = vpack.c.bf16 %v3189_v35, %v3189_v35  ;;  %v3266_v38 = vpack.c.bf16 %v2962_v36, %v2962_v36  ;;  %v3038_v39 = vsel %vm2430_vm11, %v1840_v27, %v2734_v32  ;;  %v4710_v29 = vld [vmem:[%s6944_s0 + $0x340] sm:$0xff] }
 0x1b1   :  { %3722 = vst.msk [vmem:[%s6946_s3 + $0x2f0] sm:$0xf] %vm3533_vm3, %v3417_v34  ;;  %v3342_v40 = vpack.c.bf16 %v3038_v39, %v3038_v39  ;;  %v2029_v41 = vpop.f32.mrf.mxu2  ;;  %v2219_v42 = vpop.f32.mrf.mxu3 }
 0x1b2   :  { %3798 = vst.msk [vmem:[%s6946_s3 + $0x420] sm:$0xf] %vm3533_vm3, %v3493_v37  ;;  %v2030_v45 = vadd.f32 %v5845_v60, %v2029_v41  ;;  %v2220_v46 = vadd.f32 %v5845_v60, %v2219_v42  ;;  %v1652_v47 = vpop.f32.mrf.mxu0  ;;  %v1842_v48 = vpop.f32.mrf.mxu1 }
 0x1b3   :  { %3571 = vst.msk [vmem:[%s6946_s3 + $0x94] sm:$0xf] %vm3533_vm3, %v3266_v38  ;;  %v1653_v51 = vadd.f32 %v5845_v60, %v1652_v47  ;;  %v1843_v22 = vadd.f32 %v5845_v60, %v1842_v48 }
 0x1b4   :  { %3647 = vst.msk [vmem:[%s6946_s3 + $0x1c4] sm:$0xf] %vm3533_vm3, %v3342_v40  ;;  %vm2506_vm12 = vcmp.ge.f32.partialorder %v2030_v45, 0.0  ;;  %v2810_v52 = vmul.f32 0.2, %v2030_v45  ;;  %vm2582_vm13 = vcmp.ge.f32.partialorder %v2220_v46, 0.0 }
 0x1b5   :  { %v2886_v53 = vmul.f32 0.2, %v2220_v46  ;;  %vm2355_vm14 = vcmp.ge.f32.partialorder %v1653_v51, 0.0  ;;  %v2659_v54 = vmul.f32 0.2, %v1653_v51  ;;  %vm2431_vm15 = vcmp.ge.f32.partialorder %v1843_v22, 0.0  ;;  %4481 = vmatmul.msk.bf16.gmra.mxu0 %vm1091_vm0, %v4633_v43  ;;  %4519 = vmatmul.msk.bf16.gmra.mxu1 %vm1091_vm0, %v4671_v44 }
 0x1b6   :  { %v3114_v55 = vsel %vm2506_vm12, %v2030_v45, %v2810_v52  ;;  %v2735_v56 = vmul.f32 0.2, %v1843_v22  ;;  %4557 = vmatmul.msk.bf16.gmra.mxu2 %vm1091_vm0, %v4709_v49  ;;  %4595 = vmatmul.msk.bf16.gmra.mxu3 %vm1091_vm0, %v4747_v50 }
 0x1b7   :  { %v3418_v57 = vpack.c.bf16 %v3114_v55, %v3114_v55  ;;  %v3190_v58 = vsel %vm2582_vm13, %v2220_v46, %v2886_v53  ;;  %v2963_v59 = vsel %vm2355_vm14, %v1653_v51, %v2659_v54 }
 0x1b8   :  { %v3494_v61 = vpack.c.bf16 %v3190_v58, %v3190_v58  ;;  %v3267_v62 = vpack.c.bf16 %v2963_v59, %v2963_v59  ;;  %v3039_v63 = vsel %vm2431_vm15, %v1843_v22, %v2735_v56 }
 0x1b9   :  { %3723 = vst.msk [vmem:[%s6946_s3 + $0x2f4] sm:$0xf] %vm3533_vm3, %v3418_v57  ;;  %v3343_v0 = vpack.c.bf16 %v3039_v63, %v3039_v63  ;;  %v2032_v1 = vpop.f32.mrf.mxu2  ;;  %v2222_v2 = vpop.f32.mrf.mxu3 }
 0x1ba   :  { %3799 = vst.msk [vmem:[%s6946_s3 + $0x424] sm:$0xf] %vm3533_vm3, %v3494_v61  ;;  %v2033_v3 = vadd.f32 %v5845_v60, %v2032_v1  ;;  %v2223_v4 = vadd.f32 %v5845_v60, %v2222_v2  ;;  %v1654_v5 = vpop.f32.mrf.mxu0  ;;  %v1844_v6 = vpop.f32.mrf.mxu1 }
 0x1bb   :  { %3572 = vst.msk [vmem:[%s6946_s3 + $0x98] sm:$0xf] %vm3533_vm3, %v3267_v62  ;;  %v1655_v7 = vadd.f32 %v5845_v60, %v1654_v5  ;;  %v1845_v8 = vadd.f32 %v5845_v60, %v1844_v6  ;;  %v4673_v5 = vld [vmem:[%s6944_s0 + $0x218] sm:$0xff] }
 0x1bc   :  { %3648 = vst.msk [vmem:[%s6946_s3 + $0x1c8] sm:$0xf] %vm3533_vm3, %v3343_v0  ;;  %vm2507_vm1 = vcmp.ge.f32.partialorder %v2033_v3, 0.0  ;;  %v2811_v9 = vmul.f32 0.2, %v2033_v3  ;;  %vm2583_vm2 = vcmp.ge.f32.partialorder %v2223_v4, 0.0 }
 0x1bd   :  { %v2887_v10 = vmul.f32 0.2, %v2223_v4  ;;  %vm2356_vm4 = vcmp.ge.f32.partialorder %v1655_v7, 0.0  ;;  %v2660_v11 = vmul.f32 0.2, %v1655_v7  ;;  %vm2432_vm5 = vcmp.ge.f32.partialorder %v1845_v8, 0.0 }
 0x1be   :  { %v3115_v12 = vsel %vm2507_vm1, %v2033_v3, %v2811_v9  ;;  %v2736_v13 = vmul.f32 0.2, %v1845_v8 }
 0x1bf   :  { %v3419_v33 = vpack.c.bf16 %v3115_v12, %v3115_v12  ;;  %v3191_v14 = vsel %vm2583_vm2, %v2223_v4, %v2887_v10  ;;  %v2964_v15 = vsel %vm2356_vm4, %v1655_v7, %v2660_v11  ;;  %v4635_v4 = vld [vmem:[%s6944_s0 + $0xe8] sm:$0xff]  ;;  %v4749_v11 = vld [vmem:[%s6944_s0 + $0x478] sm:$0xff] }
 0x1c0   :  { %v3495_v16 = vpack.c.bf16 %v3191_v14, %v3191_v14  ;;  %v3268_v17 = vpack.c.bf16 %v2964_v15, %v2964_v15  ;;  %v3040_v18 = vsel %vm2432_vm5, %v1845_v8, %v2736_v13  ;;  %v4711_v10 = vld [vmem:[%s6944_s0 + $0x348] sm:$0xff] }
 0x1c1   :  { %3724 = vst.msk [vmem:[%s6946_s3 + $0x2f8] sm:$0xf] %vm3533_vm3, %v3419_v33  ;;  %v3344_v19 = vpack.c.bf16 %v3040_v18, %v3040_v18  ;;  %v2034_v20 = vpop.f32.mrf.mxu2  ;;  %v2224_v21 = vpop.f32.mrf.mxu3 }
 0x1c2   :  { %3800 = vst.msk [vmem:[%s6946_s3 + $0x428] sm:$0xf] %vm3533_vm3, %v3495_v16  ;;  %v2035_v25 = vadd.f32 %v5845_v60, %v2034_v20  ;;  %v2225_v26 = vadd.f32 %v5845_v60, %v2224_v21  ;;  %v1657_v27 = vpop.f32.mrf.mxu0  ;;  %v1847_v28 = vpop.f32.mrf.mxu1 }
 0x1c3   :  { %3573 = vst.msk [vmem:[%s6946_s3 + $0x9c] sm:$0xf] %vm3533_vm3, %v3268_v17  ;;  %v1658_v31 = vadd.f32 %v5845_v60, %v1657_v27  ;;  %v1848_v32 = vadd.f32 %v5845_v60, %v1847_v28 }
 0x1c4   :  { %3649 = vst.msk [vmem:[%s6946_s3 + $0x1cc] sm:$0xf] %vm3533_vm3, %v3344_v19  ;;  %vm2508_vm6 = vcmp.ge.f32.partialorder %v2035_v25, 0.0  ;;  %v2812_v34 = vmul.f32 0.2, %v2035_v25  ;;  %vm2584_vm7 = vcmp.ge.f32.partialorder %v2225_v26, 0.0 }
 0x1c5   :  { %v2888_v35 = vmul.f32 0.2, %v2225_v26  ;;  %vm2357_vm8 = vcmp.ge.f32.partialorder %v1658_v31, 0.0  ;;  %v2661_v36 = vmul.f32 0.2, %v1658_v31  ;;  %vm2433_vm9 = vcmp.ge.f32.partialorder %v1848_v32, 0.0  ;;  %4482 = vmatmul.msk.bf16.gmra.mxu0 %vm1091_vm0, %v4634_v23  ;;  %4520 = vmatmul.msk.bf16.gmra.mxu1 %vm1091_vm0, %v4672_v24 }
 0x1c6   :  { %v3116_v37 = vsel %vm2508_vm6, %v2035_v25, %v2812_v34  ;;  %v2737_v38 = vmul.f32 0.2, %v1848_v32  ;;  %4558 = vmatmul.msk.bf16.gmra.mxu2 %vm1091_vm0, %v4710_v29  ;;  %4596 = vmatmul.msk.bf16.gmra.mxu3 %vm1091_vm0, %v4748_v30 }
 0x1c7   :  { %v3420_v39 = vpack.c.bf16 %v3116_v37, %v3116_v37  ;;  %v3192_v40 = vsel %vm2584_vm7, %v2225_v26, %v2888_v35  ;;  %v2965_v41 = vsel %vm2357_vm8, %v1658_v31, %v2661_v36 }
 0x1c8   :  { %v3496_v42 = vpack.c.bf16 %v3192_v40, %v3192_v40  ;;  %v3269_v43 = vpack.c.bf16 %v2965_v41, %v2965_v41  ;;  %v3041_v44 = vsel %vm2433_vm9, %v1848_v32, %v2737_v38 }
 0x1c9   :  { %3725 = vst.msk [vmem:[%s6946_s3 + $0x2fc] sm:$0xf] %vm3533_vm3, %v3420_v39  ;;  %v3345_v45 = vpack.c.bf16 %v3041_v44, %v3041_v44  ;;  %v2037_v46 = vpop.f32.mrf.mxu2  ;;  %v2227_v47 = vpop.f32.mrf.mxu3 }
 0x1ca   :  { %3801 = vst.msk [vmem:[%s6946_s3 + $0x42c] sm:$0xf] %vm3533_vm3, %v3496_v42  ;;  %v2038_v48 = vadd.f32 %v5845_v60, %v2037_v46  ;;  %v2228_v49 = vadd.f32 %v5845_v60, %v2227_v47  ;;  %v1659_v50 = vpop.f32.mrf.mxu0  ;;  %v1849_v51 = vpop.f32.mrf.mxu1 }
 0x1cb   :  { %3574 = vst.msk [vmem:[%s6946_s3 + $0xa0] sm:$0xf] %vm3533_vm3, %v3269_v43  ;;  %v1660_v22 = vadd.f32 %v5845_v60, %v1659_v50  ;;  %v1850_v52 = vadd.f32 %v5845_v60, %v1849_v51  ;;  %v4674_v50 = vld [vmem:[%s6944_s0 + $0x220] sm:$0xff] }
 0x1cc   :  { %3650 = vst.msk [vmem:[%s6946_s3 + $0x1d0] sm:$0xf] %vm3533_vm3, %v3345_v45  ;;  %vm2509_vm10 = vcmp.ge.f32.partialorder %v2038_v48, 0.0  ;;  %v2813_v53 = vmul.f32 0.2, %v2038_v48  ;;  %vm2585_vm11 = vcmp.ge.f32.partialorder %v2228_v49, 0.0 }
 0x1cd   :  { %v2889_v54 = vmul.f32 0.2, %v2228_v49  ;;  %vm2358_vm12 = vcmp.ge.f32.partialorder %v1660_v22, 0.0  ;;  %v2662_v55 = vmul.f32 0.2, %v1660_v22  ;;  %vm2434_vm13 = vcmp.ge.f32.partialorder %v1850_v52, 0.0 }
 0x1ce   :  { %v3117_v56 = vsel %vm2509_vm10, %v2038_v48, %v2813_v53  ;;  %v2738_v57 = vmul.f32 0.2, %v1850_v52 }
 0x1cf   :  { %v3421_v58 = vpack.c.bf16 %v3117_v56, %v3117_v56  ;;  %v3193_v59 = vsel %vm2585_vm11, %v2228_v49, %v2889_v54  ;;  %v2966_v61 = vsel %vm2358_vm12, %v1660_v22, %v2662_v55  ;;  %v4636_v49 = vld [vmem:[%s6944_s0 + $0xf0] sm:$0xff]  ;;  %v4750_v55 = vld [vmem:[%s6944_s0 + $0x480] sm:$0xff] }
 0x1d0   :  { %v3497_v62 = vpack.c.bf16 %v3193_v59, %v3193_v59  ;;  %v3270_v63 = vpack.c.bf16 %v2966_v61, %v2966_v61  ;;  %v3042_v0 = vsel %vm2434_vm13, %v1850_v52, %v2738_v57  ;;  %v4712_v54 = vld [vmem:[%s6944_s0 + $0x350] sm:$0xff] }
 0x1d1   :  { %3726 = vst.msk [vmem:[%s6946_s3 + $0x300] sm:$0xf] %vm3533_vm3, %v3421_v58  ;;  %v3346_v1 = vpack.c.bf16 %v3042_v0, %v3042_v0  ;;  %v2039_v2 = vpop.f32.mrf.mxu2  ;;  %v2229_v3 = vpop.f32.mrf.mxu3 }
 0x1d2   :  { %3802 = vst.msk [vmem:[%s6946_s3 + $0x430] sm:$0xf] %vm3533_vm3, %v3497_v62  ;;  %v2040_v6 = vadd.f32 %v5845_v60, %v2039_v2  ;;  %v2230_v7 = vadd.f32 %v5845_v60, %v2229_v3  ;;  %v1662_v8 = vpop.f32.mrf.mxu0  ;;  %v1852_v9 = vpop.f32.mrf.mxu1 }
 0x1d3   :  { %3575 = vst.msk [vmem:[%s6946_s3 + $0xa4] sm:$0xf] %vm3533_vm3, %v3270_v63  ;;  %v1663_v12 = vadd.f32 %v5845_v60, %v1662_v8  ;;  %v1853_v13 = vadd.f32 %v5845_v60, %v1852_v9 }
 0x1d4   :  { %3651 = vst.msk [vmem:[%s6946_s3 + $0x1d4] sm:$0xf] %vm3533_vm3, %v3346_v1  ;;  %vm2510_vm14 = vcmp.ge.f32.partialorder %v2040_v6, 0.0  ;;  %v2814_v33 = vmul.f32 0.2, %v2040_v6  ;;  %vm2586_vm15 = vcmp.ge.f32.partialorder %v2230_v7, 0.0 }
 0x1d5   :  { %v2890_v14 = vmul.f32 0.2, %v2230_v7  ;;  %vm2359_vm1 = vcmp.ge.f32.partialorder %v1663_v12, 0.0  ;;  %v2663_v15 = vmul.f32 0.2, %v1663_v12  ;;  %vm2435_vm2 = vcmp.ge.f32.partialorder %v1853_v13, 0.0  ;;  %4483 = vmatmul.msk.bf16.gmra.mxu0 %vm1091_vm0, %v4635_v4  ;;  %4521 = vmatmul.msk.bf16.gmra.mxu1 %vm1091_vm0, %v4673_v5 }
 0x1d6   :  { %v3118_v16 = vsel %vm2510_vm14, %v2040_v6, %v2814_v33  ;;  %v2739_v17 = vmul.f32 0.2, %v1853_v13  ;;  %4559 = vmatmul.msk.bf16.gmra.mxu2 %vm1091_vm0, %v4711_v10  ;;  %4597 = vmatmul.msk.bf16.gmra.mxu3 %vm1091_vm0, %v4749_v11 }
 0x1d7   :  { %v3422_v18 = vpack.c.bf16 %v3118_v16, %v3118_v16  ;;  %v3194_v19 = vsel %vm2586_vm15, %v2230_v7, %v2890_v14  ;;  %v2967_v20 = vsel %vm2359_vm1, %v1663_v12, %v2663_v15 }
 0x1d8   :  { %v3498_v21 = vpack.c.bf16 %v3194_v19, %v3194_v19  ;;  %v3271_v23 = vpack.c.bf16 %v2967_v20, %v2967_v20  ;;  %v3043_v24 = vsel %vm2435_vm2, %v1853_v13, %v2739_v17 }
 0x1d9   :  { %3727 = vst.msk [vmem:[%s6946_s3 + $0x304] sm:$0xf] %vm3533_vm3, %v3422_v18  ;;  %v3347_v25 = vpack.c.bf16 %v3043_v24, %v3043_v24  ;;  %v2042_v26 = vpop.f32.mrf.mxu2  ;;  %v2232_v27 = vpop.f32.mrf.mxu3 }
 0x1da   :  { %3803 = vst.msk [vmem:[%s6946_s3 + $0x434] sm:$0xf] %vm3533_vm3, %v3498_v21  ;;  %v2043_v28 = vadd.f32 %v5845_v60, %v2042_v26  ;;  %v2233_v29 = vadd.f32 %v5845_v60, %v2232_v27  ;;  %v1664_v30 = vpop.f32.mrf.mxu0  ;;  %v1854_v31 = vpop.f32.mrf.mxu1 }
 0x1db   :  { %3576 = vst.msk [vmem:[%s6946_s3 + $0xa8] sm:$0xf] %vm3533_vm3, %v3271_v23  ;;  %v1665_v32 = vadd.f32 %v5845_v60, %v1664_v30  ;;  %v1855_v34 = vadd.f32 %v5845_v60, %v1854_v31  ;;  %v4675_v30 = vld [vmem:[%s6944_s0 + $0x228] sm:$0xff] }
 0x1dc   :  { %3652 = vst.msk [vmem:[%s6946_s3 + $0x1d8] sm:$0xf] %vm3533_vm3, %v3347_v25  ;;  %vm2511_vm4 = vcmp.ge.f32.partialorder %v2043_v28, 0.0  ;;  %v2815_v35 = vmul.f32 0.2, %v2043_v28  ;;  %vm2587_vm5 = vcmp.ge.f32.partialorder %v2233_v29, 0.0 }
 0x1dd   :  { %v2891_v36 = vmul.f32 0.2, %v2233_v29  ;;  %vm2360_vm6 = vcmp.ge.f32.partialorder %v1665_v32, 0.0  ;;  %v2664_v37 = vmul.f32 0.2, %v1665_v32  ;;  %vm2436_vm7 = vcmp.ge.f32.partialorder %v1855_v34, 0.0 }
 0x1de   :  { %v3119_v38 = vsel %vm2511_vm4, %v2043_v28, %v2815_v35  ;;  %v2740_v39 = vmul.f32 0.2, %v1855_v34 }
 0x1df   :  { %v3423_v40 = vpack.c.bf16 %v3119_v38, %v3119_v38  ;;  %v3195_v41 = vsel %vm2587_vm5, %v2233_v29, %v2891_v36  ;;  %v2968_v42 = vsel %vm2360_vm6, %v1665_v32, %v2664_v37  ;;  %v4637_v29 = vld [vmem:[%s6944_s0 + $0xf8] sm:$0xff]  ;;  %v4751_v37 = vld [vmem:[%s6944_s0 + $0x488] sm:$0xff] }
 0x1e0   :  { %v3499_v43 = vpack.c.bf16 %v3195_v41, %v3195_v41  ;;  %v3272_v44 = vpack.c.bf16 %v2968_v42, %v2968_v42  ;;  %v3044_v45 = vsel %vm2436_vm7, %v1855_v34, %v2740_v39  ;;  %v4713_v36 = vld [vmem:[%s6944_s0 + $0x358] sm:$0xff] }
 0x1e1   :  { %3728 = vst.msk [vmem:[%s6946_s3 + $0x308] sm:$0xf] %vm3533_vm3, %v3423_v40  ;;  %v3348_v46 = vpack.c.bf16 %v3044_v45, %v3044_v45  ;;  %v2044_v47 = vpop.f32.mrf.mxu2  ;;  %v2234_v48 = vpop.f32.mrf.mxu3 }
 0x1e2   :  { %3804 = vst.msk [vmem:[%s6946_s3 + $0x438] sm:$0xf] %vm3533_vm3, %v3499_v43  ;;  %v2045_v51 = vadd.f32 %v5845_v60, %v2044_v47  ;;  %v2235_v22 = vadd.f32 %v5845_v60, %v2234_v48  ;;  %v1667_v52 = vpop.f32.mrf.mxu0  ;;  %v1857_v53 = vpop.f32.mrf.mxu1 }
 0x1e3   :  { %3577 = vst.msk [vmem:[%s6946_s3 + $0xac] sm:$0xf] %vm3533_vm3, %v3272_v44  ;;  %v1668_v56 = vadd.f32 %v5845_v60, %v1667_v52  ;;  %v1858_v57 = vadd.f32 %v5845_v60, %v1857_v53 }
 0x1e4   :  { %3653 = vst.msk [vmem:[%s6946_s3 + $0x1dc] sm:$0xf] %vm3533_vm3, %v3348_v46  ;;  %vm2512_vm8 = vcmp.ge.f32.partialorder %v2045_v51, 0.0  ;;  %v2816_v58 = vmul.f32 0.2, %v2045_v51  ;;  %vm2588_vm9 = vcmp.ge.f32.partialorder %v2235_v22, 0.0 }
 0x1e5   :  { %v2892_v59 = vmul.f32 0.2, %v2235_v22  ;;  %vm2361_vm10 = vcmp.ge.f32.partialorder %v1668_v56, 0.0  ;;  %v2665_v61 = vmul.f32 0.2, %v1668_v56  ;;  %vm2437_vm11 = vcmp.ge.f32.partialorder %v1858_v57, 0.0  ;;  %4484 = vmatmul.msk.bf16.gmra.mxu0 %vm1091_vm0, %v4636_v49  ;;  %4522 = vmatmul.msk.bf16.gmra.mxu1 %vm1091_vm0, %v4674_v50 }
 0x1e6   :  { %v3120_v62 = vsel %vm2512_vm8, %v2045_v51, %v2816_v58  ;;  %v2741_v63 = vmul.f32 0.2, %v1858_v57  ;;  %4560 = vmatmul.msk.bf16.gmra.mxu2 %vm1091_vm0, %v4712_v54  ;;  %4598 = vmatmul.msk.bf16.gmra.mxu3 %vm1091_vm0, %v4750_v55 }
 0x1e7   :  { %v3424_v0 = vpack.c.bf16 %v3120_v62, %v3120_v62  ;;  %v3196_v1 = vsel %vm2588_vm9, %v2235_v22, %v2892_v59  ;;  %v2969_v2 = vsel %vm2361_vm10, %v1668_v56, %v2665_v61 }
 0x1e8   :  { %v3500_v3 = vpack.c.bf16 %v3196_v1, %v3196_v1  ;;  %v3273_v4 = vpack.c.bf16 %v2969_v2, %v2969_v2  ;;  %v3045_v5 = vsel %vm2437_vm11, %v1858_v57, %v2741_v63 }
 0x1e9   :  { %3729 = vst.msk [vmem:[%s6946_s3 + $0x30c] sm:$0xf] %vm3533_vm3, %v3424_v0  ;;  %v3349_v6 = vpack.c.bf16 %v3045_v5, %v3045_v5  ;;  %v2047_v7 = vpop.f32.mrf.mxu2  ;;  %v2237_v8 = vpop.f32.mrf.mxu3 }
 0x1ea   :  { %3805 = vst.msk [vmem:[%s6946_s3 + $0x43c] sm:$0xf] %vm3533_vm3, %v3500_v3  ;;  %v2048_v9 = vadd.f32 %v5845_v60, %v2047_v7  ;;  %v2238_v10 = vadd.f32 %v5845_v60, %v2237_v8  ;;  %v1669_v11 = vpop.f32.mrf.mxu0  ;;  %v1859_v12 = vpop.f32.mrf.mxu1 }
 0x1eb   :  { %3578 = vst.msk [vmem:[%s6946_s3 + $0xb0] sm:$0xf] %vm3533_vm3, %v3273_v4  ;;  %v1670_v13 = vadd.f32 %v5845_v60, %v1669_v11  ;;  %v1860_v33 = vadd.f32 %v5845_v60, %v1859_v12  ;;  %v4676_v11 = vld [vmem:[%s6944_s0 + $0x230] sm:$0xff] }
 0x1ec   :  { %3654 = vst.msk [vmem:[%s6946_s3 + $0x1e0] sm:$0xf] %vm3533_vm3, %v3349_v6  ;;  %vm2513_vm12 = vcmp.ge.f32.partialorder %v2048_v9, 0.0  ;;  %v2817_v14 = vmul.f32 0.2, %v2048_v9  ;;  %vm2589_vm13 = vcmp.ge.f32.partialorder %v2238_v10, 0.0 }
 0x1ed   :  { %v2893_v15 = vmul.f32 0.2, %v2238_v10  ;;  %vm2362_vm14 = vcmp.ge.f32.partialorder %v1670_v13, 0.0  ;;  %v2666_v16 = vmul.f32 0.2, %v1670_v13  ;;  %vm2438_vm15 = vcmp.ge.f32.partialorder %v1860_v33, 0.0 }
 0x1ee   :  { %v3121_v17 = vsel %vm2513_vm12, %v2048_v9, %v2817_v14  ;;  %v2742_v18 = vmul.f32 0.2, %v1860_v33 }
 0x1ef   :  { %v3425_v19 = vpack.c.bf16 %v3121_v17, %v3121_v17  ;;  %v3197_v20 = vsel %vm2589_vm13, %v2238_v10, %v2893_v15  ;;  %v2970_v21 = vsel %vm2362_vm14, %v1670_v13, %v2666_v16  ;;  %v4638_v10 = vld [vmem:[%s6944_s0 + $0x100] sm:$0xff]  ;;  %v4752_v16 = vld [vmem:[%s6944_s0 + $0x490] sm:$0xff] }
 0x1f0   :  { %v3501_v23 = vpack.c.bf16 %v3197_v20, %v3197_v20  ;;  %v3274_v24 = vpack.c.bf16 %v2970_v21, %v2970_v21  ;;  %v3046_v25 = vsel %vm2438_vm15, %v1860_v33, %v2742_v18  ;;  %v4714_v15 = vld [vmem:[%s6944_s0 + $0x360] sm:$0xff] }
 0x1f1   :  { %3730 = vst.msk [vmem:[%s6946_s3 + $0x310] sm:$0xf] %vm3533_vm3, %v3425_v19  ;;  %v3350_v26 = vpack.c.bf16 %v3046_v25, %v3046_v25  ;;  %v2049_v27 = vpop.f32.mrf.mxu2  ;;  %v2239_v28 = vpop.f32.mrf.mxu3 }
 0x1f2   :  { %3806 = vst.msk [vmem:[%s6946_s3 + $0x440] sm:$0xf] %vm3533_vm3, %v3501_v23  ;;  %v2050_v31 = vadd.f32 %v5845_v60, %v2049_v27  ;;  %v2240_v32 = vadd.f32 %v5845_v60, %v2239_v28  ;;  %v1672_v34 = vpop.f32.mrf.mxu0  ;;  %v1862_v35 = vpop.f32.mrf.mxu1 }
 0x1f3   :  { %3579 = vst.msk [vmem:[%s6946_s3 + $0xb4] sm:$0xf] %vm3533_vm3, %v3274_v24  ;;  %v1673_v38 = vadd.f32 %v5845_v60, %v1672_v34  ;;  %v1863_v39 = vadd.f32 %v5845_v60, %v1862_v35  ;;  %v6298_v34 = vld [vmem:[%s6945_s2] ss:$0 sm:$0xff] }
 0x1f4   :  { %3655 = vst.msk [vmem:[%s6946_s3 + $0x1e4] sm:$0xf] %vm3533_vm3, %v3350_v26  ;;  %vm2514_vm1 = vcmp.ge.f32.partialorder %v2050_v31, 0.0  ;;  %v2818_v40 = vmul.f32 0.2, %v2050_v31  ;;  %vm2590_vm2 = vcmp.ge.f32.partialorder %v2240_v32, 0.0 }
 0x1f5   :  { %v2894_v41 = vmul.f32 0.2, %v2240_v32  ;;  %vm2363_vm4 = vcmp.ge.f32.partialorder %v1673_v38, 0.0  ;;  %v2667_v42 = vmul.f32 0.2, %v1673_v38  ;;  %vm2439_vm5 = vcmp.ge.f32.partialorder %v1863_v39, 0.0  ;;  %4485 = vmatmul.msk.bf16.gmra.mxu0 %vm1091_vm0, %v4637_v29  ;;  %4523 = vmatmul.msk.bf16.gmra.mxu1 %vm1091_vm0, %v4675_v30 }
 0x1f6   :  { %v3122_v43 = vsel %vm2514_vm1, %v2050_v31, %v2818_v40  ;;  %v2743_v44 = vmul.f32 0.2, %v1863_v39  ;;  %4561 = vmatmul.msk.bf16.gmra.mxu2 %vm1091_vm0, %v4713_v36  ;;  %4599 = vmatmul.msk.bf16.gmra.mxu3 %vm1091_vm0, %v4751_v37 }
 0x1f7   :  { %v3426_v45 = vpack.c.bf16 %v3122_v43, %v3122_v43  ;;  %v3198_v46 = vsel %vm2590_vm2, %v2240_v32, %v2894_v41  ;;  %v2971_v47 = vsel %vm2363_vm4, %v1673_v38, %v2667_v42 }
 0x1f8   :  { %v3502_v48 = vpack.c.bf16 %v3198_v46, %v3198_v46  ;;  %v3275_v49 = vpack.c.bf16 %v2971_v47, %v2971_v47  ;;  %v3047_v50 = vsel %vm2439_vm5, %v1863_v39, %v2743_v44 }
 0x1f9   :  { %3731 = vst.msk [vmem:[%s6946_s3 + $0x314] sm:$0xf] %vm3533_vm3, %v3426_v45  ;;  %v3351_v51 = vpack.c.bf16 %v3047_v50, %v3047_v50  ;;  %v2052_v22 = vpop.f32.mrf.mxu2  ;;  %v2242_v52 = vpop.f32.mrf.mxu3 }
 0x1fa   :  { %3807 = vst.msk [vmem:[%s6946_s3 + $0x444] sm:$0xf] %vm3533_vm3, %v3502_v48  ;;  %v2053_v53 = vadd.f32 %v5845_v60, %v2052_v22  ;;  %v2243_v54 = vadd.f32 %v5845_v60, %v2242_v52  ;;  %v1674_v55 = vpop.f32.mrf.mxu0  ;;  %v1864_v56 = vpop.f32.mrf.mxu1 }
 0x1fb   :  { %3580 = vst.msk [vmem:[%s6946_s3 + $0xb8] sm:$0xf] %vm3533_vm3, %v3275_v49  ;;  %v1675_v57 = vadd.f32 %v5845_v60, %v1674_v55  ;;  %v1865_v58 = vadd.f32 %v5845_v60, %v1864_v56  ;;  %v4677_v55 = vld [vmem:[%s6944_s0 + $0x238] sm:$0xff] }
 0x1fc   :  { %3656 = vst.msk [vmem:[%s6946_s3 + $0x1e8] sm:$0xf] %vm3533_vm3, %v3351_v51  ;;  %vm2515_vm6 = vcmp.ge.f32.partialorder %v2053_v53, 0.0  ;;  %v2819_v59 = vmul.f32 0.2, %v2053_v53  ;;  %vm2591_vm7 = vcmp.ge.f32.partialorder %v2243_v54, 0.0 }
 0x1fd   :  { %v2895_v61 = vmul.f32 0.2, %v2243_v54  ;;  %vm2364_vm8 = vcmp.ge.f32.partialorder %v1675_v57, 0.0  ;;  %v2668_v62 = vmul.f32 0.2, %v1675_v57  ;;  %vm2440_vm9 = vcmp.ge.f32.partialorder %v1865_v58, 0.0 }
 0x1fe   :  { %v3123_v63 = vsel %vm2515_vm6, %v2053_v53, %v2819_v59  ;;  %v2744_v0 = vmul.f32 0.2, %v1865_v58 }
 0x1ff   :  { %v3427_v1 = vpack.c.bf16 %v3123_v63, %v3123_v63  ;;  %v3199_v2 = vsel %vm2591_vm7, %v2243_v54, %v2895_v61  ;;  %v2972_v3 = vsel %vm2364_vm8, %v1675_v57, %v2668_v62  ;;  %v4639_v54 = vld [vmem:[%s6944_s0 + $0x108] sm:$0xff]  ;;  %v4753_v62 = vld [vmem:[%s6944_s0 + $0x498] sm:$0xff] }
 0x200   :  { %v3503_v4 = vpack.c.bf16 %v3199_v2, %v3199_v2  ;;  %v3276_v5 = vpack.c.bf16 %v2972_v3, %v2972_v3  ;;  %v3048_v6 = vsel %vm2440_vm9, %v1865_v58, %v2744_v0  ;;  %v4715_v61 = vld [vmem:[%s6944_s0 + $0x368] sm:$0xff] }
 0x201   :  { %3732 = vst.msk [vmem:[%s6946_s3 + $0x318] sm:$0xf] %vm3533_vm3, %v3427_v1  ;;  %v3352_v7 = vpack.c.bf16 %v3048_v6, %v3048_v6  ;;  %v2054_v8 = vpop.f32.mrf.mxu2  ;;  %v2244_v9 = vpop.f32.mrf.mxu3 }
 0x202   :  { %3808 = vst.msk [vmem:[%s6946_s3 + $0x448] sm:$0xf] %vm3533_vm3, %v3503_v4  ;;  %v2055_v12 = vadd.f32 %v5845_v60, %v2054_v8  ;;  %v2245_v13 = vadd.f32 %v5845_v60, %v2244_v9  ;;  %v1677_v33 = vpop.f32.mrf.mxu0  ;;  %v1867_v14 = vpop.f32.mrf.mxu1 }
 0x203   :  { %3581 = vst.msk [vmem:[%s6946_s3 + $0xbc] sm:$0xf] %vm3533_vm3, %v3276_v5  ;;  %v1678_v17 = vadd.f32 %v5845_v60, %v1677_v33  ;;  %v1868_v18 = vadd.f32 %v5845_v60, %v1867_v14 }
 0x204   :  { %3657 = vst.msk [vmem:[%s6946_s3 + $0x1ec] sm:$0xf] %vm3533_vm3, %v3352_v7  ;;  %vm2516_vm10 = vcmp.ge.f32.partialorder %v2055_v12, 0.0  ;;  %v2820_v19 = vmul.f32 0.2, %v2055_v12  ;;  %vm2592_vm11 = vcmp.ge.f32.partialorder %v2245_v13, 0.0 }
 0x205   :  { %v2896_v20 = vmul.f32 0.2, %v2245_v13  ;;  %vm2365_vm12 = vcmp.ge.f32.partialorder %v1678_v17, 0.0  ;;  %v2669_v21 = vmul.f32 0.2, %v1678_v17  ;;  %vm2441_vm13 = vcmp.ge.f32.partialorder %v1868_v18, 0.0  ;;  %4486 = vmatmul.msk.bf16.gmra.mxu0 %vm1091_vm0, %v4638_v10  ;;  %4524 = vmatmul.msk.bf16.gmra.mxu1 %vm1091_vm0, %v4676_v11 }
 0x206   :  { %v3124_v23 = vsel %vm2516_vm10, %v2055_v12, %v2820_v19  ;;  %v2745_v24 = vmul.f32 0.2, %v1868_v18  ;;  %4562 = vmatmul.msk.bf16.gmra.mxu2 %vm1091_vm0, %v4714_v15  ;;  %4600 = vmatmul.msk.bf16.gmra.mxu3 %vm1091_vm0, %v4752_v16 }
 0x207   :  { %v3428_v60 = vpack.c.bf16 %v3124_v23, %v3124_v23  ;;  %v3200_v25 = vsel %vm2592_vm11, %v2245_v13, %v2896_v20  ;;  %v2973_v26 = vsel %vm2365_vm12, %v1678_v17, %v2669_v21 }
 0x208   :  { %v3504_v27 = vpack.c.bf16 %v3200_v25, %v3200_v25  ;;  %v3277_v28 = vpack.c.bf16 %v2973_v26, %v2973_v26  ;;  %v3049_v29 = vsel %vm2441_vm13, %v1868_v18, %v2745_v24 }
 0x209   :  { %3733 = vst.msk [vmem:[%s6946_s3 + $0x31c] sm:$0xf] %vm3533_vm3, %v3428_v60  ;;  %v3353_v30 = vpack.c.bf16 %v3049_v29, %v3049_v29  ;;  %v2057_v31 = vpop.f32.mrf.mxu2  ;;  %v2247_v32 = vpop.f32.mrf.mxu3 }
 0x20a   :  { %3809 = vst.msk [vmem:[%s6946_s3 + $0x44c] sm:$0xf] %vm3533_vm3, %v3504_v27  ;;  %v2058_v35 = vadd.f32 %v6298_v34, %v2057_v31  ;;  %v2248_v36 = vadd.f32 %v6298_v34, %v2247_v32  ;;  %v1679_v37 = vpop.f32.mrf.mxu0  ;;  %v1869_v38 = vpop.f32.mrf.mxu1 }
 0x20b   :  { %3582 = vst.msk [vmem:[%s6946_s3 + $0xc0] sm:$0xf] %vm3533_vm3, %v3277_v28  ;;  %v1680_v39 = vadd.f32 %v6298_v34, %v1679_v37  ;;  %v1870_v40 = vadd.f32 %v6298_v34, %v1869_v38  ;;  %v4678_v37 = vld [vmem:[%s6944_s0 + $0x240] sm:$0xff] }
 0x20c   :  { %3658 = vst.msk [vmem:[%s6946_s3 + $0x1f0] sm:$0xf] %vm3533_vm3, %v3353_v30  ;;  %vm2517_vm14 = vcmp.ge.f32.partialorder %v2058_v35, 0.0  ;;  %v2821_v41 = vmul.f32 0.2, %v2058_v35  ;;  %vm2593_vm15 = vcmp.ge.f32.partialorder %v2248_v36, 0.0 }
 0x20d   :  { %v2897_v42 = vmul.f32 0.2, %v2248_v36  ;;  %vm2366_vm1 = vcmp.ge.f32.partialorder %v1680_v39, 0.0  ;;  %v2670_v43 = vmul.f32 0.2, %v1680_v39  ;;  %vm2442_vm2 = vcmp.ge.f32.partialorder %v1870_v40, 0.0 }
 0x20e   :  { %v3125_v44 = vsel %vm2517_vm14, %v2058_v35, %v2821_v41  ;;  %v2746_v45 = vmul.f32 0.2, %v1870_v40 }
 0x20f   :  { %v3429_v46 = vpack.c.bf16 %v3125_v44, %v3125_v44  ;;  %v3201_v47 = vsel %vm2593_vm15, %v2248_v36, %v2897_v42  ;;  %v2974_v48 = vsel %vm2366_vm1, %v1680_v39, %v2670_v43  ;;  %v4640_v36 = vld [vmem:[%s6944_s0 + $0x110] sm:$0xff]  ;;  %v4754_v43 = vld [vmem:[%s6944_s0 + $0x4a0] sm:$0xff] }
 0x210   :  { %v3505_v49 = vpack.c.bf16 %v3201_v47, %v3201_v47  ;;  %v3278_v50 = vpack.c.bf16 %v2974_v48, %v2974_v48  ;;  %v3050_v51 = vsel %vm2442_vm2, %v1870_v40, %v2746_v45  ;;  %v4716_v42 = vld [vmem:[%s6944_s0 + $0x370] sm:$0xff] }
 0x211   :  { %3734 = vst.msk [vmem:[%s6946_s3 + $0x320] sm:$0xf] %vm3533_vm3, %v3429_v46  ;;  %v3354_v22 = vpack.c.bf16 %v3050_v51, %v3050_v51  ;;  %v2059_v52 = vpop.f32.mrf.mxu2  ;;  %v2249_v53 = vpop.f32.mrf.mxu3 }
 0x212   :  { %3810 = vst.msk [vmem:[%s6946_s3 + $0x450] sm:$0xf] %vm3533_vm3, %v3505_v49  ;;  %v2060_v56 = vadd.f32 %v6298_v34, %v2059_v52  ;;  %v2250_v57 = vadd.f32 %v6298_v34, %v2249_v53  ;;  %v1682_v58 = vpop.f32.mrf.mxu0  ;;  %v1872_v59 = vpop.f32.mrf.mxu1 }
 0x213   :  { %3583 = vst.msk [vmem:[%s6946_s3 + $0xc4] sm:$0xf] %vm3533_vm3, %v3278_v50  ;;  %v1683_v63 = vadd.f32 %v6298_v34, %v1682_v58  ;;  %v1873_v0 = vadd.f32 %v6298_v34, %v1872_v59 }
 0x214   :  { %3659 = vst.msk [vmem:[%s6946_s3 + $0x1f4] sm:$0xf] %vm3533_vm3, %v3354_v22  ;;  %vm2518_vm4 = vcmp.ge.f32.partialorder %v2060_v56, 0.0  ;;  %v2822_v1 = vmul.f32 0.2, %v2060_v56  ;;  %vm2594_vm5 = vcmp.ge.f32.partialorder %v2250_v57, 0.0 }
 0x215   :  { %v2898_v2 = vmul.f32 0.2, %v2250_v57  ;;  %vm2367_vm6 = vcmp.ge.f32.partialorder %v1683_v63, 0.0  ;;  %v2671_v3 = vmul.f32 0.2, %v1683_v63  ;;  %vm2443_vm7 = vcmp.ge.f32.partialorder %v1873_v0, 0.0  ;;  %4487 = vmatmul.msk.bf16.gmra.mxu0 %vm1091_vm0, %v4639_v54  ;;  %4525 = vmatmul.msk.bf16.gmra.mxu1 %vm1091_vm0, %v4677_v55 }
 0x216   :  { %v3126_v4 = vsel %vm2518_vm4, %v2060_v56, %v2822_v1  ;;  %v2747_v5 = vmul.f32 0.2, %v1873_v0  ;;  %4563 = vmatmul.msk.bf16.gmra.mxu2 %vm1091_vm0, %v4715_v61  ;;  %4601 = vmatmul.msk.bf16.gmra.mxu3 %vm1091_vm0, %v4753_v62 }
 0x217   :  { %v3430_v6 = vpack.c.bf16 %v3126_v4, %v3126_v4  ;;  %v3202_v7 = vsel %vm2594_vm5, %v2250_v57, %v2898_v2  ;;  %v2975_v8 = vsel %vm2367_vm6, %v1683_v63, %v2671_v3 }
 0x218   :  { %v3506_v9 = vpack.c.bf16 %v3202_v7, %v3202_v7  ;;  %v3279_v10 = vpack.c.bf16 %v2975_v8, %v2975_v8  ;;  %v3051_v11 = vsel %vm2443_vm7, %v1873_v0, %v2747_v5 }
 0x219   :  { %3735 = vst.msk [vmem:[%s6946_s3 + $0x324] sm:$0xf] %vm3533_vm3, %v3430_v6  ;;  %v3355_v12 = vpack.c.bf16 %v3051_v11, %v3051_v11  ;;  %v2062_v13 = vpop.f32.mrf.mxu2  ;;  %v2252_v33 = vpop.f32.mrf.mxu3 }
 0x21a   :  { %3811 = vst.msk [vmem:[%s6946_s3 + $0x454] sm:$0xf] %vm3533_vm3, %v3506_v9  ;;  %v2063_v14 = vadd.f32 %v6298_v34, %v2062_v13  ;;  %v2253_v15 = vadd.f32 %v6298_v34, %v2252_v33  ;;  %v1684_v16 = vpop.f32.mrf.mxu0  ;;  %v1874_v17 = vpop.f32.mrf.mxu1 }
 0x21b   :  { %3584 = vst.msk [vmem:[%s6946_s3 + $0xc8] sm:$0xf] %vm3533_vm3, %v3279_v10  ;;  %v1685_v18 = vadd.f32 %v6298_v34, %v1684_v16  ;;  %v1875_v19 = vadd.f32 %v6298_v34, %v1874_v17  ;;  %v4679_v16 = vld [vmem:[%s6944_s0 + $0x248] sm:$0xff] }
 0x21c   :  { %3660 = vst.msk [vmem:[%s6946_s3 + $0x1f8] sm:$0xf] %vm3533_vm3, %v3355_v12  ;;  %vm2519_vm8 = vcmp.ge.f32.partialorder %v2063_v14, 0.0  ;;  %v2823_v20 = vmul.f32 0.2, %v2063_v14  ;;  %vm2595_vm9 = vcmp.ge.f32.partialorder %v2253_v15, 0.0 }
 0x21d   :  { %v2899_v21 = vmul.f32 0.2, %v2253_v15  ;;  %vm2368_vm10 = vcmp.ge.f32.partialorder %v1685_v18, 0.0  ;;  %v2672_v23 = vmul.f32 0.2, %v1685_v18  ;;  %vm2444_vm11 = vcmp.ge.f32.partialorder %v1875_v19, 0.0 }
 0x21e   :  { %v3127_v24 = vsel %vm2519_vm8, %v2063_v14, %v2823_v20  ;;  %v2748_v60 = vmul.f32 0.2, %v1875_v19 }
 0x21f   :  { %v3431_v25 = vpack.c.bf16 %v3127_v24, %v3127_v24  ;;  %v3203_v26 = vsel %vm2595_vm9, %v2253_v15, %v2899_v21  ;;  %v2976_v27 = vsel %vm2368_vm10, %v1685_v18, %v2672_v23  ;;  %v4641_v15 = vld [vmem:[%s6944_s0 + $0x118] sm:$0xff]  ;;  %v4755_v23 = vld [vmem:[%s6944_s0 + $0x4a8] sm:$0xff] }
 0x220   :  { %v3507_v28 = vpack.c.bf16 %v3203_v26, %v3203_v26  ;;  %v3280_v29 = vpack.c.bf16 %v2976_v27, %v2976_v27  ;;  %v3052_v30 = vsel %vm2444_vm11, %v1875_v19, %v2748_v60  ;;  %v4717_v21 = vld [vmem:[%s6944_s0 + $0x378] sm:$0xff] }
 0x221   :  { %3736 = vst.msk [vmem:[%s6946_s3 + $0x328] sm:$0xf] %vm3533_vm3, %v3431_v25  ;;  %v3356_v31 = vpack.c.bf16 %v3052_v30, %v3052_v30  ;;  %v2064_v32 = vpop.f32.mrf.mxu2  ;;  %v2254_v35 = vpop.f32.mrf.mxu3 }
 0x222   :  { %3812 = vst.msk [vmem:[%s6946_s3 + $0x458] sm:$0xf] %vm3533_vm3, %v3507_v28  ;;  %v2065_v38 = vadd.f32 %v6298_v34, %v2064_v32  ;;  %v2255_v39 = vadd.f32 %v6298_v34, %v2254_v35  ;;  %v1687_v40 = vpop.f32.mrf.mxu0  ;;  %v1877_v41 = vpop.f32.mrf.mxu1 }
 0x223   :  { %3585 = vst.msk [vmem:[%s6946_s3 + $0xcc] sm:$0xf] %vm3533_vm3, %v3280_v29  ;;  %v1688_v44 = vadd.f32 %v6298_v34, %v1687_v40  ;;  %v1878_v45 = vadd.f32 %v6298_v34, %v1877_v41 }
 0x224   :  { %3661 = vst.msk [vmem:[%s6946_s3 + $0x1fc] sm:$0xf] %vm3533_vm3, %v3356_v31  ;;  %vm2520_vm12 = vcmp.ge.f32.partialorder %v2065_v38, 0.0  ;;  %v2824_v46 = vmul.f32 0.2, %v2065_v38  ;;  %vm2596_vm13 = vcmp.ge.f32.partialorder %v2255_v39, 0.0 }
 0x225   :  { %v2900_v47 = vmul.f32 0.2, %v2255_v39  ;;  %vm2369_vm14 = vcmp.ge.f32.partialorder %v1688_v44, 0.0  ;;  %v2673_v48 = vmul.f32 0.2, %v1688_v44  ;;  %vm2445_vm15 = vcmp.ge.f32.partialorder %v1878_v45, 0.0  ;;  %4488 = vmatmul.msk.bf16.gmra.mxu0 %vm1091_vm0, %v4640_v36  ;;  %4526 = vmatmul.msk.bf16.gmra.mxu1 %vm1091_vm0, %v4678_v37 }
 0x226   :  { %v3128_v49 = vsel %vm2520_vm12, %v2065_v38, %v2824_v46  ;;  %v2749_v50 = vmul.f32 0.2, %v1878_v45  ;;  %4564 = vmatmul.msk.bf16.gmra.mxu2 %vm1091_vm0, %v4716_v42  ;;  %4602 = vmatmul.msk.bf16.gmra.mxu3 %vm1091_vm0, %v4754_v43 }
 0x227   :  { %v3432_v51 = vpack.c.bf16 %v3128_v49, %v3128_v49  ;;  %v3204_v22 = vsel %vm2596_vm13, %v2255_v39, %v2900_v47  ;;  %v2977_v52 = vsel %vm2369_vm14, %v1688_v44, %v2673_v48 }
 0x228   :  { %v3508_v53 = vpack.c.bf16 %v3204_v22, %v3204_v22  ;;  %v3281_v54 = vpack.c.bf16 %v2977_v52, %v2977_v52  ;;  %v3053_v55 = vsel %vm2445_vm15, %v1878_v45, %v2749_v50 }
 0x229   :  { %3737 = vst.msk [vmem:[%s6946_s3 + $0x32c] sm:$0xf] %vm3533_vm3, %v3432_v51  ;;  %v3357_v56 = vpack.c.bf16 %v3053_v55, %v3053_v55  ;;  %v2067_v57 = vpop.f32.mrf.mxu2  ;;  %v2257_v58 = vpop.f32.mrf.mxu3 }
 0x22a   :  { %3813 = vst.msk [vmem:[%s6946_s3 + $0x45c] sm:$0xf] %vm3533_vm3, %v3508_v53  ;;  %v2068_v59 = vadd.f32 %v6298_v34, %v2067_v57  ;;  %v2258_v61 = vadd.f32 %v6298_v34, %v2257_v58  ;;  %v1689_v62 = vpop.f32.mrf.mxu0  ;;  %v1879_v63 = vpop.f32.mrf.mxu1 }
 0x22b   :  { %3586 = vst.msk [vmem:[%s6946_s3 + $0xd0] sm:$0xf] %vm3533_vm3, %v3281_v54  ;;  %v1690_v0 = vadd.f32 %v6298_v34, %v1689_v62  ;;  %v1880_v1 = vadd.f32 %v6298_v34, %v1879_v63  ;;  %v4680_v62 = vld [vmem:[%s6944_s0 + $0x250] sm:$0xff] }
 0x22c   :  { %3662 = vst.msk [vmem:[%s6946_s3 + $0x200] sm:$0xf] %vm3533_vm3, %v3357_v56  ;;  %vm2521_vm1 = vcmp.ge.f32.partialorder %v2068_v59, 0.0  ;;  %v2825_v2 = vmul.f32 0.2, %v2068_v59  ;;  %vm2597_vm2 = vcmp.ge.f32.partialorder %v2258_v61, 0.0 }
 0x22d   :  { %v2901_v3 = vmul.f32 0.2, %v2258_v61  ;;  %vm2370_vm4 = vcmp.ge.f32.partialorder %v1690_v0, 0.0  ;;  %v2674_v4 = vmul.f32 0.2, %v1690_v0  ;;  %vm2446_vm5 = vcmp.ge.f32.partialorder %v1880_v1, 0.0 }
 0x22e   :  { %v3129_v5 = vsel %vm2521_vm1, %v2068_v59, %v2825_v2  ;;  %v2750_v6 = vmul.f32 0.2, %v1880_v1 }
 0x22f   :  { %v3433_v7 = vpack.c.bf16 %v3129_v5, %v3129_v5  ;;  %v3205_v8 = vsel %vm2597_vm2, %v2258_v61, %v2901_v3  ;;  %v2978_v9 = vsel %vm2370_vm4, %v1690_v0, %v2674_v4  ;;  %v4642_v61 = vld [vmem:[%s6944_s0 + $0x120] sm:$0xff]  ;;  %v4756_v4 = vld [vmem:[%s6944_s0 + $0x4b0] sm:$0xff] }
 0x230   :  { %v3509_v10 = vpack.c.bf16 %v3205_v8, %v3205_v8  ;;  %v3282_v11 = vpack.c.bf16 %v2978_v9, %v2978_v9  ;;  %v3054_v12 = vsel %vm2446_vm5, %v1880_v1, %v2750_v6  ;;  %v4718_v3 = vld [vmem:[%s6944_s0 + $0x380] sm:$0xff] }
 0x231   :  { %3738 = vst.msk [vmem:[%s6946_s3 + $0x330] sm:$0xf] %vm3533_vm3, %v3433_v7  ;;  %v3358_v13 = vpack.c.bf16 %v3054_v12, %v3054_v12  ;;  %v2069_v33 = vpop.f32.mrf.mxu2  ;;  %v2259_v14 = vpop.f32.mrf.mxu3 }
 0x232   :  { %3814 = vst.msk [vmem:[%s6946_s3 + $0x460] sm:$0xf] %vm3533_vm3, %v3509_v10  ;;  %v2070_v17 = vadd.f32 %v6298_v34, %v2069_v33  ;;  %v2260_v18 = vadd.f32 %v6298_v34, %v2259_v14  ;;  %v1692_v19 = vpop.f32.mrf.mxu0  ;;  %v1882_v20 = vpop.f32.mrf.mxu1 }
 0x233   :  { %3587 = vst.msk [vmem:[%s6946_s3 + $0xd4] sm:$0xf] %vm3533_vm3, %v3282_v11  ;;  %v1693_v24 = vadd.f32 %v6298_v34, %v1692_v19  ;;  %v1883_v60 = vadd.f32 %v6298_v34, %v1882_v20 }
 0x234   :  { %3663 = vst.msk [vmem:[%s6946_s3 + $0x204] sm:$0xf] %vm3533_vm3, %v3358_v13  ;;  %vm2522_vm6 = vcmp.ge.f32.partialorder %v2070_v17, 0.0  ;;  %v2826_v25 = vmul.f32 0.2, %v2070_v17  ;;  %vm2598_vm7 = vcmp.ge.f32.partialorder %v2260_v18, 0.0 }
 0x235   :  { %v2902_v26 = vmul.f32 0.2, %v2260_v18  ;;  %vm2371_vm8 = vcmp.ge.f32.partialorder %v1693_v24, 0.0  ;;  %v2675_v27 = vmul.f32 0.2, %v1693_v24  ;;  %vm2447_vm9 = vcmp.ge.f32.partialorder %v1883_v60, 0.0  ;;  %4489 = vmatmul.msk.bf16.gmra.mxu0 %vm1091_vm0, %v4641_v15  ;;  %4527 = vmatmul.msk.bf16.gmra.mxu1 %vm1091_vm0, %v4679_v16 }
 0x236   :  { %v3130_v28 = vsel %vm2522_vm6, %v2070_v17, %v2826_v25  ;;  %v2751_v29 = vmul.f32 0.2, %v1883_v60  ;;  %4565 = vmatmul.msk.bf16.gmra.mxu2 %vm1091_vm0, %v4717_v21  ;;  %4603 = vmatmul.msk.bf16.gmra.mxu3 %vm1091_vm0, %v4755_v23 }
 0x237   :  { %v3434_v30 = vpack.c.bf16 %v3130_v28, %v3130_v28  ;;  %v3206_v31 = vsel %vm2598_vm7, %v2260_v18, %v2902_v26  ;;  %v2979_v32 = vsel %vm2371_vm8, %v1693_v24, %v2675_v27 }
 0x238   :  { %v3510_v35 = vpack.c.bf16 %v3206_v31, %v3206_v31  ;;  %v3283_v36 = vpack.c.bf16 %v2979_v32, %v2979_v32  ;;  %v3055_v37 = vsel %vm2447_vm9, %v1883_v60, %v2751_v29 }
 0x239   :  { %3739 = vst.msk [vmem:[%s6946_s3 + $0x334] sm:$0xf] %vm3533_vm3, %v3434_v30  ;;  %v3359_v38 = vpack.c.bf16 %v3055_v37, %v3055_v37  ;;  %v2072_v39 = vpop.f32.mrf.mxu2  ;;  %v2262_v40 = vpop.f32.mrf.mxu3 }
 0x23a   :  { %3815 = vst.msk [vmem:[%s6946_s3 + $0x464] sm:$0xf] %vm3533_vm3, %v3510_v35  ;;  %v2073_v41 = vadd.f32 %v6298_v34, %v2072_v39  ;;  %v2263_v42 = vadd.f32 %v6298_v34, %v2262_v40  ;;  %v1694_v43 = vpop.f32.mrf.mxu0  ;;  %v1884_v44 = vpop.f32.mrf.mxu1 }
 0x23b   :  { %3588 = vst.msk [vmem:[%s6946_s3 + $0xd8] sm:$0xf] %vm3533_vm3, %v3283_v36  ;;  %v1695_v45 = vadd.f32 %v6298_v34, %v1694_v43  ;;  %v1885_v46 = vadd.f32 %v6298_v34, %v1884_v44  ;;  %v4681_v43 = vld [vmem:[%s6944_s0 + $0x258] sm:$0xff] }
 0x23c   :  { %3664 = vst.msk [vmem:[%s6946_s3 + $0x208] sm:$0xf] %vm3533_vm3, %v3359_v38  ;;  %vm2523_vm10 = vcmp.ge.f32.partialorder %v2073_v41, 0.0  ;;  %v2827_v47 = vmul.f32 0.2, %v2073_v41  ;;  %vm2599_vm11 = vcmp.ge.f32.partialorder %v2263_v42, 0.0 }
 0x23d   :  { %v2903_v48 = vmul.f32 0.2, %v2263_v42  ;;  %vm2372_vm12 = vcmp.ge.f32.partialorder %v1695_v45, 0.0  ;;  %v2676_v49 = vmul.f32 0.2, %v1695_v45  ;;  %vm2448_vm13 = vcmp.ge.f32.partialorder %v1885_v46, 0.0 }
 0x23e   :  { %v3131_v50 = vsel %vm2523_vm10, %v2073_v41, %v2827_v47  ;;  %v2752_v51 = vmul.f32 0.2, %v1885_v46 }
 0x23f   :  { %v3435_v22 = vpack.c.bf16 %v3131_v50, %v3131_v50  ;;  %v3207_v52 = vsel %vm2599_vm11, %v2263_v42, %v2903_v48  ;;  %v2980_v53 = vsel %vm2372_vm12, %v1695_v45, %v2676_v49  ;;  %v4643_v42 = vld [vmem:[%s6944_s0 + $0x128] sm:$0xff]  ;;  %v4757_v49 = vld [vmem:[%s6944_s0 + $0x4b8] sm:$0xff] }
 0x240   :  { %v3511_v54 = vpack.c.bf16 %v3207_v52, %v3207_v52  ;;  %v3284_v55 = vpack.c.bf16 %v2980_v53, %v2980_v53  ;;  %v3056_v56 = vsel %vm2448_vm13, %v1885_v46, %v2752_v51  ;;  %v4719_v48 = vld [vmem:[%s6944_s0 + $0x388] sm:$0xff] }
 0x241   :  { %3740 = vst.msk [vmem:[%s6946_s3 + $0x338] sm:$0xf] %vm3533_vm3, %v3435_v22  ;;  %v3360_v57 = vpack.c.bf16 %v3056_v56, %v3056_v56  ;;  %v2074_v58 = vpop.f32.mrf.mxu2  ;;  %v2264_v59 = vpop.f32.mrf.mxu3 }
 0x242   :  { %3816 = vst.msk [vmem:[%s6946_s3 + $0x468] sm:$0xf] %vm3533_vm3, %v3511_v54  ;;  %v2075_v63 = vadd.f32 %v6298_v34, %v2074_v58  ;;  %v2265_v0 = vadd.f32 %v6298_v34, %v2264_v59  ;;  %v1697_v1 = vpop.f32.mrf.mxu0  ;;  %v1887_v2 = vpop.f32.mrf.mxu1 }
 0x243   :  { %3589 = vst.msk [vmem:[%s6946_s3 + $0xdc] sm:$0xf] %vm3533_vm3, %v3284_v55  ;;  %v1698_v5 = vadd.f32 %v6298_v34, %v1697_v1  ;;  %v1888_v6 = vadd.f32 %v6298_v34, %v1887_v2 }
 0x244   :  { %3665 = vst.msk [vmem:[%s6946_s3 + $0x20c] sm:$0xf] %vm3533_vm3, %v3360_v57  ;;  %vm2524_vm14 = vcmp.ge.f32.partialorder %v2075_v63, 0.0  ;;  %v2828_v7 = vmul.f32 0.2, %v2075_v63  ;;  %vm2600_vm15 = vcmp.ge.f32.partialorder %v2265_v0, 0.0 }
 0x245   :  { %v2904_v8 = vmul.f32 0.2, %v2265_v0  ;;  %vm2373_vm1 = vcmp.ge.f32.partialorder %v1698_v5, 0.0  ;;  %v2677_v9 = vmul.f32 0.2, %v1698_v5  ;;  %vm2449_vm2 = vcmp.ge.f32.partialorder %v1888_v6, 0.0  ;;  %4490 = vmatmul.msk.bf16.gmra.mxu0 %vm1091_vm0, %v4642_v61  ;;  %4528 = vmatmul.msk.bf16.gmra.mxu1 %vm1091_vm0, %v4680_v62 }
 0x246   :  { %v3132_v10 = vsel %vm2524_vm14, %v2075_v63, %v2828_v7  ;;  %v2753_v11 = vmul.f32 0.2, %v1888_v6  ;;  %4566 = vmatmul.msk.bf16.gmra.mxu2 %vm1091_vm0, %v4718_v3  ;;  %4604 = vmatmul.msk.bf16.gmra.mxu3 %vm1091_vm0, %v4756_v4 }
 0x247   :  { %v3436_v12 = vpack.c.bf16 %v3132_v10, %v3132_v10  ;;  %v3208_v13 = vsel %vm2600_vm15, %v2265_v0, %v2904_v8  ;;  %v2981_v33 = vsel %vm2373_vm1, %v1698_v5, %v2677_v9 }
 0x248   :  { %v3512_v14 = vpack.c.bf16 %v3208_v13, %v3208_v13  ;;  %v3285_v15 = vpack.c.bf16 %v2981_v33, %v2981_v33  ;;  %v3057_v16 = vsel %vm2449_vm2, %v1888_v6, %v2753_v11 }
 0x249   :  { %3741 = vst.msk [vmem:[%s6946_s3 + $0x33c] sm:$0xf] %vm3533_vm3, %v3436_v12  ;;  %v3361_v17 = vpack.c.bf16 %v3057_v16, %v3057_v16  ;;  %v2077_v18 = vpop.f32.mrf.mxu2  ;;  %v2267_v19 = vpop.f32.mrf.mxu3 }
 0x24a   :  { %3817 = vst.msk [vmem:[%s6946_s3 + $0x46c] sm:$0xf] %vm3533_vm3, %v3512_v14  ;;  %v2078_v20 = vadd.f32 %v6298_v34, %v2077_v18  ;;  %v2268_v21 = vadd.f32 %v6298_v34, %v2267_v19  ;;  %v1699_v23 = vpop.f32.mrf.mxu0  ;;  %v1889_v24 = vpop.f32.mrf.mxu1 }
 0x24b   :  { %3590 = vst.msk [vmem:[%s6946_s3 + $0xe0] sm:$0xf] %vm3533_vm3, %v3285_v15  ;;  %v1700_v60 = vadd.f32 %v6298_v34, %v1699_v23  ;;  %v1890_v25 = vadd.f32 %v6298_v34, %v1889_v24 }
 0x24c   :  { %3666 = vst.msk [vmem:[%s6946_s3 + $0x210] sm:$0xf] %vm3533_vm3, %v3361_v17  ;;  %vm2525_vm4 = vcmp.ge.f32.partialorder %v2078_v20, 0.0  ;;  %v2829_v26 = vmul.f32 0.2, %v2078_v20  ;;  %vm2601_vm5 = vcmp.ge.f32.partialorder %v2268_v21, 0.0 }
 0x24d   :  { %v2905_v27 = vmul.f32 0.2, %v2268_v21  ;;  %vm2374_vm6 = vcmp.ge.f32.partialorder %v1700_v60, 0.0  ;;  %v2678_v28 = vmul.f32 0.2, %v1700_v60  ;;  %vm2450_vm7 = vcmp.ge.f32.partialorder %v1890_v25, 0.0 }
 0x24e   :  { %v3133_v29 = vsel %vm2525_vm4, %v2078_v20, %v2829_v26  ;;  %v2754_v30 = vmul.f32 0.2, %v1890_v25 }
 0x24f   :  { %v3437_v31 = vpack.c.bf16 %v3133_v29, %v3133_v29  ;;  %v3209_v32 = vsel %vm2601_vm5, %v2268_v21, %v2905_v27  ;;  %v2982_v35 = vsel %vm2374_vm6, %v1700_v60, %v2678_v28 }
 0x250   :  { %v3513_v36 = vpack.c.bf16 %v3209_v32, %v3209_v32  ;;  %v3286_v37 = vpack.c.bf16 %v2982_v35, %v2982_v35  ;;  %v3058_v38 = vsel %vm2450_vm7, %v1890_v25, %v2754_v30 }
 0x251   :  { %3742 = vst.msk [vmem:[%s6946_s3 + $0x340] sm:$0xf] %vm3533_vm3, %v3437_v31  ;;  %v3362_v39 = vpack.c.bf16 %v3058_v38, %v3058_v38  ;;  %v2079_v40 = vpop.f32.mrf.mxu2  ;;  %v2269_v41 = vpop.f32.mrf.mxu3 }
 0x252   :  { %3818 = vst.msk [vmem:[%s6946_s3 + $0x470] sm:$0xf] %vm3533_vm3, %v3513_v36  ;;  %v2080_v44 = vadd.f32 %v6298_v34, %v2079_v40  ;;  %v2270_v45 = vadd.f32 %v6298_v34, %v2269_v41  ;;  %v1702_v46 = vpop.f32.mrf.mxu0  ;;  %v1892_v47 = vpop.f32.mrf.mxu1 }
 0x253   :  { %3591 = vst.msk [vmem:[%s6946_s3 + $0xe4] sm:$0xf] %vm3533_vm3, %v3286_v37  ;;  %v1703_v50 = vadd.f32 %v6298_v34, %v1702_v46  ;;  %v1893_v51 = vadd.f32 %v6298_v34, %v1892_v47 }
 0x254   :  { %3667 = vst.msk [vmem:[%s6946_s3 + $0x214] sm:$0xf] %vm3533_vm3, %v3362_v39  ;;  %vm2526_vm8 = vcmp.ge.f32.partialorder %v2080_v44, 0.0  ;;  %v2830_v22 = vmul.f32 0.2, %v2080_v44  ;;  %vm2602_vm9 = vcmp.ge.f32.partialorder %v2270_v45, 0.0 }
 0x255   :  { %v2906_v52 = vmul.f32 0.2, %v2270_v45  ;;  %vm2375_vm10 = vcmp.ge.f32.partialorder %v1703_v50, 0.0  ;;  %v2679_v53 = vmul.f32 0.2, %v1703_v50  ;;  %vm2451_vm11 = vcmp.ge.f32.partialorder %v1893_v51, 0.0  ;;  %4491 = vmatmul.msk.bf16.gmra.mxu0 %vm1091_vm0, %v4643_v42  ;;  %4529 = vmatmul.msk.bf16.gmra.mxu1 %vm1091_vm0, %v4681_v43 }
 0x256   :  { %v3134_v54 = vsel %vm2526_vm8, %v2080_v44, %v2830_v22  ;;  %v2755_v55 = vmul.f32 0.2, %v1893_v51  ;;  %4567 = vmatmul.msk.bf16.gmra.mxu2 %vm1091_vm0, %v4719_v48  ;;  %4605 = vmatmul.msk.bf16.gmra.mxu3 %vm1091_vm0, %v4757_v49 }
 0x257   :  { %v3438_v56 = vpack.c.bf16 %v3134_v54, %v3134_v54  ;;  %v3210_v57 = vsel %vm2602_vm9, %v2270_v45, %v2906_v52  ;;  %v2983_v58 = vsel %vm2375_vm10, %v1703_v50, %v2679_v53 }
 0x258   :  { %v3514_v59 = vpack.c.bf16 %v3210_v57, %v3210_v57  ;;  %v3287_v61 = vpack.c.bf16 %v2983_v58, %v2983_v58  ;;  %v3059_v62 = vsel %vm2451_vm11, %v1893_v51, %v2755_v55 }
 0x259   :  { %3743 = vst.msk [vmem:[%s6946_s3 + $0x344] sm:$0xf] %vm3533_vm3, %v3438_v56  ;;  %v3363_v63 = vpack.c.bf16 %v3059_v62, %v3059_v62  ;;  %v2082_v0 = vpop.f32.mrf.mxu2  ;;  %v2272_v1 = vpop.f32.mrf.mxu3 }
 0x25a   :  { %3819 = vst.msk [vmem:[%s6946_s3 + $0x474] sm:$0xf] %vm3533_vm3, %v3514_v59  ;;  %v2083_v2 = vadd.f32 %v6298_v34, %v2082_v0  ;;  %v2273_v3 = vadd.f32 %v6298_v34, %v2272_v1  ;;  %v1704_v4 = vpop.f32.mrf.mxu0  ;;  %v1894_v5 = vpop.f32.mrf.mxu1 }
 0x25b   :  { %3592 = vst.msk [vmem:[%s6946_s3 + $0xe8] sm:$0xf] %vm3533_vm3, %v3287_v61  ;;  %v1705_v6 = vadd.f32 %v6298_v34, %v1704_v4  ;;  %v1895_v7 = vadd.f32 %v6298_v34, %v1894_v5 }
 0x25c   :  { %3668 = vst.msk [vmem:[%s6946_s3 + $0x218] sm:$0xf] %vm3533_vm3, %v3363_v63  ;;  %vm2527_vm0 = vcmp.ge.f32.partialorder %v2083_v2, 0.0  ;;  %v2831_v8 = vmul.f32 0.2, %v2083_v2  ;;  %vm2603_vm12 = vcmp.ge.f32.partialorder %v2273_v3, 0.0 }
 0x25d   :  { %v2907_v9 = vmul.f32 0.2, %v2273_v3  ;;  %vm2376_vm13 = vcmp.ge.f32.partialorder %v1705_v6, 0.0  ;;  %v2680_v10 = vmul.f32 0.2, %v1705_v6  ;;  %vm2452_vm14 = vcmp.ge.f32.partialorder %v1895_v7, 0.0 }
 0x25e   :  { %v3135_v11 = vsel %vm2527_vm0, %v2083_v2, %v2831_v8  ;;  %v2756_v12 = vmul.f32 0.2, %v1895_v7 }
 0x25f   :  { %v3439_v13 = vpack.c.bf16 %v3135_v11, %v3135_v11  ;;  %v3211_v33 = vsel %vm2603_vm12, %v2273_v3, %v2907_v9  ;;  %v2984_v14 = vsel %vm2376_vm13, %v1705_v6, %v2680_v10 }
 0x260   :  { %v3515_v15 = vpack.c.bf16 %v3211_v33, %v3211_v33  ;;  %v3288_v16 = vpack.c.bf16 %v2984_v14, %v2984_v14  ;;  %v3060_v17 = vsel %vm2452_vm14, %v1895_v7, %v2756_v12 }
 0x261   :  { %3744 = vst.msk [vmem:[%s6946_s3 + $0x348] sm:$0xf] %vm3533_vm3, %v3439_v13  ;;  %v3364_v18 = vpack.c.bf16 %v3060_v17, %v3060_v17  ;;  %v2084_v19 = vpop.f32.mrf.mxu2  ;;  %v2274_v20 = vpop.f32.mrf.mxu3 }
 0x262   :  { %3820 = vst.msk [vmem:[%s6946_s3 + $0x478] sm:$0xf] %vm3533_vm3, %v3515_v15  ;;  %v2085_v21 = vadd.f32 %v6298_v34, %v2084_v19  ;;  %v2275_v23 = vadd.f32 %v6298_v34, %v2274_v20  ;;  %v1707_v24 = vpop.f32.mrf.mxu0  ;;  %v1897_v60 = vpop.f32.mrf.mxu1 }
 0x263   :  { %3593 = vst.msk [vmem:[%s6946_s3 + $0xec] sm:$0xf] %vm3533_vm3, %v3288_v16  ;;  %v1708_v25 = vadd.f32 %v6298_v34, %v1707_v24  ;;  %v1898_v26 = vadd.f32 %v6298_v34, %v1897_v60 }
 0x264   :  { %3669 = vst.msk [vmem:[%s6946_s3 + $0x21c] sm:$0xf] %vm3533_vm3, %v3364_v18  ;;  %vm2528_vm15 = vcmp.ge.f32.partialorder %v2085_v21, 0.0  ;;  %v2832_v27 = vmul.f32 0.2, %v2085_v21  ;;  %vm2604_vm1 = vcmp.ge.f32.partialorder %v2275_v23, 0.0 }
 0x265   :  { %v2908_v28 = vmul.f32 0.2, %v2275_v23  ;;  %vm2377_vm2 = vcmp.ge.f32.partialorder %v1708_v25, 0.0  ;;  %v2681_v29 = vmul.f32 0.2, %v1708_v25  ;;  %vm2453_vm4 = vcmp.ge.f32.partialorder %v1898_v26, 0.0 }
 0x266   :  { %v3136_v30 = vsel %vm2528_vm15, %v2085_v21, %v2832_v27  ;;  %v2757_v31 = vmul.f32 0.2, %v1898_v26 }
 0x267   :  { %v3440_v32 = vpack.c.bf16 %v3136_v30, %v3136_v30  ;;  %v3212_v35 = vsel %vm2604_vm1, %v2275_v23, %v2908_v28  ;;  %v2985_v36 = vsel %vm2377_vm2, %v1708_v25, %v2681_v29 }
 0x268   :  { %v3516_v37 = vpack.c.bf16 %v3212_v35, %v3212_v35  ;;  %v3289_v38 = vpack.c.bf16 %v2985_v36, %v2985_v36  ;;  %v3061_v39 = vsel %vm2453_vm4, %v1898_v26, %v2757_v31 }
 0x269   :  { %3745 = vst.msk [vmem:[%s6946_s3 + $0x34c] sm:$0xf] %vm3533_vm3, %v3440_v32  ;;  %v3365_v40 = vpack.c.bf16 %v3061_v39, %v3061_v39  ;;  %v2087_v41 = vpop.f32.mrf.mxu2  ;;  %v2277_v42 = vpop.f32.mrf.mxu3 }
 0x26a   :  { %3821 = vst.msk [vmem:[%s6946_s3 + $0x47c] sm:$0xf] %vm3533_vm3, %v3516_v37  ;;  %v2088_v43 = vadd.f32 %v6298_v34, %v2087_v41  ;;  %v2278_v44 = vadd.f32 %v6298_v34, %v2277_v42  ;;  %v1709_v45 = vpop.f32.mrf.mxu0  ;;  %v1899_v46 = vpop.f32.mrf.mxu1 }
 0x26b   :  { %3594 = vst.msk [vmem:[%s6946_s3 + $0xf0] sm:$0xf] %vm3533_vm3, %v3289_v38  ;;  %v1710_v47 = vadd.f32 %v6298_v34, %v1709_v45  ;;  %v1900_v48 = vadd.f32 %v6298_v34, %v1899_v46 }
 0x26c   :  { %3670 = vst.msk [vmem:[%s6946_s3 + $0x220] sm:$0xf] %vm3533_vm3, %v3365_v40  ;;  %vm2529_vm5 = vcmp.ge.f32.partialorder %v2088_v43, 0.0  ;;  %v2833_v49 = vmul.f32 0.2, %v2088_v43  ;;  %vm2605_vm6 = vcmp.ge.f32.partialorder %v2278_v44, 0.0 }
 0x26d   :  { %v2909_v50 = vmul.f32 0.2, %v2278_v44  ;;  %vm2378_vm7 = vcmp.ge.f32.partialorder %v1710_v47, 0.0  ;;  %v2682_v51 = vmul.f32 0.2, %v1710_v47  ;;  %vm2454_vm8 = vcmp.ge.f32.partialorder %v1900_v48, 0.0 }
 0x26e   :  { %v3137_v22 = vsel %vm2529_vm5, %v2088_v43, %v2833_v49  ;;  %v2758_v52 = vmul.f32 0.2, %v1900_v48 }
 0x26f   :  { %v3441_v53 = vpack.c.bf16 %v3137_v22, %v3137_v22  ;;  %v3213_v54 = vsel %vm2605_vm6, %v2278_v44, %v2909_v50  ;;  %v2986_v55 = vsel %vm2378_vm7, %v1710_v47, %v2682_v51 }
 0x270   :  { %v3517_v56 = vpack.c.bf16 %v3213_v54, %v3213_v54  ;;  %v3290_v57 = vpack.c.bf16 %v2986_v55, %v2986_v55  ;;  %v3062_v58 = vsel %vm2454_vm8, %v1900_v48, %v2758_v52 }
 0x271   :  { %3746 = vst.msk [vmem:[%s6946_s3 + $0x350] sm:$0xf] %vm3533_vm3, %v3441_v53  ;;  %v3366_v59 = vpack.c.bf16 %v3062_v58, %v3062_v58  ;;  %v2089_v61 = vpop.f32.mrf.mxu2  ;;  %v2279_v62 = vpop.f32.mrf.mxu3 }
 0x272   :  { %3822 = vst.msk [vmem:[%s6946_s3 + $0x480] sm:$0xf] %vm3533_vm3, %v3517_v56  ;;  %v2090_v63 = vadd.f32 %v6298_v34, %v2089_v61  ;;  %v2280_v0 = vadd.f32 %v6298_v34, %v2279_v62  ;;  %v1712_v1 = vpop.f32.mrf.mxu0  ;;  %v1902_v2 = vpop.f32.mrf.mxu1 }
 0x273   :  { %3595 = vst.msk [vmem:[%s6946_s3 + $0xf4] sm:$0xf] %vm3533_vm3, %v3290_v57  ;;  %v1713_v3 = vadd.f32 %v6298_v34, %v1712_v1  ;;  %v1903_v4 = vadd.f32 %v6298_v34, %v1902_v2 }
 0x274   :  { %3671 = vst.msk [vmem:[%s6946_s3 + $0x224] sm:$0xf] %vm3533_vm3, %v3366_v59  ;;  %vm2530_vm9 = vcmp.ge.f32.partialorder %v2090_v63, 0.0  ;;  %v2834_v5 = vmul.f32 0.2, %v2090_v63  ;;  %vm2606_vm10 = vcmp.ge.f32.partialorder %v2280_v0, 0.0 }
 0x275   :  { %v2910_v6 = vmul.f32 0.2, %v2280_v0  ;;  %vm2379_vm11 = vcmp.ge.f32.partialorder %v1713_v3, 0.0  ;;  %v2683_v7 = vmul.f32 0.2, %v1713_v3  ;;  %vm2455_vm0 = vcmp.ge.f32.partialorder %v1903_v4, 0.0 }
 0x276   :  { %v3138_v8 = vsel %vm2530_vm9, %v2090_v63, %v2834_v5  ;;  %v2759_v9 = vmul.f32 0.2, %v1903_v4 }
 0x277   :  { %v3442_v10 = vpack.c.bf16 %v3138_v8, %v3138_v8  ;;  %v3214_v11 = vsel %vm2606_vm10, %v2280_v0, %v2910_v6  ;;  %v2987_v12 = vsel %vm2379_vm11, %v1713_v3, %v2683_v7 }
 0x278   :  { %v3518_v13 = vpack.c.bf16 %v3214_v11, %v3214_v11  ;;  %v3291_v33 = vpack.c.bf16 %v2987_v12, %v2987_v12  ;;  %v3063_v14 = vsel %vm2455_vm0, %v1903_v4, %v2759_v9 }
 0x279   :  { %3747 = vst.msk [vmem:[%s6946_s3 + $0x354] sm:$0xf] %vm3533_vm3, %v3442_v10  ;;  %v3367_v15 = vpack.c.bf16 %v3063_v14, %v3063_v14  ;;  %v2092_v16 = vpop.f32.mrf.mxu2  ;;  %v2282_v17 = vpop.f32.mrf.mxu3  ;;  %v6723_v14 = vld [vmem:[%s6945_s2] ss:$0 sm:$0xff] }
 0x27a   :  { %3823 = vst.msk [vmem:[%s6946_s3 + $0x484] sm:$0xf] %vm3533_vm3, %v3518_v13  ;;  %v2093_v18 = vadd.f32 %v6298_v34, %v2092_v16  ;;  %v2283_v19 = vadd.f32 %v6298_v34, %v2282_v17  ;;  %v1714_v20 = vpop.f32.mrf.mxu0  ;;  %v1904_v21 = vpop.f32.mrf.mxu1 }
 0x27b   :  { %3596 = vst.msk [vmem:[%s6946_s3 + $0xf8] sm:$0xf] %vm3533_vm3, %v3291_v33  ;;  %v1715_v23 = vadd.f32 %v6298_v34, %v1714_v20  ;;  %v1905_v24 = vadd.f32 %v6298_v34, %v1904_v21 }
 0x27c   :  { %3672 = vst.msk [vmem:[%s6946_s3 + $0x228] sm:$0xf] %vm3533_vm3, %v3367_v15  ;;  %vm2531_vm12 = vcmp.ge.f32.partialorder %v2093_v18, 0.0  ;;  %v2835_v60 = vmul.f32 0.2, %v2093_v18  ;;  %vm2607_vm13 = vcmp.ge.f32.partialorder %v2283_v19, 0.0 }
 0x27d   :  { %v2911_v25 = vmul.f32 0.2, %v2283_v19  ;;  %vm2380_vm14 = vcmp.ge.f32.partialorder %v1715_v23, 0.0  ;;  %v2684_v26 = vmul.f32 0.2, %v1715_v23  ;;  %vm2456_vm15 = vcmp.ge.f32.partialorder %v1905_v24, 0.0 }
 0x27e   :  { %v3139_v27 = vsel %vm2531_vm12, %v2093_v18, %v2835_v60  ;;  %v2760_v28 = vmul.f32 0.2, %v1905_v24 }
 0x27f   :  { %v3443_v29 = vpack.c.bf16 %v3139_v27, %v3139_v27  ;;  %v3215_v30 = vsel %vm2607_vm13, %v2283_v19, %v2911_v25  ;;  %v2988_v31 = vsel %vm2380_vm14, %v1715_v23, %v2684_v26 }
 0x280   :  { %v3519_v32 = vpack.c.bf16 %v3215_v30, %v3215_v30  ;;  %v3292_v35 = vpack.c.bf16 %v2988_v31, %v2988_v31  ;;  %v3064_v36 = vsel %vm2456_vm15, %v1905_v24, %v2760_v28 }
 0x281   :  { %3748 = vst.msk [vmem:[%s6946_s3 + $0x358] sm:$0xf] %vm3533_vm3, %v3443_v29  ;;  %v3368_v37 = vpack.c.bf16 %v3064_v36, %v3064_v36  ;;  %v2094_v38 = vpop.f32.mrf.mxu2  ;;  %v2284_v39 = vpop.f32.mrf.mxu3 }
 0x282   :  { %3824 = vst.msk [vmem:[%s6946_s3 + $0x488] sm:$0xf] %vm3533_vm3, %v3519_v32  ;;  %v2095_v40 = vadd.f32 %v6298_v34, %v2094_v38  ;;  %v2285_v41 = vadd.f32 %v6298_v34, %v2284_v39  ;;  %v1717_v42 = vpop.f32.mrf.mxu0  ;;  %v1907_v43 = vpop.f32.mrf.mxu1 }
 0x283   :  { %3597 = vst.msk [vmem:[%s6946_s3 + $0xfc] sm:$0xf] %vm3533_vm3, %v3292_v35  ;;  %v1718_v44 = vadd.f32 %v6298_v34, %v1717_v42  ;;  %v1908_v45 = vadd.f32 %v6298_v34, %v1907_v43 }
 0x284   :  { %3673 = vst.msk [vmem:[%s6946_s3 + $0x22c] sm:$0xf] %vm3533_vm3, %v3368_v37  ;;  %vm2532_vm1 = vcmp.ge.f32.partialorder %v2095_v40, 0.0  ;;  %v2836_v46 = vmul.f32 0.2, %v2095_v40  ;;  %vm2608_vm2 = vcmp.ge.f32.partialorder %v2285_v41, 0.0 }
 0x285   :  { %v2912_v47 = vmul.f32 0.2, %v2285_v41  ;;  %vm2381_vm4 = vcmp.ge.f32.partialorder %v1718_v44, 0.0  ;;  %v2685_v48 = vmul.f32 0.2, %v1718_v44  ;;  %vm2457_vm5 = vcmp.ge.f32.partialorder %v1908_v45, 0.0 }
 0x286   :  { %v3140_v49 = vsel %vm2532_vm1, %v2095_v40, %v2836_v46  ;;  %v2761_v50 = vmul.f32 0.2, %v1908_v45 }
 0x287   :  { %v3444_v51 = vpack.c.bf16 %v3140_v49, %v3140_v49  ;;  %v3216_v22 = vsel %vm2608_vm2, %v2285_v41, %v2912_v47  ;;  %v2989_v52 = vsel %vm2381_vm4, %v1718_v44, %v2685_v48 }
 0x288   :  { %v3520_v53 = vpack.c.bf16 %v3216_v22, %v3216_v22  ;;  %v3293_v54 = vpack.c.bf16 %v2989_v52, %v2989_v52  ;;  %v3065_v55 = vsel %vm2457_vm5, %v1908_v45, %v2761_v50 }
 0x289   :  { %3749 = vst.msk [vmem:[%s6946_s3 + $0x35c] sm:$0xf] %vm3533_vm3, %v3444_v51  ;;  %v3369_v56 = vpack.c.bf16 %v3065_v55, %v3065_v55  ;;  %v2097_v57 = vpop.f32.mrf.mxu2  ;;  %v2287_v58 = vpop.f32.mrf.mxu3 }
 0x28a   :  { %3825 = vst.msk [vmem:[%s6946_s3 + $0x48c] sm:$0xf] %vm3533_vm3, %v3520_v53  ;;  %v2098_v59 = vadd.f32 %v6298_v34, %v2097_v57  ;;  %v2288_v61 = vadd.f32 %v6298_v34, %v2287_v58  ;;  %v1719_v62 = vpop.f32.mrf.mxu0  ;;  %v1909_v63 = vpop.f32.mrf.mxu1 }
 0x28b   :  { %3598 = vst.msk [vmem:[%s6946_s3 + $0x100] sm:$0xf] %vm3533_vm3, %v3293_v54  ;;  %v1720_v0 = vadd.f32 %v6298_v34, %v1719_v62  ;;  %v1910_v1 = vadd.f32 %v6298_v34, %v1909_v63 }
 0x28c   :  { %3674 = vst.msk [vmem:[%s6946_s3 + $0x230] sm:$0xf] %vm3533_vm3, %v3369_v56  ;;  %vm2533_vm6 = vcmp.ge.f32.partialorder %v2098_v59, 0.0  ;;  %v2837_v2 = vmul.f32 0.2, %v2098_v59  ;;  %vm2609_vm7 = vcmp.ge.f32.partialorder %v2288_v61, 0.0 }
 0x28d   :  { %v2913_v3 = vmul.f32 0.2, %v2288_v61  ;;  %vm2382_vm8 = vcmp.ge.f32.partialorder %v1720_v0, 0.0  ;;  %v2686_v4 = vmul.f32 0.2, %v1720_v0  ;;  %vm2458_vm9 = vcmp.ge.f32.partialorder %v1910_v1, 0.0 }
 0x28e   :  { %v3141_v5 = vsel %vm2533_vm6, %v2098_v59, %v2837_v2  ;;  %v2762_v6 = vmul.f32 0.2, %v1910_v1 }
 0x28f   :  { %v3445_v7 = vpack.c.bf16 %v3141_v5, %v3141_v5  ;;  %v3217_v8 = vsel %vm2609_vm7, %v2288_v61, %v2913_v3  ;;  %v2990_v9 = vsel %vm2382_vm8, %v1720_v0, %v2686_v4 }
 0x290   :  { %v3521_v10 = vpack.c.bf16 %v3217_v8, %v3217_v8  ;;  %v3294_v11 = vpack.c.bf16 %v2990_v9, %v2990_v9  ;;  %v3066_v34 = vsel %vm2458_vm9, %v1910_v1, %v2762_v6 }
 0x291   :  { %3750 = vst.msk [vmem:[%s6946_s3 + $0x360] sm:$0xf] %vm3533_vm3, %v3445_v7  ;;  %v3370_v12 = vpack.c.bf16 %v3066_v34, %v3066_v34  ;;  %v2099_v13 = vpop.f32.mrf.mxu2  ;;  %v2289_v33 = vpop.f32.mrf.mxu3 }
 0x292   :  { %3826 = vst.msk [vmem:[%s6946_s3 + $0x490] sm:$0xf] %vm3533_vm3, %v3521_v10  ;;  %v2100_v15 = vadd.f32 %v6723_v14, %v2099_v13  ;;  %v2290_v16 = vadd.f32 %v6723_v14, %v2289_v33  ;;  %v1722_v17 = vpop.f32.mrf.mxu0  ;;  %v1912_v18 = vpop.f32.mrf.mxu1 }
 0x293   :  { %3599 = vst.msk [vmem:[%s6946_s3 + $0x104] sm:$0xf] %vm3533_vm3, %v3294_v11  ;;  %v1723_v19 = vadd.f32 %v6723_v14, %v1722_v17  ;;  %v1913_v20 = vadd.f32 %v6723_v14, %v1912_v18 }
 0x294   :  { %3675 = vst.msk [vmem:[%s6946_s3 + $0x234] sm:$0xf] %vm3533_vm3, %v3370_v12  ;;  %vm2534_vm10 = vcmp.ge.f32.partialorder %v2100_v15, 0.0  ;;  %v2838_v21 = vmul.f32 0.2, %v2100_v15  ;;  %vm2610_vm11 = vcmp.ge.f32.partialorder %v2290_v16, 0.0 }
 0x295   :  { %v2914_v23 = vmul.f32 0.2, %v2290_v16  ;;  %vm2383_vm0 = vcmp.ge.f32.partialorder %v1723_v19, 0.0  ;;  %v2687_v24 = vmul.f32 0.2, %v1723_v19  ;;  %vm2459_vm12 = vcmp.ge.f32.partialorder %v1913_v20, 0.0 }
 0x296   :  { %v3142_v60 = vsel %vm2534_vm10, %v2100_v15, %v2838_v21  ;;  %v2763_v25 = vmul.f32 0.2, %v1913_v20 }
 0x297   :  { %v3446_v26 = vpack.c.bf16 %v3142_v60, %v3142_v60  ;;  %v3218_v27 = vsel %vm2610_vm11, %v2290_v16, %v2914_v23  ;;  %v2991_v28 = vsel %vm2383_vm0, %v1723_v19, %v2687_v24 }
 0x298   :  { %v3522_v29 = vpack.c.bf16 %v3218_v27, %v3218_v27  ;;  %v3295_v30 = vpack.c.bf16 %v2991_v28, %v2991_v28  ;;  %v3067_v31 = vsel %vm2459_vm12, %v1913_v20, %v2763_v25 }
 0x299   :  { %3751 = vst.msk [vmem:[%s6946_s3 + $0x364] sm:$0xf] %vm3533_vm3, %v3446_v26  ;;  %v3371_v32 = vpack.c.bf16 %v3067_v31, %v3067_v31  ;;  %v2102_v35 = vpop.f32.mrf.mxu2  ;;  %v2292_v36 = vpop.f32.mrf.mxu3 }
 0x29a   :  { %3827 = vst.msk [vmem:[%s6946_s3 + $0x494] sm:$0xf] %vm3533_vm3, %v3522_v29  ;;  %v2103_v37 = vadd.f32 %v6723_v14, %v2102_v35  ;;  %v2293_v38 = vadd.f32 %v6723_v14, %v2292_v36  ;;  %v1724_v39 = vpop.f32.mrf.mxu0  ;;  %v1914_v40 = vpop.f32.mrf.mxu1 }
 0x29b   :  { %3600 = vst.msk [vmem:[%s6946_s3 + $0x108] sm:$0xf] %vm3533_vm3, %v3295_v30  ;;  %v1725_v41 = vadd.f32 %v6723_v14, %v1724_v39  ;;  %v1915_v42 = vadd.f32 %v6723_v14, %v1914_v40 }
 0x29c   :  { %3676 = vst.msk [vmem:[%s6946_s3 + $0x238] sm:$0xf] %vm3533_vm3, %v3371_v32  ;;  %vm2535_vm13 = vcmp.ge.f32.partialorder %v2103_v37, 0.0  ;;  %v2839_v43 = vmul.f32 0.2, %v2103_v37  ;;  %vm2611_vm14 = vcmp.ge.f32.partialorder %v2293_v38, 0.0 }
 0x29d   :  { %v2915_v44 = vmul.f32 0.2, %v2293_v38  ;;  %vm2384_vm15 = vcmp.ge.f32.partialorder %v1725_v41, 0.0  ;;  %v2688_v45 = vmul.f32 0.2, %v1725_v41  ;;  %vm2460_vm1 = vcmp.ge.f32.partialorder %v1915_v42, 0.0 }
 0x29e   :  { %v3143_v46 = vsel %vm2535_vm13, %v2103_v37, %v2839_v43  ;;  %v2764_v47 = vmul.f32 0.2, %v1915_v42 }
 0x29f   :  { %v3447_v48 = vpack.c.bf16 %v3143_v46, %v3143_v46  ;;  %v3219_v49 = vsel %vm2611_vm14, %v2293_v38, %v2915_v44  ;;  %v2992_v50 = vsel %vm2384_vm15, %v1725_v41, %v2688_v45 }
 0x2a0   :  { %v3523_v51 = vpack.c.bf16 %v3219_v49, %v3219_v49  ;;  %v3296_v22 = vpack.c.bf16 %v2992_v50, %v2992_v50  ;;  %v3068_v52 = vsel %vm2460_vm1, %v1915_v42, %v2764_v47 }
 0x2a1   :  { %3752 = vst.msk [vmem:[%s6946_s3 + $0x368] sm:$0xf] %vm3533_vm3, %v3447_v48  ;;  %v3372_v53 = vpack.c.bf16 %v3068_v52, %v3068_v52  ;;  %v2104_v54 = vpop.f32.mrf.mxu2  ;;  %v2294_v55 = vpop.f32.mrf.mxu3 }
 0x2a2   :  { %3828 = vst.msk [vmem:[%s6946_s3 + $0x498] sm:$0xf] %vm3533_vm3, %v3523_v51  ;;  %v2105_v56 = vadd.f32 %v6723_v14, %v2104_v54  ;;  %v2295_v57 = vadd.f32 %v6723_v14, %v2294_v55  ;;  %v1727_v58 = vpop.f32.mrf.mxu0  ;;  %v1917_v59 = vpop.f32.mrf.mxu1 }
 0x2a3   :  { %3601 = vst.msk [vmem:[%s6946_s3 + $0x10c] sm:$0xf] %vm3533_vm3, %v3296_v22  ;;  %v1728_v61 = vadd.f32 %v6723_v14, %v1727_v58  ;;  %v1918_v62 = vadd.f32 %v6723_v14, %v1917_v59 }
 0x2a4   :  { %3677 = vst.msk [vmem:[%s6946_s3 + $0x23c] sm:$0xf] %vm3533_vm3, %v3372_v53  ;;  %vm2536_vm2 = vcmp.ge.f32.partialorder %v2105_v56, 0.0  ;;  %v2840_v63 = vmul.f32 0.2, %v2105_v56  ;;  %vm2612_vm4 = vcmp.ge.f32.partialorder %v2295_v57, 0.0 }
 0x2a5   :  { %v2916_v0 = vmul.f32 0.2, %v2295_v57  ;;  %vm2385_vm5 = vcmp.ge.f32.partialorder %v1728_v61, 0.0  ;;  %v2689_v1 = vmul.f32 0.2, %v1728_v61  ;;  %vm2461_vm6 = vcmp.ge.f32.partialorder %v1918_v62, 0.0 }
 0x2a6   :  { %v3144_v2 = vsel %vm2536_vm2, %v2105_v56, %v2840_v63  ;;  %v2765_v3 = vmul.f32 0.2, %v1918_v62 }
 0x2a7   :  { %v3448_v4 = vpack.c.bf16 %v3144_v2, %v3144_v2  ;;  %v3220_v5 = vsel %vm2612_vm4, %v2295_v57, %v2916_v0  ;;  %v2993_v6 = vsel %vm2385_vm5, %v1728_v61, %v2689_v1 }
 0x2a8   :  { %v3524_v7 = vpack.c.bf16 %v3220_v5, %v3220_v5  ;;  %v3297_v8 = vpack.c.bf16 %v2993_v6, %v2993_v6  ;;  %v3069_v9 = vsel %vm2461_vm6, %v1918_v62, %v2765_v3 }
 0x2a9   :  { %3753 = vst.msk [vmem:[%s6946_s3 + $0x36c] sm:$0xf] %vm3533_vm3, %v3448_v4  ;;  %v3373_v10 = vpack.c.bf16 %v3069_v9, %v3069_v9  ;;  %v2107_v11 = vpop.f32.mrf.mxu2  ;;  %v2297_v34 = vpop.f32.mrf.mxu3 }
 0x2aa   :  { %3829 = vst.msk [vmem:[%s6946_s3 + $0x49c] sm:$0xf] %vm3533_vm3, %v3524_v7  ;;  %v2108_v12 = vadd.f32 %v6723_v14, %v2107_v11  ;;  %v2298_v13 = vadd.f32 %v6723_v14, %v2297_v34  ;;  %v1729_v33 = vpop.f32.mrf.mxu0  ;;  %v1919_v15 = vpop.f32.mrf.mxu1 }
 0x2ab   :  { %3602 = vst.msk [vmem:[%s6946_s3 + $0x110] sm:$0xf] %vm3533_vm3, %v3297_v8  ;;  %v1730_v16 = vadd.f32 %v6723_v14, %v1729_v33  ;;  %v1920_v17 = vadd.f32 %v6723_v14, %v1919_v15 }
 0x2ac   :  { %3678 = vst.msk [vmem:[%s6946_s3 + $0x240] sm:$0xf] %vm3533_vm3, %v3373_v10  ;;  %vm2537_vm7 = vcmp.ge.f32.partialorder %v2108_v12, 0.0  ;;  %v2841_v18 = vmul.f32 0.2, %v2108_v12  ;;  %vm2613_vm8 = vcmp.ge.f32.partialorder %v2298_v13, 0.0 }
 0x2ad   :  { %v2917_v19 = vmul.f32 0.2, %v2298_v13  ;;  %vm2386_vm9 = vcmp.ge.f32.partialorder %v1730_v16, 0.0  ;;  %v2690_v20 = vmul.f32 0.2, %v1730_v16  ;;  %vm2462_vm10 = vcmp.ge.f32.partialorder %v1920_v17, 0.0 }
 0x2ae   :  { %v3145_v21 = vsel %vm2537_vm7, %v2108_v12, %v2841_v18  ;;  %v2766_v23 = vmul.f32 0.2, %v1920_v17 }
 0x2af   :  { %v3449_v24 = vpack.c.bf16 %v3145_v21, %v3145_v21  ;;  %v3221_v60 = vsel %vm2613_vm8, %v2298_v13, %v2917_v19  ;;  %v2994_v25 = vsel %vm2386_vm9, %v1730_v16, %v2690_v20 }
 0x2b0   :  { %v3525_v26 = vpack.c.bf16 %v3221_v60, %v3221_v60  ;;  %v3298_v27 = vpack.c.bf16 %v2994_v25, %v2994_v25  ;;  %v3070_v28 = vsel %vm2462_vm10, %v1920_v17, %v2766_v23 }
 0x2b1   :  { %3754 = vst.msk [vmem:[%s6946_s3 + $0x370] sm:$0xf] %vm3533_vm3, %v3449_v24  ;;  %v3374_v29 = vpack.c.bf16 %v3070_v28, %v3070_v28  ;;  %v2109_v30 = vpop.f32.mrf.mxu2  ;;  %v2299_v31 = vpop.f32.mrf.mxu3 }
 0x2b2   :  { %3830 = vst.msk [vmem:[%s6946_s3 + $0x4a0] sm:$0xf] %vm3533_vm3, %v3525_v26  ;;  %v2110_v32 = vadd.f32 %v6723_v14, %v2109_v30  ;;  %v2300_v35 = vadd.f32 %v6723_v14, %v2299_v31  ;;  %v1732_v36 = vpop.f32.mrf.mxu0  ;;  %v1922_v37 = vpop.f32.mrf.mxu1 }
 0x2b3   :  { %3603 = vst.msk [vmem:[%s6946_s3 + $0x114] sm:$0xf] %vm3533_vm3, %v3298_v27  ;;  %v1733_v38 = vadd.f32 %v6723_v14, %v1732_v36  ;;  %v1923_v39 = vadd.f32 %v6723_v14, %v1922_v37 }
 0x2b4   :  { %3679 = vst.msk [vmem:[%s6946_s3 + $0x244] sm:$0xf] %vm3533_vm3, %v3374_v29  ;;  %vm2538_vm11 = vcmp.ge.f32.partialorder %v2110_v32, 0.0  ;;  %v2842_v40 = vmul.f32 0.2, %v2110_v32  ;;  %vm2614_vm0 = vcmp.ge.f32.partialorder %v2300_v35, 0.0 }
 0x2b5   :  { %v2918_v41 = vmul.f32 0.2, %v2300_v35  ;;  %vm2387_vm12 = vcmp.ge.f32.partialorder %v1733_v38, 0.0  ;;  %v2691_v42 = vmul.f32 0.2, %v1733_v38  ;;  %vm2463_vm13 = vcmp.ge.f32.partialorder %v1923_v39, 0.0 }
 0x2b6   :  { %v3146_v43 = vsel %vm2538_vm11, %v2110_v32, %v2842_v40  ;;  %v2767_v44 = vmul.f32 0.2, %v1923_v39 }
 0x2b7   :  { %v3450_v45 = vpack.c.bf16 %v3146_v43, %v3146_v43  ;;  %v3222_v46 = vsel %vm2614_vm0, %v2300_v35, %v2918_v41  ;;  %v2995_v47 = vsel %vm2387_vm12, %v1733_v38, %v2691_v42 }
 0x2b8   :  { %v3526_v48 = vpack.c.bf16 %v3222_v46, %v3222_v46  ;;  %v3299_v49 = vpack.c.bf16 %v2995_v47, %v2995_v47  ;;  %v3071_v50 = vsel %vm2463_vm13, %v1923_v39, %v2767_v44 }
 0x2b9   :  { %3755 = vst.msk [vmem:[%s6946_s3 + $0x374] sm:$0xf] %vm3533_vm3, %v3450_v45  ;;  %v3375_v51 = vpack.c.bf16 %v3071_v50, %v3071_v50  ;;  %v2112_v22 = vpop.f32.mrf.mxu2  ;;  %v2302_v52 = vpop.f32.mrf.mxu3 }
 0x2ba   :  { %3831 = vst.msk [vmem:[%s6946_s3 + $0x4a4] sm:$0xf] %vm3533_vm3, %v3526_v48  ;;  %v2113_v53 = vadd.f32 %v6723_v14, %v2112_v22  ;;  %v2303_v54 = vadd.f32 %v6723_v14, %v2302_v52  ;;  %v1734_v55 = vpop.f32.mrf.mxu0  ;;  %v1924_v56 = vpop.f32.mrf.mxu1 }
 0x2bb   :  { %3604 = vst.msk [vmem:[%s6946_s3 + $0x118] sm:$0xf] %vm3533_vm3, %v3299_v49  ;;  %v1735_v57 = vadd.f32 %v6723_v14, %v1734_v55  ;;  %v1925_v58 = vadd.f32 %v6723_v14, %v1924_v56 }
 0x2bc   :  { %3680 = vst.msk [vmem:[%s6946_s3 + $0x248] sm:$0xf] %vm3533_vm3, %v3375_v51  ;;  %vm2539_vm14 = vcmp.ge.f32.partialorder %v2113_v53, 0.0  ;;  %v2843_v59 = vmul.f32 0.2, %v2113_v53  ;;  %vm2615_vm15 = vcmp.ge.f32.partialorder %v2303_v54, 0.0 }
 0x2bd   :  { %v2919_v61 = vmul.f32 0.2, %v2303_v54  ;;  %vm2388_vm1 = vcmp.ge.f32.partialorder %v1735_v57, 0.0  ;;  %v2692_v62 = vmul.f32 0.2, %v1735_v57  ;;  %vm2464_vm2 = vcmp.ge.f32.partialorder %v1925_v58, 0.0 }
 0x2be   :  { %v3147_v63 = vsel %vm2539_vm14, %v2113_v53, %v2843_v59  ;;  %v2768_v0 = vmul.f32 0.2, %v1925_v58 }
 0x2bf   :  { %v3451_v1 = vpack.c.bf16 %v3147_v63, %v3147_v63  ;;  %v3223_v2 = vsel %vm2615_vm15, %v2303_v54, %v2919_v61  ;;  %v2996_v3 = vsel %vm2388_vm1, %v1735_v57, %v2692_v62 }
 0x2c0   :  { %v3527_v4 = vpack.c.bf16 %v3223_v2, %v3223_v2  ;;  %v3300_v5 = vpack.c.bf16 %v2996_v3, %v2996_v3  ;;  %v3072_v6 = vsel %vm2464_vm2, %v1925_v58, %v2768_v0 }
 0x2c1   :  { %3756 = vst.msk [vmem:[%s6946_s3 + $0x378] sm:$0xf] %vm3533_vm3, %v3451_v1  ;;  %v3376_v7 = vpack.c.bf16 %v3072_v6, %v3072_v6  ;;  %v2114_v8 = vpop.f32.mrf.mxu2  ;;  %v2304_v9 = vpop.f32.mrf.mxu3 }
 0x2c2   :  { %3832 = vst.msk [vmem:[%s6946_s3 + $0x4a8] sm:$0xf] %vm3533_vm3, %v3527_v4  ;;  %v2115_v10 = vadd.f32 %v6723_v14, %v2114_v8  ;;  %v2305_v11 = vadd.f32 %v6723_v14, %v2304_v9  ;;  %v1737_v34 = vpop.f32.mrf.mxu0  ;;  %v1927_v12 = vpop.f32.mrf.mxu1 }
 0x2c3   :  { %3605 = vst.msk [vmem:[%s6946_s3 + $0x11c] sm:$0xf] %vm3533_vm3, %v3300_v5  ;;  %v1738_v13 = vadd.f32 %v6723_v14, %v1737_v34  ;;  %v1928_v33 = vadd.f32 %v6723_v14, %v1927_v12 }
 0x2c4   :  { %3681 = vst.msk [vmem:[%s6946_s3 + $0x24c] sm:$0xf] %vm3533_vm3, %v3376_v7  ;;  %vm2540_vm4 = vcmp.ge.f32.partialorder %v2115_v10, 0.0  ;;  %v2844_v15 = vmul.f32 0.2, %v2115_v10  ;;  %vm2616_vm5 = vcmp.ge.f32.partialorder %v2305_v11, 0.0 }
 0x2c5   :  { %v2920_v16 = vmul.f32 0.2, %v2305_v11  ;;  %vm2389_vm6 = vcmp.ge.f32.partialorder %v1738_v13, 0.0  ;;  %v2693_v17 = vmul.f32 0.2, %v1738_v13  ;;  %vm2465_vm7 = vcmp.ge.f32.partialorder %v1928_v33, 0.0 }
 0x2c6   :  { %v3148_v18 = vsel %vm2540_vm4, %v2115_v10, %v2844_v15  ;;  %v2769_v19 = vmul.f32 0.2, %v1928_v33 }
 0x2c7   :  { %v3452_v20 = vpack.c.bf16 %v3148_v18, %v3148_v18  ;;  %v3224_v21 = vsel %vm2616_vm5, %v2305_v11, %v2920_v16  ;;  %v2997_v23 = vsel %vm2389_vm6, %v1738_v13, %v2693_v17 }
 0x2c8   :  { %v3528_v24 = vpack.c.bf16 %v3224_v21, %v3224_v21  ;;  %v3301_v60 = vpack.c.bf16 %v2997_v23, %v2997_v23  ;;  %v3073_v25 = vsel %vm2465_vm7, %v1928_v33, %v2769_v19 }
 0x2c9   :  { %3757 = vst.msk [vmem:[%s6946_s3 + $0x37c] sm:$0xf] %vm3533_vm3, %v3452_v20  ;;  %v3377_v26 = vpack.c.bf16 %v3073_v25, %v3073_v25  ;;  %v2117_v27 = vpop.f32.mrf.mxu2  ;;  %v2307_v28 = vpop.f32.mrf.mxu3 }
 0x2ca   :  { %3833 = vst.msk [vmem:[%s6946_s3 + $0x4ac] sm:$0xf] %vm3533_vm3, %v3528_v24  ;;  %v2118_v29 = vadd.f32 %v6723_v14, %v2117_v27  ;;  %v2308_v30 = vadd.f32 %v6723_v14, %v2307_v28  ;;  %v1739_v31 = vpop.f32.mrf.mxu0  ;;  %v1929_v32 = vpop.f32.mrf.mxu1 }
 0x2cb   :  { %3606 = vst.msk [vmem:[%s6946_s3 + $0x120] sm:$0xf] %vm3533_vm3, %v3301_v60  ;;  %v1740_v35 = vadd.f32 %v6723_v14, %v1739_v31  ;;  %v1930_v36 = vadd.f32 %v6723_v14, %v1929_v32 }
 0x2cc   :  { %3682 = vst.msk [vmem:[%s6946_s3 + $0x250] sm:$0xf] %vm3533_vm3, %v3377_v26  ;;  %vm2541_vm8 = vcmp.ge.f32.partialorder %v2118_v29, 0.0  ;;  %v2845_v37 = vmul.f32 0.2, %v2118_v29  ;;  %vm2617_vm9 = vcmp.ge.f32.partialorder %v2308_v30, 0.0 }
 0x2cd   :  { %v2921_v38 = vmul.f32 0.2, %v2308_v30  ;;  %vm2390_vm10 = vcmp.ge.f32.partialorder %v1740_v35, 0.0  ;;  %v2694_v39 = vmul.f32 0.2, %v1740_v35  ;;  %vm2466_vm11 = vcmp.ge.f32.partialorder %v1930_v36, 0.0 }
 0x2ce   :  { %v3149_v40 = vsel %vm2541_vm8, %v2118_v29, %v2845_v37  ;;  %v2770_v41 = vmul.f32 0.2, %v1930_v36 }
 0x2cf   :  { %v3453_v42 = vpack.c.bf16 %v3149_v40, %v3149_v40  ;;  %v3225_v43 = vsel %vm2617_vm9, %v2308_v30, %v2921_v38  ;;  %v2998_v44 = vsel %vm2390_vm10, %v1740_v35, %v2694_v39 }
 0x2d0   :  { %v3529_v45 = vpack.c.bf16 %v3225_v43, %v3225_v43  ;;  %v3302_v46 = vpack.c.bf16 %v2998_v44, %v2998_v44  ;;  %v3074_v47 = vsel %vm2466_vm11, %v1930_v36, %v2770_v41 }
 0x2d1   :  { %3758 = vst.msk [vmem:[%s6946_s3 + $0x380] sm:$0xf] %vm3533_vm3, %v3453_v42  ;;  %v3378_v48 = vpack.c.bf16 %v3074_v47, %v3074_v47  ;;  %v2119_v49 = vpop.f32.mrf.mxu2  ;;  %v2309_v50 = vpop.f32.mrf.mxu3 }
 0x2d2   :  { %3834 = vst.msk [vmem:[%s6946_s3 + $0x4b0] sm:$0xf] %vm3533_vm3, %v3529_v45  ;;  %v2120_v51 = vadd.f32 %v6723_v14, %v2119_v49  ;;  %v2310_v22 = vadd.f32 %v6723_v14, %v2309_v50  ;;  %v1742_v52 = vpop.f32.mrf.mxu0  ;;  %v1932_v53 = vpop.f32.mrf.mxu1 }
 0x2d3   :  { %3607 = vst.msk [vmem:[%s6946_s3 + $0x124] sm:$0xf] %vm3533_vm3, %v3302_v46  ;;  %v1743_v54 = vadd.f32 %v6723_v14, %v1742_v52  ;;  %v1933_v55 = vadd.f32 %v6723_v14, %v1932_v53 }
 0x2d4   :  { %3683 = vst.msk [vmem:[%s6946_s3 + $0x254] sm:$0xf] %vm3533_vm3, %v3378_v48  ;;  %vm2542_vm0 = vcmp.ge.f32.partialorder %v2120_v51, 0.0  ;;  %v2846_v56 = vmul.f32 0.2, %v2120_v51  ;;  %vm2618_vm12 = vcmp.ge.f32.partialorder %v2310_v22, 0.0 }
 0x2d5   :  { %v2922_v57 = vmul.f32 0.2, %v2310_v22  ;;  %vm2391_vm13 = vcmp.ge.f32.partialorder %v1743_v54, 0.0  ;;  %v2695_v58 = vmul.f32 0.2, %v1743_v54  ;;  %vm2467_vm14 = vcmp.ge.f32.partialorder %v1933_v55, 0.0 }
 0x2d6   :  { %v3150_v59 = vsel %vm2542_vm0, %v2120_v51, %v2846_v56  ;;  %v2771_v61 = vmul.f32 0.2, %v1933_v55 }
 0x2d7   :  { %v3454_v62 = vpack.c.bf16 %v3150_v59, %v3150_v59  ;;  %v3226_v63 = vsel %vm2618_vm12, %v2310_v22, %v2922_v57  ;;  %v2999_v0 = vsel %vm2391_vm13, %v1743_v54, %v2695_v58 }
 0x2d8   :  { %v3530_v1 = vpack.c.bf16 %v3226_v63, %v3226_v63  ;;  %v3303_v2 = vpack.c.bf16 %v2999_v0, %v2999_v0  ;;  %v3075_v3 = vsel %vm2467_vm14, %v1933_v55, %v2771_v61 }
 0x2d9   :  { %3759 = vst.msk [vmem:[%s6946_s3 + $0x384] sm:$0xf] %vm3533_vm3, %v3454_v62  ;;  %v3379_v4 = vpack.c.bf16 %v3075_v3, %v3075_v3  ;;  %v2122_v5 = vpop.f32.mrf.mxu2  ;;  %v2312_v6 = vpop.f32.mrf.mxu3 }
 0x2da   :  { %3835 = vst.msk [vmem:[%s6946_s3 + $0x4b4] sm:$0xf] %vm3533_vm3, %v3530_v1  ;;  %v2123_v7 = vadd.f32 %v6723_v14, %v2122_v5  ;;  %v2313_v8 = vadd.f32 %v6723_v14, %v2312_v6  ;;  %v1744_v9 = vpop.f32.mrf.mxu0  ;;  %v1934_v10 = vpop.f32.mrf.mxu1 }
 0x2db   :  { %3608 = vst.msk [vmem:[%s6946_s3 + $0x128] sm:$0xf] %vm3533_vm3, %v3303_v2  ;;  %v1745_v11 = vadd.f32 %v6723_v14, %v1744_v9  ;;  %v1935_v34 = vadd.f32 %v6723_v14, %v1934_v10 }
 0x2dc   :  { %3684 = vst.msk [vmem:[%s6946_s3 + $0x258] sm:$0xf] %vm3533_vm3, %v3379_v4  ;;  %vm2543_vm15 = vcmp.ge.f32.partialorder %v2123_v7, 0.0  ;;  %v2847_v12 = vmul.f32 0.2, %v2123_v7  ;;  %vm2619_vm1 = vcmp.ge.f32.partialorder %v2313_v8, 0.0 }
 0x2dd   :  { %v2923_v13 = vmul.f32 0.2, %v2313_v8  ;;  %vm2392_vm2 = vcmp.ge.f32.partialorder %v1745_v11, 0.0  ;;  %v2696_v33 = vmul.f32 0.2, %v1745_v11  ;;  %vm2468_vm4 = vcmp.ge.f32.partialorder %v1935_v34, 0.0 }
 0x2de   :  { %v3151_v15 = vsel %vm2543_vm15, %v2123_v7, %v2847_v12  ;;  %v2772_v16 = vmul.f32 0.2, %v1935_v34 }
 0x2df   :  { %v3455_v17 = vpack.c.bf16 %v3151_v15, %v3151_v15  ;;  %v3227_v18 = vsel %vm2619_vm1, %v2313_v8, %v2923_v13  ;;  %v3000_v19 = vsel %vm2392_vm2, %v1745_v11, %v2696_v33 }
 0x2e0   :  { %v3531_v20 = vpack.c.bf16 %v3227_v18, %v3227_v18  ;;  %v3304_v21 = vpack.c.bf16 %v3000_v19, %v3000_v19  ;;  %v3076_v23 = vsel %vm2468_vm4, %v1935_v34, %v2772_v16 }
 0x2e1   :  { %3760 = vst.msk [vmem:[%s6946_s3 + $0x388] sm:$0xf] %vm3533_vm3, %v3455_v17  ;;  %v3380_v24 = vpack.c.bf16 %v3076_v23, %v3076_v23  ;;  %v2124_v60 = vpop.f32.mrf.mxu2  ;;  %v2314_v25 = vpop.f32.mrf.mxu3 }
 0x2e2   :  { %3836 = vst.msk [vmem:[%s6946_s3 + $0x4b8] sm:$0xf] %vm3533_vm3, %v3531_v20  ;;  %v2125_v26 = vadd.f32 %v6723_v14, %v2124_v60  ;;  %v2315_v27 = vadd.f32 %v6723_v14, %v2314_v25 }
 0x2e3   :  { %3609 = vst.msk [vmem:[%s6946_s3 + $0x12c] sm:$0xf] %vm3533_vm3, %v3304_v21 }
 0x2e4   :  { %3685 = vst.msk [vmem:[%s6946_s3 + $0x25c] sm:$0xf] %vm3533_vm3, %v3380_v24  ;;  %vm2544_vm5 = vcmp.ge.f32.partialorder %v2125_v26, 0.0  ;;  %v2848_v28 = vmul.f32 0.2, %v2125_v26  ;;  %vm2620_vm6 = vcmp.ge.f32.partialorder %v2315_v27, 0.0 }
 0x2e5   :  { %v2924_v29 = vmul.f32 0.2, %v2315_v27 }
 0x2e6   :  { %v3152_v30 = vsel %vm2544_vm5, %v2125_v26, %v2848_v28 }
 0x2e7   :  { %v3456_v31 = vpack.c.bf16 %v3152_v30, %v3152_v30  ;;  %v3228_v32 = vsel %vm2620_vm6, %v2315_v27, %v2924_v29 }
 0x2e8   :  { %v3532_v35 = vpack.c.bf16 %v3228_v32, %v3228_v32 }
 0x2e9   :  { %3761 = vst.msk [vmem:[%s6946_s3 + $0x38c] sm:$0xf] %vm3533_vm3, %v3456_v31 }
 0x2ea   :  { %3837 = vst.msk [vmem:[%s6946_s3 + $0x4bc] sm:$0xf] %vm3533_vm3, %v3532_v35 }

// kernel: discriminator_forward.7
= control target key start
LH: loop header
LB: loop body
LE: loop exit
PB: predicated region body
PF: predicated region fallthrough
CT: control target
= control target key end

     0   :  { %vm931_vm2 = vcmask 60416   ;;  %s1846_s1 = inlined_call_operand.vmem [shape: bf16[128,8], index: 1, kind: input, shape index: {}]   ;;  %s1847_s2 = inlined_call_operand.vmem [shape: f32[1,8], index: 2, kind: input, shape index: {}]   ;;  %s1848_s0 = inlined_call_operand.vmem [shape: bf16[640,128], index: 0, kind: input, shape index: {}]   ;;  %s1849_s3 = inlined_call_operand.vmem [shape: bf16[640,8], index: 3, kind: output, shape index: {}]  }
   0x1   :  { %v1255_v0 = vld [vmem:[%s1846_s1 + $0x38] sm:$0xff]  ;;  %v1254_v1 = vld [vmem:[%s1846_s1 + $0x30] sm:$0xff]  ;;  %v1253_v2 = vld [vmem:[%s1846_s1 + $0x28] sm:$0xff] }
   0x2   :  { %402 = vmatpush.bf16.msra.mxu0 %v1255_v0  ;;  %1256 = vmatpush.bf16.msra.mxu1 %v1255_v0  ;;  %v1252_v3 = vld [vmem:[%s1846_s1 + $0x20] sm:$0xff]  ;;  %v1251_v4 = vld [vmem:[%s1846_s1 + $0x18] sm:$0xff]  ;;  %v1250_v5 = vld [vmem:[%s1846_s1 + $0x10] sm:$0xff] }
   0x3   :  { %1257 = vmatpush.bf16.msra.mxu2 %v1255_v0  ;;  %1258 = vmatpush.bf16.msra.mxu3 %v1255_v0  ;;  %v1249_v6 = vld [vmem:[%s1846_s1 + $0x8] sm:$0xff]  ;;  %v1248_v7 = vld [vmem:[%s1846_s1] sm:$0xff]  ;;  %v1218_v9 = vld [vmem:[%s1848_s0 + $0x50] sm:$0xff] }
   0x4   :  { %v1208_v8 = vld [vmem:[%s1848_s0] sm:$0xff]  ;;  %v1238_v11 = vld [vmem:[%s1848_s0 + $0xf0] sm:$0xff]  ;;  %v1209_v12 = vld [vmem:[%s1848_s0 + $0x8] sm:$0xff] }
   0x5   :  { %v1228_v10 = vld [vmem:[%s1848_s0 + $0xa0] sm:$0xff]  ;;  %v1219_v13 = vld [vmem:[%s1848_s0 + $0x58] sm:$0xff]  ;;  %v1229_v14 = vld [vmem:[%s1848_s0 + $0xa8] sm:$0xff] }
   0x6   :  { %403 = vmatpush.bf16.msra.mxu0 %v1254_v1  ;;  %1259 = vmatpush.bf16.msra.mxu1 %v1254_v1  ;;  %v1239_v15 = vld [vmem:[%s1848_s0 + $0xf8] sm:$0xff]  ;;  %v1210_v16 = vld [vmem:[%s1848_s0 + $0x10] sm:$0xff]  ;;  %v1220_v17 = vld [vmem:[%s1848_s0 + $0x60] sm:$0xff] }
   0x7   :  { %1260 = vmatpush.bf16.msra.mxu2 %v1254_v1  ;;  %1261 = vmatpush.bf16.msra.mxu3 %v1254_v1  ;;  %v1230_v18 = vld [vmem:[%s1848_s0 + $0xb0] sm:$0xff]  ;;  %v1240_v19 = vld [vmem:[%s1848_s0 + $0x100] sm:$0xff]  ;;  %v1211_v20 = vld [vmem:[%s1848_s0 + $0x18] sm:$0xff] }
   0x8   :  { %v1221_v21 = vld [vmem:[%s1848_s0 + $0x68] sm:$0xff]  ;;  %v1231_v22 = vld [vmem:[%s1848_s0 + $0xb8] sm:$0xff]  ;;  %v1212_v24 = vld [vmem:[%s1848_s0 + $0x20] sm:$0xff] }
   0x9   :  { %v1241_v23 = vld [vmem:[%s1848_s0 + $0x108] sm:$0xff]  ;;  %v1222_v25 = vld [vmem:[%s1848_s0 + $0x70] sm:$0xff]  ;;  %v1232_v26 = vld [vmem:[%s1848_s0 + $0xc0] sm:$0xff] }
   0xa   :  { %404 = vmatpush.bf16.msra.mxu0 %v1253_v2  ;;  %1262 = vmatpush.bf16.msra.mxu1 %v1253_v2  ;;  %v1242_v27 = vld [vmem:[%s1848_s0 + $0x110] sm:$0xff]  ;;  %v1213_v28 = vld [vmem:[%s1848_s0 + $0x28] sm:$0xff]  ;;  %v1223_v29 = vld [vmem:[%s1848_s0 + $0x78] sm:$0xff] }
   0xb   :  { %1263 = vmatpush.bf16.msra.mxu2 %v1253_v2  ;;  %1264 = vmatpush.bf16.msra.mxu3 %v1253_v2  ;;  %v1233_v30 = vld [vmem:[%s1848_s0 + $0xc8] sm:$0xff]  ;;  %v1243_v31 = vld [vmem:[%s1848_s0 + $0x118] sm:$0xff]  ;;  %v1214_v32 = vld [vmem:[%s1848_s0 + $0x30] sm:$0xff] }
   0xc   :  { %v1224_v33 = vld [vmem:[%s1848_s0 + $0x80] sm:$0xff]  ;;  %v1234_v34 = vld [vmem:[%s1848_s0 + $0xd0] sm:$0xff]  ;;  %v1215_v36 = vld [vmem:[%s1848_s0 + $0x38] sm:$0xff] }
   0xd   :  { %v1244_v35 = vld [vmem:[%s1848_s0 + $0x120] sm:$0xff]  ;;  %v1225_v37 = vld [vmem:[%s1848_s0 + $0x88] sm:$0xff]  ;;  %v1235_v38 = vld [vmem:[%s1848_s0 + $0xd8] sm:$0xff] }
   0xe   :  { %405 = vmatpush.bf16.msra.mxu0 %v1252_v3  ;;  %1265 = vmatpush.bf16.msra.mxu1 %v1252_v3  ;;  %v1245_v39 = vld [vmem:[%s1848_s0 + $0x128] sm:$0xff]  ;;  %v1425_v40 = vld [vmem:[%s1847_s2] ss:$0 sm:$0xff]  ;;  %v1226_v42 = vld [vmem:[%s1848_s0 + $0x90] sm:$0xff] }
   0xf   :  { %1266 = vmatpush.bf16.msra.mxu2 %v1252_v3  ;;  %1267 = vmatpush.bf16.msra.mxu3 %v1252_v3  ;;  %v1216_v41 = vld [vmem:[%s1848_s0 + $0x40] sm:$0xff]  ;;  %v1246_v46 = vld [vmem:[%s1848_s0 + $0x130] sm:$0xff] }
  0x10   :  { %v1236_v45 = vld [vmem:[%s1848_s0 + $0xe0] sm:$0xff] }
  0x12   :  { %406 = vmatpush.bf16.msra.mxu0 %v1251_v4  ;;  %1268 = vmatpush.bf16.msra.mxu1 %v1251_v4 }
  0x13   :  { %1269 = vmatpush.bf16.msra.mxu2 %v1251_v4  ;;  %1270 = vmatpush.bf16.msra.mxu3 %v1251_v4 }
  0x16   :  { %407 = vmatpush.bf16.msra.mxu0 %v1250_v5  ;;  %1271 = vmatpush.bf16.msra.mxu1 %v1250_v5 }
  0x17   :  { %1272 = vmatpush.bf16.msra.mxu2 %v1250_v5  ;;  %1273 = vmatpush.bf16.msra.mxu3 %v1250_v5 }
  0x1a   :  { %408 = vmatpush.bf16.msra.mxu0 %v1249_v6  ;;  %1274 = vmatpush.bf16.msra.mxu1 %v1249_v6 }
  0x1b   :  { %1275 = vmatpush.bf16.msra.mxu2 %v1249_v6  ;;  %1276 = vmatpush.bf16.msra.mxu3 %v1249_v6 }
  0x1e   :  { %409 = vmatpush.bf16.msra.mxu0 %v1248_v7  ;;  %1277 = vmatpush.bf16.msra.mxu1 %v1248_v7 }
  0x1f   :  { %1278 = vmatpush.bf16.msra.mxu2 %v1248_v7  ;;  %1279 = vmatpush.bf16.msra.mxu3 %v1248_v7 }
  0x21   :  { %410 = vmatmul.bf16.vlgmr.msra.gmra.mxu0 %v1208_v8  ;;  %460 = vmatmul.bf16.vlgmr.msra.gmra.mxu1 %v1218_v9 }
  0x22   :  { %510 = vmatmul.bf16.vlgmr.msra.gmra.mxu2 %v1228_v10  ;;  %560 = vmatmul.bf16.vlgmr.msra.gmra.mxu3 %v1238_v11 }
  0x31   :  { %415 = vmatmul.bf16.gmra.mxu0 %v1209_v12  ;;  %465 = vmatmul.bf16.gmra.mxu1 %v1219_v13  ;;  %v1217_v13 = vld [vmem:[%s1848_s0 + $0x48] sm:$0xff] }
  0x32   :  { %515 = vmatmul.bf16.gmra.mxu2 %v1229_v14  ;;  %565 = vmatmul.bf16.gmra.mxu3 %v1239_v15  ;;  %v1227_v14 = vld [vmem:[%s1848_s0 + $0x98] sm:$0xff] }
  0x41   :  { %420 = vmatmul.bf16.gmra.mxu0 %v1210_v16  ;;  %470 = vmatmul.bf16.gmra.mxu1 %v1220_v17 }
  0x42   :  { %520 = vmatmul.bf16.gmra.mxu2 %v1230_v18  ;;  %570 = vmatmul.bf16.gmra.mxu3 %v1240_v19  ;;  %v1237_v19 = vld [vmem:[%s1848_s0 + $0xe8] sm:$0xff] }
  0x51   :  { %425 = vmatmul.bf16.gmra.mxu0 %v1211_v20  ;;  %475 = vmatmul.bf16.gmra.mxu1 %v1221_v21  ;;  %v1247_v20 = vld [vmem:[%s1848_s0 + $0x138] sm:$0xff] }
  0x52   :  { %525 = vmatmul.bf16.gmra.mxu2 %v1231_v22  ;;  %575 = vmatmul.bf16.gmra.mxu3 %v1241_v23 }
  0x61   :  { %430 = vmatmul.bf16.gmra.mxu0 %v1212_v24  ;;  %480 = vmatmul.bf16.gmra.mxu1 %v1222_v25 }
  0x62   :  { %530 = vmatmul.bf16.gmra.mxu2 %v1232_v26  ;;  %580 = vmatmul.bf16.gmra.mxu3 %v1242_v27 }
  0x71   :  { %435 = vmatmul.bf16.gmra.mxu0 %v1213_v28  ;;  %485 = vmatmul.bf16.gmra.mxu1 %v1223_v29 }
  0x72   :  { %535 = vmatmul.bf16.gmra.mxu2 %v1233_v30  ;;  %585 = vmatmul.bf16.gmra.mxu3 %v1243_v31 }
  0x81   :  { %440 = vmatmul.bf16.gmra.mxu0 %v1214_v32  ;;  %490 = vmatmul.bf16.gmra.mxu1 %v1224_v33 }
  0x82   :  { %540 = vmatmul.bf16.gmra.mxu2 %v1234_v34  ;;  %590 = vmatmul.bf16.gmra.mxu3 %v1244_v35 }
  0x91   :  { %445 = vmatmul.bf16.gmra.mxu0 %v1215_v36  ;;  %495 = vmatmul.bf16.gmra.mxu1 %v1225_v37 }
  0x92   :  { %545 = vmatmul.bf16.gmra.mxu2 %v1235_v38  ;;  %595 = vmatmul.bf16.gmra.mxu3 %v1245_v39 }
  0x9e   :  { %v411_v43 = vpop.f32.mrf.mxu0  ;;  %v461_v44 = vpop.f32.mrf.mxu1 }
  0x9f   :  { %v412_v47 = vadd.f32 %v1425_v40, %v411_v43  ;;  %v462_v48 = vadd.f32 %v1425_v40, %v461_v44 }
  0xa1   :  { %vm611_vm0 = vcmp.ge.f32.partialorder %v412_v47, 0.0  ;;  %v691_v49 = vmul.f32 0.2, %v412_v47  ;;  %vm631_vm1 = vcmp.ge.f32.partialorder %v462_v48, 0.0  ;;  %v711_v50 = vmul.f32 0.2, %v462_v48  ;;  %450 = vmatmul.bf16.gmra.mxu0 %v1216_v41  ;;  %500 = vmatmul.bf16.gmra.mxu1 %v1226_v42 }
  0xa2   :  { %550 = vmatmul.bf16.gmra.mxu2 %v1236_v45  ;;  %600 = vmatmul.bf16.gmra.mxu3 %v1246_v46 }
  0xa3   :  { %v771_v51 = vsel %vm611_vm0, %v412_v47, %v691_v49  ;;  %v791_v52 = vsel %vm631_vm1, %v462_v48, %v711_v50 }
  0xa4   :  { %v851_v53 = vpack.c.bf16 %v771_v51, %v771_v51  ;;  %v871_v54 = vpack.c.bf16 %v791_v52, %v791_v52 }
  0xa5   :  { %v511_v55 = vpop.f32.mrf.mxu2  ;;  %v561_v56 = vpop.f32.mrf.mxu3 }
  0xa6   :  { %932 = vst.msk [vmem:[%s1849_s3] sm:$0xf] %vm931_vm2, %v851_v53  ;;  %v512_v57 = vadd.f32 %v1425_v40, %v511_v55  ;;  %v562_v58 = vadd.f32 %v1425_v40, %v561_v56  ;;  %v413_v59 = vpop.f32.mrf.mxu0  ;;  %v463_v60 = vpop.f32.mrf.mxu1 }
  0xa7   :  { %952 = vst.msk [vmem:[%s1849_s3 + $0x50] sm:$0xf] %vm931_vm2, %v871_v54  ;;  %v414_v61 = vadd.f32 %v1425_v40, %v413_v59  ;;  %v464_v62 = vadd.f32 %v1425_v40, %v463_v60 }
  0xa8   :  { %vm651_vm3 = vcmp.ge.f32.partialorder %v512_v57, 0.0  ;;  %v731_v63 = vmul.f32 0.2, %v512_v57  ;;  %vm671_vm4 = vcmp.ge.f32.partialorder %v562_v58, 0.0  ;;  %v751_v0 = vmul.f32 0.2, %v562_v58 }
  0xa9   :  { %vm612_vm5 = vcmp.ge.f32.partialorder %v414_v61, 0.0  ;;  %v692_v1 = vmul.f32 0.2, %v414_v61  ;;  %vm632_vm6 = vcmp.ge.f32.partialorder %v464_v62, 0.0  ;;  %v712_v2 = vmul.f32 0.2, %v464_v62 }
  0xaa   :  { %v811_v3 = vsel %vm651_vm3, %v512_v57, %v731_v63  ;;  %v831_v4 = vsel %vm671_vm4, %v562_v58, %v751_v0 }
  0xab   :  { %v891_v5 = vpack.c.bf16 %v811_v3, %v811_v3  ;;  %v911_v6 = vpack.c.bf16 %v831_v4, %v831_v4  ;;  %v772_v7 = vsel %vm612_vm5, %v414_v61, %v692_v1  ;;  %v792_v8 = vsel %vm632_vm6, %v464_v62, %v712_v2 }
  0xac   :  { %v852_v9 = vpack.c.bf16 %v772_v7, %v772_v7  ;;  %v872_v10 = vpack.c.bf16 %v792_v8, %v792_v8 }
  0xad   :  { %972 = vst.msk [vmem:[%s1849_s3 + $0xa0] sm:$0xf] %vm931_vm2, %v891_v5  ;;  %v513_v11 = vpop.f32.mrf.mxu2  ;;  %v563_v12 = vpop.f32.mrf.mxu3 }
  0xae   :  { %992 = vst.msk [vmem:[%s1849_s3 + $0xf0] sm:$0xf] %vm931_vm2, %v911_v6  ;;  %v514_v15 = vadd.f32 %v1425_v40, %v513_v11  ;;  %v564_v16 = vadd.f32 %v1425_v40, %v563_v12  ;;  %v416_v17 = vpop.f32.mrf.mxu0  ;;  %v466_v18 = vpop.f32.mrf.mxu1 }
  0xaf   :  { %933 = vst.msk [vmem:[%s1849_s3 + $0x4] sm:$0xf] %vm931_vm2, %v852_v9  ;;  %v417_v21 = vadd.f32 %v1425_v40, %v416_v17  ;;  %v467_v22 = vadd.f32 %v1425_v40, %v466_v18 }
  0xb0   :  { %953 = vst.msk [vmem:[%s1849_s3 + $0x54] sm:$0xf] %vm931_vm2, %v872_v10  ;;  %vm652_vm7 = vcmp.ge.f32.partialorder %v514_v15, 0.0  ;;  %v732_v23 = vmul.f32 0.2, %v514_v15  ;;  %vm672_vm8 = vcmp.ge.f32.partialorder %v564_v16, 0.0 }
  0xb1   :  { %v752_v24 = vmul.f32 0.2, %v564_v16  ;;  %vm613_vm9 = vcmp.ge.f32.partialorder %v417_v21, 0.0  ;;  %v693_v25 = vmul.f32 0.2, %v417_v21  ;;  %vm633_vm10 = vcmp.ge.f32.partialorder %v467_v22, 0.0  ;;  %455 = vmatmul.bf16.gmra.mxu0 %v1217_v13  ;;  %505 = vmatmul.bf16.gmra.mxu1 %v1227_v14 }
  0xb2   :  { %v812_v26 = vsel %vm652_vm7, %v514_v15, %v732_v23  ;;  %v713_v27 = vmul.f32 0.2, %v467_v22  ;;  %555 = vmatmul.bf16.gmra.mxu2 %v1237_v19  ;;  %605 = vmatmul.bf16.gmra.mxu3 %v1247_v20 }
  0xb3   :  { %v892_v28 = vpack.c.bf16 %v812_v26, %v812_v26  ;;  %v832_v29 = vsel %vm672_vm8, %v564_v16, %v752_v24  ;;  %v773_v30 = vsel %vm613_vm9, %v417_v21, %v693_v25 }
  0xb4   :  { %v912_v31 = vpack.c.bf16 %v832_v29, %v832_v29  ;;  %v853_v32 = vpack.c.bf16 %v773_v30, %v773_v30  ;;  %v793_v33 = vsel %vm633_vm10, %v467_v22, %v713_v27 }
  0xb5   :  { %973 = vst.msk [vmem:[%s1849_s3 + $0xa4] sm:$0xf] %vm931_vm2, %v892_v28  ;;  %v873_v34 = vpack.c.bf16 %v793_v33, %v793_v33  ;;  %v516_v35 = vpop.f32.mrf.mxu2  ;;  %v566_v36 = vpop.f32.mrf.mxu3 }
  0xb6   :  { %993 = vst.msk [vmem:[%s1849_s3 + $0xf4] sm:$0xf] %vm931_vm2, %v912_v31  ;;  %v517_v37 = vadd.f32 %v1425_v40, %v516_v35  ;;  %v567_v38 = vadd.f32 %v1425_v40, %v566_v36  ;;  %v418_v39 = vpop.f32.mrf.mxu0  ;;  %v468_v41 = vpop.f32.mrf.mxu1 }
  0xb7   :  { %934 = vst.msk [vmem:[%s1849_s3 + $0x8] sm:$0xf] %vm931_vm2, %v853_v32  ;;  %v419_v42 = vadd.f32 %v1425_v40, %v418_v39  ;;  %v469_v43 = vadd.f32 %v1425_v40, %v468_v41 }
  0xb8   :  { %954 = vst.msk [vmem:[%s1849_s3 + $0x58] sm:$0xf] %vm931_vm2, %v873_v34  ;;  %vm653_vm11 = vcmp.ge.f32.partialorder %v517_v37, 0.0  ;;  %v733_v44 = vmul.f32 0.2, %v517_v37  ;;  %vm673_vm12 = vcmp.ge.f32.partialorder %v567_v38, 0.0 }
  0xb9   :  { %v753_v45 = vmul.f32 0.2, %v567_v38  ;;  %vm614_vm13 = vcmp.ge.f32.partialorder %v419_v42, 0.0  ;;  %v694_v46 = vmul.f32 0.2, %v419_v42  ;;  %vm634_vm14 = vcmp.ge.f32.partialorder %v469_v43, 0.0 }
  0xba   :  { %v813_v47 = vsel %vm653_vm11, %v517_v37, %v733_v44  ;;  %v714_v48 = vmul.f32 0.2, %v469_v43 }
  0xbb   :  { %v893_v49 = vpack.c.bf16 %v813_v47, %v813_v47  ;;  %v833_v50 = vsel %vm673_vm12, %v567_v38, %v753_v45  ;;  %v774_v51 = vsel %vm614_vm13, %v419_v42, %v694_v46 }
  0xbc   :  { %v913_v52 = vpack.c.bf16 %v833_v50, %v833_v50  ;;  %v854_v53 = vpack.c.bf16 %v774_v51, %v774_v51  ;;  %v794_v54 = vsel %vm634_vm14, %v469_v43, %v714_v48 }
  0xbd   :  { %974 = vst.msk [vmem:[%s1849_s3 + $0xa8] sm:$0xf] %vm931_vm2, %v893_v49  ;;  %v874_v55 = vpack.c.bf16 %v794_v54, %v794_v54  ;;  %v518_v56 = vpop.f32.mrf.mxu2  ;;  %v568_v57 = vpop.f32.mrf.mxu3 }
  0xbe   :  { %994 = vst.msk [vmem:[%s1849_s3 + $0xf8] sm:$0xf] %vm931_vm2, %v913_v52  ;;  %v519_v58 = vadd.f32 %v1425_v40, %v518_v56  ;;  %v569_v59 = vadd.f32 %v1425_v40, %v568_v57  ;;  %v421_v60 = vpop.f32.mrf.mxu0  ;;  %v471_v61 = vpop.f32.mrf.mxu1 }
  0xbf   :  { %935 = vst.msk [vmem:[%s1849_s3 + $0xc] sm:$0xf] %vm931_vm2, %v854_v53  ;;  %v422_v62 = vadd.f32 %v1425_v40, %v421_v60  ;;  %v472_v63 = vadd.f32 %v1425_v40, %v471_v61 }
  0xc0   :  { %955 = vst.msk [vmem:[%s1849_s3 + $0x5c] sm:$0xf] %vm931_vm2, %v874_v55  ;;  %vm654_vm15 = vcmp.ge.f32.partialorder %v519_v58, 0.0  ;;  %v734_v0 = vmul.f32 0.2, %v519_v58  ;;  %vm674_vm0 = vcmp.ge.f32.partialorder %v569_v59, 0.0 }
  0xc1   :  { %v754_v1 = vmul.f32 0.2, %v569_v59  ;;  %vm615_vm1 = vcmp.ge.f32.partialorder %v422_v62, 0.0  ;;  %v695_v2 = vmul.f32 0.2, %v422_v62  ;;  %vm635_vm3 = vcmp.ge.f32.partialorder %v472_v63, 0.0 }
  0xc2   :  { %v814_v3 = vsel %vm654_vm15, %v519_v58, %v734_v0  ;;  %v715_v4 = vmul.f32 0.2, %v472_v63 }
  0xc3   :  { %v894_v5 = vpack.c.bf16 %v814_v3, %v814_v3  ;;  %v834_v6 = vsel %vm674_vm0, %v569_v59, %v754_v1  ;;  %v775_v7 = vsel %vm615_vm1, %v422_v62, %v695_v2 }
  0xc4   :  { %v914_v8 = vpack.c.bf16 %v834_v6, %v834_v6  ;;  %v855_v9 = vpack.c.bf16 %v775_v7, %v775_v7  ;;  %v795_v10 = vsel %vm635_vm3, %v472_v63, %v715_v4 }
  0xc5   :  { %975 = vst.msk [vmem:[%s1849_s3 + $0xac] sm:$0xf] %vm931_vm2, %v894_v5  ;;  %v875_v11 = vpack.c.bf16 %v795_v10, %v795_v10  ;;  %v521_v12 = vpop.f32.mrf.mxu2  ;;  %v571_v13 = vpop.f32.mrf.mxu3 }
  0xc6   :  { %995 = vst.msk [vmem:[%s1849_s3 + $0xfc] sm:$0xf] %vm931_vm2, %v914_v8  ;;  %v522_v14 = vadd.f32 %v1425_v40, %v521_v12  ;;  %v572_v15 = vadd.f32 %v1425_v40, %v571_v13  ;;  %v423_v16 = vpop.f32.mrf.mxu0  ;;  %v473_v17 = vpop.f32.mrf.mxu1 }
  0xc7   :  { %936 = vst.msk [vmem:[%s1849_s3 + $0x10] sm:$0xf] %vm931_vm2, %v855_v9  ;;  %v424_v18 = vadd.f32 %v1425_v40, %v423_v16  ;;  %v474_v19 = vadd.f32 %v1425_v40, %v473_v17 }
  0xc8   :  { %956 = vst.msk [vmem:[%s1849_s3 + $0x60] sm:$0xf] %vm931_vm2, %v875_v11  ;;  %vm655_vm4 = vcmp.ge.f32.partialorder %v522_v14, 0.0  ;;  %v735_v20 = vmul.f32 0.2, %v522_v14  ;;  %vm675_vm5 = vcmp.ge.f32.partialorder %v572_v15, 0.0 }
  0xc9   :  { %v755_v21 = vmul.f32 0.2, %v572_v15  ;;  %vm616_vm6 = vcmp.ge.f32.partialorder %v424_v18, 0.0  ;;  %v696_v22 = vmul.f32 0.2, %v424_v18  ;;  %vm636_vm7 = vcmp.ge.f32.partialorder %v474_v19, 0.0 }
  0xca   :  { %v815_v23 = vsel %vm655_vm4, %v522_v14, %v735_v20  ;;  %v716_v24 = vmul.f32 0.2, %v474_v19 }
  0xcb   :  { %v895_v25 = vpack.c.bf16 %v815_v23, %v815_v23  ;;  %v835_v26 = vsel %vm675_vm5, %v572_v15, %v755_v21  ;;  %v776_v27 = vsel %vm616_vm6, %v424_v18, %v696_v22 }
  0xcc   :  { %v915_v28 = vpack.c.bf16 %v835_v26, %v835_v26  ;;  %v856_v29 = vpack.c.bf16 %v776_v27, %v776_v27  ;;  %v796_v30 = vsel %vm636_vm7, %v474_v19, %v716_v24 }
  0xcd   :  { %976 = vst.msk [vmem:[%s1849_s3 + $0xb0] sm:$0xf] %vm931_vm2, %v895_v25  ;;  %v876_v31 = vpack.c.bf16 %v796_v30, %v796_v30  ;;  %v523_v32 = vpop.f32.mrf.mxu2  ;;  %v573_v33 = vpop.f32.mrf.mxu3 }
  0xce   :  { %996 = vst.msk [vmem:[%s1849_s3 + $0x100] sm:$0xf] %vm931_vm2, %v915_v28  ;;  %v524_v34 = vadd.f32 %v1425_v40, %v523_v32  ;;  %v574_v35 = vadd.f32 %v1425_v40, %v573_v33  ;;  %v426_v36 = vpop.f32.mrf.mxu0  ;;  %v476_v37 = vpop.f32.mrf.mxu1 }
  0xcf   :  { %937 = vst.msk [vmem:[%s1849_s3 + $0x14] sm:$0xf] %vm931_vm2, %v856_v29  ;;  %v427_v38 = vadd.f32 %v1425_v40, %v426_v36  ;;  %v477_v39 = vadd.f32 %v1425_v40, %v476_v37 }
  0xd0   :  { %957 = vst.msk [vmem:[%s1849_s3 + $0x64] sm:$0xf] %vm931_vm2, %v876_v31  ;;  %vm656_vm8 = vcmp.ge.f32.partialorder %v524_v34, 0.0  ;;  %v736_v41 = vmul.f32 0.2, %v524_v34  ;;  %vm676_vm9 = vcmp.ge.f32.partialorder %v574_v35, 0.0 }
  0xd1   :  { %v756_v42 = vmul.f32 0.2, %v574_v35  ;;  %vm617_vm10 = vcmp.ge.f32.partialorder %v427_v38, 0.0  ;;  %v697_v43 = vmul.f32 0.2, %v427_v38  ;;  %vm637_vm11 = vcmp.ge.f32.partialorder %v477_v39, 0.0 }
  0xd2   :  { %v816_v44 = vsel %vm656_vm8, %v524_v34, %v736_v41  ;;  %v717_v45 = vmul.f32 0.2, %v477_v39 }
  0xd3   :  { %v896_v46 = vpack.c.bf16 %v816_v44, %v816_v44  ;;  %v836_v47 = vsel %vm676_vm9, %v574_v35, %v756_v42  ;;  %v777_v48 = vsel %vm617_vm10, %v427_v38, %v697_v43 }
  0xd4   :  { %v916_v49 = vpack.c.bf16 %v836_v47, %v836_v47  ;;  %v857_v50 = vpack.c.bf16 %v777_v48, %v777_v48  ;;  %v797_v51 = vsel %vm637_vm11, %v477_v39, %v717_v45 }
  0xd5   :  { %977 = vst.msk [vmem:[%s1849_s3 + $0xb4] sm:$0xf] %vm931_vm2, %v896_v46  ;;  %v877_v52 = vpack.c.bf16 %v797_v51, %v797_v51  ;;  %v526_v53 = vpop.f32.mrf.mxu2  ;;  %v576_v54 = vpop.f32.mrf.mxu3 }
  0xd6   :  { %997 = vst.msk [vmem:[%s1849_s3 + $0x104] sm:$0xf] %vm931_vm2, %v916_v49  ;;  %v527_v55 = vadd.f32 %v1425_v40, %v526_v53  ;;  %v577_v56 = vadd.f32 %v1425_v40, %v576_v54  ;;  %v428_v57 = vpop.f32.mrf.mxu0  ;;  %v478_v58 = vpop.f32.mrf.mxu1 }
  0xd7   :  { %938 = vst.msk [vmem:[%s1849_s3 + $0x18] sm:$0xf] %vm931_vm2, %v857_v50  ;;  %v429_v59 = vadd.f32 %v1425_v40, %v428_v57  ;;  %v479_v60 = vadd.f32 %v1425_v40, %v478_v58 }
  0xd8   :  { %958 = vst.msk [vmem:[%s1849_s3 + $0x68] sm:$0xf] %vm931_vm2, %v877_v52  ;;  %vm657_vm12 = vcmp.ge.f32.partialorder %v527_v55, 0.0  ;;  %v737_v61 = vmul.f32 0.2, %v527_v55  ;;  %vm677_vm13 = vcmp.ge.f32.partialorder %v577_v56, 0.0 }
  0xd9   :  { %v757_v62 = vmul.f32 0.2, %v577_v56  ;;  %vm618_vm14 = vcmp.ge.f32.partialorder %v429_v59, 0.0  ;;  %v698_v63 = vmul.f32 0.2, %v429_v59  ;;  %vm638_vm15 = vcmp.ge.f32.partialorder %v479_v60, 0.0 }
  0xda   :  { %v817_v0 = vsel %vm657_vm12, %v527_v55, %v737_v61  ;;  %v718_v1 = vmul.f32 0.2, %v479_v60 }
  0xdb   :  { %v897_v2 = vpack.c.bf16 %v817_v0, %v817_v0  ;;  %v837_v3 = vsel %vm677_vm13, %v577_v56, %v757_v62  ;;  %v778_v4 = vsel %vm618_vm14, %v429_v59, %v698_v63 }
  0xdc   :  { %v917_v5 = vpack.c.bf16 %v837_v3, %v837_v3  ;;  %v858_v6 = vpack.c.bf16 %v778_v4, %v778_v4  ;;  %v798_v7 = vsel %vm638_vm15, %v479_v60, %v718_v1 }
  0xdd   :  { %978 = vst.msk [vmem:[%s1849_s3 + $0xb8] sm:$0xf] %vm931_vm2, %v897_v2  ;;  %v878_v8 = vpack.c.bf16 %v798_v7, %v798_v7  ;;  %v528_v9 = vpop.f32.mrf.mxu2  ;;  %v578_v10 = vpop.f32.mrf.mxu3 }
  0xde   :  { %998 = vst.msk [vmem:[%s1849_s3 + $0x108] sm:$0xf] %vm931_vm2, %v917_v5  ;;  %v529_v11 = vadd.f32 %v1425_v40, %v528_v9  ;;  %v579_v12 = vadd.f32 %v1425_v40, %v578_v10  ;;  %v431_v13 = vpop.f32.mrf.mxu0  ;;  %v481_v14 = vpop.f32.mrf.mxu1 }
  0xdf   :  { %939 = vst.msk [vmem:[%s1849_s3 + $0x1c] sm:$0xf] %vm931_vm2, %v858_v6  ;;  %v432_v15 = vadd.f32 %v1425_v40, %v431_v13  ;;  %v482_v16 = vadd.f32 %v1425_v40, %v481_v14 }
  0xe0   :  { %959 = vst.msk [vmem:[%s1849_s3 + $0x6c] sm:$0xf] %vm931_vm2, %v878_v8  ;;  %vm658_vm0 = vcmp.ge.f32.partialorder %v529_v11, 0.0  ;;  %v738_v17 = vmul.f32 0.2, %v529_v11  ;;  %vm678_vm1 = vcmp.ge.f32.partialorder %v579_v12, 0.0 }
  0xe1   :  { %v758_v18 = vmul.f32 0.2, %v579_v12  ;;  %vm619_vm3 = vcmp.ge.f32.partialorder %v432_v15, 0.0  ;;  %v699_v19 = vmul.f32 0.2, %v432_v15  ;;  %vm639_vm4 = vcmp.ge.f32.partialorder %v482_v16, 0.0 }
  0xe2   :  { %v818_v20 = vsel %vm658_vm0, %v529_v11, %v738_v17  ;;  %v719_v21 = vmul.f32 0.2, %v482_v16 }
  0xe3   :  { %v898_v22 = vpack.c.bf16 %v818_v20, %v818_v20  ;;  %v838_v23 = vsel %vm678_vm1, %v579_v12, %v758_v18  ;;  %v779_v24 = vsel %vm619_vm3, %v432_v15, %v699_v19 }
  0xe4   :  { %v918_v25 = vpack.c.bf16 %v838_v23, %v838_v23  ;;  %v859_v26 = vpack.c.bf16 %v779_v24, %v779_v24  ;;  %v799_v27 = vsel %vm639_vm4, %v482_v16, %v719_v21 }
  0xe5   :  { %979 = vst.msk [vmem:[%s1849_s3 + $0xbc] sm:$0xf] %vm931_vm2, %v898_v22  ;;  %v879_v28 = vpack.c.bf16 %v799_v27, %v799_v27  ;;  %v531_v29 = vpop.f32.mrf.mxu2  ;;  %v581_v30 = vpop.f32.mrf.mxu3 }
  0xe6   :  { %999 = vst.msk [vmem:[%s1849_s3 + $0x10c] sm:$0xf] %vm931_vm2, %v918_v25  ;;  %v532_v31 = vadd.f32 %v1425_v40, %v531_v29  ;;  %v582_v32 = vadd.f32 %v1425_v40, %v581_v30  ;;  %v433_v33 = vpop.f32.mrf.mxu0  ;;  %v483_v34 = vpop.f32.mrf.mxu1 }
  0xe7   :  { %940 = vst.msk [vmem:[%s1849_s3 + $0x20] sm:$0xf] %vm931_vm2, %v859_v26  ;;  %v434_v35 = vadd.f32 %v1425_v40, %v433_v33  ;;  %v484_v36 = vadd.f32 %v1425_v40, %v483_v34 }
  0xe8   :  { %960 = vst.msk [vmem:[%s1849_s3 + $0x70] sm:$0xf] %vm931_vm2, %v879_v28  ;;  %vm659_vm5 = vcmp.ge.f32.partialorder %v532_v31, 0.0  ;;  %v739_v37 = vmul.f32 0.2, %v532_v31  ;;  %vm679_vm6 = vcmp.ge.f32.partialorder %v582_v32, 0.0 }
  0xe9   :  { %v759_v38 = vmul.f32 0.2, %v582_v32  ;;  %vm620_vm7 = vcmp.ge.f32.partialorder %v434_v35, 0.0  ;;  %v700_v39 = vmul.f32 0.2, %v434_v35  ;;  %vm640_vm8 = vcmp.ge.f32.partialorder %v484_v36, 0.0 }
  0xea   :  { %v819_v41 = vsel %vm659_vm5, %v532_v31, %v739_v37  ;;  %v720_v42 = vmul.f32 0.2, %v484_v36 }
  0xeb   :  { %v899_v43 = vpack.c.bf16 %v819_v41, %v819_v41  ;;  %v839_v44 = vsel %vm679_vm6, %v582_v32, %v759_v38  ;;  %v780_v45 = vsel %vm620_vm7, %v434_v35, %v700_v39 }
  0xec   :  { %v919_v46 = vpack.c.bf16 %v839_v44, %v839_v44  ;;  %v860_v47 = vpack.c.bf16 %v780_v45, %v780_v45  ;;  %v800_v48 = vsel %vm640_vm8, %v484_v36, %v720_v42 }
  0xed   :  { %980 = vst.msk [vmem:[%s1849_s3 + $0xc0] sm:$0xf] %vm931_vm2, %v899_v43  ;;  %v880_v49 = vpack.c.bf16 %v800_v48, %v800_v48  ;;  %v533_v50 = vpop.f32.mrf.mxu2  ;;  %v583_v51 = vpop.f32.mrf.mxu3 }
  0xee   :  { %1000 = vst.msk [vmem:[%s1849_s3 + $0x110] sm:$0xf] %vm931_vm2, %v919_v46  ;;  %v534_v52 = vadd.f32 %v1425_v40, %v533_v50  ;;  %v584_v53 = vadd.f32 %v1425_v40, %v583_v51  ;;  %v436_v54 = vpop.f32.mrf.mxu0  ;;  %v486_v55 = vpop.f32.mrf.mxu1 }
  0xef   :  { %941 = vst.msk [vmem:[%s1849_s3 + $0x24] sm:$0xf] %vm931_vm2, %v860_v47  ;;  %v437_v56 = vadd.f32 %v1425_v40, %v436_v54  ;;  %v487_v57 = vadd.f32 %v1425_v40, %v486_v55 }
  0xf0   :  { %961 = vst.msk [vmem:[%s1849_s3 + $0x74] sm:$0xf] %vm931_vm2, %v880_v49  ;;  %vm660_vm9 = vcmp.ge.f32.partialorder %v534_v52, 0.0  ;;  %v740_v58 = vmul.f32 0.2, %v534_v52  ;;  %vm680_vm10 = vcmp.ge.f32.partialorder %v584_v53, 0.0 }
  0xf1   :  { %v760_v59 = vmul.f32 0.2, %v584_v53  ;;  %vm621_vm11 = vcmp.ge.f32.partialorder %v437_v56, 0.0  ;;  %v701_v60 = vmul.f32 0.2, %v437_v56  ;;  %vm641_vm12 = vcmp.ge.f32.partialorder %v487_v57, 0.0 }
  0xf2   :  { %v820_v61 = vsel %vm660_vm9, %v534_v52, %v740_v58  ;;  %v721_v62 = vmul.f32 0.2, %v487_v57 }
  0xf3   :  { %v900_v63 = vpack.c.bf16 %v820_v61, %v820_v61  ;;  %v840_v0 = vsel %vm680_vm10, %v584_v53, %v760_v59  ;;  %v781_v1 = vsel %vm621_vm11, %v437_v56, %v701_v60 }
  0xf4   :  { %v920_v2 = vpack.c.bf16 %v840_v0, %v840_v0  ;;  %v861_v3 = vpack.c.bf16 %v781_v1, %v781_v1  ;;  %v801_v4 = vsel %vm641_vm12, %v487_v57, %v721_v62 }
  0xf5   :  { %981 = vst.msk [vmem:[%s1849_s3 + $0xc4] sm:$0xf] %vm931_vm2, %v900_v63  ;;  %v881_v5 = vpack.c.bf16 %v801_v4, %v801_v4  ;;  %v536_v6 = vpop.f32.mrf.mxu2  ;;  %v586_v7 = vpop.f32.mrf.mxu3 }
  0xf6   :  { %1001 = vst.msk [vmem:[%s1849_s3 + $0x114] sm:$0xf] %vm931_vm2, %v920_v2  ;;  %v537_v8 = vadd.f32 %v1425_v40, %v536_v6  ;;  %v587_v9 = vadd.f32 %v1425_v40, %v586_v7  ;;  %v438_v10 = vpop.f32.mrf.mxu0  ;;  %v488_v11 = vpop.f32.mrf.mxu1 }
  0xf7   :  { %942 = vst.msk [vmem:[%s1849_s3 + $0x28] sm:$0xf] %vm931_vm2, %v861_v3  ;;  %v439_v12 = vadd.f32 %v1425_v40, %v438_v10  ;;  %v489_v13 = vadd.f32 %v1425_v40, %v488_v11 }
  0xf8   :  { %962 = vst.msk [vmem:[%s1849_s3 + $0x78] sm:$0xf] %vm931_vm2, %v881_v5  ;;  %vm661_vm13 = vcmp.ge.f32.partialorder %v537_v8, 0.0  ;;  %v741_v14 = vmul.f32 0.2, %v537_v8  ;;  %vm681_vm14 = vcmp.ge.f32.partialorder %v587_v9, 0.0 }
  0xf9   :  { %v761_v15 = vmul.f32 0.2, %v587_v9  ;;  %vm622_vm15 = vcmp.ge.f32.partialorder %v439_v12, 0.0  ;;  %v702_v16 = vmul.f32 0.2, %v439_v12  ;;  %vm642_vm0 = vcmp.ge.f32.partialorder %v489_v13, 0.0 }
  0xfa   :  { %v821_v17 = vsel %vm661_vm13, %v537_v8, %v741_v14  ;;  %v722_v18 = vmul.f32 0.2, %v489_v13 }
  0xfb   :  { %v901_v19 = vpack.c.bf16 %v821_v17, %v821_v17  ;;  %v841_v20 = vsel %vm681_vm14, %v587_v9, %v761_v15  ;;  %v782_v21 = vsel %vm622_vm15, %v439_v12, %v702_v16 }
  0xfc   :  { %v921_v22 = vpack.c.bf16 %v841_v20, %v841_v20  ;;  %v862_v23 = vpack.c.bf16 %v782_v21, %v782_v21  ;;  %v802_v24 = vsel %vm642_vm0, %v489_v13, %v722_v18 }
  0xfd   :  { %982 = vst.msk [vmem:[%s1849_s3 + $0xc8] sm:$0xf] %vm931_vm2, %v901_v19  ;;  %v882_v25 = vpack.c.bf16 %v802_v24, %v802_v24  ;;  %v538_v26 = vpop.f32.mrf.mxu2  ;;  %v588_v27 = vpop.f32.mrf.mxu3 }
  0xfe   :  { %1002 = vst.msk [vmem:[%s1849_s3 + $0x118] sm:$0xf] %vm931_vm2, %v921_v22  ;;  %v539_v28 = vadd.f32 %v1425_v40, %v538_v26  ;;  %v589_v29 = vadd.f32 %v1425_v40, %v588_v27  ;;  %v441_v30 = vpop.f32.mrf.mxu0  ;;  %v491_v31 = vpop.f32.mrf.mxu1 }
  0xff   :  { %943 = vst.msk [vmem:[%s1849_s3 + $0x2c] sm:$0xf] %vm931_vm2, %v862_v23  ;;  %v442_v32 = vadd.f32 %v1425_v40, %v441_v30  ;;  %v492_v33 = vadd.f32 %v1425_v40, %v491_v31 }
 0x100   :  { %963 = vst.msk [vmem:[%s1849_s3 + $0x7c] sm:$0xf] %vm931_vm2, %v882_v25  ;;  %vm662_vm1 = vcmp.ge.f32.partialorder %v539_v28, 0.0  ;;  %v742_v34 = vmul.f32 0.2, %v539_v28  ;;  %vm682_vm3 = vcmp.ge.f32.partialorder %v589_v29, 0.0 }
 0x101   :  { %v762_v35 = vmul.f32 0.2, %v589_v29  ;;  %vm623_vm4 = vcmp.ge.f32.partialorder %v442_v32, 0.0  ;;  %v703_v36 = vmul.f32 0.2, %v442_v32  ;;  %vm643_vm5 = vcmp.ge.f32.partialorder %v492_v33, 0.0 }
 0x102   :  { %v822_v37 = vsel %vm662_vm1, %v539_v28, %v742_v34  ;;  %v723_v38 = vmul.f32 0.2, %v492_v33 }
 0x103   :  { %v902_v39 = vpack.c.bf16 %v822_v37, %v822_v37  ;;  %v842_v41 = vsel %vm682_vm3, %v589_v29, %v762_v35  ;;  %v783_v42 = vsel %vm623_vm4, %v442_v32, %v703_v36 }
 0x104   :  { %v922_v43 = vpack.c.bf16 %v842_v41, %v842_v41  ;;  %v863_v44 = vpack.c.bf16 %v783_v42, %v783_v42  ;;  %v803_v45 = vsel %vm643_vm5, %v492_v33, %v723_v38 }
 0x105   :  { %983 = vst.msk [vmem:[%s1849_s3 + $0xcc] sm:$0xf] %vm931_vm2, %v902_v39  ;;  %v883_v46 = vpack.c.bf16 %v803_v45, %v803_v45  ;;  %v541_v47 = vpop.f32.mrf.mxu2  ;;  %v591_v48 = vpop.f32.mrf.mxu3 }
 0x106   :  { %1003 = vst.msk [vmem:[%s1849_s3 + $0x11c] sm:$0xf] %vm931_vm2, %v922_v43  ;;  %v542_v49 = vadd.f32 %v1425_v40, %v541_v47  ;;  %v592_v50 = vadd.f32 %v1425_v40, %v591_v48  ;;  %v443_v51 = vpop.f32.mrf.mxu0  ;;  %v493_v52 = vpop.f32.mrf.mxu1 }
 0x107   :  { %944 = vst.msk [vmem:[%s1849_s3 + $0x30] sm:$0xf] %vm931_vm2, %v863_v44  ;;  %v444_v53 = vadd.f32 %v1425_v40, %v443_v51  ;;  %v494_v54 = vadd.f32 %v1425_v40, %v493_v52 }
 0x108   :  { %964 = vst.msk [vmem:[%s1849_s3 + $0x80] sm:$0xf] %vm931_vm2, %v883_v46  ;;  %vm663_vm6 = vcmp.ge.f32.partialorder %v542_v49, 0.0  ;;  %v743_v55 = vmul.f32 0.2, %v542_v49  ;;  %vm683_vm7 = vcmp.ge.f32.partialorder %v592_v50, 0.0 }
 0x109   :  { %v763_v56 = vmul.f32 0.2, %v592_v50  ;;  %vm624_vm8 = vcmp.ge.f32.partialorder %v444_v53, 0.0  ;;  %v704_v57 = vmul.f32 0.2, %v444_v53  ;;  %vm644_vm9 = vcmp.ge.f32.partialorder %v494_v54, 0.0 }
 0x10a   :  { %v823_v58 = vsel %vm663_vm6, %v542_v49, %v743_v55  ;;  %v724_v59 = vmul.f32 0.2, %v494_v54 }
 0x10b   :  { %v903_v60 = vpack.c.bf16 %v823_v58, %v823_v58  ;;  %v843_v61 = vsel %vm683_vm7, %v592_v50, %v763_v56  ;;  %v784_v62 = vsel %vm624_vm8, %v444_v53, %v704_v57 }
 0x10c   :  { %v923_v63 = vpack.c.bf16 %v843_v61, %v843_v61  ;;  %v864_v0 = vpack.c.bf16 %v784_v62, %v784_v62  ;;  %v804_v1 = vsel %vm644_vm9, %v494_v54, %v724_v59 }
 0x10d   :  { %984 = vst.msk [vmem:[%s1849_s3 + $0xd0] sm:$0xf] %vm931_vm2, %v903_v60  ;;  %v884_v2 = vpack.c.bf16 %v804_v1, %v804_v1  ;;  %v543_v3 = vpop.f32.mrf.mxu2  ;;  %v593_v4 = vpop.f32.mrf.mxu3 }
 0x10e   :  { %1004 = vst.msk [vmem:[%s1849_s3 + $0x120] sm:$0xf] %vm931_vm2, %v923_v63  ;;  %v544_v5 = vadd.f32 %v1425_v40, %v543_v3  ;;  %v594_v6 = vadd.f32 %v1425_v40, %v593_v4  ;;  %v446_v7 = vpop.f32.mrf.mxu0  ;;  %v496_v8 = vpop.f32.mrf.mxu1 }
 0x10f   :  { %945 = vst.msk [vmem:[%s1849_s3 + $0x34] sm:$0xf] %vm931_vm2, %v864_v0  ;;  %v447_v9 = vadd.f32 %v1425_v40, %v446_v7  ;;  %v497_v10 = vadd.f32 %v1425_v40, %v496_v8 }
 0x110   :  { %965 = vst.msk [vmem:[%s1849_s3 + $0x84] sm:$0xf] %vm931_vm2, %v884_v2  ;;  %vm664_vm10 = vcmp.ge.f32.partialorder %v544_v5, 0.0  ;;  %v744_v11 = vmul.f32 0.2, %v544_v5  ;;  %vm684_vm11 = vcmp.ge.f32.partialorder %v594_v6, 0.0 }
 0x111   :  { %v764_v12 = vmul.f32 0.2, %v594_v6  ;;  %vm625_vm12 = vcmp.ge.f32.partialorder %v447_v9, 0.0  ;;  %v705_v13 = vmul.f32 0.2, %v447_v9  ;;  %vm645_vm13 = vcmp.ge.f32.partialorder %v497_v10, 0.0 }
 0x112   :  { %v824_v14 = vsel %vm664_vm10, %v544_v5, %v744_v11  ;;  %v725_v15 = vmul.f32 0.2, %v497_v10 }
 0x113   :  { %v904_v16 = vpack.c.bf16 %v824_v14, %v824_v14  ;;  %v844_v17 = vsel %vm684_vm11, %v594_v6, %v764_v12  ;;  %v785_v18 = vsel %vm625_vm12, %v447_v9, %v705_v13 }
 0x114   :  { %v924_v19 = vpack.c.bf16 %v844_v17, %v844_v17  ;;  %v865_v20 = vpack.c.bf16 %v785_v18, %v785_v18  ;;  %v805_v21 = vsel %vm645_vm13, %v497_v10, %v725_v15 }
 0x115   :  { %985 = vst.msk [vmem:[%s1849_s3 + $0xd4] sm:$0xf] %vm931_vm2, %v904_v16  ;;  %v885_v22 = vpack.c.bf16 %v805_v21, %v805_v21  ;;  %v546_v23 = vpop.f32.mrf.mxu2  ;;  %v596_v24 = vpop.f32.mrf.mxu3 }
 0x116   :  { %1005 = vst.msk [vmem:[%s1849_s3 + $0x124] sm:$0xf] %vm931_vm2, %v924_v19  ;;  %v547_v25 = vadd.f32 %v1425_v40, %v546_v23  ;;  %v597_v26 = vadd.f32 %v1425_v40, %v596_v24  ;;  %v448_v27 = vpop.f32.mrf.mxu0  ;;  %v498_v28 = vpop.f32.mrf.mxu1 }
 0x117   :  { %946 = vst.msk [vmem:[%s1849_s3 + $0x38] sm:$0xf] %vm931_vm2, %v865_v20  ;;  %v449_v29 = vadd.f32 %v1425_v40, %v448_v27  ;;  %v499_v30 = vadd.f32 %v1425_v40, %v498_v28 }
 0x118   :  { %966 = vst.msk [vmem:[%s1849_s3 + $0x88] sm:$0xf] %vm931_vm2, %v885_v22  ;;  %vm665_vm14 = vcmp.ge.f32.partialorder %v547_v25, 0.0  ;;  %v745_v31 = vmul.f32 0.2, %v547_v25  ;;  %vm685_vm15 = vcmp.ge.f32.partialorder %v597_v26, 0.0 }
 0x119   :  { %v765_v32 = vmul.f32 0.2, %v597_v26  ;;  %vm626_vm0 = vcmp.ge.f32.partialorder %v449_v29, 0.0  ;;  %v706_v33 = vmul.f32 0.2, %v449_v29  ;;  %vm646_vm1 = vcmp.ge.f32.partialorder %v499_v30, 0.0 }
 0x11a   :  { %v825_v34 = vsel %vm665_vm14, %v547_v25, %v745_v31  ;;  %v726_v35 = vmul.f32 0.2, %v499_v30 }
 0x11b   :  { %v905_v36 = vpack.c.bf16 %v825_v34, %v825_v34  ;;  %v845_v37 = vsel %vm685_vm15, %v597_v26, %v765_v32  ;;  %v786_v38 = vsel %vm626_vm0, %v449_v29, %v706_v33  ;;  %v1281_v26 = vld [vmem:[%s1847_s2] ss:$0 sm:$0xff] }
 0x11c   :  { %v925_v39 = vpack.c.bf16 %v845_v37, %v845_v37  ;;  %v866_v41 = vpack.c.bf16 %v786_v38, %v786_v38  ;;  %v806_v42 = vsel %vm646_vm1, %v499_v30, %v726_v35 }
 0x11d   :  { %986 = vst.msk [vmem:[%s1849_s3 + $0xd8] sm:$0xf] %vm931_vm2, %v905_v36  ;;  %v886_v43 = vpack.c.bf16 %v806_v42, %v806_v42  ;;  %v548_v44 = vpop.f32.mrf.mxu2  ;;  %v598_v45 = vpop.f32.mrf.mxu3 }
 0x11e   :  { %1006 = vst.msk [vmem:[%s1849_s3 + $0x128] sm:$0xf] %vm931_vm2, %v925_v39  ;;  %v549_v46 = vadd.f32 %v1425_v40, %v548_v44  ;;  %v599_v47 = vadd.f32 %v1425_v40, %v598_v45  ;;  %v451_v48 = vpop.f32.mrf.mxu0  ;;  %v501_v49 = vpop.f32.mrf.mxu1 }
 0x11f   :  { %947 = vst.msk [vmem:[%s1849_s3 + $0x3c] sm:$0xf] %vm931_vm2, %v866_v41  ;;  %v452_v50 = vadd.f32 %v1425_v40, %v451_v48  ;;  %v502_v51 = vadd.f32 %v1425_v40, %v501_v49 }
 0x120   :  { %967 = vst.msk [vmem:[%s1849_s3 + $0x8c] sm:$0xf] %vm931_vm2, %v886_v43  ;;  %vm666_vm3 = vcmp.ge.f32.partialorder %v549_v46, 0.0  ;;  %v746_v52 = vmul.f32 0.2, %v549_v46  ;;  %vm686_vm4 = vcmp.ge.f32.partialorder %v599_v47, 0.0 }
 0x121   :  { %v766_v53 = vmul.f32 0.2, %v599_v47  ;;  %vm627_vm5 = vcmp.ge.f32.partialorder %v452_v50, 0.0  ;;  %v707_v54 = vmul.f32 0.2, %v452_v50  ;;  %vm647_vm6 = vcmp.ge.f32.partialorder %v502_v51, 0.0 }
 0x122   :  { %v826_v55 = vsel %vm666_vm3, %v549_v46, %v746_v52  ;;  %v727_v56 = vmul.f32 0.2, %v502_v51 }
 0x123   :  { %v906_v57 = vpack.c.bf16 %v826_v55, %v826_v55  ;;  %v846_v58 = vsel %vm686_vm4, %v599_v47, %v766_v53  ;;  %v787_v59 = vsel %vm627_vm5, %v452_v50, %v707_v54 }
 0x124   :  { %v926_v60 = vpack.c.bf16 %v846_v58, %v846_v58  ;;  %v867_v61 = vpack.c.bf16 %v787_v59, %v787_v59  ;;  %v807_v62 = vsel %vm647_vm6, %v502_v51, %v727_v56 }
 0x125   :  { %987 = vst.msk [vmem:[%s1849_s3 + $0xdc] sm:$0xf] %vm931_vm2, %v906_v57  ;;  %v887_v63 = vpack.c.bf16 %v807_v62, %v807_v62  ;;  %v551_v0 = vpop.f32.mrf.mxu2  ;;  %v601_v1 = vpop.f32.mrf.mxu3 }
 0x126   :  { %1007 = vst.msk [vmem:[%s1849_s3 + $0x12c] sm:$0xf] %vm931_vm2, %v926_v60  ;;  %v552_v2 = vadd.f32 %v1425_v40, %v551_v0  ;;  %v602_v3 = vadd.f32 %v1425_v40, %v601_v1  ;;  %v453_v4 = vpop.f32.mrf.mxu0  ;;  %v503_v5 = vpop.f32.mrf.mxu1 }
 0x127   :  { %948 = vst.msk [vmem:[%s1849_s3 + $0x40] sm:$0xf] %vm931_vm2, %v867_v61  ;;  %v454_v6 = vadd.f32 %v1425_v40, %v453_v4  ;;  %v504_v7 = vadd.f32 %v1425_v40, %v503_v5 }
 0x128   :  { %968 = vst.msk [vmem:[%s1849_s3 + $0x90] sm:$0xf] %vm931_vm2, %v887_v63  ;;  %vm667_vm7 = vcmp.ge.f32.partialorder %v552_v2, 0.0  ;;  %v747_v8 = vmul.f32 0.2, %v552_v2  ;;  %vm687_vm8 = vcmp.ge.f32.partialorder %v602_v3, 0.0 }
 0x129   :  { %v767_v9 = vmul.f32 0.2, %v602_v3  ;;  %vm628_vm9 = vcmp.ge.f32.partialorder %v454_v6, 0.0  ;;  %v708_v10 = vmul.f32 0.2, %v454_v6  ;;  %vm648_vm10 = vcmp.ge.f32.partialorder %v504_v7, 0.0 }
 0x12a   :  { %v827_v11 = vsel %vm667_vm7, %v552_v2, %v747_v8  ;;  %v728_v12 = vmul.f32 0.2, %v504_v7 }
 0x12b   :  { %v907_v13 = vpack.c.bf16 %v827_v11, %v827_v11  ;;  %v847_v14 = vsel %vm687_vm8, %v602_v3, %v767_v9  ;;  %v788_v15 = vsel %vm628_vm9, %v454_v6, %v708_v10 }
 0x12c   :  { %v927_v16 = vpack.c.bf16 %v847_v14, %v847_v14  ;;  %v868_v17 = vpack.c.bf16 %v788_v15, %v788_v15  ;;  %v808_v18 = vsel %vm648_vm10, %v504_v7, %v728_v12 }
 0x12d   :  { %988 = vst.msk [vmem:[%s1849_s3 + $0xe0] sm:$0xf] %vm931_vm2, %v907_v13  ;;  %v888_v19 = vpack.c.bf16 %v808_v18, %v808_v18  ;;  %v553_v20 = vpop.f32.mrf.mxu2  ;;  %v603_v21 = vpop.f32.mrf.mxu3 }
 0x12e   :  { %1008 = vst.msk [vmem:[%s1849_s3 + $0x130] sm:$0xf] %vm931_vm2, %v927_v16  ;;  %v554_v22 = vadd.f32 %v1425_v40, %v553_v20  ;;  %v604_v23 = vadd.f32 %v1425_v40, %v603_v21  ;;  %v456_v24 = vpop.f32.mrf.mxu0  ;;  %v506_v25 = vpop.f32.mrf.mxu1 }
 0x12f   :  { %949 = vst.msk [vmem:[%s1849_s3 + $0x44] sm:$0xf] %vm931_vm2, %v868_v17  ;;  %v457_v27 = vadd.f32 %v1281_v26, %v456_v24  ;;  %v507_v28 = vadd.f32 %v1281_v26, %v506_v25 }
 0x130   :  { %969 = vst.msk [vmem:[%s1849_s3 + $0x94] sm:$0xf] %vm931_vm2, %v888_v19  ;;  %vm668_vm11 = vcmp.ge.f32.partialorder %v554_v22, 0.0  ;;  %v748_v40 = vmul.f32 0.2, %v554_v22  ;;  %vm688_vm12 = vcmp.ge.f32.partialorder %v604_v23, 0.0 }
 0x131   :  { %v768_v29 = vmul.f32 0.2, %v604_v23  ;;  %vm629_vm13 = vcmp.ge.f32.partialorder %v457_v27, 0.0  ;;  %v709_v30 = vmul.f32 0.2, %v457_v27  ;;  %vm649_vm14 = vcmp.ge.f32.partialorder %v507_v28, 0.0 }
 0x132   :  { %v828_v31 = vsel %vm668_vm11, %v554_v22, %v748_v40  ;;  %v729_v32 = vmul.f32 0.2, %v507_v28 }
 0x133   :  { %v908_v33 = vpack.c.bf16 %v828_v31, %v828_v31  ;;  %v848_v34 = vsel %vm688_vm12, %v604_v23, %v768_v29  ;;  %v789_v35 = vsel %vm629_vm13, %v457_v27, %v709_v30 }
 0x134   :  { %v928_v36 = vpack.c.bf16 %v848_v34, %v848_v34  ;;  %v869_v37 = vpack.c.bf16 %v789_v35, %v789_v35  ;;  %v809_v38 = vsel %vm649_vm14, %v507_v28, %v729_v32 }
 0x135   :  { %989 = vst.msk [vmem:[%s1849_s3 + $0xe4] sm:$0xf] %vm931_vm2, %v908_v33  ;;  %v889_v39 = vpack.c.bf16 %v809_v38, %v809_v38  ;;  %v556_v41 = vpop.f32.mrf.mxu2  ;;  %v606_v42 = vpop.f32.mrf.mxu3 }
 0x136   :  { %1009 = vst.msk [vmem:[%s1849_s3 + $0x134] sm:$0xf] %vm931_vm2, %v928_v36  ;;  %v557_v43 = vadd.f32 %v1281_v26, %v556_v41  ;;  %v607_v44 = vadd.f32 %v1281_v26, %v606_v42  ;;  %v458_v45 = vpop.f32.mrf.mxu0  ;;  %v508_v46 = vpop.f32.mrf.mxu1 }
 0x137   :  { %950 = vst.msk [vmem:[%s1849_s3 + $0x48] sm:$0xf] %vm931_vm2, %v869_v37  ;;  %v459_v47 = vadd.f32 %v1281_v26, %v458_v45  ;;  %v509_v48 = vadd.f32 %v1281_v26, %v508_v46 }
 0x138   :  { %970 = vst.msk [vmem:[%s1849_s3 + $0x98] sm:$0xf] %vm931_vm2, %v889_v39  ;;  %vm669_vm15 = vcmp.ge.f32.partialorder %v557_v43, 0.0  ;;  %v749_v49 = vmul.f32 0.2, %v557_v43  ;;  %vm689_vm0 = vcmp.ge.f32.partialorder %v607_v44, 0.0 }
 0x139   :  { %v769_v50 = vmul.f32 0.2, %v607_v44  ;;  %vm630_vm1 = vcmp.ge.f32.partialorder %v459_v47, 0.0  ;;  %v710_v51 = vmul.f32 0.2, %v459_v47  ;;  %vm650_vm3 = vcmp.ge.f32.partialorder %v509_v48, 0.0 }
 0x13a   :  { %v829_v52 = vsel %vm669_vm15, %v557_v43, %v749_v49  ;;  %v730_v53 = vmul.f32 0.2, %v509_v48 }
 0x13b   :  { %v909_v54 = vpack.c.bf16 %v829_v52, %v829_v52  ;;  %v849_v55 = vsel %vm689_vm0, %v607_v44, %v769_v50  ;;  %v790_v56 = vsel %vm630_vm1, %v459_v47, %v710_v51 }
 0x13c   :  { %v929_v57 = vpack.c.bf16 %v849_v55, %v849_v55  ;;  %v870_v58 = vpack.c.bf16 %v790_v56, %v790_v56  ;;  %v810_v59 = vsel %vm650_vm3, %v509_v48, %v730_v53 }
 0x13d   :  { %990 = vst.msk [vmem:[%s1849_s3 + $0xe8] sm:$0xf] %vm931_vm2, %v909_v54  ;;  %v890_v60 = vpack.c.bf16 %v810_v59, %v810_v59  ;;  %v558_v61 = vpop.f32.mrf.mxu2  ;;  %v608_v62 = vpop.f32.mrf.mxu3 }
 0x13e   :  { %1010 = vst.msk [vmem:[%s1849_s3 + $0x138] sm:$0xf] %vm931_vm2, %v929_v57  ;;  %v559_v63 = vadd.f32 %v1281_v26, %v558_v61  ;;  %v609_v0 = vadd.f32 %v1281_v26, %v608_v62 }
 0x13f   :  { %951 = vst.msk [vmem:[%s1849_s3 + $0x4c] sm:$0xf] %vm931_vm2, %v870_v58 }
 0x140   :  { %971 = vst.msk [vmem:[%s1849_s3 + $0x9c] sm:$0xf] %vm931_vm2, %v890_v60  ;;  %vm670_vm4 = vcmp.ge.f32.partialorder %v559_v63, 0.0  ;;  %v750_v1 = vmul.f32 0.2, %v559_v63  ;;  %vm690_vm5 = vcmp.ge.f32.partialorder %v609_v0, 0.0 }
 0x141   :  { %v770_v2 = vmul.f32 0.2, %v609_v0 }
 0x142   :  { %v830_v3 = vsel %vm670_vm4, %v559_v63, %v750_v1 }
 0x143   :  { %v910_v4 = vpack.c.bf16 %v830_v3, %v830_v3  ;;  %v850_v5 = vsel %vm690_vm5, %v609_v0, %v770_v2 }
 0x144   :  { %v930_v6 = vpack.c.bf16 %v850_v5, %v850_v5 }
 0x145   :  { %991 = vst.msk [vmem:[%s1849_s3 + $0xec] sm:$0xf] %vm931_vm2, %v910_v4 }
 0x146   :  { %1011 = vst.msk [vmem:[%s1849_s3 + $0x13c] sm:$0xf] %vm931_vm2, %v930_v6 }

// kernel: discriminator_forward.8
= control target key start
LH: loop header
LB: loop body
LE: loop exit
PB: predicated region body
PF: predicated region fallthrough
CT: control target
= control target key end

     0   :  { %vm220_vm0 = vcmask 130048   ;;  %vm493_vm4 = vcmask 125952   ;;  %s1078_s1 = inlined_call_operand.vmem [shape: bf16[128,16], index: 1, kind: input, shape index: {}]   ;;  %s1079_s0 = inlined_call_operand.vmem [shape: bf16[160,128], index: 0, kind: input, shape index: {}]   ;;  %s1080_s3 = inlined_call_operand.vmem [shape: f32[1,16], index: 3, kind: input, shape index: {}]   ;;  %s1081_s2 = inlined_call_operand.vmem [shape: f32[1,16], index: 2, kind: input, shape index: {}]   ;;  %s1082_s4 = inlined_call_operand.vmem [shape: bf16[160,16], index: 4, kind: output, shape index: {}]  }
   0x1   :  { %v607_v0 = vld [vmem:[%s1078_s1 + $0x38] sm:$0xff]  ;;  %v606_v1 = vld [vmem:[%s1078_s1 + $0x30] sm:$0xff]  ;;  %v605_v2 = vld [vmem:[%s1078_s1 + $0x28] sm:$0xff] }
   0x2   :  { %161 = vmatpush.bf16.msra.mxu0 %v607_v0  ;;  %609 = vmatpush.bf16.msra.mxu2 %v607_v0  ;;  %v604_v3 = vld [vmem:[%s1078_s1 + $0x20] sm:$0xff]  ;;  %v603_v4 = vld [vmem:[%s1078_s1 + $0x18] sm:$0xff]  ;;  %v602_v5 = vld [vmem:[%s1078_s1 + $0x10] sm:$0xff] }
   0x3   :  { %608 = vmatpush.bf16.msra.mxu1 %v607_v0  ;;  %610 = vmatpush.bf16.msra.mxu3 %v607_v0  ;;  %v601_v6 = vld [vmem:[%s1078_s1 + $0x8] sm:$0xff]  ;;  %v600_v7 = vld [vmem:[%s1078_s1] sm:$0xff]  ;;  %v592_v10 = vld [vmem:[%s1079_s0 + $0x10] sm:$0xff] }
   0x4   :  { %v590_v8 = vld [vmem:[%s1079_s0] sm:$0xff]  ;;  %v597_v11 = vld [vmem:[%s1079_s0 + $0x38] sm:$0xff]  ;;  %v591_v12 = vld [vmem:[%s1079_s0 + $0x8] sm:$0xff] }
   0x5   :  { %v594_v9 = vld [vmem:[%s1079_s0 + $0x20] sm:$0xff]  ;;  %v595_v13 = vld [vmem:[%s1079_s0 + $0x28] sm:$0xff]  ;;  %v593_v14 = vld [vmem:[%s1079_s0 + $0x18] sm:$0xff] }
   0x6   :  { %162 = vmatpush.bf16.msra.mxu0 %v606_v1  ;;  %612 = vmatpush.bf16.msra.mxu2 %v606_v1  ;;  %v598_v15 = vld [vmem:[%s1079_s0 + $0x40] sm:$0xff]  ;;  %v596_v16 = vld [vmem:[%s1079_s0 + $0x30] sm:$0xff]  ;;  %v599_v17 = vld [vmem:[%s1079_s0 + $0x48] sm:$0xff] }
   0x7   :  { %611 = vmatpush.bf16.msra.mxu1 %v606_v1  ;;  %613 = vmatpush.bf16.msra.mxu3 %v606_v1 }
   0xa   :  { %163 = vmatpush.bf16.msra.mxu0 %v605_v2  ;;  %615 = vmatpush.bf16.msra.mxu2 %v605_v2 }
   0xb   :  { %614 = vmatpush.bf16.msra.mxu1 %v605_v2  ;;  %616 = vmatpush.bf16.msra.mxu3 %v605_v2 }
   0xe   :  { %164 = vmatpush.bf16.msra.mxu0 %v604_v3  ;;  %618 = vmatpush.bf16.msra.mxu2 %v604_v3 }
   0xf   :  { %617 = vmatpush.bf16.msra.mxu1 %v604_v3  ;;  %619 = vmatpush.bf16.msra.mxu3 %v604_v3 }
  0x12   :  { %165 = vmatpush.bf16.msra.mxu0 %v603_v4  ;;  %621 = vmatpush.bf16.msra.mxu2 %v603_v4 }
  0x13   :  { %620 = vmatpush.bf16.msra.mxu1 %v603_v4  ;;  %622 = vmatpush.bf16.msra.mxu3 %v603_v4 }
  0x16   :  { %166 = vmatpush.bf16.msra.mxu0 %v602_v5  ;;  %624 = vmatpush.bf16.msra.mxu2 %v602_v5 }
  0x17   :  { %623 = vmatpush.bf16.msra.mxu1 %v602_v5  ;;  %625 = vmatpush.bf16.msra.mxu3 %v602_v5 }
  0x1a   :  { %167 = vmatpush.bf16.msra.mxu0 %v601_v6  ;;  %627 = vmatpush.bf16.msra.mxu2 %v601_v6 }
  0x1b   :  { %626 = vmatpush.bf16.msra.mxu1 %v601_v6  ;;  %628 = vmatpush.bf16.msra.mxu3 %v601_v6 }
  0x1e   :  { %168 = vmatpush.bf16.msra.mxu0 %v600_v7  ;;  %630 = vmatpush.bf16.msra.mxu2 %v600_v7 }
  0x1f   :  { %629 = vmatpush.bf16.msra.mxu1 %v600_v7  ;;  %631 = vmatpush.bf16.msra.mxu3 %v600_v7 }
  0x21   :  { %169 = vmatmul.bf16.vlgmr.msra.gmra.mxu0 %v590_v8  ;;  %189 = vmatmul.bf16.vlgmr.msra.gmra.mxu2 %v594_v9 }
  0x22   :  { %179 = vmatmul.bf16.vlgmr.msra.gmra.mxu1 %v592_v10  ;;  %204 = vmatmul.bf16.vlgmr.msra.gmra.mxu3 %v597_v11 }
  0x31   :  { %174 = vmatmul.bf16.gmra.mxu0 %v591_v12  ;;  %194 = vmatmul.bf16.gmra.mxu2 %v595_v13 }
  0x32   :  { %184 = vmatmul.bf16.gmra.mxu1 %v593_v14  ;;  %209 = vmatmul.bf16.gmra.mxu3 %v598_v15 }
  0x41   :  { %199 = vmatmul.bf16.gmra.mxu2 %v596_v16 }
  0x42   :  { %214 = vmatmul.bf16.gmra.mxu3 %v599_v17 }
  0x9e   :  { %v714_v18 = vpop.f32.mrf.mxu0 }
  0x9f   :  { %v716_v19 = vpop.f32.mrf.mxu1  ;;  %v221_v29 = vsel %vm220_vm0, %v714_v18, 0.0 }
  0xa0   :  { %v228_v38 = vsel %vm220_vm0, %v716_v19, 0.0 }
  0xa4   :  { %v718_v20 = vpop.f32.mrf.mxu2 }
  0xa5   :  { %v720_v21 = vpop.f32.mrf.mxu3  ;;  %v236_v48 = vsel %vm220_vm0, %v718_v20, 0.0 }
  0xa6   :  { %v722_v22 = vpop.f32.mrf.mxu0  ;;  %v248_v0 = vsel %vm220_vm0, %v720_v21, 0.0 }
  0xa7   :  { %v724_v23 = vpop.f32.mrf.mxu1  ;;  %v222_v27 = vsel %vm220_vm0, %v722_v22, 0.0 }
  0xa8   :  { %v223_v31 = vadd.f32 %v222_v27, %v221_v29  ;;  %v230_v40 = vsel %vm220_vm0, %v724_v23, 0.0 }
  0xac   :  { %v726_v24 = vpop.f32.mrf.mxu2 }
  0xad   :  { %v728_v26 = vpop.f32.mrf.mxu3  ;;  %v238_v51 = vsel %vm220_vm0, %v726_v24, 0.0 }
  0xae   :  { %v175_v25 = vpop.f32.mrf.mxu0  ;;  %v250_v2 = vsel %vm220_vm0, %v728_v26, 0.0 }
  0xaf   :  { %v732_v28 = vpop.f32.mrf.mxu1  ;;  %v224_v30 = vsel %vm220_vm0, %v175_v25, 0.0 }
  0xb0   :  { %v225_v33 = vadd.f32 %v224_v30, %v223_v31  ;;  %v232_v44 = vsel %vm220_vm0, %v732_v28, 0.0 }
  0xb4   :  { %v737_v32 = vpop.f32.mrf.mxu2 }
  0xb5   :  { %v740_v37 = vpop.f32.mrf.mxu3  ;;  %v240_v54 = vsel %vm220_vm0, %v737_v32, 0.0 }
  0xb6   :  { %v177_v34 = vpop.f32.mrf.mxu0  ;;  %v252_v4 = vsel %vm220_vm0, %v740_v37, 0.0 }
  0xb7   :  { %v226_v35 = vsel %vm220_vm0, %v177_v34, 0.0  ;;  %v187_v41 = vpop.f32.mrf.mxu1 }
  0xb8   :  { %v227_v36 = vadd.f32 %v226_v35, %v225_v33  ;;  %v234_v46 = vsel %vm220_vm0, %v187_v41, 0.0 }
  0xba   :  { %v229_v39 = vadd.f32 %v228_v38, %v227_v36 }
  0xbc   :  { %v231_v42 = vadd.f32 %v230_v40, %v229_v39  ;;  %v746_v43 = vpop.f32.mrf.mxu2 }
  0xbd   :  { %v753_v50 = vpop.f32.mrf.mxu3  ;;  %v242_v56 = vsel %vm220_vm0, %v746_v43, 0.0 }
  0xbe   :  { %v233_v45 = vadd.f32 %v232_v44, %v231_v42  ;;  %v254_v6 = vsel %vm220_vm0, %v753_v50, 0.0 }
  0xc0   :  { %v235_v47 = vadd.f32 %v234_v46, %v233_v45 }
  0xc2   :  { %v237_v49 = vadd.f32 %v236_v48, %v235_v47 }
  0xc4   :  { %v239_v52 = vadd.f32 %v238_v51, %v237_v49  ;;  %v757_v53 = vpop.f32.mrf.mxu2 }
  0xc5   :  { %v244_v58 = vsel %vm220_vm0, %v757_v53, 0.0  ;;  %v765_v60 = vpop.f32.mrf.mxu3 }
  0xc6   :  { %v241_v55 = vadd.f32 %v240_v54, %v239_v52  ;;  %v256_v9 = vsel %vm220_vm0, %v765_v60, 0.0 }
  0xc8   :  { %v243_v57 = vadd.f32 %v242_v56, %v241_v55 }
  0xca   :  { %v245_v59 = vadd.f32 %v244_v58, %v243_v57 }
  0xcc   :  { %v767_v61 = vpop.f32.mrf.mxu2 }
  0xcd   :  { %v246_v62 = vsel %vm220_vm0, %v767_v61, 0.0  ;;  %v779_v7 = vpop.f32.mrf.mxu3 }
  0xce   :  { %v247_v63 = vadd.f32 %v246_v62, %v245_v59  ;;  %v258_v11 = vsel %vm220_vm0, %v779_v7, 0.0 }
  0xd0   :  { %v249_v1 = vadd.f32 %v248_v0, %v247_v63 }
  0xd2   :  { %v251_v3 = vadd.f32 %v250_v2, %v249_v1 }
  0xd4   :  { %v253_v5 = vadd.f32 %v252_v4, %v251_v3 }
  0xd6   :  { %v255_v8 = vadd.f32 %v254_v6, %v253_v5 }
  0xd8   :  { %v257_v10 = vadd.f32 %v256_v9, %v255_v8 }
  0xda   :  { %v259_v12 = vadd.f32 %v258_v11, %v257_v10 }
  0xdc   :  { %v260_v13 = vrot.slane %v259_v12, 4 }
  0xde   :  { %v261_v14 = vadd.f32 %v260_v13, %v259_v12 }
  0xe0   :  { %v262_v15 = vrot.slane %v261_v14, 2 }
  0xe2   :  { %v263_v16 = vadd.f32 %v262_v15, %v261_v14 }
  0xe4   :  { %v264_v17 = vrot.slane %v263_v16, 1 }
  0xe6   :  { %v265_v27 = vadd.f32 %v264_v17, %v263_v16 }
  0xe8   :  { %v785_v29 = vmul.f32 0.00625, %v265_v27 }
  0xea   :  { %v789_v30 = vsub.f32 %v714_v18, %v785_v29  ;;  %v793_v31 = vsub.f32 %v722_v22, %v785_v29  ;;  %v796_v33 = vsub.f32 %v175_v25, %v785_v29  ;;  %v799_v35 = vsub.f32 %v177_v34, %v785_v29 }
  0xeb   :  { %v807_v18 = vsub.f32 %v716_v19, %v785_v29  ;;  %v813_v25 = vsub.f32 %v724_v23, %v785_v29  ;;  %v821_v44 = vsub.f32 %v732_v28, %v785_v29  ;;  %v827_v23 = vsub.f32 %v187_v41, %v785_v29 }
  0xec   :  { %v287_v36 = vmul.f32 %v789_v30, %v789_v30  ;;  %v288_v38 = vmul.f32 %v793_v31, %v793_v31  ;;  %v289_v22 = vmul.f32 %v796_v33, %v796_v33  ;;  %v290_v34 = vmul.f32 %v799_v35, %v799_v35 }
  0xed   :  { %v291_v19 = vmul.f32 %v807_v18, %v807_v18  ;;  %v292_v47 = vmul.f32 %v813_v25, %v813_v25  ;;  %v834_v51 = vsub.f32 %v718_v20, %v785_v29  ;;  %v293_v28 = vmul.f32 %v821_v44, %v821_v44 }
  0xee   :  { %v307_v39 = vsel %vm220_vm0, %v287_v36, 0.0  ;;  %v308_v40 = vsel %vm220_vm0, %v288_v38, 0.0  ;;  %v310_v45 = vsel %vm220_vm0, %v289_v22, 0.0  ;;  %v312_v48 = vsel %vm220_vm0, %v290_v34, 0.0 }
  0xef   :  { %v309_v42 = vadd.f32 %v308_v40, %v307_v39  ;;  %v314_v52 = vsel %vm220_vm0, %v291_v19, 0.0  ;;  %v841_v41 = vsub.f32 %v726_v24, %v785_v29  ;;  %v294_v55 = vmul.f32 %v827_v23, %v827_v23 }
  0xf0   :  { %v316_v56 = vsel %vm220_vm0, %v292_v47, 0.0  ;;  %v848_v20 = vsub.f32 %v737_v32, %v785_v29  ;;  %v295_v58 = vmul.f32 %v834_v51, %v834_v51  ;;  %v318_v59 = vsel %vm220_vm0, %v293_v28, 0.0 }
  0xf1   :  { %v311_v46 = vadd.f32 %v310_v45, %v309_v42  ;;  %v855_v24 = vsub.f32 %v746_v43, %v785_v29  ;;  %v296_v63 = vmul.f32 %v841_v41, %v841_v41  ;;  %v320_v0 = vsel %vm220_vm0, %v294_v55, 0.0 }
  0xf2   :  { %v862_v32 = vsub.f32 %v757_v53, %v785_v29  ;;  %v297_v2 = vmul.f32 %v848_v20, %v848_v20  ;;  %v322_v3 = vsel %vm220_vm0, %v295_v58, 0.0  ;;  %v869_v43 = vsub.f32 %v767_v61, %v785_v29 }
  0xf3   :  { %v313_v49 = vadd.f32 %v312_v48, %v311_v46  ;;  %v298_v5 = vmul.f32 %v855_v24, %v855_v24  ;;  %v324_v6 = vsel %vm220_vm0, %v296_v63, 0.0  ;;  %v876_v53 = vsub.f32 %v720_v21, %v785_v29 }
  0xf4   :  { %v299_v9 = vmul.f32 %v862_v32, %v862_v32  ;;  %v326_v10 = vsel %vm220_vm0, %v297_v2, 0.0  ;;  %v883_v61 = vsub.f32 %v728_v26, %v785_v29  ;;  %v300_v12 = vmul.f32 %v869_v43, %v869_v43 }
  0xf5   :  { %v315_v54 = vadd.f32 %v314_v52, %v313_v49  ;;  %v328_v13 = vsel %vm220_vm0, %v298_v5, 0.0  ;;  %v890_v21 = vsub.f32 %v740_v37, %v785_v29  ;;  %v301_v15 = vmul.f32 %v876_v53, %v876_v53  ;;  %v353_v5 = vld [vmem:[%s1081_s2] sm:$0x1] }
  0xf6   :  { %v330_v16 = vsel %vm220_vm0, %v299_v9, 0.0  ;;  %v284_v26 = vsub.f32 %v753_v50, %v785_v29  ;;  %v302_v27 = vmul.f32 %v883_v61, %v883_v61  ;;  %v332_v36 = vsel %vm220_vm0, %v300_v12, 0.0 }
  0xf7   :  { %v317_v57 = vadd.f32 %v316_v56, %v315_v54  ;;  %v285_v22 = vsub.f32 %v765_v60, %v785_v29  ;;  %v303_v37 = vmul.f32 %v890_v21, %v890_v21  ;;  %v334_v34 = vsel %vm220_vm0, %v301_v15, 0.0 }
  0xf8   :  { %v286_v40 = vsub.f32 %v779_v7, %v785_v29  ;;  %v304_v42 = vmul.f32 %v284_v26, %v284_v26  ;;  %v336_v50 = vsel %vm220_vm0, %v302_v27, 0.0 }
  0xf9   :  { %v319_v62 = vadd.f32 %v318_v59, %v317_v57  ;;  %v305_v45 = vmul.f32 %v285_v22, %v285_v22  ;;  %v338_v46 = vsel %vm220_vm0, %v303_v37, 0.0 }
  0xfa   :  { %v306_v48 = vmul.f32 %v286_v40, %v286_v40  ;;  %v340_v60 = vsel %vm220_vm0, %v304_v42, 0.0 }
  0xfb   :  { %v321_v1 = vadd.f32 %v320_v0, %v319_v62  ;;  %v342_v28 = vsel %vm220_vm0, %v305_v45, 0.0 }
  0xfc   :  { %v344_v54 = vsel %vm220_vm0, %v306_v48, 0.0 }
  0xfd   :  { %v323_v4 = vadd.f32 %v322_v3, %v321_v1 }
  0xff   :  { %v325_v8 = vadd.f32 %v324_v6, %v323_v4 }
 0x101   :  { %v327_v11 = vadd.f32 %v326_v10, %v325_v8 }
 0x103   :  { %v329_v14 = vadd.f32 %v328_v13, %v327_v11 }
 0x105   :  { %v331_v17 = vadd.f32 %v330_v16, %v329_v14 }
 0x107   :  { %v333_v38 = vadd.f32 %v332_v36, %v331_v17  ;;  %v632_v36 = vld [vmem:[%s1080_s3] ss:$0 sm:$0xff] }
 0x109   :  { %v335_v39 = vadd.f32 %v334_v34, %v333_v38 }
 0x10b   :  { %v337_v19 = vadd.f32 %v336_v50, %v335_v39 }
 0x10d   :  { %v339_v47 = vadd.f32 %v338_v46, %v337_v19 }
 0x10f   :  { %v341_v49 = vadd.f32 %v340_v60, %v339_v47 }
 0x111   :  { %v343_v52 = vadd.f32 %v342_v28, %v341_v49 }
 0x113   :  { %v345_v55 = vadd.f32 %v344_v54, %v343_v52 }
 0x115   :  { %v346_v56 = vrot.slane %v345_v55, 4 }
 0x117   :  { %v347_v7 = vadd.f32 %v346_v56, %v345_v55 }
 0x119   :  { %v348_v29 = vrot.slane %v347_v7, 2 }
 0x11b   :  { %v349_v57 = vadd.f32 %v348_v29, %v347_v7 }
 0x11d   :  { %v350_v58 = vrot.slane %v349_v57, 1 }
 0x11f   :  { %v351_v59 = vadd.f32 %v350_v58, %v349_v57 }
 0x121   :  { %v352_v62 = vmul.f32 0.00625, %v351_v59 }
 0x123   :  { %v354_v63 = vadd.f32 1e-05, %v352_v62 }
 0x125   :  { %633 = vrsqrt.f32 %v354_v63  ;;  %vm361_vm2 = vweird.f32 %v354_v63 }
 0x12b   :  { %v634_v0 = vpop.eup %633 }
 0x12c   :  { %v356_v1 = vmul.f32 %v634_v0, %v354_v63  ;;  %vm362_vm1 = vweird.f32 %v634_v0 }
 0x12d   :  { %vm363_vm3 = vmor %vm361_vm2, %vm362_vm1 }
 0x12e   :  { %v357_v2 = vmul.f32 %v634_v0, %v356_v1 }
 0x130   :  { %v358_v3 = vmul.f32 0.5, %v357_v2 }
 0x132   :  { %v359_v4 = vsub.f32 1.5, %v358_v3 }
 0x134   :  { %v360_v6 = vmul.f32 %v634_v0, %v359_v4 }
 0x136   :  { %v364_v8 = vsel %vm363_vm3, %v634_v0, %v360_v6 }
 0x137   :  { %v365_v9 = vmul.f32 %v364_v8, %v353_v5 }
 0x139   :  { %v367_v10 = vperm.slane %v365_v9, 0 }
 0x13b   :  { %v386_v11 = vmul.f32 %v367_v10, %v284_v26  ;;  %v387_v12 = vmul.f32 %v367_v10, %v285_v22  ;;  %v369_v13 = vmul.f32 %v367_v10, %v789_v30  ;;  %v370_v14 = vmul.f32 %v367_v10, %v793_v31 }
 0x13c   :  { %v371_v15 = vmul.f32 %v367_v10, %v796_v33  ;;  %v372_v16 = vmul.f32 %v367_v10, %v799_v35  ;;  %v373_v17 = vmul.f32 %v367_v10, %v807_v18  ;;  %v374_v27 = vmul.f32 %v367_v10, %v813_v25 }
 0x13d   :  { %v375_v38 = vmul.f32 %v367_v10, %v821_v44  ;;  %v376_v26 = vmul.f32 %v367_v10, %v827_v23  ;;  %v377_v30 = vmul.f32 %v367_v10, %v834_v51  ;;  %v378_v31 = vmul.f32 %v367_v10, %v841_v41 }
 0x13e   :  { %v379_v33 = vmul.f32 %v367_v10, %v848_v20  ;;  %v380_v35 = vmul.f32 %v367_v10, %v855_v24  ;;  %v381_v18 = vmul.f32 %v367_v10, %v862_v32  ;;  %v382_v25 = vmul.f32 %v367_v10, %v869_v43 }
 0x13f   :  { %v383_v22 = vmul.f32 %v367_v10, %v876_v53  ;;  %v384_v37 = vmul.f32 %v367_v10, %v883_v61  ;;  %v385_v44 = vmul.f32 %v367_v10, %v890_v21  ;;  %v388_v34 = vmul.f32 %v367_v10, %v286_v40 }
 0x140   :  { %v393_v23 = vadd.f32 %v632_v36, %v369_v13  ;;  %v394_v39 = vadd.f32 %v632_v36, %v370_v14  ;;  %v395_v51 = vadd.f32 %v632_v36, %v371_v15  ;;  %v396_v42 = vadd.f32 %v632_v36, %v372_v16 }
 0x141   :  { %v397_v41 = vadd.f32 %v632_v36, %v373_v17  ;;  %v398_v50 = vadd.f32 %v632_v36, %v374_v27  ;;  %v399_v20 = vadd.f32 %v632_v36, %v375_v38  ;;  %v400_v19 = vadd.f32 %v632_v36, %v376_v26 }
 0x142   :  { %v401_v24 = vadd.f32 %v632_v36, %v377_v30  ;;  %v402_v45 = vadd.f32 %v632_v36, %v378_v31  ;;  %v403_v32 = vadd.f32 %v632_v36, %v379_v33  ;;  %v935_v46 = vadd.f32 %v632_v36, %v380_v35 }
 0x143   :  { %v937_v43 = vadd.f32 %v632_v36, %v381_v18  ;;  %v939_v53 = vadd.f32 %v632_v36, %v382_v25  ;;  %v941_v61 = vadd.f32 %v632_v36, %v383_v22  ;;  %v943_v21 = vadd.f32 %v632_v36, %v384_v37 }
 0x144   :  { %v945_v40 = vadd.f32 %v632_v36, %v385_v44  ;;  %v947_v47 = vadd.f32 %v632_v36, %v386_v11  ;;  %v433_v48 = vmul.f32 0.2, %v393_v23  ;;  %v434_v60 = vmul.f32 0.2, %v394_v39 }
 0x145   :  { %vm413_vm5 = vcmp.ge.f32.partialorder %v393_v23, 0.0  ;;  %vm414_vm6 = vcmp.ge.f32.partialorder %v394_v39, 0.0  ;;  %v435_v49 = vmul.f32 0.2, %v395_v51  ;;  %v436_v28 = vmul.f32 0.2, %v396_v42 }
 0x146   :  { %v949_v52 = vadd.f32 %v632_v36, %v387_v12  ;;  %vm415_vm7 = vcmp.ge.f32.partialorder %v395_v51, 0.0  ;;  %vm416_vm8 = vcmp.ge.f32.partialorder %v396_v42, 0.0  ;;  %v437_v54 = vmul.f32 0.2, %v397_v41 }
 0x147   :  { %v951_v55 = vadd.f32 %v632_v36, %v388_v34  ;;  %vm417_vm9 = vcmp.ge.f32.partialorder %v397_v41, 0.0  ;;  %vm418_vm10 = vcmp.ge.f32.partialorder %v398_v50, 0.0  ;;  %v438_v56 = vmul.f32 0.2, %v398_v50 }
 0x148   :  { %vm419_vm11 = vcmp.ge.f32.partialorder %v399_v20, 0.0  ;;  %v439_v7 = vmul.f32 0.2, %v399_v20  ;;  %v453_v29 = vsel %vm413_vm5, %v393_v23, %v433_v48  ;;  %v454_v57 = vsel %vm414_vm6, %v394_v39, %v434_v60 }
 0x149   :  { %vm420_vm12 = vcmp.ge.f32.partialorder %v400_v19, 0.0  ;;  %v440_v58 = vmul.f32 0.2, %v400_v19  ;;  %v455_v59 = vsel %vm415_vm7, %v395_v51, %v435_v49  ;;  %v456_v62 = vsel %vm416_vm8, %v396_v42, %v436_v28 }
 0x14a   :  { %vm421_vm13 = vcmp.ge.f32.partialorder %v401_v24, 0.0  ;;  %vm422_vm14 = vcmp.ge.f32.partialorder %v402_v45, 0.0  ;;  %v441_v63 = vmul.f32 0.2, %v401_v24  ;;  %v457_v0 = vsel %vm417_vm9, %v397_v41, %v437_v54 }
 0x14b   :  { %v442_v1 = vmul.f32 0.2, %v402_v45  ;;  %v458_v2 = vsel %vm418_vm10, %v398_v50, %v438_v56  ;;  %v473_v3 = vpack.c.bf16 %v453_v29, %v453_v29  ;;  %v474_v4 = vpack.c.bf16 %v454_v57, %v454_v57 }
 0x14c   :  { %v443_v5 = vmul.f32 0.2, %v403_v32  ;;  %v459_v6 = vsel %vm419_vm11, %v399_v20, %v439_v7  ;;  %v475_v8 = vpack.c.bf16 %v455_v59, %v455_v59  ;;  %v476_v9 = vpack.c.bf16 %v456_v62, %v456_v62 }
 0x14d   :  { %vm423_vm15 = vcmp.ge.f32.partialorder %v403_v32, 0.0  ;;  %v444_v10 = vmul.f32 0.2, %v935_v46  ;;  %v460_v11 = vsel %vm420_vm12, %v400_v19, %v440_v58  ;;  %v477_v12 = vpack.c.bf16 %v457_v0, %v457_v0  ;;  %494 = vst.msk [vmem:[%s1082_s4] sm:$0xf] %vm493_vm4, %v473_v3 }
 0x14e   :  { %vm424_vm0 = vcmp.ge.f32.partialorder %v935_v46, 0.0  ;;  %v445_v13 = vmul.f32 0.2, %v937_v43  ;;  %v461_v14 = vsel %vm421_vm13, %v401_v24, %v441_v63  ;;  %v478_v15 = vpack.c.bf16 %v458_v2, %v458_v2  ;;  %495 = vst.msk [vmem:[%s1082_s4 + $0x4] sm:$0xf] %vm493_vm4, %v474_v4 }
 0x14f   :  { %vm425_vm1 = vcmp.ge.f32.partialorder %v937_v43, 0.0  ;;  %v446_v16 = vmul.f32 0.2, %v939_v53  ;;  %v462_v17 = vsel %vm422_vm14, %v402_v45, %v442_v1  ;;  %v479_v27 = vpack.c.bf16 %v459_v6, %v459_v6  ;;  %496 = vst.msk [vmem:[%s1082_s4 + $0x8] sm:$0xf] %vm493_vm4, %v475_v8 }
 0x150   :  { %vm426_vm2 = vcmp.ge.f32.partialorder %v939_v53, 0.0  ;;  %v447_v36 = vmul.f32 0.2, %v941_v61  ;;  %v463_v38 = vsel %vm423_vm15, %v403_v32, %v443_v5  ;;  %v480_v26 = vpack.c.bf16 %v460_v11, %v460_v11  ;;  %497 = vst.msk [vmem:[%s1082_s4 + $0xc] sm:$0xf] %vm493_vm4, %v476_v9 }
 0x151   :  { %vm427_vm3 = vcmp.ge.f32.partialorder %v941_v61, 0.0  ;;  %v448_v30 = vmul.f32 0.2, %v943_v21  ;;  %v464_v31 = vsel %vm424_vm0, %v935_v46, %v444_v10  ;;  %v481_v33 = vpack.c.bf16 %v461_v14, %v461_v14  ;;  %498 = vst.msk [vmem:[%s1082_s4 + $0x10] sm:$0xf] %vm493_vm4, %v477_v12 }
 0x152   :  { %vm428_vm5 = vcmp.ge.f32.partialorder %v943_v21, 0.0  ;;  %v449_v35 = vmul.f32 0.2, %v945_v40  ;;  %v465_v18 = vsel %vm425_vm1, %v937_v43, %v445_v13  ;;  %v482_v25 = vpack.c.bf16 %v462_v17, %v462_v17  ;;  %499 = vst.msk [vmem:[%s1082_s4 + $0x14] sm:$0xf] %vm493_vm4, %v478_v15 }
 0x153   :  { %vm429_vm6 = vcmp.ge.f32.partialorder %v945_v40, 0.0  ;;  %v450_v22 = vmul.f32 0.2, %v947_v47  ;;  %v466_v37 = vsel %vm426_vm2, %v939_v53, %v446_v16  ;;  %v483_v44 = vpack.c.bf16 %v463_v38, %v463_v38  ;;  %500 = vst.msk [vmem:[%s1082_s4 + $0x18] sm:$0xf] %vm493_vm4, %v479_v27 }
 0x154   :  { %vm430_vm7 = vcmp.ge.f32.partialorder %v947_v47, 0.0  ;;  %v451_v34 = vmul.f32 0.2, %v949_v52  ;;  %v467_v23 = vsel %vm427_vm3, %v941_v61, %v447_v36  ;;  %v484_v39 = vpack.c.bf16 %v464_v31, %v464_v31  ;;  %501 = vst.msk [vmem:[%s1082_s4 + $0x1c] sm:$0xf] %vm493_vm4, %v480_v26 }
 0x155   :  { %vm431_vm8 = vcmp.ge.f32.partialorder %v949_v52, 0.0  ;;  %v452_v51 = vmul.f32 0.2, %v951_v55  ;;  %v468_v42 = vsel %vm428_vm5, %v943_v21, %v448_v30  ;;  %v485_v41 = vpack.c.bf16 %v465_v18, %v465_v18  ;;  %502 = vst.msk [vmem:[%s1082_s4 + $0x20] sm:$0xf] %vm493_vm4, %v481_v33 }
 0x156   :  { %vm432_vm9 = vcmp.ge.f32.partialorder %v951_v55, 0.0  ;;  %v469_v50 = vsel %vm429_vm6, %v945_v40, %v449_v35  ;;  %v486_v20 = vpack.c.bf16 %v466_v37, %v466_v37  ;;  %503 = vst.msk [vmem:[%s1082_s4 + $0x24] sm:$0xf] %vm493_vm4, %v482_v25  ;;  %v470_v19 = vsel %vm430_vm7, %v947_v47, %v450_v22 }
 0x157   :  { %v487_v24 = vpack.c.bf16 %v467_v23, %v467_v23  ;;  %504 = vst.msk [vmem:[%s1082_s4 + $0x28] sm:$0xf] %vm493_vm4, %v483_v44  ;;  %v471_v45 = vsel %vm431_vm8, %v949_v52, %v451_v34  ;;  %v488_v32 = vpack.c.bf16 %v468_v42, %v468_v42  ;;  %v472_v46 = vsel %vm432_vm9, %v951_v55, %v452_v51 }
 0x158   :  { %505 = vst.msk [vmem:[%s1082_s4 + $0x2c] sm:$0xf] %vm493_vm4, %v484_v39  ;;  %v489_v43 = vpack.c.bf16 %v469_v50, %v469_v50  ;;  %v490_v53 = vpack.c.bf16 %v470_v19, %v470_v19  ;;  %v491_v61 = vpack.c.bf16 %v471_v45, %v471_v45  ;;  %v492_v21 = vpack.c.bf16 %v472_v46, %v472_v46 }
 0x159   :  { %506 = vst.msk [vmem:[%s1082_s4 + $0x30] sm:$0xf] %vm493_vm4, %v485_v41 }
 0x15a   :  { %507 = vst.msk [vmem:[%s1082_s4 + $0x34] sm:$0xf] %vm493_vm4, %v486_v20 }
 0x15b   :  { %508 = vst.msk [vmem:[%s1082_s4 + $0x38] sm:$0xf] %vm493_vm4, %v487_v24 }
 0x15c   :  { %509 = vst.msk [vmem:[%s1082_s4 + $0x3c] sm:$0xf] %vm493_vm4, %v488_v32 }
 0x15d   :  { %510 = vst.msk [vmem:[%s1082_s4 + $0x40] sm:$0xf] %vm493_vm4, %v489_v43 }
 0x15e   :  { %511 = vst.msk [vmem:[%s1082_s4 + $0x44] sm:$0xf] %vm493_vm4, %v490_v53 }
 0x15f   :  { %512 = vst.msk [vmem:[%s1082_s4 + $0x48] sm:$0xf] %vm493_vm4, %v491_v61 }
 0x160   :  { %513 = vst.msk [vmem:[%s1082_s4 + $0x4c] sm:$0xf] %vm493_vm4, %v492_v21 }

// kernel: discriminator_forward.9
= control target key start
LH: loop header
LB: loop body
LE: loop exit
PB: predicated region body
PF: predicated region fallthrough
CT: control target
= control target key end

     0   :  { %vm229_vm0 = vcmask 261120   ;;  %vm334_vm10 = vcmask 257024   ;;  %s625_s1 = inlined_call_operand.vmem [shape: bf16[256,32], index: 1, kind: input, shape index: {}]   ;;  %s626_s0 = inlined_call_operand.vmem [shape: bf16[48,256], index: 0, kind: input, shape index: {}]   ;;  %s627_s3 = inlined_call_operand.vmem [shape: f32[1,32], index: 3, kind: input, shape index: {}]   ;;  %s628_s2 = inlined_call_operand.vmem [shape: f32[1,32], index: 2, kind: input, shape index: {}]   ;;  %s629_s4 = inlined_call_operand.vmem [shape: bf16[48,32], index: 4, kind: output, shape index: {}]  }
   0x1   :  { %v446_v0 = vld [vmem:[%s625_s1 + $0x38] sm:$0xff]  ;;  %v445_v2 = vld [vmem:[%s625_s1 + $0x30] sm:$0xff]  ;;  %v444_v4 = vld [vmem:[%s625_s1 + $0x28] sm:$0xff] }
   0x2   :  { %v454_v1 = vld [vmem:[%s625_s1 + $0x78] sm:$0xff]  ;;  %181 = vmatpush.bf16.msra.mxu0 %v446_v0  ;;  %455 = vmatpush.bf16.msra.mxu2 %v446_v0  ;;  %v453_v3 = vld [vmem:[%s625_s1 + $0x70] sm:$0xff]  ;;  %v452_v5 = vld [vmem:[%s625_s1 + $0x68] sm:$0xff] }
   0x3   :  { %205 = vmatpush.bf16.msra.mxu1 %v454_v1  ;;  %463 = vmatpush.bf16.msra.mxu3 %v454_v1  ;;  %v443_v6 = vld [vmem:[%s625_s1 + $0x20] sm:$0xff]  ;;  %v442_v8 = vld [vmem:[%s625_s1 + $0x18] sm:$0xff]  ;;  %v441_v10 = vld [vmem:[%s625_s1 + $0x10] sm:$0xff] }
   0x4   :  { %v451_v7 = vld [vmem:[%s625_s1 + $0x60] sm:$0xff]  ;;  %v450_v9 = vld [vmem:[%s625_s1 + $0x58] sm:$0xff]  ;;  %v449_v11 = vld [vmem:[%s625_s1 + $0x50] sm:$0xff] }
   0x5   :  { %v440_v12 = vld [vmem:[%s625_s1 + $0x8] sm:$0xff]  ;;  %v439_v14 = vld [vmem:[%s625_s1] sm:$0xff]  ;;  %v355_v18 = vld [vmem:[%s626_s0 + $0x10] sm:$0xf] }
   0x6   :  { %182 = vmatpush.bf16.msra.mxu0 %v445_v2  ;;  %456 = vmatpush.bf16.msra.mxu2 %v445_v2  ;;  %v448_v13 = vld [vmem:[%s625_s1 + $0x48] sm:$0xff]  ;;  %v447_v15 = vld [vmem:[%s625_s1 + $0x40] sm:$0xff]  ;;  %v436_v19 = vld [vmem:[%s626_s0 + $0x14] sm:$0xf0] }
   0x7   :  { %206 = vmatpush.bf16.msra.mxu1 %v453_v3  ;;  %464 = vmatpush.bf16.msra.mxu3 %v453_v3  ;;  %v347_v16 = vld [vmem:[%s626_s0] sm:$0xf]  ;;  %v434_v17 = vld [vmem:[%s626_s0 + $0x4] sm:$0xf0]  ;;  %v433_v20 = vld [vmem:[%s626_s0 + $0x4] sm:$0xf]  ;;  %v356_v25 = vor.u32 %v436_v19, %v355_v18 }
   0x8   :  { %v349_v21 = vld [vmem:[%s626_s0 + $0x8] sm:$0xf0]  ;;  %v435_v22 = vld [vmem:[%s626_s0 + $0x14] sm:$0xf]  ;;  %v357_v23 = vld [vmem:[%s626_s0 + $0x18] sm:$0xf0]  ;;  %v348_v24 = vor.u32 %v434_v17, %v347_v16 }
   0x9   :  { %v352_v26 = vor.u32 %v433_v20, %v349_v21  ;;  %v360_v27 = vor.u32 %v435_v22, %v357_v23  ;;  %v363_v28 = vld [vmem:[%s626_s0 + $0x20] sm:$0xf]  ;;  %v438_v29 = vld [vmem:[%s626_s0 + $0x24] sm:$0xf0]  ;;  %v437_v30 = vld [vmem:[%s626_s0 + $0x24] sm:$0xf] }
   0xa   :  { %183 = vmatpush.bf16.msra.mxu0 %v444_v4  ;;  %457 = vmatpush.bf16.msra.mxu2 %v444_v4  ;;  %v365_v31 = vld [vmem:[%s626_s0 + $0x28] sm:$0xf0]  ;;  %v364_v32 = vor.u32 %v438_v29, %v363_v28 }
   0xb   :  { %207 = vmatpush.bf16.msra.mxu1 %v452_v5  ;;  %465 = vmatpush.bf16.msra.mxu3 %v452_v5  ;;  %v368_v33 = vor.u32 %v437_v30, %v365_v31 }
   0xe   :  { %184 = vmatpush.bf16.msra.mxu0 %v443_v6  ;;  %458 = vmatpush.bf16.msra.mxu2 %v443_v6 }
   0xf   :  { %208 = vmatpush.bf16.msra.mxu1 %v451_v7  ;;  %466 = vmatpush.bf16.msra.mxu3 %v451_v7 }
  0x12   :  { %185 = vmatpush.bf16.msra.mxu0 %v442_v8  ;;  %459 = vmatpush.bf16.msra.mxu2 %v442_v8 }
  0x13   :  { %209 = vmatpush.bf16.msra.mxu1 %v450_v9  ;;  %467 = vmatpush.bf16.msra.mxu3 %v450_v9 }
  0x16   :  { %186 = vmatpush.bf16.msra.mxu0 %v441_v10  ;;  %460 = vmatpush.bf16.msra.mxu2 %v441_v10 }
  0x17   :  { %210 = vmatpush.bf16.msra.mxu1 %v449_v11  ;;  %468 = vmatpush.bf16.msra.mxu3 %v449_v11 }
  0x1a   :  { %187 = vmatpush.bf16.msra.mxu0 %v440_v12  ;;  %461 = vmatpush.bf16.msra.mxu2 %v440_v12 }
  0x1b   :  { %211 = vmatpush.bf16.msra.mxu1 %v448_v13  ;;  %469 = vmatpush.bf16.msra.mxu3 %v448_v13 }
  0x1e   :  { %188 = vmatpush.bf16.msra.mxu0 %v439_v14  ;;  %462 = vmatpush.bf16.msra.mxu2 %v439_v14 }
  0x1f   :  { %212 = vmatpush.bf16.msra.mxu1 %v447_v15  ;;  %470 = vmatpush.bf16.msra.mxu3 %v447_v15 }
  0x21   :  { %189 = vmatmul.bf16.vlgmr.msra.gmra.mxu0 %v348_v24  ;;  %194 = vmatmul.bf16.vlgmr.msra.gmra.mxu2 %v356_v25 }
  0x22   :  { %213 = vmatmul.bf16.vlgmr.msra.gmra.mxu1 %v352_v26  ;;  %218 = vmatmul.bf16.vlgmr.msra.gmra.mxu3 %v360_v27 }
  0x31   :  { %199 = vmatmul.bf16.gmra.mxu2 %v364_v32 }
  0x32   :  { %223 = vmatmul.bf16.gmra.mxu3 %v368_v33 }
  0x9e   :  { %v190_v34 = vpop.f32.mrf.mxu0 }
  0x9f   :  { %v214_v35 = vpop.f32.mrf.mxu1 }
  0xa0   :  { %v215_v42 = vadd.f32 %v214_v35, %v190_v34 }
  0xa2   :  { %v230_v44 = vsel %vm229_vm0, %v215_v42, 0.0 }
  0xa4   :  { %v195_v36 = vpop.f32.mrf.mxu2 }
  0xa5   :  { %v219_v37 = vpop.f32.mrf.mxu3 }
  0xa6   :  { %v192_v38 = vpop.f32.mrf.mxu0  ;;  %v220_v48 = vadd.f32 %v219_v37, %v195_v36 }
  0xa7   :  { %v216_v40 = vpop.f32.mrf.mxu1 }
  0xa8   :  { %v217_v43 = vadd.f32 %v216_v40, %v192_v38  ;;  %v233_v52 = vsel %vm229_vm0, %v220_v48, 0.0 }
  0xaa   :  { %v231_v45 = vsel %vm229_vm0, %v217_v43, 0.0 }
  0xab   :  { %v232_v50 = vadd.f32 %v231_v45, %v230_v44 }
  0xac   :  { %v197_v39 = vpop.f32.mrf.mxu2 }
  0xad   :  { %v221_v41 = vpop.f32.mrf.mxu3  ;;  %v234_v54 = vadd.f32 %v233_v52, %v232_v50 }
  0xae   :  { %v222_v49 = vadd.f32 %v221_v41, %v197_v39 }
  0xb0   :  { %v235_v53 = vsel %vm229_vm0, %v222_v49, 0.0 }
  0xb1   :  { %v236_v57 = vadd.f32 %v235_v53, %v234_v54 }
  0xb4   :  { %v200_v46 = vpop.f32.mrf.mxu2 }
  0xb5   :  { %v224_v47 = vpop.f32.mrf.mxu3 }
  0xb6   :  { %v225_v51 = vadd.f32 %v224_v47, %v200_v46  ;;  %v471_v47 = vld [vmem:[%s627_s3] ss:$0 sm:$0xff] }
  0xb8   :  { %v237_v55 = vsel %vm229_vm0, %v225_v51, 0.0 }
  0xb9   :  { %v238_v60 = vadd.f32 %v237_v55, %v236_v57 }
  0xbc   :  { %v202_v56 = vpop.f32.mrf.mxu2 }
  0xbd   :  { %v226_v58 = vpop.f32.mrf.mxu3 }
  0xbe   :  { %v227_v59 = vadd.f32 %v226_v58, %v202_v56 }
  0xc0   :  { %v239_v61 = vsel %vm229_vm0, %v227_v59, 0.0 }
  0xc1   :  { %v240_v62 = vadd.f32 %v239_v61, %v238_v60 }
  0xc3   :  { %v241_v63 = vrot.slane %v240_v62, 4 }
  0xc5   :  { %v242_v0 = vadd.f32 %v241_v63, %v240_v62 }
  0xc7   :  { %v243_v1 = vrot.slane %v242_v0, 2 }
  0xc9   :  { %v244_v2 = vadd.f32 %v243_v1, %v242_v0 }
  0xcb   :  { %v245_v3 = vrot.slane %v244_v2, 1 }
  0xcd   :  { %v246_v4 = vadd.f32 %v245_v3, %v244_v2 }
  0xcf   :  { %v247_v5 = vmul.f32 0.020833334, %v246_v4 }
  0xd1   :  { %v248_v6 = vsub.f32 %v215_v42, %v247_v5  ;;  %v249_v7 = vsub.f32 %v217_v43, %v247_v5  ;;  %v250_v8 = vsub.f32 %v220_v48, %v247_v5  ;;  %v251_v9 = vsub.f32 %v222_v49, %v247_v5  ;;  %v278_v42 = vld [vmem:[%s628_s2] sm:$0x1] }
  0xd2   :  { %v252_v10 = vsub.f32 %v225_v51, %v247_v5  ;;  %v253_v14 = vsub.f32 %v227_v59, %v247_v5 }
  0xd3   :  { %v254_v11 = vmul.f32 %v248_v6, %v248_v6  ;;  %v255_v12 = vmul.f32 %v249_v7, %v249_v7  ;;  %v256_v13 = vmul.f32 %v250_v8, %v250_v8  ;;  %v257_v15 = vmul.f32 %v251_v9, %v251_v9 }
  0xd4   :  { %v258_v19 = vmul.f32 %v252_v10, %v252_v10  ;;  %v259_v22 = vmul.f32 %v253_v14, %v253_v14 }
  0xd5   :  { %v260_v16 = vsel %vm229_vm0, %v254_v11, 0.0  ;;  %v261_v17 = vsel %vm229_vm0, %v255_v12, 0.0  ;;  %v263_v20 = vsel %vm229_vm0, %v256_v13, 0.0  ;;  %v265_v23 = vsel %vm229_vm0, %v257_v15, 0.0 }
  0xd6   :  { %v262_v18 = vadd.f32 %v261_v17, %v260_v16  ;;  %v267_v25 = vsel %vm229_vm0, %v258_v19, 0.0  ;;  %v269_v27 = vsel %vm229_vm0, %v259_v22, 0.0 }
  0xd8   :  { %v264_v21 = vadd.f32 %v263_v20, %v262_v18 }
  0xda   :  { %v266_v24 = vadd.f32 %v265_v23, %v264_v21 }
  0xdc   :  { %v268_v26 = vadd.f32 %v267_v25, %v266_v24 }
  0xde   :  { %v270_v28 = vadd.f32 %v269_v27, %v268_v26 }
  0xe0   :  { %v271_v29 = vrot.slane %v270_v28, 4 }
  0xe2   :  { %v272_v30 = vadd.f32 %v271_v29, %v270_v28 }
  0xe4   :  { %v273_v31 = vrot.slane %v272_v30, 2 }
  0xe6   :  { %v274_v32 = vadd.f32 %v273_v31, %v272_v30 }
  0xe8   :  { %v275_v33 = vrot.slane %v274_v32, 1 }
  0xea   :  { %v276_v34 = vadd.f32 %v275_v33, %v274_v32 }
  0xec   :  { %v277_v35 = vmul.f32 0.020833334, %v276_v34 }
  0xee   :  { %v279_v36 = vadd.f32 1e-05, %v277_v35 }
  0xf0   :  { %472 = vrsqrt.f32 %v279_v36  ;;  %vm286_vm2 = vweird.f32 %v279_v36 }
  0xf6   :  { %v473_v37 = vpop.eup %472 }
  0xf7   :  { %v281_v38 = vmul.f32 %v473_v37, %v279_v36  ;;  %vm287_vm1 = vweird.f32 %v473_v37 }
  0xf8   :  { %vm288_vm3 = vmor %vm286_vm2, %vm287_vm1 }
  0xf9   :  { %v282_v39 = vmul.f32 %v473_v37, %v281_v38 }
  0xfb   :  { %v283_v40 = vmul.f32 0.5, %v282_v39 }
  0xfd   :  { %v284_v41 = vsub.f32 1.5, %v283_v40 }
  0xff   :  { %v285_v43 = vmul.f32 %v473_v37, %v284_v41 }
 0x101   :  { %v289_v44 = vsel %vm288_vm3, %v473_v37, %v285_v43 }
 0x102   :  { %v290_v45 = vmul.f32 %v289_v44, %v278_v42 }
 0x104   :  { %v292_v46 = vperm.slane %v290_v45, 0 }
 0x106   :  { %v294_v48 = vmul.f32 %v292_v46, %v248_v6  ;;  %v295_v49 = vmul.f32 %v292_v46, %v249_v7  ;;  %v296_v50 = vmul.f32 %v292_v46, %v250_v8  ;;  %v297_v51 = vmul.f32 %v292_v46, %v251_v9 }
 0x107   :  { %v298_v52 = vmul.f32 %v292_v46, %v252_v10  ;;  %v299_v53 = vmul.f32 %v292_v46, %v253_v14 }
 0x108   :  { %v304_v54 = vadd.f32 %v471_v47, %v294_v48  ;;  %v305_v55 = vadd.f32 %v471_v47, %v295_v49  ;;  %v306_v56 = vadd.f32 %v471_v47, %v296_v50  ;;  %v307_v57 = vadd.f32 %v471_v47, %v297_v51 }
 0x109   :  { %v308_v58 = vadd.f32 %v471_v47, %v298_v52  ;;  %v309_v59 = vadd.f32 %v471_v47, %v299_v53 }
 0x10a   :  { %vm310_vm4 = vcmp.ge.f32.partialorder %v304_v54, 0.0  ;;  %vm311_vm5 = vcmp.ge.f32.partialorder %v305_v55, 0.0  ;;  %vm312_vm6 = vcmp.ge.f32.partialorder %v306_v56, 0.0  ;;  %vm313_vm7 = vcmp.ge.f32.partialorder %v307_v57, 0.0 }
 0x10b   :  { %vm314_vm8 = vcmp.ge.f32.partialorder %v308_v58, 0.0  ;;  %vm315_vm9 = vcmp.ge.f32.partialorder %v309_v59, 0.0  ;;  %v316_v60 = vmul.f32 0.2, %v304_v54  ;;  %v317_v61 = vmul.f32 0.2, %v305_v55 }
 0x10c   :  { %v318_v62 = vmul.f32 0.2, %v306_v56  ;;  %v319_v63 = vmul.f32 0.2, %v307_v57  ;;  %v320_v0 = vmul.f32 0.2, %v308_v58 }
 0x10d   :  { %v321_v1 = vmul.f32 0.2, %v309_v59  ;;  %v322_v2 = vsel %vm310_vm4, %v304_v54, %v316_v60  ;;  %v323_v3 = vsel %vm311_vm5, %v305_v55, %v317_v61 }
 0x10e   :  { %v324_v4 = vsel %vm312_vm6, %v306_v56, %v318_v62  ;;  %v325_v5 = vsel %vm313_vm7, %v307_v57, %v319_v63  ;;  %v326_v6 = vsel %vm314_vm8, %v308_v58, %v320_v0  ;;  %v328_v7 = vpack.c.bf16 %v322_v2, %v322_v2 }
 0x10f   :  { %v327_v8 = vsel %vm315_vm9, %v309_v59, %v321_v1  ;;  %v329_v9 = vpack.c.bf16 %v323_v3, %v323_v3  ;;  %v330_v10 = vpack.c.bf16 %v324_v4, %v324_v4  ;;  %v331_v11 = vpack.c.bf16 %v325_v5, %v325_v5 }
 0x110   :  { %v332_v12 = vpack.c.bf16 %v326_v6, %v326_v6  ;;  %335 = vst.msk [vmem:[%s629_s4] sm:$0xf] %vm334_vm10, %v328_v7  ;;  %v333_v13 = vpack.c.bf16 %v327_v8, %v327_v8 }
 0x111   :  { %336 = vst.msk [vmem:[%s629_s4 + $0x4] sm:$0xf] %vm334_vm10, %v329_v9 }
 0x112   :  { %337 = vst.msk [vmem:[%s629_s4 + $0x8] sm:$0xf] %vm334_vm10, %v330_v10 }
 0x113   :  { %338 = vst.msk [vmem:[%s629_s4 + $0xc] sm:$0xf] %vm334_vm10, %v331_v11 }
 0x114   :  { %339 = vst.msk [vmem:[%s629_s4 + $0x10] sm:$0xf] %vm334_vm10, %v332_v12 }
 0x115   :  { %340 = vst.msk [vmem:[%s629_s4 + $0x14] sm:$0xf] %vm334_vm10, %v333_v13 }

// kernel: discriminator_forward.10
= control target key start
LH: loop header
LB: loop body
LE: loop exit
PB: predicated region body
PF: predicated region fallthrough
CT: control target
= control target key end

     0   :  { %vm441_vm0 = vcmask 523264   ;;  %vm546_vm10 = vcmask 519168   ;;  %s1015_s1 = inlined_call_operand.vmem [shape: bf16[512,64], index: 1, kind: input, shape index: {}]   ;;  %s1016_s0 = inlined_call_operand.vmem [shape: bf16[48,512], index: 0, kind: input, shape index: {}]   ;;  %s1017_s3 = inlined_call_operand.vmem [shape: f32[1,64], index: 3, kind: input, shape index: {}]   ;;  %s1018_s2 = inlined_call_operand.vmem [shape: f32[1,64], index: 2, kind: input, shape index: {}]   ;;  %s1019_s4 = inlined_call_operand.vmem [shape: bf16[48,64], index: 4, kind: output, shape index: {}]  }
   0x1   :  { %v752_v0 = vld [vmem:[%s1015_s1 + $0x38] sm:$0xff]  ;;  %v751_v4 = vld [vmem:[%s1015_s1 + $0x30] sm:$0xff]  ;;  %v750_v8 = vld [vmem:[%s1015_s1 + $0x28] sm:$0xff] }
   0x2   :  { %v760_v1 = vld [vmem:[%s1015_s1 + $0x78] sm:$0xff]  ;;  %345 = vmatpush.bf16.msra.mxu0 %v752_v0  ;;  %v759_v5 = vld [vmem:[%s1015_s1 + $0x70] sm:$0xff]  ;;  %v758_v9 = vld [vmem:[%s1015_s1 + $0x68] sm:$0xff] }
   0x3   :  { %v768_v2 = vld [vmem:[%s1015_s1 + $0xb8] sm:$0xff]  ;;  %369 = vmatpush.bf16.msra.mxu1 %v760_v1  ;;  %v767_v6 = vld [vmem:[%s1015_s1 + $0xb0] sm:$0xff]  ;;  %v766_v10 = vld [vmem:[%s1015_s1 + $0xa8] sm:$0xff] }
   0x4   :  { %v776_v3 = vld [vmem:[%s1015_s1 + $0xf8] sm:$0xff]  ;;  %393 = vmatpush.bf16.msra.mxu2 %v768_v2  ;;  %v775_v7 = vld [vmem:[%s1015_s1 + $0xf0] sm:$0xff]  ;;  %v774_v11 = vld [vmem:[%s1015_s1 + $0xe8] sm:$0xff] }
   0x5   :  { %417 = vmatpush.bf16.msra.mxu3 %v776_v3  ;;  %v749_v12 = vld [vmem:[%s1015_s1 + $0x20] sm:$0xff]  ;;  %v748_v16 = vld [vmem:[%s1015_s1 + $0x18] sm:$0xff]  ;;  %v747_v20 = vld [vmem:[%s1015_s1 + $0x10] sm:$0xff] }
   0x6   :  { %346 = vmatpush.bf16.msra.mxu0 %v751_v4  ;;  %v757_v13 = vld [vmem:[%s1015_s1 + $0x60] sm:$0xff]  ;;  %v756_v17 = vld [vmem:[%s1015_s1 + $0x58] sm:$0xff]  ;;  %v755_v21 = vld [vmem:[%s1015_s1 + $0x50] sm:$0xff] }
   0x7   :  { %370 = vmatpush.bf16.msra.mxu1 %v759_v5  ;;  %v765_v14 = vld [vmem:[%s1015_s1 + $0xa0] sm:$0xff]  ;;  %v764_v18 = vld [vmem:[%s1015_s1 + $0x98] sm:$0xff]  ;;  %v763_v22 = vld [vmem:[%s1015_s1 + $0x90] sm:$0xff] }
   0x8   :  { %394 = vmatpush.bf16.msra.mxu2 %v767_v6  ;;  %v773_v15 = vld [vmem:[%s1015_s1 + $0xe0] sm:$0xff]  ;;  %v772_v19 = vld [vmem:[%s1015_s1 + $0xd8] sm:$0xff]  ;;  %v771_v23 = vld [vmem:[%s1015_s1 + $0xd0] sm:$0xff] }
   0x9   :  { %418 = vmatpush.bf16.msra.mxu3 %v775_v7  ;;  %v746_v24 = vld [vmem:[%s1015_s1 + $0x8] sm:$0xff]  ;;  %v745_v28 = vld [vmem:[%s1015_s1] sm:$0xff]  ;;  %v735_v33 = vld [vmem:[%s1016_s0 + $0xc] sm:$0xf0] }
   0xa   :  { %347 = vmatpush.bf16.msra.mxu0 %v750_v8  ;;  %v754_v25 = vld [vmem:[%s1015_s1 + $0x48] sm:$0xff]  ;;  %v753_v29 = vld [vmem:[%s1015_s1 + $0x40] sm:$0xff]  ;;  %v561_v35 = vld [vmem:[%s1016_s0 + $0x10] sm:$0xf0] }
   0xb   :  { %371 = vmatpush.bf16.msra.mxu1 %v758_v9  ;;  %v762_v26 = vld [vmem:[%s1015_s1 + $0x88] sm:$0xff]  ;;  %v761_v30 = vld [vmem:[%s1015_s1 + $0x80] sm:$0xff]  ;;  %v736_v37 = vld [vmem:[%s1016_s0 + $0x14] sm:$0xf0] }
   0xc   :  { %395 = vmatpush.bf16.msra.mxu2 %v766_v10  ;;  %v770_v27 = vld [vmem:[%s1015_s1 + $0xc8] sm:$0xff]  ;;  %v769_v31 = vld [vmem:[%s1015_s1 + $0xc0] sm:$0xff]  ;;  %v569_v39 = vld [vmem:[%s1016_s0 + $0x18] sm:$0xf0] }
   0xd   :  { %419 = vmatpush.bf16.msra.mxu3 %v774_v11  ;;  %v559_v32 = vld [vmem:[%s1016_s0] sm:$0xf]  ;;  %v733_v34 = vld [vmem:[%s1016_s0 + $0x4] sm:$0xf]  ;;  %v567_v36 = vld [vmem:[%s1016_s0 + $0x8] sm:$0xf] }
   0xe   :  { %348 = vmatpush.bf16.msra.mxu0 %v749_v12  ;;  %v734_v38 = vld [vmem:[%s1016_s0 + $0xc] sm:$0xf]  ;;  %v560_v40 = vor.u32 %v735_v33, %v559_v32  ;;  %v564_v41 = vor.u32 %v733_v34, %v561_v35  ;;  %v568_v42 = vor.u32 %v736_v37, %v567_v36  ;;  %v575_v44 = vld [vmem:[%s1016_s0 + $0x20] sm:$0xf]  ;;  %v739_v45 = vld [vmem:[%s1016_s0 + $0x2c] sm:$0xf0] }
   0xf   :  { %372 = vmatpush.bf16.msra.mxu1 %v757_v13  ;;  %v572_v43 = vor.u32 %v734_v38, %v569_v39  ;;  %v737_v46 = vld [vmem:[%s1016_s0 + $0x24] sm:$0xf]  ;;  %v577_v47 = vld [vmem:[%s1016_s0 + $0x30] sm:$0xf0]  ;;  %v583_v48 = vld [vmem:[%s1016_s0 + $0x28] sm:$0xf]  ;;  %v576_v52 = vor.u32 %v739_v45, %v575_v44 }
  0x10   :  { %396 = vmatpush.bf16.msra.mxu2 %v765_v14  ;;  %v740_v49 = vld [vmem:[%s1016_s0 + $0x34] sm:$0xf0]  ;;  %v738_v50 = vld [vmem:[%s1016_s0 + $0x2c] sm:$0xf]  ;;  %v585_v51 = vld [vmem:[%s1016_s0 + $0x38] sm:$0xf0]  ;;  %v580_v53 = vor.u32 %v737_v46, %v577_v47 }
  0x11   :  { %420 = vmatpush.bf16.msra.mxu3 %v773_v15  ;;  %v584_v54 = vor.u32 %v740_v49, %v583_v48  ;;  %v588_v55 = vor.u32 %v738_v50, %v585_v51  ;;  %v591_v56 = vld [vmem:[%s1016_s0 + $0x40] sm:$0xf]  ;;  %v743_v57 = vld [vmem:[%s1016_s0 + $0x4c] sm:$0xf0]  ;;  %v741_v58 = vld [vmem:[%s1016_s0 + $0x44] sm:$0xf] }
  0x12   :  { %349 = vmatpush.bf16.msra.mxu0 %v748_v16  ;;  %v593_v59 = vld [vmem:[%s1016_s0 + $0x50] sm:$0xf0]  ;;  %v599_v60 = vld [vmem:[%s1016_s0 + $0x48] sm:$0xf]  ;;  %v744_v61 = vld [vmem:[%s1016_s0 + $0x54] sm:$0xf0]  ;;  %v592_v0 = vor.u32 %v743_v57, %v591_v56 }
  0x13   :  { %373 = vmatpush.bf16.msra.mxu1 %v756_v17  ;;  %v742_v62 = vld [vmem:[%s1016_s0 + $0x4c] sm:$0xf]  ;;  %v601_v63 = vld [vmem:[%s1016_s0 + $0x58] sm:$0xf0]  ;;  %v596_v1 = vor.u32 %v741_v58, %v593_v59  ;;  %v600_v2 = vor.u32 %v744_v61, %v599_v60 }
  0x14   :  { %397 = vmatpush.bf16.msra.mxu2 %v764_v18  ;;  %v604_v3 = vor.u32 %v742_v62, %v601_v63 }
  0x15   :  { %421 = vmatpush.bf16.msra.mxu3 %v772_v19 }
  0x16   :  { %350 = vmatpush.bf16.msra.mxu0 %v747_v20 }
  0x17   :  { %374 = vmatpush.bf16.msra.mxu1 %v755_v21 }
  0x18   :  { %398 = vmatpush.bf16.msra.mxu2 %v763_v22 }
  0x19   :  { %422 = vmatpush.bf16.msra.mxu3 %v771_v23 }
  0x1a   :  { %351 = vmatpush.bf16.msra.mxu0 %v746_v24 }
  0x1b   :  { %375 = vmatpush.bf16.msra.mxu1 %v754_v25 }
  0x1c   :  { %399 = vmatpush.bf16.msra.mxu2 %v762_v26 }
  0x1d   :  { %423 = vmatpush.bf16.msra.mxu3 %v770_v27 }
  0x1e   :  { %352 = vmatpush.bf16.msra.mxu0 %v745_v28 }
  0x1f   :  { %376 = vmatpush.bf16.msra.mxu1 %v753_v29 }
  0x20   :  { %400 = vmatpush.bf16.msra.mxu2 %v761_v30 }
  0x21   :  { %424 = vmatpush.bf16.msra.mxu3 %v769_v31  ;;  %353 = vmatmul.bf16.vlgmr.msra.gmra.mxu0 %v560_v40 }
  0x22   :  { %377 = vmatmul.bf16.vlgmr.msra.gmra.mxu1 %v564_v41 }
  0x23   :  { %401 = vmatmul.bf16.vlgmr.msra.gmra.mxu2 %v568_v42 }
  0x24   :  { %425 = vmatmul.bf16.vlgmr.msra.gmra.mxu3 %v572_v43 }
  0x31   :  { %358 = vmatmul.bf16.gmra.mxu0 %v576_v52 }
  0x32   :  { %382 = vmatmul.bf16.gmra.mxu1 %v580_v53 }
  0x33   :  { %406 = vmatmul.bf16.gmra.mxu2 %v584_v54 }
  0x34   :  { %430 = vmatmul.bf16.gmra.mxu3 %v588_v55 }
  0x41   :  { %363 = vmatmul.bf16.gmra.mxu0 %v592_v0 }
  0x42   :  { %387 = vmatmul.bf16.gmra.mxu1 %v596_v1 }
  0x43   :  { %411 = vmatmul.bf16.gmra.mxu2 %v600_v2 }
  0x44   :  { %435 = vmatmul.bf16.gmra.mxu3 %v604_v3 }
  0x9e   :  { %v354_v4 = vpop.f32.mrf.mxu0 }
  0x9f   :  { %v378_v5 = vpop.f32.mrf.mxu1 }
  0xa0   :  { %v379_v20 = vadd.f32 %v378_v5, %v354_v4 }
  0xa6   :  { %v402_v6 = vpop.f32.mrf.mxu2  ;;  %v356_v8 = vpop.f32.mrf.mxu0 }
  0xa7   :  { %v426_v7 = vpop.f32.mrf.mxu3  ;;  %v380_v9 = vpop.f32.mrf.mxu1  ;;  %v403_v26 = vadd.f32 %v402_v6, %v379_v20 }
  0xa8   :  { %v381_v21 = vadd.f32 %v380_v9, %v356_v8 }
  0xa9   :  { %v427_v34 = vadd.f32 %v426_v7, %v403_v26 }
  0xab   :  { %v442_v41 = vsel %vm441_vm0, %v427_v34, 0.0 }
  0xae   :  { %v404_v10 = vpop.f32.mrf.mxu2  ;;  %v359_v12 = vpop.f32.mrf.mxu0 }
  0xaf   :  { %v428_v11 = vpop.f32.mrf.mxu3  ;;  %v383_v13 = vpop.f32.mrf.mxu1  ;;  %v405_v25 = vadd.f32 %v404_v10, %v381_v21 }
  0xb0   :  { %v384_v22 = vadd.f32 %v383_v13, %v359_v12 }
  0xb1   :  { %v429_v30 = vadd.f32 %v428_v11, %v405_v25 }
  0xb3   :  { %v443_v37 = vsel %vm441_vm0, %v429_v30, 0.0 }
  0xb4   :  { %v444_v44 = vadd.f32 %v443_v37, %v442_v41  ;;  %v777_v41 = vld [vmem:[%s1017_s3] ss:$0 sm:$0xff] }
  0xb6   :  { %v407_v14 = vpop.f32.mrf.mxu2  ;;  %v361_v16 = vpop.f32.mrf.mxu0 }
  0xb7   :  { %v431_v15 = vpop.f32.mrf.mxu3  ;;  %v385_v17 = vpop.f32.mrf.mxu1  ;;  %v408_v27 = vadd.f32 %v407_v14, %v384_v22 }
  0xb8   :  { %v386_v28 = vadd.f32 %v385_v17, %v361_v16 }
  0xb9   :  { %v432_v35 = vadd.f32 %v431_v15, %v408_v27 }
  0xbb   :  { %v445_v42 = vsel %vm441_vm0, %v432_v35, 0.0 }
  0xbc   :  { %v446_v47 = vadd.f32 %v445_v42, %v444_v44 }
  0xbe   :  { %v409_v18 = vpop.f32.mrf.mxu2  ;;  %v364_v23 = vpop.f32.mrf.mxu0 }
  0xbf   :  { %v433_v19 = vpop.f32.mrf.mxu3  ;;  %v388_v24 = vpop.f32.mrf.mxu1  ;;  %v410_v31 = vadd.f32 %v409_v18, %v386_v28 }
  0xc0   :  { %v389_v29 = vadd.f32 %v388_v24, %v364_v23 }
  0xc1   :  { %v434_v38 = vadd.f32 %v433_v19, %v410_v31 }
  0xc3   :  { %v447_v45 = vsel %vm441_vm0, %v434_v38, 0.0 }
  0xc4   :  { %v448_v51 = vadd.f32 %v447_v45, %v446_v47 }
  0xc6   :  { %v412_v32 = vpop.f32.mrf.mxu2  ;;  %v366_v39 = vpop.f32.mrf.mxu0 }
  0xc7   :  { %v436_v33 = vpop.f32.mrf.mxu3  ;;  %v413_v36 = vadd.f32 %v412_v32, %v389_v29  ;;  %v390_v40 = vpop.f32.mrf.mxu1 }
  0xc8   :  { %v391_v46 = vadd.f32 %v390_v40, %v366_v39 }
  0xc9   :  { %v437_v43 = vadd.f32 %v436_v33, %v413_v36  ;;  %v490_v36 = vld [vmem:[%s1018_s2] sm:$0x1] }
  0xcb   :  { %v449_v49 = vsel %vm441_vm0, %v437_v43, 0.0 }
  0xcc   :  { %v450_v54 = vadd.f32 %v449_v49, %v448_v51 }
  0xce   :  { %v414_v48 = vpop.f32.mrf.mxu2 }
  0xcf   :  { %v415_v50 = vadd.f32 %v414_v48, %v391_v46  ;;  %v438_v52 = vpop.f32.mrf.mxu3 }
  0xd1   :  { %v439_v53 = vadd.f32 %v438_v52, %v415_v50 }
  0xd3   :  { %v451_v55 = vsel %vm441_vm0, %v439_v53, 0.0 }
  0xd4   :  { %v452_v56 = vadd.f32 %v451_v55, %v450_v54 }
  0xd6   :  { %v453_v57 = vrot.slane %v452_v56, 4 }
  0xd8   :  { %v454_v58 = vadd.f32 %v453_v57, %v452_v56 }
  0xda   :  { %v455_v59 = vrot.slane %v454_v58, 2 }
  0xdc   :  { %v456_v60 = vadd.f32 %v455_v59, %v454_v58 }
  0xde   :  { %v457_v61 = vrot.slane %v456_v60, 1 }
  0xe0   :  { %v458_v62 = vadd.f32 %v457_v61, %v456_v60 }
  0xe2   :  { %v459_v63 = vmul.f32 0.020833334, %v458_v62 }
  0xe4   :  { %v460_v0 = vsub.f32 %v427_v34, %v459_v63  ;;  %v461_v1 = vsub.f32 %v429_v30, %v459_v63  ;;  %v462_v2 = vsub.f32 %v432_v35, %v459_v63  ;;  %v463_v3 = vsub.f32 %v434_v38, %v459_v63 }
  0xe5   :  { %v464_v4 = vsub.f32 %v437_v43, %v459_v63  ;;  %v465_v8 = vsub.f32 %v439_v53, %v459_v63 }
  0xe6   :  { %v466_v5 = vmul.f32 %v460_v0, %v460_v0  ;;  %v467_v6 = vmul.f32 %v461_v1, %v461_v1  ;;  %v468_v7 = vmul.f32 %v462_v2, %v462_v2  ;;  %v469_v9 = vmul.f32 %v463_v3, %v463_v3 }
  0xe7   :  { %v470_v13 = vmul.f32 %v464_v4, %v464_v4  ;;  %v471_v16 = vmul.f32 %v465_v8, %v465_v8 }
  0xe8   :  { %v472_v10 = vsel %vm441_vm0, %v466_v5, 0.0  ;;  %v473_v11 = vsel %vm441_vm0, %v467_v6, 0.0  ;;  %v475_v14 = vsel %vm441_vm0, %v468_v7, 0.0  ;;  %v477_v17 = vsel %vm441_vm0, %v469_v9, 0.0 }
  0xe9   :  { %v474_v12 = vadd.f32 %v473_v11, %v472_v10  ;;  %v479_v19 = vsel %vm441_vm0, %v470_v13, 0.0  ;;  %v481_v21 = vsel %vm441_vm0, %v471_v16, 0.0 }
  0xeb   :  { %v476_v15 = vadd.f32 %v475_v14, %v474_v12 }
  0xed   :  { %v478_v18 = vadd.f32 %v477_v17, %v476_v15 }
  0xef   :  { %v480_v20 = vadd.f32 %v479_v19, %v478_v18 }
  0xf1   :  { %v482_v22 = vadd.f32 %v481_v21, %v480_v20 }
  0xf3   :  { %v483_v23 = vrot.slane %v482_v22, 4 }
  0xf5   :  { %v484_v24 = vadd.f32 %v483_v23, %v482_v22 }
  0xf7   :  { %v485_v25 = vrot.slane %v484_v24, 2 }
  0xf9   :  { %v486_v26 = vadd.f32 %v485_v25, %v484_v24 }
  0xfb   :  { %v487_v27 = vrot.slane %v486_v26, 1 }
  0xfd   :  { %v488_v28 = vadd.f32 %v487_v27, %v486_v26 }
  0xff   :  { %v489_v29 = vmul.f32 0.020833334, %v488_v28 }
 0x101   :  { %v491_v30 = vadd.f32 1e-05, %v489_v29 }
 0x103   :  { %778 = vrsqrt.f32 %v491_v30  ;;  %vm498_vm2 = vweird.f32 %v491_v30 }
 0x109   :  { %v779_v31 = vpop.eup %778 }
 0x10a   :  { %v493_v32 = vmul.f32 %v779_v31, %v491_v30  ;;  %vm499_vm1 = vweird.f32 %v779_v31 }
 0x10b   :  { %vm500_vm3 = vmor %vm498_vm2, %vm499_vm1 }
 0x10c   :  { %v494_v33 = vmul.f32 %v779_v31, %v493_v32 }
 0x10e   :  { %v495_v34 = vmul.f32 0.5, %v494_v33 }
 0x110   :  { %v496_v35 = vsub.f32 1.5, %v495_v34 }
 0x112   :  { %v497_v37 = vmul.f32 %v779_v31, %v496_v35 }
 0x114   :  { %v501_v38 = vsel %vm500_vm3, %v779_v31, %v497_v37 }
 0x115   :  { %v502_v39 = vmul.f32 %v501_v38, %v490_v36 }
 0x117   :  { %v504_v40 = vperm.slane %v502_v39, 0 }
 0x119   :  { %v506_v42 = vmul.f32 %v504_v40, %v460_v0  ;;  %v507_v43 = vmul.f32 %v504_v40, %v461_v1  ;;  %v508_v44 = vmul.f32 %v504_v40, %v462_v2  ;;  %v509_v45 = vmul.f32 %v504_v40, %v463_v3 }
 0x11a   :  { %v510_v46 = vmul.f32 %v504_v40, %v464_v4  ;;  %v511_v47 = vmul.f32 %v504_v40, %v465_v8 }
 0x11b   :  { %v516_v48 = vadd.f32 %v777_v41, %v506_v42  ;;  %v517_v49 = vadd.f32 %v777_v41, %v507_v43  ;;  %v518_v50 = vadd.f32 %v777_v41, %v508_v44  ;;  %v519_v51 = vadd.f32 %v777_v41, %v509_v45 }
 0x11c   :  { %v520_v52 = vadd.f32 %v777_v41, %v510_v46  ;;  %v521_v53 = vadd.f32 %v777_v41, %v511_v47 }
 0x11d   :  { %vm522_vm4 = vcmp.ge.f32.partialorder %v516_v48, 0.0  ;;  %vm523_vm5 = vcmp.ge.f32.partialorder %v517_v49, 0.0  ;;  %vm524_vm6 = vcmp.ge.f32.partialorder %v518_v50, 0.0  ;;  %vm525_vm7 = vcmp.ge.f32.partialorder %v519_v51, 0.0 }
 0x11e   :  { %vm526_vm8 = vcmp.ge.f32.partialorder %v520_v52, 0.0  ;;  %vm527_vm9 = vcmp.ge.f32.partialorder %v521_v53, 0.0  ;;  %v528_v54 = vmul.f32 0.2, %v516_v48  ;;  %v529_v55 = vmul.f32 0.2, %v517_v49 }
 0x11f   :  { %v530_v56 = vmul.f32 0.2, %v518_v50  ;;  %v531_v57 = vmul.f32 0.2, %v519_v51  ;;  %v532_v58 = vmul.f32 0.2, %v520_v52 }
 0x120   :  { %v533_v59 = vmul.f32 0.2, %v521_v53  ;;  %v534_v60 = vsel %vm522_vm4, %v516_v48, %v528_v54  ;;  %v535_v61 = vsel %vm523_vm5, %v517_v49, %v529_v55 }
 0x121   :  { %v536_v62 = vsel %vm524_vm6, %v518_v50, %v530_v56  ;;  %v537_v63 = vsel %vm525_vm7, %v519_v51, %v531_v57  ;;  %v538_v0 = vsel %vm526_vm8, %v520_v52, %v532_v58  ;;  %v540_v1 = vpack.c.bf16 %v534_v60, %v534_v60 }
 0x122   :  { %v539_v2 = vsel %vm527_vm9, %v521_v53, %v533_v59  ;;  %v541_v3 = vpack.c.bf16 %v535_v61, %v535_v61  ;;  %v542_v4 = vpack.c.bf16 %v536_v62, %v536_v62  ;;  %v543_v5 = vpack.c.bf16 %v537_v63, %v537_v63 }
 0x123   :  { %v544_v6 = vpack.c.bf16 %v538_v0, %v538_v0  ;;  %547 = vst.msk [vmem:[%s1019_s4] sm:$0xf] %vm546_vm10, %v540_v1  ;;  %v545_v7 = vpack.c.bf16 %v539_v2, %v539_v2 }
 0x124   :  { %548 = vst.msk [vmem:[%s1019_s4 + $0x4] sm:$0xf] %vm546_vm10, %v541_v3 }
 0x125   :  { %549 = vst.msk [vmem:[%s1019_s4 + $0x8] sm:$0xf] %vm546_vm10, %v542_v4 }
 0x126   :  { %550 = vst.msk [vmem:[%s1019_s4 + $0xc] sm:$0xf] %vm546_vm10, %v543_v5 }
 0x127   :  { %551 = vst.msk [vmem:[%s1019_s4 + $0x10] sm:$0xf] %vm546_vm10, %v544_v6 }
 0x128   :  { %552 = vst.msk [vmem:[%s1019_s4 + $0x14] sm:$0xf] %vm546_vm10, %v545_v7 }

// kernel: discriminator_forward.11
= control target key start
LH: loop header
LB: loop body
LE: loop exit
PB: predicated region body
PF: predicated region fallthrough
CT: control target
= control target key end

     0   :  { %vm868_vm0 = vcmask 7168   ;;  %s1706_s1 = inlined_call_operand.vmem [shape: bf16[1024,1], index: 1, kind: input, shape index: {}]   ;;  %s1707_s0 = inlined_call_operand.vmem [shape: bf16[48,1024], index: 0, kind: input, shape index: {}]   ;;  %s1708_s2 = inlined_call_operand.<no memory space> [shape: f32[1,1], index: 2, kind: input, shape index: {}]   ;;  %s1709_s3 = inlined_call_operand.vmem [shape: f32[48,1], index: 3, kind: output, shape index: {}]  }
   0x1   :  { %v1262_v0 = vld [vmem:[%s1706_s1 + $0x38] sm:$0xff]  ;;  %v1261_v4 = vld [vmem:[%s1706_s1 + $0x30] sm:$0xff]  ;;  %v1260_v8 = vld [vmem:[%s1706_s1 + $0x28] sm:$0xff] }
   0x2   :  { %v1270_v1 = vld [vmem:[%s1706_s1 + $0x78] sm:$0xff]  ;;  %676 = vmatpush.bf16.msra.mxu0 %v1262_v0  ;;  %v1269_v5 = vld [vmem:[%s1706_s1 + $0x70] sm:$0xff]  ;;  %v1268_v9 = vld [vmem:[%s1706_s1 + $0x68] sm:$0xff] }
   0x3   :  { %v1278_v2 = vld [vmem:[%s1706_s1 + $0xb8] sm:$0xff]  ;;  %700 = vmatpush.bf16.msra.mxu1 %v1270_v1  ;;  %v1277_v6 = vld [vmem:[%s1706_s1 + $0xb0] sm:$0xff]  ;;  %v1276_v10 = vld [vmem:[%s1706_s1 + $0xa8] sm:$0xff] }
   0x4   :  { %v1286_v3 = vld [vmem:[%s1706_s1 + $0xf8] sm:$0xff]  ;;  %724 = vmatpush.bf16.msra.mxu2 %v1278_v2  ;;  %v1285_v7 = vld [vmem:[%s1706_s1 + $0xf0] sm:$0xff]  ;;  %v1284_v11 = vld [vmem:[%s1706_s1 + $0xe8] sm:$0xff] }
   0x5   :  { %748 = vmatpush.bf16.msra.mxu3 %v1286_v3  ;;  %v1259_v12 = vld [vmem:[%s1706_s1 + $0x20] sm:$0xff]  ;;  %v1258_v16 = vld [vmem:[%s1706_s1 + $0x18] sm:$0xff]  ;;  %v1257_v20 = vld [vmem:[%s1706_s1 + $0x10] sm:$0xff] }
   0x6   :  { %677 = vmatpush.bf16.msra.mxu0 %v1261_v4  ;;  %v1267_v13 = vld [vmem:[%s1706_s1 + $0x60] sm:$0xff]  ;;  %v1266_v17 = vld [vmem:[%s1706_s1 + $0x58] sm:$0xff]  ;;  %v1265_v21 = vld [vmem:[%s1706_s1 + $0x50] sm:$0xff] }
   0x7   :  { %701 = vmatpush.bf16.msra.mxu1 %v1269_v5  ;;  %v1275_v14 = vld [vmem:[%s1706_s1 + $0xa0] sm:$0xff]  ;;  %v1274_v18 = vld [vmem:[%s1706_s1 + $0x98] sm:$0xff]  ;;  %v1273_v22 = vld [vmem:[%s1706_s1 + $0x90] sm:$0xff] }
   0x8   :  { %725 = vmatpush.bf16.msra.mxu2 %v1277_v6  ;;  %v1283_v15 = vld [vmem:[%s1706_s1 + $0xe0] sm:$0xff]  ;;  %v1282_v19 = vld [vmem:[%s1706_s1 + $0xd8] sm:$0xff]  ;;  %v1281_v23 = vld [vmem:[%s1706_s1 + $0xd0] sm:$0xff] }
   0x9   :  { %749 = vmatpush.bf16.msra.mxu3 %v1285_v7  ;;  %v1256_v24 = vld [vmem:[%s1706_s1 + $0x8] sm:$0xff]  ;;  %v1255_v28 = vld [vmem:[%s1706_s1] sm:$0xff]  ;;  %v1310_v40 = vld [vmem:[%s1706_s1 + $0x1b8] sm:$0xff] }
   0xa   :  { %678 = vmatpush.bf16.msra.mxu0 %v1260_v8  ;;  %v1264_v25 = vld [vmem:[%s1706_s1 + $0x48] sm:$0xff]  ;;  %v1263_v29 = vld [vmem:[%s1706_s1 + $0x40] sm:$0xff]  ;;  %v1294_v41 = vld [vmem:[%s1706_s1 + $0x138] sm:$0xff] }
   0xb   :  { %702 = vmatpush.bf16.msra.mxu1 %v1268_v9  ;;  %v1272_v26 = vld [vmem:[%s1706_s1 + $0x88] sm:$0xff]  ;;  %v1271_v30 = vld [vmem:[%s1706_s1 + $0x80] sm:$0xff]  ;;  %v1318_v46 = vld [vmem:[%s1706_s1 + $0x1f8] sm:$0xff] }
   0xc   :  { %726 = vmatpush.bf16.msra.mxu2 %v1276_v10  ;;  %v1280_v27 = vld [vmem:[%s1706_s1 + $0xc8] sm:$0xff]  ;;  %v1279_v31 = vld [vmem:[%s1706_s1 + $0xc0] sm:$0xff]  ;;  %v1302_v47 = vld [vmem:[%s1706_s1 + $0x178] sm:$0xff] }
   0xd   :  { %750 = vmatpush.bf16.msra.mxu3 %v1284_v11  ;;  %v881_v32 = vld [vmem:[%s1707_s0] sm:$0xf]  ;;  %v1231_v34 = vld [vmem:[%s1707_s0 + $0x4] sm:$0xf]  ;;  %v889_v36 = vld [vmem:[%s1707_s0 + $0x8] sm:$0xf] }
   0xe   :  { %679 = vmatpush.bf16.msra.mxu0 %v1259_v12  ;;  %v1235_v33 = vld [vmem:[%s1707_s0 + $0x1c] sm:$0xf0]  ;;  %v883_v35 = vld [vmem:[%s1707_s0 + $0x20] sm:$0xf0]  ;;  %v1236_v37 = vld [vmem:[%s1707_s0 + $0x24] sm:$0xf0] }
   0xf   :  { %703 = vmatpush.bf16.msra.mxu1 %v1267_v13  ;;  %v1232_v38 = vld [vmem:[%s1707_s0 + $0xc] sm:$0xf]  ;;  %v882_v42 = vor.u32 %v1235_v33, %v881_v32  ;;  %v886_v43 = vor.u32 %v1231_v34, %v883_v35  ;;  %v890_v44 = vor.u32 %v1236_v37, %v889_v36  ;;  %v1309_v48 = vld [vmem:[%s1706_s1 + $0x1b0] sm:$0xff]  ;;  %v913_v56 = vld [vmem:[%s1707_s0 + $0x40] sm:$0xf] }
  0x10   :  { %727 = vmatpush.bf16.msra.mxu2 %v1275_v14  ;;  %v891_v39 = vld [vmem:[%s1707_s0 + $0x28] sm:$0xf0]  ;;  %v1293_v49 = vld [vmem:[%s1706_s1 + $0x130] sm:$0xff]  ;;  %v1307_v57 = vld [vmem:[%s1706_s1 + $0x1a0] sm:$0xff] }
  0x11   :  { %751 = vmatpush.bf16.msra.mxu3 %v1283_v15  ;;  %v894_v45 = vor.u32 %v1232_v38, %v891_v39  ;;  %v1317_v50 = vld [vmem:[%s1706_s1 + $0x1f0] sm:$0xff]  ;;  %v1308_v52 = vld [vmem:[%s1706_s1 + $0x1a8] sm:$0xff]  ;;  %v1291_v58 = vld [vmem:[%s1706_s1 + $0x120] sm:$0xff] }
  0x12   :  { %680 = vmatpush.bf16.msra.mxu0 %v1258_v16  ;;  %v1301_v51 = vld [vmem:[%s1706_s1 + $0x170] sm:$0xff]  ;;  %v1292_v53 = vld [vmem:[%s1706_s1 + $0x128] sm:$0xff]  ;;  %v1243_v59 = vld [vmem:[%s1707_s0 + $0x5c] sm:$0xf0] }
  0x13   :  { %704 = vmatpush.bf16.msra.mxu1 %v1266_v17  ;;  %v1316_v54 = vld [vmem:[%s1706_s1 + $0x1e8] sm:$0xff]  ;;  %v1239_v60 = vld [vmem:[%s1707_s0 + $0x44] sm:$0xf]  ;;  %v1306_v4 = vld [vmem:[%s1706_s1 + $0x198] sm:$0xff]  ;;  %v914_v6 = vor.u32 %v1243_v59, %v913_v56 }
  0x14   :  { %728 = vmatpush.bf16.msra.mxu2 %v1274_v18  ;;  %v1300_v55 = vld [vmem:[%s1706_s1 + $0x168] sm:$0xff]  ;;  %v915_v61 = vld [vmem:[%s1707_s0 + $0x60] sm:$0xf0]  ;;  %v1290_v5 = vld [vmem:[%s1706_s1 + $0x118] sm:$0xff] }
  0x15   :  { %752 = vmatpush.bf16.msra.mxu3 %v1282_v19  ;;  %v921_v62 = vld [vmem:[%s1707_s0 + $0x48] sm:$0xf]  ;;  %v1240_v0 = vld [vmem:[%s1707_s0 + $0x4c] sm:$0xf]  ;;  %v1315_v2 = vld [vmem:[%s1706_s1 + $0x1e0] sm:$0xff]  ;;  %v918_v7 = vor.u32 %v1239_v60, %v915_v61 }
  0x16   :  { %681 = vmatpush.bf16.msra.mxu0 %v1257_v20  ;;  %v1244_v63 = vld [vmem:[%s1707_s0 + $0x64] sm:$0xf0]  ;;  %v923_v1 = vld [vmem:[%s1707_s0 + $0x68] sm:$0xf0]  ;;  %v1299_v3 = vld [vmem:[%s1706_s1 + $0x160] sm:$0xff] }
  0x17   :  { %705 = vmatpush.bf16.msra.mxu1 %v1265_v21  ;;  %v922_v8 = vor.u32 %v1244_v63, %v921_v62  ;;  %v926_v9 = vor.u32 %v1240_v0, %v923_v1  ;;  %v1314_v10 = vld [vmem:[%s1706_s1 + $0x1d8] sm:$0xff]  ;;  %v1305_v12 = vld [vmem:[%s1706_s1 + $0x190] sm:$0xff]  ;;  %v1304_v16 = vld [vmem:[%s1706_s1 + $0x188] sm:$0xff] }
  0x18   :  { %729 = vmatpush.bf16.msra.mxu2 %v1273_v22  ;;  %v1298_v11 = vld [vmem:[%s1706_s1 + $0x158] sm:$0xff]  ;;  %v1289_v13 = vld [vmem:[%s1706_s1 + $0x110] sm:$0xff]  ;;  %v1288_v17 = vld [vmem:[%s1706_s1 + $0x108] sm:$0xff] }
  0x19   :  { %753 = vmatpush.bf16.msra.mxu3 %v1281_v23  ;;  %v1313_v14 = vld [vmem:[%s1706_s1 + $0x1d0] sm:$0xff]  ;;  %v1312_v18 = vld [vmem:[%s1706_s1 + $0x1c8] sm:$0xff]  ;;  %v945_v20 = vld [vmem:[%s1707_s0 + $0x80] sm:$0xf] }
  0x1a   :  { %682 = vmatpush.bf16.msra.mxu0 %v1256_v24  ;;  %v1297_v15 = vld [vmem:[%s1706_s1 + $0x150] sm:$0xff]  ;;  %v1296_v19 = vld [vmem:[%s1706_s1 + $0x148] sm:$0xff]  ;;  %v1303_v21 = vld [vmem:[%s1706_s1 + $0x180] sm:$0xff] }
  0x1b   :  { %706 = vmatpush.bf16.msra.mxu1 %v1264_v25  ;;  %v1287_v22 = vld [vmem:[%s1706_s1 + $0x100] sm:$0xff]  ;;  %v897_v36 = vld [vmem:[%s1707_s0 + $0x10] sm:$0xf]  ;;  %v1233_v38 = vld [vmem:[%s1707_s0 + $0x14] sm:$0xf] }
  0x1c   :  { %730 = vmatpush.bf16.msra.mxu2 %v1272_v26  ;;  %v1251_v23 = vld [vmem:[%s1707_s0 + $0x9c] sm:$0xf0]  ;;  %v1247_v24 = vld [vmem:[%s1707_s0 + $0x84] sm:$0xf]  ;;  %v953_v26 = vld [vmem:[%s1707_s0 + $0x88] sm:$0xf] }
  0x1d   :  { %754 = vmatpush.bf16.msra.mxu3 %v1280_v27  ;;  %v947_v25 = vld [vmem:[%s1707_s0 + $0xa0] sm:$0xf0]  ;;  %v1252_v27 = vld [vmem:[%s1707_s0 + $0xa4] sm:$0xf0]  ;;  %v946_v32 = vor.u32 %v1251_v23, %v945_v20  ;;  %v1237_v37 = vld [vmem:[%s1707_s0 + $0x2c] sm:$0xf0] }
  0x1e   :  { %683 = vmatpush.bf16.msra.mxu0 %v1255_v28  ;;  %v1248_v28 = vld [vmem:[%s1707_s0 + $0x8c] sm:$0xf]  ;;  %v950_v33 = vor.u32 %v1247_v24, %v947_v25  ;;  %v954_v34 = vor.u32 %v1252_v27, %v953_v26  ;;  %v899_v39 = vld [vmem:[%s1707_s0 + $0x30] sm:$0xf0]  ;;  %v939_v56 = vld [vmem:[%s1707_s0 + $0x78] sm:$0xf0] }
  0x1f   :  { %707 = vmatpush.bf16.msra.mxu1 %v1263_v29  ;;  %v955_v29 = vld [vmem:[%s1707_s0 + $0xa8] sm:$0xf0]  ;;  %v961_v61 = vld [vmem:[%s1707_s0 + $0x90] sm:$0xf]  ;;  %v1249_v63 = vld [vmem:[%s1707_s0 + $0x94] sm:$0xf] }
  0x20   :  { %731 = vmatpush.bf16.msra.mxu2 %v1271_v30  ;;  %v1311_v30 = vld [vmem:[%s1706_s1 + $0x1c0] sm:$0xff]  ;;  %v958_v35 = vor.u32 %v1248_v28, %v955_v29  ;;  %v1253_v62 = vld [vmem:[%s1707_s0 + $0xac] sm:$0xf0]  ;;  %v963_v0 = vld [vmem:[%s1707_s0 + $0xb0] sm:$0xf0] }
  0x21   :  { %755 = vmatpush.bf16.msra.mxu3 %v1279_v31  ;;  %684 = vmatmul.bf16.vlgmr.msra.gmra.mxu0 %v882_v42  ;;  %v1295_v31 = vld [vmem:[%s1706_s1 + $0x140] sm:$0xff]  ;;  %v1234_v42 = vld [vmem:[%s1707_s0 + $0x1c] sm:$0xf]  ;;  %v969_v1 = vld [vmem:[%s1707_s0 + $0x98] sm:$0xf] }
  0x22   :  { %772 = vmatpush.bf16.msrb.mxu0 %v1294_v41  ;;  %708 = vmatmul.bf16.vlgmr.msra.gmra.mxu1 %v886_v43  ;;  %v1238_v41 = vld [vmem:[%s1707_s0 + $0x34] sm:$0xf0]  ;;  %v907_v43 = vld [vmem:[%s1707_s0 + $0x38] sm:$0xf0] }
  0x23   :  { %732 = vmatmul.bf16.vlgmr.msra.gmra.mxu2 %v890_v44  ;;  %796 = vmatpush.bf16.msrb.mxu1 %v1302_v47  ;;  %v898_v44 = vor.u32 %v1237_v37, %v897_v36  ;;  %v910_v47 = vor.u32 %v1234_v42, %v907_v43 }
  0x24   :  { %820 = vmatpush.bf16.msrb.mxu2 %v1310_v40  ;;  %756 = vmatmul.bf16.vlgmr.msra.gmra.mxu3 %v894_v45  ;;  %v905_v40 = vld [vmem:[%s1707_s0 + $0x18] sm:$0xf]  ;;  %v902_v45 = vor.u32 %v1233_v38, %v899_v39 }
  0x25   :  { %844 = vmatpush.bf16.msrb.mxu3 %v1318_v46  ;;  %v906_v46 = vor.u32 %v1238_v41, %v905_v40 }
  0x26   :  { %773 = vmatpush.bf16.msrb.mxu0 %v1293_v49  ;;  %v929_v49 = vld [vmem:[%s1707_s0 + $0x50] sm:$0xf] }
  0x27   :  { %797 = vmatpush.bf16.msrb.mxu1 %v1301_v51  ;;  %v1241_v51 = vld [vmem:[%s1707_s0 + $0x54] sm:$0xf] }
  0x28   :  { %821 = vmatpush.bf16.msrb.mxu2 %v1309_v48  ;;  %v8_v48 = vstv %s1708_s2 }
  0x29   :  { %845 = vmatpush.bf16.msrb.mxu3 %v1317_v50  ;;  %9 = vst [vmem:[#allocation2] sm:$0x1] %v8_v48  ;;  %v1245_v50 = vld [vmem:[%s1707_s0 + $0x6c] sm:$0xf0] }
  0x2a   :  { %774 = vmatpush.bf16.msrb.mxu0 %v1292_v53  ;;  %v937_v53 = vld [vmem:[%s1707_s0 + $0x58] sm:$0xf] }
  0x2b   :  { %798 = vmatpush.bf16.msrb.mxu1 %v1300_v55  ;;  %v1242_v55 = vld [vmem:[%s1707_s0 + $0x5c] sm:$0xf] }
  0x2c   :  { %822 = vmatpush.bf16.msrb.mxu2 %v1308_v52  ;;  %v931_v52 = vld [vmem:[%s1707_s0 + $0x70] sm:$0xf0]  ;;  %v942_v60 = vor.u32 %v1242_v55, %v939_v56 }
  0x2d   :  { %846 = vmatpush.bf16.msrb.mxu3 %v1316_v54  ;;  %v1246_v54 = vld [vmem:[%s1707_s0 + $0x74] sm:$0xf0] }
  0x2e   :  { %775 = vmatpush.bf16.msrb.mxu0 %v1291_v58  ;;  %v934_v58 = vor.u32 %v1241_v51, %v931_v52  ;;  %v938_v59 = vor.u32 %v1246_v54, %v937_v53 }
  0x2f   :  { %799 = vmatpush.bf16.msrb.mxu1 %v1299_v3  ;;  %v1250_v3 = vld [vmem:[%s1707_s0 + $0x9c] sm:$0xf] }
  0x30   :  { %823 = vmatpush.bf16.msrb.mxu2 %v1307_v57  ;;  %v930_v57 = vor.u32 %v1245_v50, %v929_v49  ;;  %v1319_v25 = vld [vmem:[#allocation2] ss:$0 sm:$0xff] }
  0x31   :  { %847 = vmatpush.bf16.msrb.mxu3 %v1315_v2  ;;  %689 = vmatmul.bf16.gmra.mxu0 %v914_v6  ;;  %v1254_v2 = vld [vmem:[%s1707_s0 + $0xb4] sm:$0xf0]  ;;  %v966_v6 = vor.u32 %v1249_v63, %v963_v0 }
  0x32   :  { %776 = vmatpush.bf16.msrb.mxu0 %v1290_v5  ;;  %713 = vmatmul.bf16.gmra.mxu1 %v918_v7  ;;  %v962_v5 = vor.u32 %v1253_v62, %v961_v61  ;;  %v970_v7 = vor.u32 %v1254_v2, %v969_v1 }
  0x33   :  { %737 = vmatmul.bf16.gmra.mxu2 %v922_v8  ;;  %800 = vmatpush.bf16.msrb.mxu1 %v1298_v11 }
  0x34   :  { %824 = vmatpush.bf16.msrb.mxu2 %v1306_v4  ;;  %761 = vmatmul.bf16.gmra.mxu3 %v926_v9  ;;  %v971_v4 = vld [vmem:[%s1707_s0 + $0xb8] sm:$0xf0] }
  0x35   :  { %848 = vmatpush.bf16.msrb.mxu3 %v1314_v10  ;;  %v974_v8 = vor.u32 %v1250_v3, %v971_v4 }
  0x36   :  { %777 = vmatpush.bf16.msrb.mxu0 %v1289_v13 }
  0x37   :  { %801 = vmatpush.bf16.msrb.mxu1 %v1297_v15 }
  0x38   :  { %825 = vmatpush.bf16.msrb.mxu2 %v1305_v12 }
  0x39   :  { %849 = vmatpush.bf16.msrb.mxu3 %v1313_v14 }
  0x3a   :  { %778 = vmatpush.bf16.msrb.mxu0 %v1288_v17 }
  0x3b   :  { %802 = vmatpush.bf16.msrb.mxu1 %v1296_v19 }
  0x3c   :  { %826 = vmatpush.bf16.msrb.mxu2 %v1304_v16 }
  0x3d   :  { %850 = vmatpush.bf16.msrb.mxu3 %v1312_v18 }
  0x3e   :  { %779 = vmatpush.bf16.msrb.mxu0 %v1287_v22 }
  0x3f   :  { %803 = vmatpush.bf16.msrb.mxu1 %v1295_v31 }
  0x40   :  { %827 = vmatpush.bf16.msrb.mxu2 %v1303_v21 }
  0x41   :  { %851 = vmatpush.bf16.msrb.mxu3 %v1311_v30  ;;  %694 = vmatmul.bf16.gmra.mxu0 %v946_v32 }
  0x42   :  { %718 = vmatmul.bf16.gmra.mxu1 %v950_v33 }
  0x43   :  { %742 = vmatmul.bf16.gmra.mxu2 %v954_v34 }
  0x44   :  { %766 = vmatmul.bf16.gmra.mxu3 %v958_v35 }
  0x51   :  { %780 = vmatmul.bf16.vlgmr.msrb.gmra.mxu0 %v898_v44 }
  0x52   :  { %804 = vmatmul.bf16.vlgmr.msrb.gmra.mxu1 %v902_v45 }
  0x53   :  { %828 = vmatmul.bf16.vlgmr.msrb.gmra.mxu2 %v906_v46 }
  0x54   :  { %852 = vmatmul.bf16.vlgmr.msrb.gmra.mxu3 %v910_v47 }
  0x61   :  { %785 = vmatmul.bf16.gmra.mxu0 %v930_v57 }
  0x62   :  { %809 = vmatmul.bf16.gmra.mxu1 %v934_v58 }
  0x63   :  { %833 = vmatmul.bf16.gmra.mxu2 %v938_v59 }
  0x64   :  { %857 = vmatmul.bf16.gmra.mxu3 %v942_v60 }
  0x71   :  { %790 = vmatmul.bf16.gmra.mxu0 %v962_v5 }
  0x72   :  { %814 = vmatmul.bf16.gmra.mxu1 %v966_v6 }
  0x73   :  { %838 = vmatmul.bf16.gmra.mxu2 %v970_v7 }
  0x74   :  { %862 = vmatmul.bf16.gmra.mxu3 %v974_v8 }
  0x9e   :  { %v685_v9 = vpop.f32.mrf.mxu0 }
  0x9f   :  { %v709_v10 = vpop.f32.mrf.mxu1  ;;  %v686_v28 = vadd.f32 %v1319_v25, %v685_v9 }
  0xa1   :  { %v710_v31 = vadd.f32 %v709_v10, %v686_v28 }
  0xa6   :  { %v733_v11 = vpop.f32.mrf.mxu2  ;;  %v687_v13 = vpop.f32.mrf.mxu0 }
  0xa7   :  { %v757_v12 = vpop.f32.mrf.mxu3  ;;  %v711_v14 = vpop.f32.mrf.mxu1  ;;  %v734_v34 = vadd.f32 %v733_v11, %v710_v31  ;;  %v688_v35 = vadd.f32 %v1319_v25, %v687_v13 }
  0xa9   :  { %v758_v38 = vadd.f32 %v757_v12, %v734_v34  ;;  %v712_v41 = vadd.f32 %v711_v14, %v688_v35 }
  0xae   :  { %v735_v15 = vpop.f32.mrf.mxu2  ;;  %v690_v17 = vpop.f32.mrf.mxu0 }
  0xaf   :  { %v759_v16 = vpop.f32.mrf.mxu3  ;;  %v714_v18 = vpop.f32.mrf.mxu1  ;;  %v736_v43 = vadd.f32 %v735_v15, %v712_v41  ;;  %v691_v44 = vadd.f32 %v1319_v25, %v690_v17 }
  0xb1   :  { %v760_v48 = vadd.f32 %v759_v16, %v736_v43  ;;  %v715_v49 = vadd.f32 %v714_v18, %v691_v44 }
  0xb6   :  { %v738_v19 = vpop.f32.mrf.mxu2  ;;  %v692_v21 = vpop.f32.mrf.mxu0 }
  0xb7   :  { %v762_v20 = vpop.f32.mrf.mxu3  ;;  %v716_v22 = vpop.f32.mrf.mxu1  ;;  %v739_v55 = vadd.f32 %v738_v19, %v715_v49  ;;  %v693_v56 = vadd.f32 %v1319_v25, %v692_v21 }
  0xb9   :  { %v763_v60 = vadd.f32 %v762_v20, %v739_v55  ;;  %v717_v0 = vadd.f32 %v716_v22, %v693_v56 }
  0xbe   :  { %v740_v23 = vpop.f32.mrf.mxu2  ;;  %v695_v26 = vpop.f32.mrf.mxu0 }
  0xbf   :  { %v764_v24 = vpop.f32.mrf.mxu3  ;;  %v719_v27 = vpop.f32.mrf.mxu1  ;;  %v741_v3 = vadd.f32 %v740_v23, %v717_v0  ;;  %v696_v4 = vadd.f32 %v1319_v25, %v695_v26 }
  0xc1   :  { %v765_v8 = vadd.f32 %v764_v24, %v741_v3  ;;  %v720_v9 = vadd.f32 %v719_v27, %v696_v4 }
  0xc6   :  { %v743_v29 = vpop.f32.mrf.mxu2  ;;  %v697_v32 = vpop.f32.mrf.mxu0 }
  0xc7   :  { %v767_v30 = vpop.f32.mrf.mxu3  ;;  %v721_v33 = vpop.f32.mrf.mxu1  ;;  %v744_v15 = vadd.f32 %v743_v29, %v720_v9  ;;  %v698_v16 = vadd.f32 %v1319_v25, %v697_v32 }
  0xc9   :  { %v768_v20 = vadd.f32 %v767_v30, %v744_v15  ;;  %v722_v23 = vadd.f32 %v721_v33, %v698_v16 }
  0xce   :  { %v745_v36 = vpop.f32.mrf.mxu2  ;;  %v781_v39 = vpop.f32.mrf.mxu0 }
  0xcf   :  { %v1679_v37 = vpop.f32.mrf.mxu3  ;;  %v805_v40 = vpop.f32.mrf.mxu1  ;;  %v782_v42 = vadd.f32 %v781_v39, %v758_v38  ;;  %v746_v28 = vadd.f32 %v745_v36, %v722_v23 }
  0xd1   :  { %v806_v45 = vadd.f32 %v805_v40, %v782_v42  ;;  %v770_v25 = vadd.f32 %v1679_v37, %v746_v28 }
  0xd6   :  { %v829_v46 = vpop.f32.mrf.mxu2  ;;  %v783_v51 = vpop.f32.mrf.mxu0 }
  0xd7   :  { %v853_v47 = vpop.f32.mrf.mxu3  ;;  %v830_v50 = vadd.f32 %v829_v46, %v806_v45  ;;  %v807_v52 = vpop.f32.mrf.mxu1  ;;  %v784_v54 = vadd.f32 %v783_v51, %v760_v48 }
  0xd9   :  { %v854_v53 = vadd.f32 %v853_v47, %v830_v50  ;;  %v808_v57 = vadd.f32 %v807_v52, %v784_v54 }
  0xdb   :  { %869 = vst.msk [vmem:[%s1709_s3] sm:$0xff] %vm868_vm0, %v854_v53 }
  0xde   :  { %v831_v58 = vpop.f32.mrf.mxu2  ;;  %v786_v62 = vpop.f32.mrf.mxu0 }
  0xdf   :  { %v855_v59 = vpop.f32.mrf.mxu3  ;;  %v832_v61 = vadd.f32 %v831_v58, %v808_v57  ;;  %v810_v63 = vpop.f32.mrf.mxu1  ;;  %v787_v2 = vadd.f32 %v786_v62, %v763_v60 }
  0xe1   :  { %v856_v1 = vadd.f32 %v855_v59, %v832_v61  ;;  %v811_v5 = vadd.f32 %v810_v63, %v787_v2 }
  0xe3   :  { %870 = vst.msk [vmem:[%s1709_s3 + $0x8] sm:$0xff] %vm868_vm0, %v856_v1 }
  0xe6   :  { %v834_v6 = vpop.f32.mrf.mxu2  ;;  %v788_v11 = vpop.f32.mrf.mxu0 }
  0xe7   :  { %v858_v7 = vpop.f32.mrf.mxu3  ;;  %v835_v10 = vadd.f32 %v834_v6, %v811_v5  ;;  %v812_v12 = vpop.f32.mrf.mxu1  ;;  %v789_v14 = vadd.f32 %v788_v11, %v765_v8 }
  0xe9   :  { %v859_v13 = vadd.f32 %v858_v7, %v835_v10  ;;  %v813_v17 = vadd.f32 %v812_v12, %v789_v14 }
  0xeb   :  { %871 = vst.msk [vmem:[%s1709_s3 + $0x10] sm:$0xff] %vm868_vm0, %v859_v13 }
  0xee   :  { %v836_v18 = vpop.f32.mrf.mxu2  ;;  %v791_v22 = vpop.f32.mrf.mxu0 }
  0xef   :  { %v860_v19 = vpop.f32.mrf.mxu3  ;;  %v837_v21 = vadd.f32 %v836_v18, %v813_v17  ;;  %v792_v26 = vadd.f32 %v791_v22, %v768_v20  ;;  %v815_v27 = vpop.f32.mrf.mxu1 }
  0xf1   :  { %v861_v24 = vadd.f32 %v860_v19, %v837_v21  ;;  %v816_v29 = vadd.f32 %v815_v27, %v792_v26 }
  0xf3   :  { %872 = vst.msk [vmem:[%s1709_s3 + $0x18] sm:$0xff] %vm868_vm0, %v861_v24 }
  0xf6   :  { %v839_v31 = vpop.f32.mrf.mxu2  ;;  %v793_v35 = vpop.f32.mrf.mxu0 }
  0xf7   :  { %v863_v34 = vpop.f32.mrf.mxu3  ;;  %v840_v32 = vadd.f32 %v839_v31, %v816_v29  ;;  %v794_v38 = vadd.f32 %v793_v35, %v770_v25  ;;  %v817_v33 = vpop.f32.mrf.mxu1 }
  0xf9   :  { %v864_v30 = vadd.f32 %v863_v34, %v840_v32  ;;  %v818_v36 = vadd.f32 %v817_v33, %v794_v38 }
  0xfb   :  { %873 = vst.msk [vmem:[%s1709_s3 + $0x20] sm:$0xff] %vm868_vm0, %v864_v30 }
  0xfe   :  { %v841_v39 = vpop.f32.mrf.mxu2 }
  0xff   :  { %v842_v40 = vadd.f32 %v841_v39, %v818_v36  ;;  %v865_v41 = vpop.f32.mrf.mxu3 }
 0x101   :  { %v866_v42 = vadd.f32 %v865_v41, %v842_v40 }
 0x103   :  { %874 = vst.msk [vmem:[%s1709_s3 + $0x28] sm:$0xff] %vm868_vm0, %v866_v42 }

</bundles_post_ra>
